<compile_context>
chip_gen: v7x
topology: tpu7x:2x2x1
jax: 0.10.0
libtpu: 0.0.40
codegen_flags: <defaults>
</compile_context>

<pallas_src>
import functools
import math

import jax
import jax.numpy as jnp
from jax.experimental import pallas as pl
from jax.experimental.pallas import tpu as pltpu

BN_EPS = 1e-5
STEM_CHUNK = 512                       # lane-chunk for the stem GEMM / BN passes
VMEM_LIMIT = 32 * 1024 * 1024          # safe on v5e/v6e/v7x, >> actual need at batch 2


def _full_spec(shape):
    zeros = (0,) * len(shape)
    return pl.BlockSpec(shape, lambda i, z=zeros: z)


def _compiler_params():
    return pltpu.CompilerParams(dimension_semantics=("arbitrary",),
                                vmem_limit_bytes=VMEM_LIMIT)


# --------------------------------- kernels -----------------------------------

def _stem_kernel(cols_ref, w_ref, g_ref, b_ref, o_ref, acc_ref, *, ch, inv_m):
    """Transposed im2col GEMM (W^T[C,K] @ cols^T[K,M]) + train-mode BN + ReLU.

    Lane-dense: M (= N*OH*OW) is the lane dimension. The pre-BN conv result only
    lives in the f32 VMEM scratch; BN uses centered (mean, then centered variance)
    statistics over the full batch.
    """
    C, M = acc_ref.shape
    n_ch = M // ch
    w = w_ref[...]                                          # [C, K] bf16, hoisted

    def gemm_pass(i, s):
        st = pl.multiple_of(i * ch, ch)
        a = jnp.dot(w, cols_ref[:, pl.ds(st, ch)],
                    preferred_element_type=jnp.float32)     # [C, ch]
        acc_ref[:, pl.ds(st, ch)] = a
        return s + jnp.sum(a, axis=1, keepdims=True)

    s = jax.lax.fori_loop(0, n_ch, gemm_pass, jnp.zeros((C, 1), jnp.float32))
    mean = s * inv_m

    def var_pass(i, q):
        st = pl.multiple_of(i * ch, ch)
        d = acc_ref[:, pl.ds(st, ch)] - mean
        return q + jnp.sum(d * d, axis=1, keepdims=True)

    q = jax.lax.fori_loop(0, n_ch, var_pass, jnp.zeros((C, 1), jnp.float32))
    var = q * inv_m
    scale = g_ref[...] * jax.lax.rsqrt(var + BN_EPS)
    shift = b_ref[...] - mean * scale

    def out_pass(i, carry):
        st = pl.multiple_of(i * ch, ch)
        y = jnp.maximum(acc_ref[:, pl.ds(st, ch)] * scale + shift, 0.0)
        o_ref[:, pl.ds(st, ch)] = y.astype(o_ref.dtype)
        return carry

    jax.lax.fori_loop(0, n_ch, out_pass, 0)


def _maxpool_kernel(ph_ref, o_ref, *, fw):
    """3x3/s2/p1 max-pool via a stride-2 phase decomposition.

    ph_ref: [4, C, N*fw*fw] bf16 phase planes of the zero-padded activation.
    The 9 window taps are plain lane shifts of those planes (all lane-dense).
    """
    C, L = o_ref.shape
    span = L - (fw + 1)
    o_ref[...] = jnp.zeros_like(o_ref)
    m = None
    for dy in range(3):
        a, u = dy % 2, dy // 2
        for dx in range(3):
            b, v = dx % 2, dx // 2
            p = a * 2 + b
            off = u * fw + v
            t = ph_ref[p, :, off:off + span]
            m = t if m is None else jnp.maximum(m, t)
    o_ref[:, 0:span] = m


def _block_kernel(*refs, wp, lp, guard, inv_cnt, has_sc):
    """One fused BasicBlock: conv1(3x3,/s)+BN1+ReLU -> conv2(3x3,/1)+BN2,
    plus (1x1/s conv + BN) or identity shortcut, add, ReLU.

    Everything is channel-major [C, Lp] over the *zero-padded* output frame
    (Hp=OH+2, Wp=OW+2). conv1's im2col columns are frame-ordered by the wrapper,
    so its GEMM result lands directly in frame layout; conv2's 9 taps are plain
    lane shifts of the VMEM-resident frame. `mask` restricts BN statistics to the
    N*OH*OW valid positions and zeroes the pad ring.
    """
    if has_sc:
        (c1_ref, w1_ref, g1_ref, b1_ref,
         csc_ref, wsc_ref, gsc_ref, bsc_ref,
         w2_ref, g2_ref, b2_ref, mask_ref,
         o_ref, frame_ref) = refs
    else:
        (c1_ref, w1_ref, g1_ref, b1_ref,
         res_ref,
         w2_ref, g2_ref, b2_ref, mask_ref,
         o_ref, frame_ref) = refs

    mask = mask_ref[...]                                    # [1, lp] f32, 1 = valid

    def bn(a, g_ref_, b_ref_):
        s = jnp.sum(a * mask, axis=1, keepdims=True)
        mean = s * inv_cnt
        d = (a - mean) * mask
        var = jnp.sum(d * d, axis=1, keepdims=True) * inv_cnt
        scale = g_ref_[...] * jax.lax.rsqrt(var + BN_EPS)
        shift = b_ref_[...] - mean * scale
        return a * scale + shift

    # conv1 (frame-ordered transposed GEMM) + BN1 + ReLU -> padded frame scratch.
    a1 = jnp.dot(w1_ref[...], c1_ref[...], preferred_element_type=jnp.float32)
    y1 = jnp.maximum(bn(a1, g1_ref, b1_ref), 0.0) * mask    # ring/pad -> exact zeros
    frame_ref[...] = jnp.zeros_like(frame_ref)              # zero guards + ring
    frame_ref[:, guard:guard + lp] = y1.astype(frame_ref.dtype)

    # conv2 (3x3 / stride 1) as 9 shifted sub-GEMMs over the zero-padded frame.
    acc = None
    for t in range(9):
        dy, dx = t // 3, t % 3
        off = guard + (dy - 1) * wp + (dx - 1)
        part = jnp.dot(w2_ref[t], frame_ref[:, off:off + lp],
                       preferred_element_type=jnp.float32)
        acc = part if acc is None else acc + part
    y2 = bn(acc, g2_ref, b2_ref)

    # shortcut branch
    if has_sc:
        asc = jnp.dot(wsc_ref[...], csc_ref[...], preferred_element_type=jnp.float32)
        res = bn(asc, gsc_ref, bsc_ref)
    else:
        res = res_ref[...].astype(jnp.float32)

    o_ref[...] = (jnp.maximum(y2 + res, 0.0) * mask).astype(o_ref.dtype)


def _head_kernel(x_ref, w_ref, b_ref, o_ref):
    # F.avg_pool2d(out, 4) + flatten + Linear, fused (channel-major / transposed).
    feat = jnp.mean(x_ref[...].astype(jnp.float32), axis=2)        # [C, N]
    o_ref[...] = jnp.dot(w_ref[...], feat,
                         preferred_element_type=jnp.float32) + b_ref[...]


# ------------------------------ JAX wrappers ----------------------------------

def stem_conv_bn_relu(x_cm, w_t, g, b):
    """7x7/s2/p3 conv + BN + ReLU; channel-major, lane-dense [Cout, M] output."""
    Cin, N, H, W = x_cm.shape
    OH, OW = H // 2, W // 2
    M = N * OH * OW
    Cout = w_t.shape[0]
    xp = jnp.pad(x_cm, ((0, 0), (0, 0), (3, 3), (3, 3)))
    taps = []
    for dy in range(7):
        for dx in range(7):
            t = jax.lax.slice(
                xp, (0, 0, dy, dx),
                (Cin, N, dy + 2 * (OH - 1) + 1, dx + 2 * (OW - 1) + 1),
                (1, 1, 2, 2))
            taps.append(t.reshape(Cin, M))
    cols = jnp.concatenate(taps, axis=0)                     # [49*Cin, M] bf16
    ch = math.gcd(M, STEM_CHUNK)
    out = pl.pallas_call(
        functools.partial(_stem_kernel, ch=ch, inv_m=1.0 / M),
        out_shape=jax.ShapeDtypeStruct((Cout, M), jnp.bfloat16),
        grid=(1,),
        in_specs=[_full_spec(cols.shape), _full_spec(w_t.shape),
                  _full_spec(g.shape), _full_spec(b.shape)],
        out_specs=_full_spec((Cout, M)),
        scratch_shapes=[pltpu.VMEM((Cout, M), jnp.float32)],
        compiler_params=_compiler_params(),
    )(cols, w_t, g, b)
    return out.reshape(Cout, N, OH, OW)


def maxpool_3x3_s2(y):
    """y: [C, N, H, W] bf16 (post-ReLU, so zero padding == -inf padding)."""
    C, N, H, W = y.shape
    OH, OW = H // 2, W // 2
    fw = OH + 1                                              # phase-plane frame width
    yp = jnp.pad(y, ((0, 0), (0, 0), (1, 1), (1, 1)))
    phases = jnp.stack([yp[:, :, a::2, b::2] for a in range(2) for b in range(2)],
                       axis=0).reshape(4, C, N * fw * fw)
    out = pl.pallas_call(
        functools.partial(_maxpool_kernel, fw=fw),
        out_shape=jax.ShapeDtypeStruct((C, N * fw * fw), jnp.bfloat16),
        grid=(1,),
        in_specs=[_full_spec(phases.shape)],
        out_specs=_full_spec((C, N * fw * fw)),
        compiler_params=_compiler_params(),
    )(phases)
    return out.reshape(C, N, fw, fw)[:, :, :OH, :OW]


def basic_block(x, p, stride):
    """One fused pallas_call per BasicBlock (channel-major activations)."""
    Cin, N, H, W = x.shape
    Cout = p["bn1_g"].shape[0]
    OH, OW = H // stride, W // stride
    Hp, Wp = OH + 2, OW + 2
    Lp = N * Hp * Wp
    G = Wp + 1                                               # guard for conv2 lane shifts

    # conv1 im2col, transposed and ordered over the padded output frame, so the
    # kernel's GEMM lands directly in frame layout (ring is garbage, masked in-kernel).
    pad1 = stride + 1
    xp = jnp.pad(x, ((0, 0), (0, 0), (pad1, pad1), (pad1, pad1)))
    taps = []
    for dy in range(3):
        for dx in range(3):
            t = jax.lax.slice(
                xp, (0, 0, dy, dx),
                (Cin, N, dy + stride * (Hp - 1) + 1, dx + stride * (Wp - 1) + 1),
                (1, 1, stride, stride))
            taps.append(t.reshape(Cin, Lp))
    cols1 = jnp.concatenate(taps, axis=0)                    # [9*Cin, Lp]

    mask = jnp.pad(jnp.ones((N, OH, OW), jnp.float32),
                   ((0, 0), (1, 1), (1, 1))).reshape(1, Lp)
    inv_cnt = 1.0 / (N * OH * OW)

    inputs = [cols1, p["conv1_wT"], p["bn1_g"], p["bn1_b"]]
    has_sc = "sc_wT" in p
    if has_sc:
        xq = jnp.pad(x, ((0, 0), (0, 0), (stride, stride), (stride, stride)))
        csc = jax.lax.slice(
            xq, (0, 0, 0, 0),
            (Cin, N, stride * (Hp - 1) + 1, stride * (Wp - 1) + 1),
            (1, 1, stride, stride)).reshape(Cin, Lp)
        inputs += [csc, p["sc_wT"], p["sc_bn_g"], p["sc_bn_b"]]
    else:
        xf = jnp.pad(x, ((0, 0), (0, 0), (1, 1), (1, 1))).reshape(Cin, Lp)
        inputs += [xf]
    inputs += [p["conv2_wT"], p["bn2_g"], p["bn2_b"], mask]

    out = pl.pallas_call(
        functools.partial(_block_kernel, wp=Wp, lp=Lp, guard=G,
                          inv_cnt=inv_cnt, has_sc=has_sc),
        out_shape=jax.ShapeDtypeStruct((Cout, Lp), jnp.bfloat16),
        grid=(1,),
        in_specs=[_full_spec(a.shape) for a in inputs],
        out_specs=_full_spec((Cout, Lp)),
        scratch_shapes=[pltpu.VMEM((Cout, Lp + 2 * G), jnp.bfloat16)],
        compiler_params=_compiler_params(),
    )(*inputs)
    return out.reshape(Cout, N, Hp, Wp)[:, :, 1:1 + OH, 1:1 + OW]


def head_avgpool_fc(y, fc_wT, fc_b):
    C, N, H, W = y.shape
    feat_in = y.reshape(C, N, H * W)
    nc = fc_wT.shape[0]
    out = pl.pallas_call(
        _head_kernel,
        out_shape=jax.ShapeDtypeStruct((nc, N), jnp.float32),
        grid=(1,),
        in_specs=[_full_spec(feat_in.shape), _full_spec(fc_wT.shape),
                  _full_spec(fc_b.shape)],
        out_specs=_full_spec((nc, N)),
        compiler_params=_compiler_params(),
    )(feat_in, fc_wT, fc_b)
    return out.T                                             # [N, num_classes]


# --------------------------- ScaledResNet forward ------------------------------

def scaled_resnet_forward(x_nchw, params):
    # channel-major [C, N, H, W], bf16 between kernels (all accumulation in f32)
    x_cm = jnp.transpose(x_nchw, (1, 0, 2, 3)).astype(jnp.bfloat16)
    y = stem_conv_bn_relu(x_cm, params["conv1_wT"], params["bn1_g"], params["bn1_b"])
    y = maxpool_3x3_s2(y)
    for stage, stride0 in zip(params["layers"], (1, 2, 2, 2)):
        for bi, bp in enumerate(stage):
            y = basic_block(y, bp, stride0 if bi == 0 else 1)
    C, N, H, W = y.shape
    assert H == 4 and W == 4, "F.avg_pool2d(out, 4) expects a 4x4 feature map"
    return head_avgpool_fc(y, params["fc_wT"], params["fc_b"])


# ------------------------------ parameter init ---------------------------------

def _kaiming_conv(key, kh, kw, cin, cout):
    fan_out = kh * kw * cout                     # kaiming_normal_, fan_out, relu
    std = math.sqrt(2.0 / fan_out)
    return std * jax.random.normal(key, (kh, kw, cin, cout), jnp.float32)


def _conv_wT(key, kh, kw, cin, cout):
    # [cout, kh*kw*cin]; K ordered (dy, dx, ci) to match the im2col row order.
    w = _kaiming_conv(key, kh, kw, cin, cout)
    return jnp.transpose(w.reshape(kh * kw * cin, cout)).astype(jnp.bfloat16)


def _conv3x3_tapT(key, cin, cout):
    # per-tap transposed weights [9, cout, cin] for the in-kernel flat-shift conv2.
    w = _kaiming_conv(key, 3, 3, cin, cout)
    return jnp.transpose(w, (0, 1, 3, 2)).reshape(9, cout, cin).astype(jnp.bfloat16)


def _bn_init(c):
    return jnp.ones((c, 1), jnp.float32), jnp.zeros((c, 1), jnp.float32)


def init_params(key, *, num_blocks=(1, 1, 1, 1), num_classes=10, scale=0.125,
                expansion=1):
    keys = iter(jax.random.split(key, 256))
    in_planes = int(64 * scale)
    g0, b0 = _bn_init(in_planes)
    params = {"conv1_wT": _conv_wT(next(keys), 7, 7, 3, in_planes),
              "bn1_g": g0, "bn1_b": b0, "layers": []}
    widths = [int(64 * scale), int(128 * scale), int(256 * scale), int(512 * scale)]
    for planes, nb, stride in zip(widths, num_blocks, (1, 2, 2, 2)):
        stage = []
        for bi in range(nb):
            s = stride if bi == 0 else 1
            g1, b1 = _bn_init(planes)
            g2, b2 = _bn_init(planes)
            bp = {"conv1_wT": _conv_wT(next(keys), 3, 3, in_planes, planes),
                  "bn1_g": g1, "bn1_b": b1,
                  "conv2_wT": _conv3x3_tapT(next(keys), planes, planes),
                  "bn2_g": g2, "bn2_b": b2}
            if s != 1 or in_planes != planes * expansion:
                gs, bs = _bn_init(planes * expansion)
                bp["sc_wT"] = _conv_wT(next(keys), 1, 1, in_planes,
                                       planes * expansion)
                bp["sc_bn_g"] = gs
                bp["sc_bn_b"] = bs
            stage.append(bp)
            in_planes = planes * expansion
        params["layers"].append(stage)
    fc_in = int(512 * expansion * scale)
    bound = 1.0 / math.sqrt(fc_in)
    kw1, kw2 = jax.random.split(next(keys))
    params["fc_wT"] = jax.random.uniform(kw1, (num_classes, fc_in), jnp.float32,
                                         -bound, bound)
    params["fc_b"] = jax.random.uniform(kw2, (num_classes, 1), jnp.float32,
                                        -bound, bound)
    return params


if __name__ == "__main__":
    key = jax.random.PRNGKey(0)
    k_param, k_x = jax.random.split(key)
    # Equivalent of ScaledResNet(BasicBlock, [1, 1, 1, 1], num_classes=10, scale=0.125)
    params = init_params(k_param, num_blocks=(1, 1, 1, 1), num_classes=10,
                         scale=0.125)
    # NCHW input (PyTorch convention); 128x128 spatial so the layer4 map is 4x4,
    # as required by F.avg_pool2d(out, 4) + flatten + Linear. Channels stay tiny
    # via scale=0.125 (8/8/16/32/64).
    x = jax.random.normal(k_x, (2, 3, 128, 128), jnp.float32)
    fwd = jax.jit(scaled_resnet_forward)
    logits = fwd(x, params)
    jax.block_until_ready(logits)
    assert logits.shape == (2, 10)
    print("KERNEL_OK")
</pallas_src>

<mosaic_0001>
module attributes {stable_mosaic.version = 11 : i64} {
  func.func @_stem_kernel(%arg0: i32, %arg1: memref<147x8192xbf16, #tpu.memory_space<vmem>>, %arg2: memref<8x147xbf16, #tpu.memory_space<vmem>>, %arg3: memref<8x1xf32, #tpu.memory_space<vmem>>, %arg4: memref<8x1xf32, #tpu.memory_space<vmem>>, %arg5: memref<8x8192xbf16, #tpu.memory_space<vmem>>, %arg6: memref<8x8192xf32, #tpu.memory_space<vmem>>) attributes {dimension_semantics = [#tpu.dimension_semantics<arbitrary>], iteration_bounds = array<i64: 1>, scalar_prefetch = 0 : i64, scratch_operands = 1 : i64, tpu.core_type = #tpu.core_type<tc>, window_params = [{pipeline_mode = #tpu.pipeline_mode<synchronous>, transform_indices = @transform_0, window_bounds = array<i64: 147, 8192>}, {pipeline_mode = #tpu.pipeline_mode<synchronous>, transform_indices = @transform_1, window_bounds = array<i64: 8, 147>}, {pipeline_mode = #tpu.pipeline_mode<synchronous>, transform_indices = @transform_2, window_bounds = array<i64: 8, 1>}, {pipeline_mode = #tpu.pipeline_mode<synchronous>, transform_indices = @transform_3, window_bounds = array<i64: 8, 1>}, {pipeline_mode = #tpu.pipeline_mode<synchronous>, transform_indices = @transform_4, window_bounds = array<i64: 8, 8192>}]} {
    %c0 = arith.constant 0 : index
    %c0_0 = arith.constant 0 : index
    %0 = vector.load %arg2[%c0, %c0_0] : memref<8x147xbf16, #tpu.memory_space<vmem>>, vector<8x147xbf16>
    %cst = arith.constant 0.000000e+00 : f32
    %1 = vector.broadcast %cst : f32 to vector<8x1xf32>
    %c0_i32 = arith.constant 0 : i32
    %c16_i32 = arith.constant 16 : i32
    %2 = arith.addi %c0_i32, %c16_i32 : i32
    %c1_i32 = arith.constant 1 : i32
    %3 = scf.for %arg7 = %c0_i32 to %2 step %c1_i32 iter_args(%arg8 = %1) -> (vector<8x1xf32>)  : i32 {
      %c512_i32 = arith.constant 512 : i32
      %20 = arith.muli %arg7, %c512_i32 : i32
      %21 = tpu.assume_multiple %20, 512 : i32
      %c0_18 = arith.constant 0 : index
      %22 = arith.index_cast %21 : i32 to index
      %23 = vector.load %arg1[%c0_18, %22] : memref<147x8192xbf16, #tpu.memory_space<vmem>>, vector<147x512xbf16>
      %cst_19 = arith.constant dense<0.000000e+00> : vector<8x512xf32>
      %24 = tpu.matmul %0, %23, %cst_19 {dimension_numbers = #tpu.dot_dimension_numbers<[1], [0], [0], [1], [0, 0, 1, 1], [], []>} : vector<8x147xbf16>, vector<147x512xbf16>, vector<8x512xf32> -> vector<8x512xf32>
      %c0_20 = arith.constant 0 : index
      %25 = arith.index_cast %21 : i32 to index
      %26 = vector.load %arg6[%c0_20, %25] : memref<8x8192xf32, #tpu.memory_space<vmem>>, vector<8x512xf32>
      tpu.vector_store %arg6[%c0_20, %25], %24 {strides = array<i32>} : memref<8x8192xf32, #tpu.memory_space<vmem>>, vector<8x512xf32>,
      %cst_21 = arith.constant dense<0.000000e+00> : vector<8xf32>
      %27 = vector.multi_reduction <add>, %24, %cst_21 [1] : vector<8x512xf32> to vector<8xf32>
      %28 = vector.shape_cast %27 : vector<8xf32> to vector<8x1xf32>
      %29 = arith.addf %arg8, %28 : vector<8x1xf32>
      scf.yield %29 : vector<8x1xf32>
    }
    %c16_i32_1 = arith.constant 16 : i32
    %cst_2 = arith.constant 1.22070313E-4 : f32
    %4 = vector.broadcast %cst_2 : f32 to vector<8x1xf32>
    %5 = arith.mulf %3, %4 : vector<8x1xf32>
    %cst_3 = arith.constant 0.000000e+00 : f32
    %6 = vector.broadcast %cst_3 : f32 to vector<8x1xf32>
    %c0_i32_4 = arith.constant 0 : i32
    %c16_i32_5 = arith.constant 16 : i32
    %7 = arith.addi %c0_i32_4, %c16_i32_5 : i32
    %c1_i32_6 = arith.constant 1 : i32
    %8 = scf.for %arg7 = %c0_i32_4 to %7 step %c1_i32_6 iter_args(%arg8 = %6) -> (vector<8x1xf32>)  : i32 {
      %c512_i32 = arith.constant 512 : i32
      %20 = arith.muli %arg7, %c512_i32 : i32
      %21 = tpu.assume_multiple %20, 512 : i32
      %c0_18 = arith.constant 0 : index
      %22 = arith.index_cast %21 : i32 to index
      %23 = vector.load %arg6[%c0_18, %22] : memref<8x8192xf32, #tpu.memory_space<vmem>>, vector<8x512xf32>
      %24 = vector.broadcast %5 : vector<8x1xf32> to vector<8x512xf32>
      %25 = arith.subf %23, %24 : vector<8x512xf32>
      %26 = arith.mulf %25, %25 : vector<8x512xf32>
      %cst_19 = arith.constant dense<0.000000e+00> : vector<8xf32>
      %27 = vector.multi_reduction <add>, %26, %cst_19 [1] : vector<8x512xf32> to vector<8xf32>
      %28 = vector.shape_cast %27 : vector<8xf32> to vector<8x1xf32>
      %29 = arith.addf %arg8, %28 : vector<8x1xf32>
      scf.yield %29 : vector<8x1xf32>
    }
    %c16_i32_7 = arith.constant 16 : i32
    %cst_8 = arith.constant 1.22070313E-4 : f32
    %9 = vector.broadcast %cst_8 : f32 to vector<8x1xf32>
    %10 = arith.mulf %8, %9 : vector<8x1xf32>
    %c0_9 = arith.constant 0 : index
    %c0_10 = arith.constant 0 : index
    %11 = vector.load %arg3[%c0_9, %c0_10] : memref<8x1xf32, #tpu.memory_space<vmem>>, vector<8x1xf32>
    %cst_11 = arith.constant 9.99999974E-6 : f32
    %12 = vector.broadcast %cst_11 : f32 to vector<8x1xf32>
    %13 = arith.addf %10, %12 : vector<8x1xf32>
    %14 = math.rsqrt %13 : vector<8x1xf32>
    %15 = arith.mulf %11, %14 : vector<8x1xf32>
    %c0_12 = arith.constant 0 : index
    %c0_13 = arith.constant 0 : index
    %16 = vector.load %arg4[%c0_12, %c0_13] : memref<8x1xf32, #tpu.memory_space<vmem>>, vector<8x1xf32>
    %17 = arith.mulf %5, %15 : vector<8x1xf32>
    %18 = arith.subf %16, %17 : vector<8x1xf32>
    %c0_i32_14 = arith.constant 0 : i32
    %c16_i32_15 = arith.constant 16 : i32
    %19 = arith.addi %c0_i32_14, %c16_i32_15 : i32
    %c1_i32_16 = arith.constant 1 : i32
    scf.for %arg7 = %c0_i32_14 to %19 step %c1_i32_16  : i32 {
      %c512_i32 = arith.constant 512 : i32
      %20 = arith.muli %arg7, %c512_i32 : i32
      %21 = tpu.assume_multiple %20, 512 : i32
      %c0_18 = arith.constant 0 : index
      %22 = arith.index_cast %21 : i32 to index
      %23 = vector.load %arg6[%c0_18, %22] : memref<8x8192xf32, #tpu.memory_space<vmem>>, vector<8x512xf32>
      %24 = vector.broadcast %15 : vector<8x1xf32> to vector<8x512xf32>
      %25 = arith.mulf %23, %24 : vector<8x512xf32>
      %26 = vector.broadcast %18 : vector<8x1xf32> to vector<8x512xf32>
      %27 = arith.addf %25, %26 : vector<8x512xf32>
      %cst_19 = arith.constant 0.000000e+00 : f32
      %28 = vector.broadcast %cst_19 : f32 to vector<8x512xf32>
      %29 = arith.maximumf %27, %28 : vector<8x512xf32>
      %30 = arith.truncf %29 : vector<8x512xf32> to vector<8x512xbf16>
      %c0_20 = arith.constant 0 : index
      %31 = arith.index_cast %21 : i32 to index
      %32 = vector.load %arg5[%c0_20, %31] : memref<8x8192xbf16, #tpu.memory_space<vmem>>, vector<8x512xbf16>
      tpu.vector_store %arg5[%c0_20, %31], %30 {strides = array<i32>} : memref<8x8192xbf16, #tpu.memory_space<vmem>>, vector<8x512xbf16>,
    }
    %c16_i32_17 = arith.constant 16 : i32
    return
  }
  func.func @transform_0(%arg0: i32) -> (i32, i32) {
    %c0_i32 = arith.constant 0 : i32
    %c0_i32_0 = arith.constant 0 : i32
    %c0_i32_1 = arith.constant 0 : i32
    return %c0_i32, %c0_i32_0 : i32, i32
  }
  func.func @transform_1(%arg0: i32) -> (i32, i32) {
    %c0_i32 = arith.constant 0 : i32
    %c0_i32_0 = arith.constant 0 : i32
    %c0_i32_1 = arith.constant 0 : i32
    return %c0_i32, %c0_i32_0 : i32, i32
  }
  func.func @transform_2(%arg0: i32) -> (i32, i32) {
    %c0_i32 = arith.constant 0 : i32
    %c0_i32_0 = arith.constant 0 : i32
    %c0_i32_1 = arith.constant 0 : i32
    return %c0_i32, %c0_i32_0 : i32, i32
  }
  func.func @transform_3(%arg0: i32) -> (i32, i32) {
    %c0_i32 = arith.constant 0 : i32
    %c0_i32_0 = arith.constant 0 : i32
    %c0_i32_1 = arith.constant 0 : i32
    return %c0_i32, %c0_i32_0 : i32, i32
  }
  func.func @transform_4(%arg0: i32) -> (i32, i32) {
    %c0_i32 = arith.constant 0 : i32
    %c0_i32_0 = arith.constant 0 : i32
    %c0_i32_1 = arith.constant 0 : i32
    return %c0_i32, %c0_i32_0 : i32, i32
  }
}

module attributes {stable_mosaic.version = 11 : i64} {
  func.func @_maxpool_kernel(%arg0: i32, %arg1: memref<4x8x2178xbf16, #tpu.memory_space<vmem>>, %arg2: memref<8x2178xbf16, #tpu.memory_space<vmem>>) attributes {dimension_semantics = [#tpu.dimension_semantics<arbitrary>], iteration_bounds = array<i64: 1>, scalar_prefetch = 0 : i64, scratch_operands = 0 : i64, tpu.core_type = #tpu.core_type<tc>, window_params = [{pipeline_mode = #tpu.pipeline_mode<synchronous>, transform_indices = @transform_0, window_bounds = array<i64: 4, 8, 2178>}, {pipeline_mode = #tpu.pipeline_mode<synchronous>, transform_indices = @transform_1, window_bounds = array<i64: 8, 2178>}]} {
    %cst = arith.constant 0.000000e+00 : bf16
    %0 = vector.broadcast %cst : bf16 to vector<8x2178xbf16>
    %c0 = arith.constant 0 : index
    %c0_0 = arith.constant 0 : index
    %1 = vector.load %arg2[%c0, %c0_0] : memref<8x2178xbf16, #tpu.memory_space<vmem>>, vector<8x2178xbf16>
    tpu.vector_store %arg2[%c0, %c0_0], %0 {strides = array<i32>} : memref<8x2178xbf16, #tpu.memory_space<vmem>>, vector<8x2178xbf16>,
    %c0_1 = arith.constant 0 : index
    %c0_2 = arith.constant 0 : index
    %c0_3 = arith.constant 0 : index
    %2 = vector.load %arg1[%c0_1, %c0_2, %c0_3] : memref<4x8x2178xbf16, #tpu.memory_space<vmem>>, vector<1x8x2144xbf16>
    %3 = vector.shape_cast %2 : vector<1x8x2144xbf16> to vector<8x2144xbf16>
    %c1 = arith.constant 1 : index
    %c0_4 = arith.constant 0 : index
    %c0_5 = arith.constant 0 : index
    %4 = vector.load %arg1[%c1, %c0_4, %c0_5] : memref<4x8x2178xbf16, #tpu.memory_space<vmem>>, vector<1x8x2144xbf16>
    %5 = vector.shape_cast %4 : vector<1x8x2144xbf16> to vector<8x2144xbf16>
    %6 = arith.maximumf %3, %5 : vector<8x2144xbf16>
    %c0_6 = arith.constant 0 : index
    %c0_7 = arith.constant 0 : index
    %c1_8 = arith.constant 1 : index
    %7 = vector.load %arg1[%c0_6, %c0_7, %c1_8] : memref<4x8x2178xbf16, #tpu.memory_space<vmem>>, vector<1x8x2144xbf16>
    %8 = vector.shape_cast %7 : vector<1x8x2144xbf16> to vector<8x2144xbf16>
    %9 = arith.maximumf %6, %8 : vector<8x2144xbf16>
    %c2 = arith.constant 2 : index
    %c0_9 = arith.constant 0 : index
    %c0_10 = arith.constant 0 : index
    %10 = vector.load %arg1[%c2, %c0_9, %c0_10] : memref<4x8x2178xbf16, #tpu.memory_space<vmem>>, vector<1x8x2144xbf16>
    %11 = vector.shape_cast %10 : vector<1x8x2144xbf16> to vector<8x2144xbf16>
    %12 = arith.maximumf %9, %11 : vector<8x2144xbf16>
    %c3 = arith.constant 3 : index
    %c0_11 = arith.constant 0 : index
    %c0_12 = arith.constant 0 : index
    %13 = vector.load %arg1[%c3, %c0_11, %c0_12] : memref<4x8x2178xbf16, #tpu.memory_space<vmem>>, vector<1x8x2144xbf16>
    %14 = vector.shape_cast %13 : vector<1x8x2144xbf16> to vector<8x2144xbf16>
    %15 = arith.maximumf %12, %14 : vector<8x2144xbf16>
    %c2_13 = arith.constant 2 : index
    %c0_14 = arith.constant 0 : index
    %c1_15 = arith.constant 1 : index
    %16 = vector.load %arg1[%c2_13, %c0_14, %c1_15] : memref<4x8x2178xbf16, #tpu.memory_space<vmem>>, vector<1x8x2144xbf16>
    %17 = vector.shape_cast %16 : vector<1x8x2144xbf16> to vector<8x2144xbf16>
    %18 = arith.maximumf %15, %17 : vector<8x2144xbf16>
    %c0_16 = arith.constant 0 : index
    %c0_17 = arith.constant 0 : index
    %c33 = arith.constant 33 : index
    %19 = vector.load %arg1[%c0_16, %c0_17, %c33] : memref<4x8x2178xbf16, #tpu.memory_space<vmem>>, vector<1x8x2144xbf16>
    %20 = vector.shape_cast %19 : vector<1x8x2144xbf16> to vector<8x2144xbf16>
    %21 = arith.maximumf %18, %20 : vector<8x2144xbf16>
    %c1_18 = arith.constant 1 : index
    %c0_19 = arith.constant 0 : index
    %c33_20 = arith.constant 33 : index
    %22 = vector.load %arg1[%c1_18, %c0_19, %c33_20] : memref<4x8x2178xbf16, #tpu.memory_space<vmem>>, vector<1x8x2144xbf16>
    %23 = vector.shape_cast %22 : vector<1x8x2144xbf16> to vector<8x2144xbf16>
    %24 = arith.maximumf %21, %23 : vector<8x2144xbf16>
    %c0_21 = arith.constant 0 : index
    %c0_22 = arith.constant 0 : index
    %c34 = arith.constant 34 : index
    %25 = vector.load %arg1[%c0_21, %c0_22, %c34] : memref<4x8x2178xbf16, #tpu.memory_space<vmem>>, vector<1x8x2144xbf16>
    %26 = vector.shape_cast %25 : vector<1x8x2144xbf16> to vector<8x2144xbf16>
    %27 = arith.maximumf %24, %26 : vector<8x2144xbf16>
    %c0_23 = arith.constant 0 : index
    %c0_24 = arith.constant 0 : index
    %28 = vector.load %arg2[%c0_23, %c0_24] : memref<8x2178xbf16, #tpu.memory_space<vmem>>, vector<8x2144xbf16>
    tpu.vector_store %arg2[%c0_23, %c0_24], %27 {strides = array<i32>} : memref<8x2178xbf16, #tpu.memory_space<vmem>>, vector<8x2144xbf16>,
    return
  }
  func.func @transform_0(%arg0: i32) -> (i32, i32, i32) {
    %c0_i32 = arith.constant 0 : i32
    %c0_i32_0 = arith.constant 0 : i32
    %c0_i32_1 = arith.constant 0 : i32
    %c0_i32_2 = arith.constant 0 : i32
    return %c0_i32, %c0_i32_0, %c0_i32_1 : i32, i32, i32
  }
  func.func @transform_1(%arg0: i32) -> (i32, i32) {
    %c0_i32 = arith.constant 0 : i32
    %c0_i32_0 = arith.constant 0 : i32
    %c0_i32_1 = arith.constant 0 : i32
    return %c0_i32, %c0_i32_0 : i32, i32
  }
}

module attributes {stable_mosaic.version = 11 : i64} {
  func.func @_block_kernel(%arg0: i32, %arg1: memref<72x2312xbf16, #tpu.memory_space<vmem>>, %arg2: memref<8x72xbf16, #tpu.memory_space<vmem>>, %arg3: memref<8x1xf32, #tpu.memory_space<vmem>>, %arg4: memref<8x1xf32, #tpu.memory_space<vmem>>, %arg5: memref<8x2312xbf16, #tpu.memory_space<vmem>>, %arg6: memref<9x8x8xbf16, #tpu.memory_space<vmem>>, %arg7: memref<8x1xf32, #tpu.memory_space<vmem>>, %arg8: memref<8x1xf32, #tpu.memory_space<vmem>>, %arg9: memref<1x2312xf32, #tpu.memory_space<vmem>>, %arg10: memref<8x2312xbf16, #tpu.memory_space<vmem>>, %arg11: memref<8x2382xbf16, #tpu.memory_space<vmem>>) attributes {dimension_semantics = [#tpu.dimension_semantics<arbitrary>], iteration_bounds = array<i64: 1>, scalar_prefetch = 0 : i64, scratch_operands = 1 : i64, tpu.core_type = #tpu.core_type<tc>, window_params = [{pipeline_mode = #tpu.pipeline_mode<synchronous>, transform_indices = @transform_0, window_bounds = array<i64: 72, 2312>}, {pipeline_mode = #tpu.pipeline_mode<synchronous>, transform_indices = @transform_1, window_bounds = array<i64: 8, 72>}, {pipeline_mode = #tpu.pipeline_mode<synchronous>, transform_indices = @transform_2, window_bounds = array<i64: 8, 1>}, {pipeline_mode = #tpu.pipeline_mode<synchronous>, transform_indices = @transform_3, window_bounds = array<i64: 8, 1>}, {pipeline_mode = #tpu.pipeline_mode<synchronous>, transform_indices = @transform_4, window_bounds = array<i64: 8, 2312>}, {pipeline_mode = #tpu.pipeline_mode<synchronous>, transform_indices = @transform_5, window_bounds = array<i64: 9, 8, 8>}, {pipeline_mode = #tpu.pipeline_mode<synchronous>, transform_indices = @transform_6, window_bounds = array<i64: 8, 1>}, {pipeline_mode = #tpu.pipeline_mode<synchronous>, transform_indices = @transform_7, window_bounds = array<i64: 8, 1>}, {pipeline_mode = #tpu.pipeline_mode<synchronous>, transform_indices = @transform_8, window_bounds = array<i64: 1, 2312>}, {pipeline_mode = #tpu.pipeline_mode<synchronous>, transform_indices = @transform_9, window_bounds = array<i64: 8, 2312>}]} {
    %c0 = arith.constant 0 : index
    %c0_0 = arith.constant 0 : index
    %0 = vector.load %arg9[%c0, %c0_0] : memref<1x2312xf32, #tpu.memory_space<vmem>>, vector<1x2312xf32>
    %c0_1 = arith.constant 0 : index
    %c0_2 = arith.constant 0 : index
    %1 = vector.load %arg2[%c0_1, %c0_2] : memref<8x72xbf16, #tpu.memory_space<vmem>>, vector<8x72xbf16>
    %c0_3 = arith.constant 0 : index
    %c0_4 = arith.constant 0 : index
    %2 = vector.load %arg1[%c0_3, %c0_4] : memref<72x2312xbf16, #tpu.memory_space<vmem>>, vector<72x2312xbf16>
    %cst = arith.constant dense<0.000000e+00> : vector<8x2312xf32>
    %3 = tpu.matmul %1, %2, %cst {dimension_numbers = #tpu.dot_dimension_numbers<[1], [0], [0], [1], [0, 0, 1, 1], [], []>} : vector<8x72xbf16>, vector<72x2312xbf16>, vector<8x2312xf32> -> vector<8x2312xf32>
    %4 = vector.broadcast %0 : vector<1x2312xf32> to vector<8x2312xf32>
    %5 = arith.mulf %3, %4 : vector<8x2312xf32>
    %cst_5 = arith.constant dense<0.000000e+00> : vector<8xf32>
    %6 = vector.multi_reduction <add>, %5, %cst_5 [1] : vector<8x2312xf32> to vector<8xf32>
    %7 = vector.shape_cast %6 : vector<8xf32> to vector<8x1xf32>
    %cst_6 = arith.constant 4.8828125E-4 : f32
    %8 = vector.broadcast %cst_6 : f32 to vector<8x1xf32>
    %9 = arith.mulf %7, %8 : vector<8x1xf32>
    %10 = vector.broadcast %9 : vector<8x1xf32> to vector<8x2312xf32>
    %11 = arith.subf %3, %10 : vector<8x2312xf32>
    %12 = vector.broadcast %0 : vector<1x2312xf32> to vector<8x2312xf32>
    %13 = arith.mulf %11, %12 : vector<8x2312xf32>
    %14 = arith.mulf %13, %13 : vector<8x2312xf32>
    %cst_7 = arith.constant dense<0.000000e+00> : vector<8xf32>
    %15 = vector.multi_reduction <add>, %14, %cst_7 [1] : vector<8x2312xf32> to vector<8xf32>
    %16 = vector.shape_cast %15 : vector<8xf32> to vector<8x1xf32>
    %cst_8 = arith.constant 4.8828125E-4 : f32
    %17 = vector.broadcast %cst_8 : f32 to vector<8x1xf32>
    %18 = arith.mulf %16, %17 : vector<8x1xf32>
    %c0_9 = arith.constant 0 : index
    %c0_10 = arith.constant 0 : index
    %19 = vector.load %arg3[%c0_9, %c0_10] : memref<8x1xf32, #tpu.memory_space<vmem>>, vector<8x1xf32>
    %cst_11 = arith.constant 9.99999974E-6 : f32
    %20 = vector.broadcast %cst_11 : f32 to vector<8x1xf32>
    %21 = arith.addf %18, %20 : vector<8x1xf32>
    %22 = math.rsqrt %21 : vector<8x1xf32>
    %23 = arith.mulf %19, %22 : vector<8x1xf32>
    %c0_12 = arith.constant 0 : index
    %c0_13 = arith.constant 0 : index
    %24 = vector.load %arg4[%c0_12, %c0_13] : memref<8x1xf32, #tpu.memory_space<vmem>>, vector<8x1xf32>
    %25 = arith.mulf %9, %23 : vector<8x1xf32>
    %26 = arith.subf %24, %25 : vector<8x1xf32>
    %27 = vector.broadcast %23 : vector<8x1xf32> to vector<8x2312xf32>
    %28 = arith.mulf %3, %27 : vector<8x2312xf32>
    %29 = vector.broadcast %26 : vector<8x1xf32> to vector<8x2312xf32>
    %30 = arith.addf %28, %29 : vector<8x2312xf32>
    %cst_14 = arith.constant 0.000000e+00 : f32
    %31 = vector.broadcast %cst_14 : f32 to vector<8x2312xf32>
    %32 = arith.maximumf %30, %31 : vector<8x2312xf32>
    %33 = vector.broadcast %0 : vector<1x2312xf32> to vector<8x2312xf32>
    %34 = arith.mulf %32, %33 : vector<8x2312xf32>
    %cst_15 = arith.constant 0.000000e+00 : bf16
    %35 = vector.broadcast %cst_15 : bf16 to vector<8x2382xbf16>
    %c0_16 = arith.constant 0 : index
    %c0_17 = arith.constant 0 : index
    %36 = vector.load %arg11[%c0_16, %c0_17] : memref<8x2382xbf16, #tpu.memory_space<vmem>>, vector<8x2382xbf16>
    tpu.vector_store %arg11[%c0_16, %c0_17], %35 {strides = array<i32>} : memref<8x2382xbf16, #tpu.memory_space<vmem>>, vector<8x2382xbf16>,
    %37 = arith.truncf %34 : vector<8x2312xf32> to vector<8x2312xbf16>
    %c0_18 = arith.constant 0 : index
    %c35 = arith.constant 35 : index
    %38 = vector.load %arg11[%c0_18, %c35] : memref<8x2382xbf16, #tpu.memory_space<vmem>>, vector<8x2312xbf16>
    tpu.vector_store %arg11[%c0_18, %c35], %37 {strides = array<i32>} : memref<8x2382xbf16, #tpu.memory_space<vmem>>, vector<8x2312xbf16>,
    %c0_19 = arith.constant 0 : index
    %c0_20 = arith.constant 0 : index
    %c0_21 = arith.constant 0 : index
    %39 = vector.load %arg6[%c0_19, %c0_20, %c0_21] : memref<9x8x8xbf16, #tpu.memory_space<vmem>>, vector<1x8x8xbf16>
    %40 = vector.shape_cast %39 : vector<1x8x8xbf16> to vector<8x8xbf16>
    %c0_22 = arith.constant 0 : index
    %c0_23 = arith.constant 0 : index
    %41 = vector.load %arg11[%c0_22, %c0_23] : memref<8x2382xbf16, #tpu.memory_space<vmem>>, vector<8x2312xbf16>
    %cst_24 = arith.constant dense<0.000000e+00> : vector<8x2312xf32>
    %42 = tpu.matmul %40, %41, %cst_24 {dimension_numbers = #tpu.dot_dimension_numbers<[1], [0], [0], [1], [0, 0, 1, 1], [], []>} : vector<8x8xbf16>, vector<8x2312xbf16>, vector<8x2312xf32> -> vector<8x2312xf32>
    %c1 = arith.constant 1 : index
    %c0_25 = arith.constant 0 : index
    %c0_26 = arith.constant 0 : index
    %43 = vector.load %arg6[%c1, %c0_25, %c0_26] : memref<9x8x8xbf16, #tpu.memory_space<vmem>>, vector<1x8x8xbf16>
    %44 = vector.shape_cast %43 : vector<1x8x8xbf16> to vector<8x8xbf16>
    %c0_27 = arith.constant 0 : index
    %c1_28 = arith.constant 1 : index
    %45 = vector.load %arg11[%c0_27, %c1_28] : memref<8x2382xbf16, #tpu.memory_space<vmem>>, vector<8x2312xbf16>
    %cst_29 = arith.constant dense<0.000000e+00> : vector<8x2312xf32>
    %46 = tpu.matmul %44, %45, %cst_29 {dimension_numbers = #tpu.dot_dimension_numbers<[1], [0], [0], [1], [0, 0, 1, 1], [], []>} : vector<8x8xbf16>, vector<8x2312xbf16>, vector<8x2312xf32> -> vector<8x2312xf32>
    %47 = arith.addf %42, %46 : vector<8x2312xf32>
    %c2 = arith.constant 2 : index
    %c0_30 = arith.constant 0 : index
    %c0_31 = arith.constant 0 : index
    %48 = vector.load %arg6[%c2, %c0_30, %c0_31] : memref<9x8x8xbf16, #tpu.memory_space<vmem>>, vector<1x8x8xbf16>
    %49 = vector.shape_cast %48 : vector<1x8x8xbf16> to vector<8x8xbf16>
    %c0_32 = arith.constant 0 : index
    %c2_33 = arith.constant 2 : index
    %50 = vector.load %arg11[%c0_32, %c2_33] : memref<8x2382xbf16, #tpu.memory_space<vmem>>, vector<8x2312xbf16>
    %cst_34 = arith.constant dense<0.000000e+00> : vector<8x2312xf32>
    %51 = tpu.matmul %49, %50, %cst_34 {dimension_numbers = #tpu.dot_dimension_numbers<[1], [0], [0], [1], [0, 0, 1, 1], [], []>} : vector<8x8xbf16>, vector<8x2312xbf16>, vector<8x2312xf32> -> vector<8x2312xf32>
    %52 = arith.addf %47, %51 : vector<8x2312xf32>
    %c3 = arith.constant 3 : index
    %c0_35 = arith.constant 0 : index
    %c0_36 = arith.constant 0 : index
    %53 = vector.load %arg6[%c3, %c0_35, %c0_36] : memref<9x8x8xbf16, #tpu.memory_space<vmem>>, vector<1x8x8xbf16>
    %54 = vector.shape_cast %53 : vector<1x8x8xbf16> to vector<8x8xbf16>
    %c0_37 = arith.constant 0 : index
    %c34 = arith.constant 34 : index
    %55 = vector.load %arg11[%c0_37, %c34] : memref<8x2382xbf16, #tpu.memory_space<vmem>>, vector<8x2312xbf16>
    %cst_38 = arith.constant dense<0.000000e+00> : vector<8x2312xf32>
    %56 = tpu.matmul %54, %55, %cst_38 {dimension_numbers = #tpu.dot_dimension_numbers<[1], [0], [0], [1], [0, 0, 1, 1], [], []>} : vector<8x8xbf16>, vector<8x2312xbf16>, vector<8x2312xf32> -> vector<8x2312xf32>
    %57 = arith.addf %52, %56 : vector<8x2312xf32>
    %c4 = arith.constant 4 : index
    %c0_39 = arith.constant 0 : index
    %c0_40 = arith.constant 0 : index
    %58 = vector.load %arg6[%c4, %c0_39, %c0_40] : memref<9x8x8xbf16, #tpu.memory_space<vmem>>, vector<1x8x8xbf16>
    %59 = vector.shape_cast %58 : vector<1x8x8xbf16> to vector<8x8xbf16>
    %c0_41 = arith.constant 0 : index
    %c35_42 = arith.constant 35 : index
    %60 = vector.load %arg11[%c0_41, %c35_42] : memref<8x2382xbf16, #tpu.memory_space<vmem>>, vector<8x2312xbf16>
    %cst_43 = arith.constant dense<0.000000e+00> : vector<8x2312xf32>
    %61 = tpu.matmul %59, %60, %cst_43 {dimension_numbers = #tpu.dot_dimension_numbers<[1], [0], [0], [1], [0, 0, 1, 1], [], []>} : vector<8x8xbf16>, vector<8x2312xbf16>, vector<8x2312xf32> -> vector<8x2312xf32>
    %62 = arith.addf %57, %61 : vector<8x2312xf32>
    %c5 = arith.constant 5 : index
    %c0_44 = arith.constant 0 : index
    %c0_45 = arith.constant 0 : index
    %63 = vector.load %arg6[%c5, %c0_44, %c0_45] : memref<9x8x8xbf16, #tpu.memory_space<vmem>>, vector<1x8x8xbf16>
    %64 = vector.shape_cast %63 : vector<1x8x8xbf16> to vector<8x8xbf16>
    %c0_46 = arith.constant 0 : index
    %c36 = arith.constant 36 : index
    %65 = vector.load %arg11[%c0_46, %c36] : memref<8x2382xbf16, #tpu.memory_space<vmem>>, vector<8x2312xbf16>
    %cst_47 = arith.constant dense<0.000000e+00> : vector<8x2312xf32>
    %66 = tpu.matmul %64, %65, %cst_47 {dimension_numbers = #tpu.dot_dimension_numbers<[1], [0], [0], [1], [0, 0, 1, 1], [], []>} : vector<8x8xbf16>, vector<8x2312xbf16>, vector<8x2312xf32> -> vector<8x2312xf32>
    %67 = arith.addf %62, %66 : vector<8x2312xf32>
    %c6 = arith.constant 6 : index
    %c0_48 = arith.constant 0 : index
    %c0_49 = arith.constant 0 : index
    %68 = vector.load %arg6[%c6, %c0_48, %c0_49] : memref<9x8x8xbf16, #tpu.memory_space<vmem>>, vector<1x8x8xbf16>
    %69 = vector.shape_cast %68 : vector<1x8x8xbf16> to vector<8x8xbf16>
    %c0_50 = arith.constant 0 : index
    %c68 = arith.constant 68 : index
    %70 = vector.load %arg11[%c0_50, %c68] : memref<8x2382xbf16, #tpu.memory_space<vmem>>, vector<8x2312xbf16>
    %cst_51 = arith.constant dense<0.000000e+00> : vector<8x2312xf32>
    %71 = tpu.matmul %69, %70, %cst_51 {dimension_numbers = #tpu.dot_dimension_numbers<[1], [0], [0], [1], [0, 0, 1, 1], [], []>} : vector<8x8xbf16>, vector<8x2312xbf16>, vector<8x2312xf32> -> vector<8x2312xf32>
    %72 = arith.addf %67, %71 : vector<8x2312xf32>
    %c7 = arith.constant 7 : index
    %c0_52 = arith.constant 0 : index
    %c0_53 = arith.constant 0 : index
    %73 = vector.load %arg6[%c7, %c0_52, %c0_53] : memref<9x8x8xbf16, #tpu.memory_space<vmem>>, vector<1x8x8xbf16>
    %74 = vector.shape_cast %73 : vector<1x8x8xbf16> to vector<8x8xbf16>
    %c0_54 = arith.constant 0 : index
    %c69 = arith.constant 69 : index
    %75 = vector.load %arg11[%c0_54, %c69] : memref<8x2382xbf16, #tpu.memory_space<vmem>>, vector<8x2312xbf16>
    %cst_55 = arith.constant dense<0.000000e+00> : vector<8x2312xf32>
    %76 = tpu.matmul %74, %75, %cst_55 {dimension_numbers = #tpu.dot_dimension_numbers<[1], [0], [0], [1], [0, 0, 1, 1], [], []>} : vector<8x8xbf16>, vector<8x2312xbf16>, vector<8x2312xf32> -> vector<8x2312xf32>
    %77 = arith.addf %72, %76 : vector<8x2312xf32>
    %c8 = arith.constant 8 : index
    %c0_56 = arith.constant 0 : index
    %c0_57 = arith.constant 0 : index
    %78 = vector.load %arg6[%c8, %c0_56, %c0_57] : memref<9x8x8xbf16, #tpu.memory_space<vmem>>, vector<1x8x8xbf16>
    %79 = vector.shape_cast %78 : vector<1x8x8xbf16> to vector<8x8xbf16>
    %c0_58 = arith.constant 0 : index
    %c70 = arith.constant 70 : index
    %80 = vector.load %arg11[%c0_58, %c70] : memref<8x2382xbf16, #tpu.memory_space<vmem>>, vector<8x2312xbf16>
    %cst_59 = arith.constant dense<0.000000e+00> : vector<8x2312xf32>
    %81 = tpu.matmul %79, %80, %cst_59 {dimension_numbers = #tpu.dot_dimension_numbers<[1], [0], [0], [1], [0, 0, 1, 1], [], []>} : vector<8x8xbf16>, vector<8x2312xbf16>, vector<8x2312xf32> -> vector<8x2312xf32>
    %82 = arith.addf %77, %81 : vector<8x2312xf32>
    %83 = vector.broadcast %0 : vector<1x2312xf32> to vector<8x2312xf32>
    %84 = arith.mulf %82, %83 : vector<8x2312xf32>
    %cst_60 = arith.constant dense<0.000000e+00> : vector<8xf32>
    %85 = vector.multi_reduction <add>, %84, %cst_60 [1] : vector<8x2312xf32> to vector<8xf32>
    %86 = vector.shape_cast %85 : vector<8xf32> to vector<8x1xf32>
    %cst_61 = arith.constant 4.8828125E-4 : f32
    %87 = vector.broadcast %cst_61 : f32 to vector<8x1xf32>
    %88 = arith.mulf %86, %87 : vector<8x1xf32>
    %89 = vector.broadcast %88 : vector<8x1xf32> to vector<8x2312xf32>
    %90 = arith.subf %82, %89 : vector<8x2312xf32>
    %91 = vector.broadcast %0 : vector<1x2312xf32> to vector<8x2312xf32>
    %92 = arith.mulf %90, %91 : vector<8x2312xf32>
    %93 = arith.mulf %92, %92 : vector<8x2312xf32>
    %cst_62 = arith.constant dense<0.000000e+00> : vector<8xf32>
    %94 = vector.multi_reduction <add>, %93, %cst_62 [1] : vector<8x2312xf32> to vector<8xf32>
    %95 = vector.shape_cast %94 : vector<8xf32> to vector<8x1xf32>
    %cst_63 = arith.constant 4.8828125E-4 : f32
    %96 = vector.broadcast %cst_63 : f32 to vector<8x1xf32>
    %97 = arith.mulf %95, %96 : vector<8x1xf32>
    %c0_64 = arith.constant 0 : index
    %c0_65 = arith.constant 0 : index
    %98 = vector.load %arg7[%c0_64, %c0_65] : memref<8x1xf32, #tpu.memory_space<vmem>>, vector<8x1xf32>
    %cst_66 = arith.constant 9.99999974E-6 : f32
    %99 = vector.broadcast %cst_66 : f32 to vector<8x1xf32>
    %100 = arith.addf %97, %99 : vector<8x1xf32>
    %101 = math.rsqrt %100 : vector<8x1xf32>
    %102 = arith.mulf %98, %101 : vector<8x1xf32>
    %c0_67 = arith.constant 0 : index
    %c0_68 = arith.constant 0 : index
    %103 = vector.load %arg8[%c0_67, %c0_68] : memref<8x1xf32, #tpu.memory_space<vmem>>, vector<8x1xf32>
    %104 = arith.mulf %88, %102 : vector<8x1xf32>
    %105 = arith.subf %103, %104 : vector<8x1xf32>
    %106 = vector.broadcast %102 : vector<8x1xf32> to vector<8x2312xf32>
    %107 = arith.mulf %82, %106 : vector<8x2312xf32>
    %108 = vector.broadcast %105 : vector<8x1xf32> to vector<8x2312xf32>
    %109 = arith.addf %107, %108 : vector<8x2312xf32>
    %c0_69 = arith.constant 0 : index
    %c0_70 = arith.constant 0 : index
    %110 = vector.load %arg5[%c0_69, %c0_70] : memref<8x2312xbf16, #tpu.memory_space<vmem>>, vector<8x2312xbf16>
    %111 = arith.extf %110 : vector<8x2312xbf16> to vector<8x2312xf32>
    %112 = arith.addf %109, %111 : vector<8x2312xf32>
    %cst_71 = arith.constant 0.000000e+00 : f32
    %113 = vector.broadcast %cst_71 : f32 to vector<8x2312xf32>
    %114 = arith.maximumf %112, %113 : vector<8x2312xf32>
    %115 = vector.broadcast %0 : vector<1x2312xf32> to vector<8x2312xf32>
    %116 = arith.mulf %114, %115 : vector<8x2312xf32>
    %117 = arith.truncf %116 : vector<8x2312xf32> to vector<8x2312xbf16>
    %c0_72 = arith.constant 0 : index
    %c0_73 = arith.constant 0 : index
    %118 = vector.load %arg10[%c0_72, %c0_73] : memref<8x2312xbf16, #tpu.memory_space<vmem>>, vector<8x2312xbf16>
    tpu.vector_store %arg10[%c0_72, %c0_73], %117 {strides = array<i32>} : memref<8x2312xbf16, #tpu.memory_space<vmem>>, vector<8x2312xbf16>,
    return
  }
  func.func @transform_0(%arg0: i32) -> (i32, i32) {
    %c0_i32 = arith.constant 0 : i32
    %c0_i32_0 = arith.constant 0 : i32
    %c0_i32_1 = arith.constant 0 : i32
    return %c0_i32, %c0_i32_0 : i32, i32
  }
  func.func @transform_1(%arg0: i32) -> (i32, i32) {
    %c0_i32 = arith.constant 0 : i32
    %c0_i32_0 = arith.constant 0 : i32
    %c0_i32_1 = arith.constant 0 : i32
    return %c0_i32, %c0_i32_0 : i32, i32
  }
  func.func @transform_2(%arg0: i32) -> (i32, i32) {
    %c0_i32 = arith.constant 0 : i32
    %c0_i32_0 = arith.constant 0 : i32
    %c0_i32_1 = arith.constant 0 : i32
    return %c0_i32, %c0_i32_0 : i32, i32
  }
  func.func @transform_3(%arg0: i32) -> (i32, i32) {
    %c0_i32 = arith.constant 0 : i32
    %c0_i32_0 = arith.constant 0 : i32
    %c0_i32_1 = arith.constant 0 : i32
    return %c0_i32, %c0_i32_0 : i32, i32
  }
  func.func @transform_4(%arg0: i32) -> (i32, i32) {
    %c0_i32 = arith.constant 0 : i32
    %c0_i32_0 = arith.constant 0 : i32
    %c0_i32_1 = arith.constant 0 : i32
    return %c0_i32, %c0_i32_0 : i32, i32
  }
  func.func @transform_5(%arg0: i32) -> (i32, i32, i32) {
    %c0_i32 = arith.constant 0 : i32
    %c0_i32_0 = arith.constant 0 : i32
    %c0_i32_1 = arith.constant 0 : i32
    %c0_i32_2 = arith.constant 0 : i32
    return %c0_i32, %c0_i32_0, %c0_i32_1 : i32, i32, i32
  }
  func.func @transform_6(%arg0: i32) -> (i32, i32) {
    %c0_i32 = arith.constant 0 : i32
    %c0_i32_0 = arith.constant 0 : i32
    %c0_i32_1 = arith.constant 0 : i32
    return %c0_i32, %c0_i32_0 : i32, i32
  }
  func.func @transform_7(%arg0: i32) -> (i32, i32) {
    %c0_i32 = arith.constant 0 : i32
    %c0_i32_0 = arith.constant 0 : i32
    %c0_i32_1 = arith.constant 0 : i32
    return %c0_i32, %c0_i32_0 : i32, i32
  }
  func.func @transform_8(%arg0: i32) -> (i32, i32) {
    %c0_i32 = arith.constant 0 : i32
    %c0_i32_0 = arith.constant 0 : i32
    %c0_i32_1 = arith.constant 0 : i32
    return %c0_i32, %c0_i32_0 : i32, i32
  }
  func.func @transform_9(%arg0: i32) -> (i32, i32) {
    %c0_i32 = arith.constant 0 : i32
    %c0_i32_0 = arith.constant 0 : i32
    %c0_i32_1 = arith.constant 0 : i32
    return %c0_i32, %c0_i32_0 : i32, i32
  }
}

module attributes {stable_mosaic.version = 11 : i64} {
  func.func @_block_kernel(%arg0: i32, %arg1: memref<72x648xbf16, #tpu.memory_space<vmem>>, %arg2: memref<16x72xbf16, #tpu.memory_space<vmem>>, %arg3: memref<16x1xf32, #tpu.memory_space<vmem>>, %arg4: memref<16x1xf32, #tpu.memory_space<vmem>>, %arg5: memref<8x648xbf16, #tpu.memory_space<vmem>>, %arg6: memref<16x8xbf16, #tpu.memory_space<vmem>>, %arg7: memref<16x1xf32, #tpu.memory_space<vmem>>, %arg8: memref<16x1xf32, #tpu.memory_space<vmem>>, %arg9: memref<9x16x16xbf16, #tpu.memory_space<vmem>>, %arg10: memref<16x1xf32, #tpu.memory_space<vmem>>, %arg11: memref<16x1xf32, #tpu.memory_space<vmem>>, %arg12: memref<1x648xf32, #tpu.memory_space<vmem>>, %arg13: memref<16x648xbf16, #tpu.memory_space<vmem>>, %arg14: memref<16x686xbf16, #tpu.memory_space<vmem>>) attributes {dimension_semantics = [#tpu.dimension_semantics<arbitrary>], iteration_bounds = array<i64: 1>, scalar_prefetch = 0 : i64, scratch_operands = 1 : i64, tpu.core_type = #tpu.core_type<tc>, window_params = [{pipeline_mode = #tpu.pipeline_mode<synchronous>, transform_indices = @transform_0, window_bounds = array<i64: 72, 648>}, {pipeline_mode = #tpu.pipeline_mode<synchronous>, transform_indices = @transform_1, window_bounds = array<i64: 16, 72>}, {pipeline_mode = #tpu.pipeline_mode<synchronous>, transform_indices = @transform_2, window_bounds = array<i64: 16, 1>}, {pipeline_mode = #tpu.pipeline_mode<synchronous>, transform_indices = @transform_3, window_bounds = array<i64: 16, 1>}, {pipeline_mode = #tpu.pipeline_mode<synchronous>, transform_indices = @transform_4, window_bounds = array<i64: 8, 648>}, {pipeline_mode = #tpu.pipeline_mode<synchronous>, transform_indices = @transform_5, window_bounds = array<i64: 16, 8>}, {pipeline_mode = #tpu.pipeline_mode<synchronous>, transform_indices = @transform_6, window_bounds = array<i64: 16, 1>}, {pipeline_mode = #tpu.pipeline_mode<synchronous>, transform_indices = @transform_7, window_bounds = array<i64: 16, 1>}, {pipeline_mode = #tpu.pipeline_mode<synchronous>, transform_indices = @transform_8, window_bounds = array<i64: 9, 16, 16>}, {pipeline_mode = #tpu.pipeline_mode<synchronous>, transform_indices = @transform_9, window_bounds = array<i64: 16, 1>}, {pipeline_mode = #tpu.pipeline_mode<synchronous>, transform_indices = @transform_10, window_bounds = array<i64: 16, 1>}, {pipeline_mode = #tpu.pipeline_mode<synchronous>, transform_indices = @transform_11, window_bounds = array<i64: 1, 648>}, {pipeline_mode = #tpu.pipeline_mode<synchronous>, transform_indices = @transform_12, window_bounds = array<i64: 16, 648>}]} {
    %c0 = arith.constant 0 : index
    %c0_0 = arith.constant 0 : index
    %0 = vector.load %arg12[%c0, %c0_0] : memref<1x648xf32, #tpu.memory_space<vmem>>, vector<1x648xf32>
    %c0_1 = arith.constant 0 : index
    %c0_2 = arith.constant 0 : index
    %1 = vector.load %arg2[%c0_1, %c0_2] : memref<16x72xbf16, #tpu.memory_space<vmem>>, vector<16x72xbf16>
    %c0_3 = arith.constant 0 : index
    %c0_4 = arith.constant 0 : index
    %2 = vector.load %arg1[%c0_3, %c0_4] : memref<72x648xbf16, #tpu.memory_space<vmem>>, vector<72x648xbf16>
    %cst = arith.constant dense<0.000000e+00> : vector<16x648xf32>
    %3 = tpu.matmul %1, %2, %cst {dimension_numbers = #tpu.dot_dimension_numbers<[1], [0], [0], [1], [0, 0, 1, 1], [], []>} : vector<16x72xbf16>, vector<72x648xbf16>, vector<16x648xf32> -> vector<16x648xf32>
    %4 = vector.broadcast %0 : vector<1x648xf32> to vector<16x648xf32>
    %5 = arith.mulf %3, %4 : vector<16x648xf32>
    %cst_5 = arith.constant dense<0.000000e+00> : vector<16xf32>
    %6 = vector.multi_reduction <add>, %5, %cst_5 [1] : vector<16x648xf32> to vector<16xf32>
    %7 = vector.shape_cast %6 : vector<16xf32> to vector<16x1xf32>
    %cst_6 = arith.constant 0.001953125 : f32
    %8 = vector.broadcast %cst_6 : f32 to vector<16x1xf32>
    %9 = arith.mulf %7, %8 : vector<16x1xf32>
    %10 = vector.broadcast %9 : vector<16x1xf32> to vector<16x648xf32>
    %11 = arith.subf %3, %10 : vector<16x648xf32>
    %12 = vector.broadcast %0 : vector<1x648xf32> to vector<16x648xf32>
    %13 = arith.mulf %11, %12 : vector<16x648xf32>
    %14 = arith.mulf %13, %13 : vector<16x648xf32>
    %cst_7 = arith.constant dense<0.000000e+00> : vector<16xf32>
    %15 = vector.multi_reduction <add>, %14, %cst_7 [1] : vector<16x648xf32> to vector<16xf32>
    %16 = vector.shape_cast %15 : vector<16xf32> to vector<16x1xf32>
    %cst_8 = arith.constant 0.001953125 : f32
    %17 = vector.broadcast %cst_8 : f32 to vector<16x1xf32>
    %18 = arith.mulf %16, %17 : vector<16x1xf32>
    %c0_9 = arith.constant 0 : index
    %c0_10 = arith.constant 0 : index
    %19 = vector.load %arg3[%c0_9, %c0_10] : memref<16x1xf32, #tpu.memory_space<vmem>>, vector<16x1xf32>
    %cst_11 = arith.constant 9.99999974E-6 : f32
    %20 = vector.broadcast %cst_11 : f32 to vector<16x1xf32>
    %21 = arith.addf %18, %20 : vector<16x1xf32>
    %22 = math.rsqrt %21 : vector<16x1xf32>
    %23 = arith.mulf %19, %22 : vector<16x1xf32>
    %c0_12 = arith.constant 0 : index
    %c0_13 = arith.constant 0 : index
    %24 = vector.load %arg4[%c0_12, %c0_13] : memref<16x1xf32, #tpu.memory_space<vmem>>, vector<16x1xf32>
    %25 = arith.mulf %9, %23 : vector<16x1xf32>
    %26 = arith.subf %24, %25 : vector<16x1xf32>
    %27 = vector.broadcast %23 : vector<16x1xf32> to vector<16x648xf32>
    %28 = arith.mulf %3, %27 : vector<16x648xf32>
    %29 = vector.broadcast %26 : vector<16x1xf32> to vector<16x648xf32>
    %30 = arith.addf %28, %29 : vector<16x648xf32>
    %cst_14 = arith.constant 0.000000e+00 : f32
    %31 = vector.broadcast %cst_14 : f32 to vector<16x648xf32>
    %32 = arith.maximumf %30, %31 : vector<16x648xf32>
    %33 = vector.broadcast %0 : vector<1x648xf32> to vector<16x648xf32>
    %34 = arith.mulf %32, %33 : vector<16x648xf32>
    %cst_15 = arith.constant 0.000000e+00 : bf16
    %35 = vector.broadcast %cst_15 : bf16 to vector<16x686xbf16>
    %c0_16 = arith.constant 0 : index
    %c0_17 = arith.constant 0 : index
    %36 = vector.load %arg14[%c0_16, %c0_17] : memref<16x686xbf16, #tpu.memory_space<vmem>>, vector<16x686xbf16>
    tpu.vector_store %arg14[%c0_16, %c0_17], %35 {strides = array<i32>} : memref<16x686xbf16, #tpu.memory_space<vmem>>, vector<16x686xbf16>,
    %37 = arith.truncf %34 : vector<16x648xf32> to vector<16x648xbf16>
    %c0_18 = arith.constant 0 : index
    %c19 = arith.constant 19 : index
    %38 = vector.load %arg14[%c0_18, %c19] : memref<16x686xbf16, #tpu.memory_space<vmem>>, vector<16x648xbf16>
    tpu.vector_store %arg14[%c0_18, %c19], %37 {strides = array<i32>} : memref<16x686xbf16, #tpu.memory_space<vmem>>, vector<16x648xbf16>,
    %c0_19 = arith.constant 0 : index
    %c0_20 = arith.constant 0 : index
    %c0_21 = arith.constant 0 : index
    %39 = vector.load %arg9[%c0_19, %c0_20, %c0_21] : memref<9x16x16xbf16, #tpu.memory_space<vmem>>, vector<1x16x16xbf16>
    %40 = vector.shape_cast %39 : vector<1x16x16xbf16> to vector<16x16xbf16>
    %c0_22 = arith.constant 0 : index
    %c0_23 = arith.constant 0 : index
    %41 = vector.load %arg14[%c0_22, %c0_23] : memref<16x686xbf16, #tpu.memory_space<vmem>>, vector<16x648xbf16>
    %cst_24 = arith.constant dense<0.000000e+00> : vector<16x648xf32>
    %42 = tpu.matmul %40, %41, %cst_24 {dimension_numbers = #tpu.dot_dimension_numbers<[1], [0], [0], [1], [0, 0, 1, 1], [], []>} : vector<16x16xbf16>, vector<16x648xbf16>, vector<16x648xf32> -> vector<16x648xf32>
    %c1 = arith.constant 1 : index
    %c0_25 = arith.constant 0 : index
    %c0_26 = arith.constant 0 : index
    %43 = vector.load %arg9[%c1, %c0_25, %c0_26] : memref<9x16x16xbf16, #tpu.memory_space<vmem>>, vector<1x16x16xbf16>
    %44 = vector.shape_cast %43 : vector<1x16x16xbf16> to vector<16x16xbf16>
    %c0_27 = arith.constant 0 : index
    %c1_28 = arith.constant 1 : index
    %45 = vector.load %arg14[%c0_27, %c1_28] : memref<16x686xbf16, #tpu.memory_space<vmem>>, vector<16x648xbf16>
    %cst_29 = arith.constant dense<0.000000e+00> : vector<16x648xf32>
    %46 = tpu.matmul %44, %45, %cst_29 {dimension_numbers = #tpu.dot_dimension_numbers<[1], [0], [0], [1], [0, 0, 1, 1], [], []>} : vector<16x16xbf16>, vector<16x648xbf16>, vector<16x648xf32> -> vector<16x648xf32>
    %47 = arith.addf %42, %46 : vector<16x648xf32>
    %c2 = arith.constant 2 : index
    %c0_30 = arith.constant 0 : index
    %c0_31 = arith.constant 0 : index
    %48 = vector.load %arg9[%c2, %c0_30, %c0_31] : memref<9x16x16xbf16, #tpu.memory_space<vmem>>, vector<1x16x16xbf16>
    %49 = vector.shape_cast %48 : vector<1x16x16xbf16> to vector<16x16xbf16>
    %c0_32 = arith.constant 0 : index
    %c2_33 = arith.constant 2 : index
    %50 = vector.load %arg14[%c0_32, %c2_33] : memref<16x686xbf16, #tpu.memory_space<vmem>>, vector<16x648xbf16>
    %cst_34 = arith.constant dense<0.000000e+00> : vector<16x648xf32>
    %51 = tpu.matmul %49, %50, %cst_34 {dimension_numbers = #tpu.dot_dimension_numbers<[1], [0], [0], [1], [0, 0, 1, 1], [], []>} : vector<16x16xbf16>, vector<16x648xbf16>, vector<16x648xf32> -> vector<16x648xf32>
    %52 = arith.addf %47, %51 : vector<16x648xf32>
    %c3 = arith.constant 3 : index
    %c0_35 = arith.constant 0 : index
    %c0_36 = arith.constant 0 : index
    %53 = vector.load %arg9[%c3, %c0_35, %c0_36] : memref<9x16x16xbf16, #tpu.memory_space<vmem>>, vector<1x16x16xbf16>
    %54 = vector.shape_cast %53 : vector<1x16x16xbf16> to vector<16x16xbf16>
    %c0_37 = arith.constant 0 : index
    %c18 = arith.constant 18 : index
    %55 = vector.load %arg14[%c0_37, %c18] : memref<16x686xbf16, #tpu.memory_space<vmem>>, vector<16x648xbf16>
    %cst_38 = arith.constant dense<0.000000e+00> : vector<16x648xf32>
    %56 = tpu.matmul %54, %55, %cst_38 {dimension_numbers = #tpu.dot_dimension_numbers<[1], [0], [0], [1], [0, 0, 1, 1], [], []>} : vector<16x16xbf16>, vector<16x648xbf16>, vector<16x648xf32> -> vector<16x648xf32>
    %57 = arith.addf %52, %56 : vector<16x648xf32>
    %c4 = arith.constant 4 : index
    %c0_39 = arith.constant 0 : index
    %c0_40 = arith.constant 0 : index
    %58 = vector.load %arg9[%c4, %c0_39, %c0_40] : memref<9x16x16xbf16, #tpu.memory_space<vmem>>, vector<1x16x16xbf16>
    %59 = vector.shape_cast %58 : vector<1x16x16xbf16> to vector<16x16xbf16>
    %c0_41 = arith.constant 0 : index
    %c19_42 = arith.constant 19 : index
    %60 = vector.load %arg14[%c0_41, %c19_42] : memref<16x686xbf16, #tpu.memory_space<vmem>>, vector<16x648xbf16>
    %cst_43 = arith.constant dense<0.000000e+00> : vector<16x648xf32>
    %61 = tpu.matmul %59, %60, %cst_43 {dimension_numbers = #tpu.dot_dimension_numbers<[1], [0], [0], [1], [0, 0, 1, 1], [], []>} : vector<16x16xbf16>, vector<16x648xbf16>, vector<16x648xf32> -> vector<16x648xf32>
    %62 = arith.addf %57, %61 : vector<16x648xf32>
    %c5 = arith.constant 5 : index
    %c0_44 = arith.constant 0 : index
    %c0_45 = arith.constant 0 : index
    %63 = vector.load %arg9[%c5, %c0_44, %c0_45] : memref<9x16x16xbf16, #tpu.memory_space<vmem>>, vector<1x16x16xbf16>
    %64 = vector.shape_cast %63 : vector<1x16x16xbf16> to vector<16x16xbf16>
    %c0_46 = arith.constant 0 : index
    %c20 = arith.constant 20 : index
    %65 = vector.load %arg14[%c0_46, %c20] : memref<16x686xbf16, #tpu.memory_space<vmem>>, vector<16x648xbf16>
    %cst_47 = arith.constant dense<0.000000e+00> : vector<16x648xf32>
    %66 = tpu.matmul %64, %65, %cst_47 {dimension_numbers = #tpu.dot_dimension_numbers<[1], [0], [0], [1], [0, 0, 1, 1], [], []>} : vector<16x16xbf16>, vector<16x648xbf16>, vector<16x648xf32> -> vector<16x648xf32>
    %67 = arith.addf %62, %66 : vector<16x648xf32>
    %c6 = arith.constant 6 : index
    %c0_48 = arith.constant 0 : index
    %c0_49 = arith.constant 0 : index
    %68 = vector.load %arg9[%c6, %c0_48, %c0_49] : memref<9x16x16xbf16, #tpu.memory_space<vmem>>, vector<1x16x16xbf16>
    %69 = vector.shape_cast %68 : vector<1x16x16xbf16> to vector<16x16xbf16>
    %c0_50 = arith.constant 0 : index
    %c36 = arith.constant 36 : index
    %70 = vector.load %arg14[%c0_50, %c36] : memref<16x686xbf16, #tpu.memory_space<vmem>>, vector<16x648xbf16>
    %cst_51 = arith.constant dense<0.000000e+00> : vector<16x648xf32>
    %71 = tpu.matmul %69, %70, %cst_51 {dimension_numbers = #tpu.dot_dimension_numbers<[1], [0], [0], [1], [0, 0, 1, 1], [], []>} : vector<16x16xbf16>, vector<16x648xbf16>, vector<16x648xf32> -> vector<16x648xf32>
    %72 = arith.addf %67, %71 : vector<16x648xf32>
    %c7 = arith.constant 7 : index
    %c0_52 = arith.constant 0 : index
    %c0_53 = arith.constant 0 : index
    %73 = vector.load %arg9[%c7, %c0_52, %c0_53] : memref<9x16x16xbf16, #tpu.memory_space<vmem>>, vector<1x16x16xbf16>
    %74 = vector.shape_cast %73 : vector<1x16x16xbf16> to vector<16x16xbf16>
    %c0_54 = arith.constant 0 : index
    %c37 = arith.constant 37 : index
    %75 = vector.load %arg14[%c0_54, %c37] : memref<16x686xbf16, #tpu.memory_space<vmem>>, vector<16x648xbf16>
    %cst_55 = arith.constant dense<0.000000e+00> : vector<16x648xf32>
    %76 = tpu.matmul %74, %75, %cst_55 {dimension_numbers = #tpu.dot_dimension_numbers<[1], [0], [0], [1], [0, 0, 1, 1], [], []>} : vector<16x16xbf16>, vector<16x648xbf16>, vector<16x648xf32> -> vector<16x648xf32>
    %77 = arith.addf %72, %76 : vector<16x648xf32>
    %c8 = arith.constant 8 : index
    %c0_56 = arith.constant 0 : index
    %c0_57 = arith.constant 0 : index
    %78 = vector.load %arg9[%c8, %c0_56, %c0_57] : memref<9x16x16xbf16, #tpu.memory_space<vmem>>, vector<1x16x16xbf16>
    %79 = vector.shape_cast %78 : vector<1x16x16xbf16> to vector<16x16xbf16>
    %c0_58 = arith.constant 0 : index
    %c38 = arith.constant 38 : index
    %80 = vector.load %arg14[%c0_58, %c38] : memref<16x686xbf16, #tpu.memory_space<vmem>>, vector<16x648xbf16>
    %cst_59 = arith.constant dense<0.000000e+00> : vector<16x648xf32>
    %81 = tpu.matmul %79, %80, %cst_59 {dimension_numbers = #tpu.dot_dimension_numbers<[1], [0], [0], [1], [0, 0, 1, 1], [], []>} : vector<16x16xbf16>, vector<16x648xbf16>, vector<16x648xf32> -> vector<16x648xf32>
    %82 = arith.addf %77, %81 : vector<16x648xf32>
    %83 = vector.broadcast %0 : vector<1x648xf32> to vector<16x648xf32>
    %84 = arith.mulf %82, %83 : vector<16x648xf32>
    %cst_60 = arith.constant dense<0.000000e+00> : vector<16xf32>
    %85 = vector.multi_reduction <add>, %84, %cst_60 [1] : vector<16x648xf32> to vector<16xf32>
    %86 = vector.shape_cast %85 : vector<16xf32> to vector<16x1xf32>
    %cst_61 = arith.constant 0.001953125 : f32
    %87 = vector.broadcast %cst_61 : f32 to vector<16x1xf32>
    %88 = arith.mulf %86, %87 : vector<16x1xf32>
    %89 = vector.broadcast %88 : vector<16x1xf32> to vector<16x648xf32>
    %90 = arith.subf %82, %89 : vector<16x648xf32>
    %91 = vector.broadcast %0 : vector<1x648xf32> to vector<16x648xf32>
    %92 = arith.mulf %90, %91 : vector<16x648xf32>
    %93 = arith.mulf %92, %92 : vector<16x648xf32>
    %cst_62 = arith.constant dense<0.000000e+00> : vector<16xf32>
    %94 = vector.multi_reduction <add>, %93, %cst_62 [1] : vector<16x648xf32> to vector<16xf32>
    %95 = vector.shape_cast %94 : vector<16xf32> to vector<16x1xf32>
    %cst_63 = arith.constant 0.001953125 : f32
    %96 = vector.broadcast %cst_63 : f32 to vector<16x1xf32>
    %97 = arith.mulf %95, %96 : vector<16x1xf32>
    %c0_64 = arith.constant 0 : index
    %c0_65 = arith.constant 0 : index
    %98 = vector.load %arg10[%c0_64, %c0_65] : memref<16x1xf32, #tpu.memory_space<vmem>>, vector<16x1xf32>
    %cst_66 = arith.constant 9.99999974E-6 : f32
    %99 = vector.broadcast %cst_66 : f32 to vector<16x1xf32>
    %100 = arith.addf %97, %99 : vector<16x1xf32>
    %101 = math.rsqrt %100 : vector<16x1xf32>
    %102 = arith.mulf %98, %101 : vector<16x1xf32>
    %c0_67 = arith.constant 0 : index
    %c0_68 = arith.constant 0 : index
    %103 = vector.load %arg11[%c0_67, %c0_68] : memref<16x1xf32, #tpu.memory_space<vmem>>, vector<16x1xf32>
    %104 = arith.mulf %88, %102 : vector<16x1xf32>
    %105 = arith.subf %103, %104 : vector<16x1xf32>
    %106 = vector.broadcast %102 : vector<16x1xf32> to vector<16x648xf32>
    %107 = arith.mulf %82, %106 : vector<16x648xf32>
    %108 = vector.broadcast %105 : vector<16x1xf32> to vector<16x648xf32>
    %109 = arith.addf %107, %108 : vector<16x648xf32>
    %c0_69 = arith.constant 0 : index
    %c0_70 = arith.constant 0 : index
    %110 = vector.load %arg6[%c0_69, %c0_70] : memref<16x8xbf16, #tpu.memory_space<vmem>>, vector<16x8xbf16>
    %c0_71 = arith.constant 0 : index
    %c0_72 = arith.constant 0 : index
    %111 = vector.load %arg5[%c0_71, %c0_72] : memref<8x648xbf16, #tpu.memory_space<vmem>>, vector<8x648xbf16>
    %cst_73 = arith.constant dense<0.000000e+00> : vector<16x648xf32>
    %112 = tpu.matmul %110, %111, %cst_73 {dimension_numbers = #tpu.dot_dimension_numbers<[1], [0], [0], [1], [0, 0, 1, 1], [], []>} : vector<16x8xbf16>, vector<8x648xbf16>, vector<16x648xf32> -> vector<16x648xf32>
    %113 = vector.broadcast %0 : vector<1x648xf32> to vector<16x648xf32>
    %114 = arith.mulf %112, %113 : vector<16x648xf32>
    %cst_74 = arith.constant dense<0.000000e+00> : vector<16xf32>
    %115 = vector.multi_reduction <add>, %114, %cst_74 [1] : vector<16x648xf32> to vector<16xf32>
    %116 = vector.shape_cast %115 : vector<16xf32> to vector<16x1xf32>
    %cst_75 = arith.constant 0.001953125 : f32
    %117 = vector.broadcast %cst_75 : f32 to vector<16x1xf32>
    %118 = arith.mulf %116, %117 : vector<16x1xf32>
    %119 = vector.broadcast %118 : vector<16x1xf32> to vector<16x648xf32>
    %120 = arith.subf %112, %119 : vector<16x648xf32>
    %121 = vector.broadcast %0 : vector<1x648xf32> to vector<16x648xf32>
    %122 = arith.mulf %120, %121 : vector<16x648xf32>
    %123 = arith.mulf %122, %122 : vector<16x648xf32>
    %cst_76 = arith.constant dense<0.000000e+00> : vector<16xf32>
    %124 = vector.multi_reduction <add>, %123, %cst_76 [1] : vector<16x648xf32> to vector<16xf32>
    %125 = vector.shape_cast %124 : vector<16xf32> to vector<16x1xf32>
    %cst_77 = arith.constant 0.001953125 : f32
    %126 = vector.broadcast %cst_77 : f32 to vector<16x1xf32>
    %127 = arith.mulf %125, %126 : vector<16x1xf32>
    %c0_78 = arith.constant 0 : index
    %c0_79 = arith.constant 0 : index
    %128 = vector.load %arg7[%c0_78, %c0_79] : memref<16x1xf32, #tpu.memory_space<vmem>>, vector<16x1xf32>
    %cst_80 = arith.constant 9.99999974E-6 : f32
    %129 = vector.broadcast %cst_80 : f32 to vector<16x1xf32>
    %130 = arith.addf %127, %129 : vector<16x1xf32>
    %131 = math.rsqrt %130 : vector<16x1xf32>
    %132 = arith.mulf %128, %131 : vector<16x1xf32>
    %c0_81 = arith.constant 0 : index
    %c0_82 = arith.constant 0 : index
    %133 = vector.load %arg8[%c0_81, %c0_82] : memref<16x1xf32, #tpu.memory_space<vmem>>, vector<16x1xf32>
    %134 = arith.mulf %118, %132 : vector<16x1xf32>
    %135 = arith.subf %133, %134 : vector<16x1xf32>
    %136 = vector.broadcast %132 : vector<16x1xf32> to vector<16x648xf32>
    %137 = arith.mulf %112, %136 : vector<16x648xf32>
    %138 = vector.broadcast %135 : vector<16x1xf32> to vector<16x648xf32>
    %139 = arith.addf %137, %138 : vector<16x648xf32>
    %140 = arith.addf %109, %139 : vector<16x648xf32>
    %cst_83 = arith.constant 0.000000e+00 : f32
    %141 = vector.broadcast %cst_83 : f32 to vector<16x648xf32>
    %142 = arith.maximumf %140, %141 : vector<16x648xf32>
    %143 = vector.broadcast %0 : vector<1x648xf32> to vector<16x648xf32>
    %144 = arith.mulf %142, %143 : vector<16x648xf32>
    %145 = arith.truncf %144 : vector<16x648xf32> to vector<16x648xbf16>
    %c0_84 = arith.constant 0 : index
    %c0_85 = arith.constant 0 : index
    %146 = vector.load %arg13[%c0_84, %c0_85] : memref<16x648xbf16, #tpu.memory_space<vmem>>, vector<16x648xbf16>
    tpu.vector_store %arg13[%c0_84, %c0_85], %145 {strides = array<i32>} : memref<16x648xbf16, #tpu.memory_space<vmem>>, vector<16x648xbf16>,
    return
  }
  func.func @transform_0(%arg0: i32) -> (i32, i32) {
    %c0_i32 = arith.constant 0 : i32
    %c0_i32_0 = arith.constant 0 : i32
    %c0_i32_1 = arith.constant 0 : i32
    return %c0_i32, %c0_i32_0 : i32, i32
  }
  func.func @transform_1(%arg0: i32) -> (i32, i32) {
    %c0_i32 = arith.constant 0 : i32
    %c0_i32_0 = arith.constant 0 : i32
    %c0_i32_1 = arith.constant 0 : i32
    return %c0_i32, %c0_i32_0 : i32, i32
  }
  func.func @transform_2(%arg0: i32) -> (i32, i32) {
    %c0_i32 = arith.constant 0 : i32
    %c0_i32_0 = arith.constant 0 : i32
    %c0_i32_1 = arith.constant 0 : i32
    return %c0_i32, %c0_i32_0 : i32, i32
  }
  func.func @transform_3(%arg0: i32) -> (i32, i32) {
    %c0_i32 = arith.constant 0 : i32
    %c0_i32_0 = arith.constant 0 : i32
    %c0_i32_1 = arith.constant 0 : i32
    return %c0_i32, %c0_i32_0 : i32, i32
  }
  func.func @transform_4(%arg0: i32) -> (i32, i32) {
    %c0_i32 = arith.constant 0 : i32
    %c0_i32_0 = arith.constant 0 : i32
    %c0_i32_1 = arith.constant 0 : i32
    return %c0_i32, %c0_i32_0 : i32, i32
  }
  func.func @transform_5(%arg0: i32) -> (i32, i32) {
    %c0_i32 = arith.constant 0 : i32
    %c0_i32_0 = arith.constant 0 : i32
    %c0_i32_1 = arith.constant 0 : i32
    return %c0_i32, %c0_i32_0 : i32, i32
  }
  func.func @transform_6(%arg0: i32) -> (i32, i32) {
    %c0_i32 = arith.constant 0 : i32
    %c0_i32_0 = arith.constant 0 : i32
    %c0_i32_1 = arith.constant 0 : i32
    return %c0_i32, %c0_i32_0 : i32, i32
  }
  func.func @transform_7(%arg0: i32) -> (i32, i32) {
    %c0_i32 = arith.constant 0 : i32
    %c0_i32_0 = arith.constant 0 : i32
    %c0_i32_1 = arith.constant 0 : i32
    return %c0_i32, %c0_i32_0 : i32, i32
  }
  func.func @transform_8(%arg0: i32) -> (i32, i32, i32) {
    %c0_i32 = arith.constant 0 : i32
    %c0_i32_0 = arith.constant 0 : i32
    %c0_i32_1 = arith.constant 0 : i32
    %c0_i32_2 = arith.constant 0 : i32
    return %c0_i32, %c0_i32_0, %c0_i32_1 : i32, i32, i32
  }
  func.func @transform_9(%arg0: i32) -> (i32, i32) {
    %c0_i32 = arith.constant 0 : i32
    %c0_i32_0 = arith.constant 0 : i32
    %c0_i32_1 = arith.constant 0 : i32
    return %c0_i32, %c0_i32_0 : i32, i32
  }
  func.func @transform_10(%arg0: i32) -> (i32, i32) {
    %c0_i32 = arith.constant 0 : i32
    %c0_i32_0 = arith.constant 0 : i32
    %c0_i32_1 = arith.constant 0 : i32
    return %c0_i32, %c0_i32_0 : i32, i32
  }
  func.func @transform_11(%arg0: i32) -> (i32, i32) {
    %c0_i32 = arith.constant 0 : i32
    %c0_i32_0 = arith.constant 0 : i32
    %c0_i32_1 = arith.constant 0 : i32
    return %c0_i32, %c0_i32_0 : i32, i32
  }
  func.func @transform_12(%arg0: i32) -> (i32, i32) {
    %c0_i32 = arith.constant 0 : i32
    %c0_i32_0 = arith.constant 0 : i32
    %c0_i32_1 = arith.constant 0 : i32
    return %c0_i32, %c0_i32_0 : i32, i32
  }
}

module attributes {stable_mosaic.version = 11 : i64} {
  func.func @_block_kernel(%arg0: i32, %arg1: memref<144x200xbf16, #tpu.memory_space<vmem>>, %arg2: memref<32x144xbf16, #tpu.memory_space<vmem>>, %arg3: memref<32x1xf32, #tpu.memory_space<vmem>>, %arg4: memref<32x1xf32, #tpu.memory_space<vmem>>, %arg5: memref<16x200xbf16, #tpu.memory_space<vmem>>, %arg6: memref<32x16xbf16, #tpu.memory_space<vmem>>, %arg7: memref<32x1xf32, #tpu.memory_space<vmem>>, %arg8: memref<32x1xf32, #tpu.memory_space<vmem>>, %arg9: memref<9x32x32xbf16, #tpu.memory_space<vmem>>, %arg10: memref<32x1xf32, #tpu.memory_space<vmem>>, %arg11: memref<32x1xf32, #tpu.memory_space<vmem>>, %arg12: memref<1x200xf32, #tpu.memory_space<vmem>>, %arg13: memref<32x200xbf16, #tpu.memory_space<vmem>>, %arg14: memref<32x222xbf16, #tpu.memory_space<vmem>>) attributes {dimension_semantics = [#tpu.dimension_semantics<arbitrary>], iteration_bounds = array<i64: 1>, scalar_prefetch = 0 : i64, scratch_operands = 1 : i64, tpu.core_type = #tpu.core_type<tc>, window_params = [{pipeline_mode = #tpu.pipeline_mode<synchronous>, transform_indices = @transform_0, window_bounds = array<i64: 144, 200>}, {pipeline_mode = #tpu.pipeline_mode<synchronous>, transform_indices = @transform_1, window_bounds = array<i64: 32, 144>}, {pipeline_mode = #tpu.pipeline_mode<synchronous>, transform_indices = @transform_2, window_bounds = array<i64: 32, 1>}, {pipeline_mode = #tpu.pipeline_mode<synchronous>, transform_indices = @transform_3, window_bounds = array<i64: 32, 1>}, {pipeline_mode = #tpu.pipeline_mode<synchronous>, transform_indices = @transform_4, window_bounds = array<i64: 16, 200>}, {pipeline_mode = #tpu.pipeline_mode<synchronous>, transform_indices = @transform_5, window_bounds = array<i64: 32, 16>}, {pipeline_mode = #tpu.pipeline_mode<synchronous>, transform_indices = @transform_6, window_bounds = array<i64: 32, 1>}, {pipeline_mode = #tpu.pipeline_mode<synchronous>, transform_indices = @transform_7, window_bounds = array<i64: 32, 1>}, {pipeline_mode = #tpu.pipeline_mode<synchronous>, transform_indices = @transform_8, window_bounds = array<i64: 9, 32, 32>}, {pipeline_mode = #tpu.pipeline_mode<synchronous>, transform_indices = @transform_9, window_bounds = array<i64: 32, 1>}, {pipeline_mode = #tpu.pipeline_mode<synchronous>, transform_indices = @transform_10, window_bounds = array<i64: 32, 1>}, {pipeline_mode = #tpu.pipeline_mode<synchronous>, transform_indices = @transform_11, window_bounds = array<i64: 1, 200>}, {pipeline_mode = #tpu.pipeline_mode<synchronous>, transform_indices = @transform_12, window_bounds = array<i64: 32, 200>}]} {
    %c0 = arith.constant 0 : index
    %c0_0 = arith.constant 0 : index
    %0 = vector.load %arg12[%c0, %c0_0] : memref<1x200xf32, #tpu.memory_space<vmem>>, vector<1x200xf32>
    %c0_1 = arith.constant 0 : index
    %c0_2 = arith.constant 0 : index
    %1 = vector.load %arg2[%c0_1, %c0_2] : memref<32x144xbf16, #tpu.memory_space<vmem>>, vector<32x144xbf16>
    %c0_3 = arith.constant 0 : index
    %c0_4 = arith.constant 0 : index
    %2 = vector.load %arg1[%c0_3, %c0_4] : memref<144x200xbf16, #tpu.memory_space<vmem>>, vector<144x200xbf16>
    %cst = arith.constant dense<0.000000e+00> : vector<32x200xf32>
    %3 = tpu.matmul %1, %2, %cst {dimension_numbers = #tpu.dot_dimension_numbers<[1], [0], [0], [1], [0, 0, 1, 1], [], []>} : vector<32x144xbf16>, vector<144x200xbf16>, vector<32x200xf32> -> vector<32x200xf32>
    %4 = vector.broadcast %0 : vector<1x200xf32> to vector<32x200xf32>
    %5 = arith.mulf %3, %4 : vector<32x200xf32>
    %cst_5 = arith.constant dense<0.000000e+00> : vector<32xf32>
    %6 = vector.multi_reduction <add>, %5, %cst_5 [1] : vector<32x200xf32> to vector<32xf32>
    %7 = vector.shape_cast %6 : vector<32xf32> to vector<32x1xf32>
    %cst_6 = arith.constant 7.812500e-03 : f32
    %8 = vector.broadcast %cst_6 : f32 to vector<32x1xf32>
    %9 = arith.mulf %7, %8 : vector<32x1xf32>
    %10 = vector.broadcast %9 : vector<32x1xf32> to vector<32x200xf32>
    %11 = arith.subf %3, %10 : vector<32x200xf32>
    %12 = vector.broadcast %0 : vector<1x200xf32> to vector<32x200xf32>
    %13 = arith.mulf %11, %12 : vector<32x200xf32>
    %14 = arith.mulf %13, %13 : vector<32x200xf32>
    %cst_7 = arith.constant dense<0.000000e+00> : vector<32xf32>
    %15 = vector.multi_reduction <add>, %14, %cst_7 [1] : vector<32x200xf32> to vector<32xf32>
    %16 = vector.shape_cast %15 : vector<32xf32> to vector<32x1xf32>
    %cst_8 = arith.constant 7.812500e-03 : f32
    %17 = vector.broadcast %cst_8 : f32 to vector<32x1xf32>
    %18 = arith.mulf %16, %17 : vector<32x1xf32>
    %c0_9 = arith.constant 0 : index
    %c0_10 = arith.constant 0 : index
    %19 = vector.load %arg3[%c0_9, %c0_10] : memref<32x1xf32, #tpu.memory_space<vmem>>, vector<32x1xf32>
    %cst_11 = arith.constant 9.99999974E-6 : f32
    %20 = vector.broadcast %cst_11 : f32 to vector<32x1xf32>
    %21 = arith.addf %18, %20 : vector<32x1xf32>
    %22 = math.rsqrt %21 : vector<32x1xf32>
    %23 = arith.mulf %19, %22 : vector<32x1xf32>
    %c0_12 = arith.constant 0 : index
    %c0_13 = arith.constant 0 : index
    %24 = vector.load %arg4[%c0_12, %c0_13] : memref<32x1xf32, #tpu.memory_space<vmem>>, vector<32x1xf32>
    %25 = arith.mulf %9, %23 : vector<32x1xf32>
    %26 = arith.subf %24, %25 : vector<32x1xf32>
    %27 = vector.broadcast %23 : vector<32x1xf32> to vector<32x200xf32>
    %28 = arith.mulf %3, %27 : vector<32x200xf32>
    %29 = vector.broadcast %26 : vector<32x1xf32> to vector<32x200xf32>
    %30 = arith.addf %28, %29 : vector<32x200xf32>
    %cst_14 = arith.constant 0.000000e+00 : f32
    %31 = vector.broadcast %cst_14 : f32 to vector<32x200xf32>
    %32 = arith.maximumf %30, %31 : vector<32x200xf32>
    %33 = vector.broadcast %0 : vector<1x200xf32> to vector<32x200xf32>
    %34 = arith.mulf %32, %33 : vector<32x200xf32>
    %cst_15 = arith.constant 0.000000e+00 : bf16
    %35 = vector.broadcast %cst_15 : bf16 to vector<32x222xbf16>
    %c0_16 = arith.constant 0 : index
    %c0_17 = arith.constant 0 : index
    %36 = vector.load %arg14[%c0_16, %c0_17] : memref<32x222xbf16, #tpu.memory_space<vmem>>, vector<32x222xbf16>
    tpu.vector_store %arg14[%c0_16, %c0_17], %35 {strides = array<i32>} : memref<32x222xbf16, #tpu.memory_space<vmem>>, vector<32x222xbf16>,
    %37 = arith.truncf %34 : vector<32x200xf32> to vector<32x200xbf16>
    %c0_18 = arith.constant 0 : index
    %c11 = arith.constant 11 : index
    %38 = vector.load %arg14[%c0_18, %c11] : memref<32x222xbf16, #tpu.memory_space<vmem>>, vector<32x200xbf16>
    tpu.vector_store %arg14[%c0_18, %c11], %37 {strides = array<i32>} : memref<32x222xbf16, #tpu.memory_space<vmem>>, vector<32x200xbf16>,
    %c0_19 = arith.constant 0 : index
    %c0_20 = arith.constant 0 : index
    %c0_21 = arith.constant 0 : index
    %39 = vector.load %arg9[%c0_19, %c0_20, %c0_21] : memref<9x32x32xbf16, #tpu.memory_space<vmem>>, vector<1x32x32xbf16>
    %40 = vector.shape_cast %39 : vector<1x32x32xbf16> to vector<32x32xbf16>
    %c0_22 = arith.constant 0 : index
    %c0_23 = arith.constant 0 : index
    %41 = vector.load %arg14[%c0_22, %c0_23] : memref<32x222xbf16, #tpu.memory_space<vmem>>, vector<32x200xbf16>
    %cst_24 = arith.constant dense<0.000000e+00> : vector<32x200xf32>
    %42 = tpu.matmul %40, %41, %cst_24 {dimension_numbers = #tpu.dot_dimension_numbers<[1], [0], [0], [1], [0, 0, 1, 1], [], []>} : vector<32x32xbf16>, vector<32x200xbf16>, vector<32x200xf32> -> vector<32x200xf32>
    %c1 = arith.constant 1 : index
    %c0_25 = arith.constant 0 : index
    %c0_26 = arith.constant 0 : index
    %43 = vector.load %arg9[%c1, %c0_25, %c0_26] : memref<9x32x32xbf16, #tpu.memory_space<vmem>>, vector<1x32x32xbf16>
    %44 = vector.shape_cast %43 : vector<1x32x32xbf16> to vector<32x32xbf16>
    %c0_27 = arith.constant 0 : index
    %c1_28 = arith.constant 1 : index
    %45 = vector.load %arg14[%c0_27, %c1_28] : memref<32x222xbf16, #tpu.memory_space<vmem>>, vector<32x200xbf16>
    %cst_29 = arith.constant dense<0.000000e+00> : vector<32x200xf32>
    %46 = tpu.matmul %44, %45, %cst_29 {dimension_numbers = #tpu.dot_dimension_numbers<[1], [0], [0], [1], [0, 0, 1, 1], [], []>} : vector<32x32xbf16>, vector<32x200xbf16>, vector<32x200xf32> -> vector<32x200xf32>
    %47 = arith.addf %42, %46 : vector<32x200xf32>
    %c2 = arith.constant 2 : index
    %c0_30 = arith.constant 0 : index
    %c0_31 = arith.constant 0 : index
    %48 = vector.load %arg9[%c2, %c0_30, %c0_31] : memref<9x32x32xbf16, #tpu.memory_space<vmem>>, vector<1x32x32xbf16>
    %49 = vector.shape_cast %48 : vector<1x32x32xbf16> to vector<32x32xbf16>
    %c0_32 = arith.constant 0 : index
    %c2_33 = arith.constant 2 : index
    %50 = vector.load %arg14[%c0_32, %c2_33] : memref<32x222xbf16, #tpu.memory_space<vmem>>, vector<32x200xbf16>
    %cst_34 = arith.constant dense<0.000000e+00> : vector<32x200xf32>
    %51 = tpu.matmul %49, %50, %cst_34 {dimension_numbers = #tpu.dot_dimension_numbers<[1], [0], [0], [1], [0, 0, 1, 1], [], []>} : vector<32x32xbf16>, vector<32x200xbf16>, vector<32x200xf32> -> vector<32x200xf32>
    %52 = arith.addf %47, %51 : vector<32x200xf32>
    %c3 = arith.constant 3 : index
    %c0_35 = arith.constant 0 : index
    %c0_36 = arith.constant 0 : index
    %53 = vector.load %arg9[%c3, %c0_35, %c0_36] : memref<9x32x32xbf16, #tpu.memory_space<vmem>>, vector<1x32x32xbf16>
    %54 = vector.shape_cast %53 : vector<1x32x32xbf16> to vector<32x32xbf16>
    %c0_37 = arith.constant 0 : index
    %c10 = arith.constant 10 : index
    %55 = vector.load %arg14[%c0_37, %c10] : memref<32x222xbf16, #tpu.memory_space<vmem>>, vector<32x200xbf16>
    %cst_38 = arith.constant dense<0.000000e+00> : vector<32x200xf32>
    %56 = tpu.matmul %54, %55, %cst_38 {dimension_numbers = #tpu.dot_dimension_numbers<[1], [0], [0], [1], [0, 0, 1, 1], [], []>} : vector<32x32xbf16>, vector<32x200xbf16>, vector<32x200xf32> -> vector<32x200xf32>
    %57 = arith.addf %52, %56 : vector<32x200xf32>
    %c4 = arith.constant 4 : index
    %c0_39 = arith.constant 0 : index
    %c0_40 = arith.constant 0 : index
    %58 = vector.load %arg9[%c4, %c0_39, %c0_40] : memref<9x32x32xbf16, #tpu.memory_space<vmem>>, vector<1x32x32xbf16>
    %59 = vector.shape_cast %58 : vector<1x32x32xbf16> to vector<32x32xbf16>
    %c0_41 = arith.constant 0 : index
    %c11_42 = arith.constant 11 : index
    %60 = vector.load %arg14[%c0_41, %c11_42] : memref<32x222xbf16, #tpu.memory_space<vmem>>, vector<32x200xbf16>
    %cst_43 = arith.constant dense<0.000000e+00> : vector<32x200xf32>
    %61 = tpu.matmul %59, %60, %cst_43 {dimension_numbers = #tpu.dot_dimension_numbers<[1], [0], [0], [1], [0, 0, 1, 1], [], []>} : vector<32x32xbf16>, vector<32x200xbf16>, vector<32x200xf32> -> vector<32x200xf32>
    %62 = arith.addf %57, %61 : vector<32x200xf32>
    %c5 = arith.constant 5 : index
    %c0_44 = arith.constant 0 : index
    %c0_45 = arith.constant 0 : index
    %63 = vector.load %arg9[%c5, %c0_44, %c0_45] : memref<9x32x32xbf16, #tpu.memory_space<vmem>>, vector<1x32x32xbf16>
    %64 = vector.shape_cast %63 : vector<1x32x32xbf16> to vector<32x32xbf16>
    %c0_46 = arith.constant 0 : index
    %c12 = arith.constant 12 : index
    %65 = vector.load %arg14[%c0_46, %c12] : memref<32x222xbf16, #tpu.memory_space<vmem>>, vector<32x200xbf16>
    %cst_47 = arith.constant dense<0.000000e+00> : vector<32x200xf32>
    %66 = tpu.matmul %64, %65, %cst_47 {dimension_numbers = #tpu.dot_dimension_numbers<[1], [0], [0], [1], [0, 0, 1, 1], [], []>} : vector<32x32xbf16>, vector<32x200xbf16>, vector<32x200xf32> -> vector<32x200xf32>
    %67 = arith.addf %62, %66 : vector<32x200xf32>
    %c6 = arith.constant 6 : index
    %c0_48 = arith.constant 0 : index
    %c0_49 = arith.constant 0 : index
    %68 = vector.load %arg9[%c6, %c0_48, %c0_49] : memref<9x32x32xbf16, #tpu.memory_space<vmem>>, vector<1x32x32xbf16>
    %69 = vector.shape_cast %68 : vector<1x32x32xbf16> to vector<32x32xbf16>
    %c0_50 = arith.constant 0 : index
    %c20 = arith.constant 20 : index
    %70 = vector.load %arg14[%c0_50, %c20] : memref<32x222xbf16, #tpu.memory_space<vmem>>, vector<32x200xbf16>
    %cst_51 = arith.constant dense<0.000000e+00> : vector<32x200xf32>
    %71 = tpu.matmul %69, %70, %cst_51 {dimension_numbers = #tpu.dot_dimension_numbers<[1], [0], [0], [1], [0, 0, 1, 1], [], []>} : vector<32x32xbf16>, vector<32x200xbf16>, vector<32x200xf32> -> vector<32x200xf32>
    %72 = arith.addf %67, %71 : vector<32x200xf32>
    %c7 = arith.constant 7 : index
    %c0_52 = arith.constant 0 : index
    %c0_53 = arith.constant 0 : index
    %73 = vector.load %arg9[%c7, %c0_52, %c0_53] : memref<9x32x32xbf16, #tpu.memory_space<vmem>>, vector<1x32x32xbf16>
    %74 = vector.shape_cast %73 : vector<1x32x32xbf16> to vector<32x32xbf16>
    %c0_54 = arith.constant 0 : index
    %c21 = arith.constant 21 : index
    %75 = vector.load %arg14[%c0_54, %c21] : memref<32x222xbf16, #tpu.memory_space<vmem>>, vector<32x200xbf16>
    %cst_55 = arith.constant dense<0.000000e+00> : vector<32x200xf32>
    %76 = tpu.matmul %74, %75, %cst_55 {dimension_numbers = #tpu.dot_dimension_numbers<[1], [0], [0], [1], [0, 0, 1, 1], [], []>} : vector<32x32xbf16>, vector<32x200xbf16>, vector<32x200xf32> -> vector<32x200xf32>
    %77 = arith.addf %72, %76 : vector<32x200xf32>
    %c8 = arith.constant 8 : index
    %c0_56 = arith.constant 0 : index
    %c0_57 = arith.constant 0 : index
    %78 = vector.load %arg9[%c8, %c0_56, %c0_57] : memref<9x32x32xbf16, #tpu.memory_space<vmem>>, vector<1x32x32xbf16>
    %79 = vector.shape_cast %78 : vector<1x32x32xbf16> to vector<32x32xbf16>
    %c0_58 = arith.constant 0 : index
    %c22 = arith.constant 22 : index
    %80 = vector.load %arg14[%c0_58, %c22] : memref<32x222xbf16, #tpu.memory_space<vmem>>, vector<32x200xbf16>
    %cst_59 = arith.constant dense<0.000000e+00> : vector<32x200xf32>
    %81 = tpu.matmul %79, %80, %cst_59 {dimension_numbers = #tpu.dot_dimension_numbers<[1], [0], [0], [1], [0, 0, 1, 1], [], []>} : vector<32x32xbf16>, vector<32x200xbf16>, vector<32x200xf32> -> vector<32x200xf32>
    %82 = arith.addf %77, %81 : vector<32x200xf32>
    %83 = vector.broadcast %0 : vector<1x200xf32> to vector<32x200xf32>
    %84 = arith.mulf %82, %83 : vector<32x200xf32>
    %cst_60 = arith.constant dense<0.000000e+00> : vector<32xf32>
    %85 = vector.multi_reduction <add>, %84, %cst_60 [1] : vector<32x200xf32> to vector<32xf32>
    %86 = vector.shape_cast %85 : vector<32xf32> to vector<32x1xf32>
    %cst_61 = arith.constant 7.812500e-03 : f32
    %87 = vector.broadcast %cst_61 : f32 to vector<32x1xf32>
    %88 = arith.mulf %86, %87 : vector<32x1xf32>
    %89 = vector.broadcast %88 : vector<32x1xf32> to vector<32x200xf32>
    %90 = arith.subf %82, %89 : vector<32x200xf32>
    %91 = vector.broadcast %0 : vector<1x200xf32> to vector<32x200xf32>
    %92 = arith.mulf %90, %91 : vector<32x200xf32>
    %93 = arith.mulf %92, %92 : vector<32x200xf32>
    %cst_62 = arith.constant dense<0.000000e+00> : vector<32xf32>
    %94 = vector.multi_reduction <add>, %93, %cst_62 [1] : vector<32x200xf32> to vector<32xf32>
    %95 = vector.shape_cast %94 : vector<32xf32> to vector<32x1xf32>
    %cst_63 = arith.constant 7.812500e-03 : f32
    %96 = vector.broadcast %cst_63 : f32 to vector<32x1xf32>
    %97 = arith.mulf %95, %96 : vector<32x1xf32>
    %c0_64 = arith.constant 0 : index
    %c0_65 = arith.constant 0 : index
    %98 = vector.load %arg10[%c0_64, %c0_65] : memref<32x1xf32, #tpu.memory_space<vmem>>, vector<32x1xf32>
    %cst_66 = arith.constant 9.99999974E-6 : f32
    %99 = vector.broadcast %cst_66 : f32 to vector<32x1xf32>
    %100 = arith.addf %97, %99 : vector<32x1xf32>
    %101 = math.rsqrt %100 : vector<32x1xf32>
    %102 = arith.mulf %98, %101 : vector<32x1xf32>
    %c0_67 = arith.constant 0 : index
    %c0_68 = arith.constant 0 : index
    %103 = vector.load %arg11[%c0_67, %c0_68] : memref<32x1xf32, #tpu.memory_space<vmem>>, vector<32x1xf32>
    %104 = arith.mulf %88, %102 : vector<32x1xf32>
    %105 = arith.subf %103, %104 : vector<32x1xf32>
    %106 = vector.broadcast %102 : vector<32x1xf32> to vector<32x200xf32>
    %107 = arith.mulf %82, %106 : vector<32x200xf32>
    %108 = vector.broadcast %105 : vector<32x1xf32> to vector<32x200xf32>
    %109 = arith.addf %107, %108 : vector<32x200xf32>
    %c0_69 = arith.constant 0 : index
    %c0_70 = arith.constant 0 : index
    %110 = vector.load %arg6[%c0_69, %c0_70] : memref<32x16xbf16, #tpu.memory_space<vmem>>, vector<32x16xbf16>
    %c0_71 = arith.constant 0 : index
    %c0_72 = arith.constant 0 : index
    %111 = vector.load %arg5[%c0_71, %c0_72] : memref<16x200xbf16, #tpu.memory_space<vmem>>, vector<16x200xbf16>
    %cst_73 = arith.constant dense<0.000000e+00> : vector<32x200xf32>
    %112 = tpu.matmul %110, %111, %cst_73 {dimension_numbers = #tpu.dot_dimension_numbers<[1], [0], [0], [1], [0, 0, 1, 1], [], []>} : vector<32x16xbf16>, vector<16x200xbf16>, vector<32x200xf32> -> vector<32x200xf32>
    %113 = vector.broadcast %0 : vector<1x200xf32> to vector<32x200xf32>
    %114 = arith.mulf %112, %113 : vector<32x200xf32>
    %cst_74 = arith.constant dense<0.000000e+00> : vector<32xf32>
    %115 = vector.multi_reduction <add>, %114, %cst_74 [1] : vector<32x200xf32> to vector<32xf32>
    %116 = vector.shape_cast %115 : vector<32xf32> to vector<32x1xf32>
    %cst_75 = arith.constant 7.812500e-03 : f32
    %117 = vector.broadcast %cst_75 : f32 to vector<32x1xf32>
    %118 = arith.mulf %116, %117 : vector<32x1xf32>
    %119 = vector.broadcast %118 : vector<32x1xf32> to vector<32x200xf32>
    %120 = arith.subf %112, %119 : vector<32x200xf32>
    %121 = vector.broadcast %0 : vector<1x200xf32> to vector<32x200xf32>
    %122 = arith.mulf %120, %121 : vector<32x200xf32>
    %123 = arith.mulf %122, %122 : vector<32x200xf32>
    %cst_76 = arith.constant dense<0.000000e+00> : vector<32xf32>
    %124 = vector.multi_reduction <add>, %123, %cst_76 [1] : vector<32x200xf32> to vector<32xf32>
    %125 = vector.shape_cast %124 : vector<32xf32> to vector<32x1xf32>
    %cst_77 = arith.constant 7.812500e-03 : f32
    %126 = vector.broadcast %cst_77 : f32 to vector<32x1xf32>
    %127 = arith.mulf %125, %126 : vector<32x1xf32>
    %c0_78 = arith.constant 0 : index
    %c0_79 = arith.constant 0 : index
    %128 = vector.load %arg7[%c0_78, %c0_79] : memref<32x1xf32, #tpu.memory_space<vmem>>, vector<32x1xf32>
    %cst_80 = arith.constant 9.99999974E-6 : f32
    %129 = vector.broadcast %cst_80 : f32 to vector<32x1xf32>
    %130 = arith.addf %127, %129 : vector<32x1xf32>
    %131 = math.rsqrt %130 : vector<32x1xf32>
    %132 = arith.mulf %128, %131 : vector<32x1xf32>
    %c0_81 = arith.constant 0 : index
    %c0_82 = arith.constant 0 : index
    %133 = vector.load %arg8[%c0_81, %c0_82] : memref<32x1xf32, #tpu.memory_space<vmem>>, vector<32x1xf32>
    %134 = arith.mulf %118, %132 : vector<32x1xf32>
    %135 = arith.subf %133, %134 : vector<32x1xf32>
    %136 = vector.broadcast %132 : vector<32x1xf32> to vector<32x200xf32>
    %137 = arith.mulf %112, %136 : vector<32x200xf32>
    %138 = vector.broadcast %135 : vector<32x1xf32> to vector<32x200xf32>
    %139 = arith.addf %137, %138 : vector<32x200xf32>
    %140 = arith.addf %109, %139 : vector<32x200xf32>
    %cst_83 = arith.constant 0.000000e+00 : f32
    %141 = vector.broadcast %cst_83 : f32 to vector<32x200xf32>
    %142 = arith.maximumf %140, %141 : vector<32x200xf32>
    %143 = vector.broadcast %0 : vector<1x200xf32> to vector<32x200xf32>
    %144 = arith.mulf %142, %143 : vector<32x200xf32>
    %145 = arith.truncf %144 : vector<32x200xf32> to vector<32x200xbf16>
    %c0_84 = arith.constant 0 : index
    %c0_85 = arith.constant 0 : index
    %146 = vector.load %arg13[%c0_84, %c0_85] : memref<32x200xbf16, #tpu.memory_space<vmem>>, vector<32x200xbf16>
    tpu.vector_store %arg13[%c0_84, %c0_85], %145 {strides = array<i32>} : memref<32x200xbf16, #tpu.memory_space<vmem>>, vector<32x200xbf16>,
    return
  }
  func.func @transform_0(%arg0: i32) -> (i32, i32) {
    %c0_i32 = arith.constant 0 : i32
    %c0_i32_0 = arith.constant 0 : i32
    %c0_i32_1 = arith.constant 0 : i32
    return %c0_i32, %c0_i32_0 : i32, i32
  }
  func.func @transform_1(%arg0: i32) -> (i32, i32) {
    %c0_i32 = arith.constant 0 : i32
    %c0_i32_0 = arith.constant 0 : i32
    %c0_i32_1 = arith.constant 0 : i32
    return %c0_i32, %c0_i32_0 : i32, i32
  }
  func.func @transform_2(%arg0: i32) -> (i32, i32) {
    %c0_i32 = arith.constant 0 : i32
    %c0_i32_0 = arith.constant 0 : i32
    %c0_i32_1 = arith.constant 0 : i32
    return %c0_i32, %c0_i32_0 : i32, i32
  }
  func.func @transform_3(%arg0: i32) -> (i32, i32) {
    %c0_i32 = arith.constant 0 : i32
    %c0_i32_0 = arith.constant 0 : i32
    %c0_i32_1 = arith.constant 0 : i32
    return %c0_i32, %c0_i32_0 : i32, i32
  }
  func.func @transform_4(%arg0: i32) -> (i32, i32) {
    %c0_i32 = arith.constant 0 : i32
    %c0_i32_0 = arith.constant 0 : i32
    %c0_i32_1 = arith.constant 0 : i32
    return %c0_i32, %c0_i32_0 : i32, i32
  }
  func.func @transform_5(%arg0: i32) -> (i32, i32) {
    %c0_i32 = arith.constant 0 : i32
    %c0_i32_0 = arith.constant 0 : i32
    %c0_i32_1 = arith.constant 0 : i32
    return %c0_i32, %c0_i32_0 : i32, i32
  }
  func.func @transform_6(%arg0: i32) -> (i32, i32) {
    %c0_i32 = arith.constant 0 : i32
    %c0_i32_0 = arith.constant 0 : i32
    %c0_i32_1 = arith.constant 0 : i32
    return %c0_i32, %c0_i32_0 : i32, i32
  }
  func.func @transform_7(%arg0: i32) -> (i32, i32) {
    %c0_i32 = arith.constant 0 : i32
    %c0_i32_0 = arith.constant 0 : i32
    %c0_i32_1 = arith.constant 0 : i32
    return %c0_i32, %c0_i32_0 : i32, i32
  }
  func.func @transform_8(%arg0: i32) -> (i32, i32, i32) {
    %c0_i32 = arith.constant 0 : i32
    %c0_i32_0 = arith.constant 0 : i32
    %c0_i32_1 = arith.constant 0 : i32
    %c0_i32_2 = arith.constant 0 : i32
    return %c0_i32, %c0_i32_0, %c0_i32_1 : i32, i32, i32
  }
  func.func @transform_9(%arg0: i32) -> (i32, i32) {
    %c0_i32 = arith.constant 0 : i32
    %c0_i32_0 = arith.constant 0 : i32
    %c0_i32_1 = arith.constant 0 : i32
    return %c0_i32, %c0_i32_0 : i32, i32
  }
  func.func @transform_10(%arg0: i32) -> (i32, i32) {
    %c0_i32 = arith.constant 0 : i32
    %c0_i32_0 = arith.constant 0 : i32
    %c0_i32_1 = arith.constant 0 : i32
    return %c0_i32, %c0_i32_0 : i32, i32
  }
  func.func @transform_11(%arg0: i32) -> (i32, i32) {
    %c0_i32 = arith.constant 0 : i32
    %c0_i32_0 = arith.constant 0 : i32
    %c0_i32_1 = arith.constant 0 : i32
    return %c0_i32, %c0_i32_0 : i32, i32
  }
  func.func @transform_12(%arg0: i32) -> (i32, i32) {
    %c0_i32 = arith.constant 0 : i32
    %c0_i32_0 = arith.constant 0 : i32
    %c0_i32_1 = arith.constant 0 : i32
    return %c0_i32, %c0_i32_0 : i32, i32
  }
}

module attributes {stable_mosaic.version = 11 : i64} {
  func.func @_block_kernel(%arg0: i32, %arg1: memref<288x72xbf16, #tpu.memory_space<vmem>>, %arg2: memref<64x288xbf16, #tpu.memory_space<vmem>>, %arg3: memref<64x1xf32, #tpu.memory_space<vmem>>, %arg4: memref<64x1xf32, #tpu.memory_space<vmem>>, %arg5: memref<32x72xbf16, #tpu.memory_space<vmem>>, %arg6: memref<64x32xbf16, #tpu.memory_space<vmem>>, %arg7: memref<64x1xf32, #tpu.memory_space<vmem>>, %arg8: memref<64x1xf32, #tpu.memory_space<vmem>>, %arg9: memref<9x64x64xbf16, #tpu.memory_space<vmem>>, %arg10: memref<64x1xf32, #tpu.memory_space<vmem>>, %arg11: memref<64x1xf32, #tpu.memory_space<vmem>>, %arg12: memref<1x72xf32, #tpu.memory_space<vmem>>, %arg13: memref<64x72xbf16, #tpu.memory_space<vmem>>, %arg14: memref<64x86xbf16, #tpu.memory_space<vmem>>) attributes {dimension_semantics = [#tpu.dimension_semantics<arbitrary>], iteration_bounds = array<i64: 1>, scalar_prefetch = 0 : i64, scratch_operands = 1 : i64, tpu.core_type = #tpu.core_type<tc>, window_params = [{pipeline_mode = #tpu.pipeline_mode<synchronous>, transform_indices = @transform_0, window_bounds = array<i64: 288, 72>}, {pipeline_mode = #tpu.pipeline_mode<synchronous>, transform_indices = @transform_1, window_bounds = array<i64: 64, 288>}, {pipeline_mode = #tpu.pipeline_mode<synchronous>, transform_indices = @transform_2, window_bounds = array<i64: 64, 1>}, {pipeline_mode = #tpu.pipeline_mode<synchronous>, transform_indices = @transform_3, window_bounds = array<i64: 64, 1>}, {pipeline_mode = #tpu.pipeline_mode<synchronous>, transform_indices = @transform_4, window_bounds = array<i64: 32, 72>}, {pipeline_mode = #tpu.pipeline_mode<synchronous>, transform_indices = @transform_5, window_bounds = array<i64: 64, 32>}, {pipeline_mode = #tpu.pipeline_mode<synchronous>, transform_indices = @transform_6, window_bounds = array<i64: 64, 1>}, {pipeline_mode = #tpu.pipeline_mode<synchronous>, transform_indices = @transform_7, window_bounds = array<i64: 64, 1>}, {pipeline_mode = #tpu.pipeline_mode<synchronous>, transform_indices = @transform_8, window_bounds = array<i64: 9, 64, 64>}, {pipeline_mode = #tpu.pipeline_mode<synchronous>, transform_indices = @transform_9, window_bounds = array<i64: 64, 1>}, {pipeline_mode = #tpu.pipeline_mode<synchronous>, transform_indices = @transform_10, window_bounds = array<i64: 64, 1>}, {pipeline_mode = #tpu.pipeline_mode<synchronous>, transform_indices = @transform_11, window_bounds = array<i64: 1, 72>}, {pipeline_mode = #tpu.pipeline_mode<synchronous>, transform_indices = @transform_12, window_bounds = array<i64: 64, 72>}]} {
    %c0 = arith.constant 0 : index
    %c0_0 = arith.constant 0 : index
    %0 = vector.load %arg12[%c0, %c0_0] : memref<1x72xf32, #tpu.memory_space<vmem>>, vector<1x72xf32>
    %c0_1 = arith.constant 0 : index
    %c0_2 = arith.constant 0 : index
    %1 = vector.load %arg2[%c0_1, %c0_2] : memref<64x288xbf16, #tpu.memory_space<vmem>>, vector<64x288xbf16>
    %c0_3 = arith.constant 0 : index
    %c0_4 = arith.constant 0 : index
    %2 = vector.load %arg1[%c0_3, %c0_4] : memref<288x72xbf16, #tpu.memory_space<vmem>>, vector<288x72xbf16>
    %cst = arith.constant dense<0.000000e+00> : vector<64x72xf32>
    %3 = tpu.matmul %1, %2, %cst {dimension_numbers = #tpu.dot_dimension_numbers<[1], [0], [0], [1], [0, 0, 1, 1], [], []>} : vector<64x288xbf16>, vector<288x72xbf16>, vector<64x72xf32> -> vector<64x72xf32>
    %4 = vector.broadcast %0 : vector<1x72xf32> to vector<64x72xf32>
    %5 = arith.mulf %3, %4 : vector<64x72xf32>
    %cst_5 = arith.constant dense<0.000000e+00> : vector<64xf32>
    %6 = vector.multi_reduction <add>, %5, %cst_5 [1] : vector<64x72xf32> to vector<64xf32>
    %7 = vector.shape_cast %6 : vector<64xf32> to vector<64x1xf32>
    %cst_6 = arith.constant 3.125000e-02 : f32
    %8 = vector.broadcast %cst_6 : f32 to vector<64x1xf32>
    %9 = arith.mulf %7, %8 : vector<64x1xf32>
    %10 = vector.broadcast %9 : vector<64x1xf32> to vector<64x72xf32>
    %11 = arith.subf %3, %10 : vector<64x72xf32>
    %12 = vector.broadcast %0 : vector<1x72xf32> to vector<64x72xf32>
    %13 = arith.mulf %11, %12 : vector<64x72xf32>
    %14 = arith.mulf %13, %13 : vector<64x72xf32>
    %cst_7 = arith.constant dense<0.000000e+00> : vector<64xf32>
    %15 = vector.multi_reduction <add>, %14, %cst_7 [1] : vector<64x72xf32> to vector<64xf32>
    %16 = vector.shape_cast %15 : vector<64xf32> to vector<64x1xf32>
    %cst_8 = arith.constant 3.125000e-02 : f32
    %17 = vector.broadcast %cst_8 : f32 to vector<64x1xf32>
    %18 = arith.mulf %16, %17 : vector<64x1xf32>
    %c0_9 = arith.constant 0 : index
    %c0_10 = arith.constant 0 : index
    %19 = vector.load %arg3[%c0_9, %c0_10] : memref<64x1xf32, #tpu.memory_space<vmem>>, vector<64x1xf32>
    %cst_11 = arith.constant 9.99999974E-6 : f32
    %20 = vector.broadcast %cst_11 : f32 to vector<64x1xf32>
    %21 = arith.addf %18, %20 : vector<64x1xf32>
    %22 = math.rsqrt %21 : vector<64x1xf32>
    %23 = arith.mulf %19, %22 : vector<64x1xf32>
    %c0_12 = arith.constant 0 : index
    %c0_13 = arith.constant 0 : index
    %24 = vector.load %arg4[%c0_12, %c0_13] : memref<64x1xf32, #tpu.memory_space<vmem>>, vector<64x1xf32>
    %25 = arith.mulf %9, %23 : vector<64x1xf32>
    %26 = arith.subf %24, %25 : vector<64x1xf32>
    %27 = vector.broadcast %23 : vector<64x1xf32> to vector<64x72xf32>
    %28 = arith.mulf %3, %27 : vector<64x72xf32>
    %29 = vector.broadcast %26 : vector<64x1xf32> to vector<64x72xf32>
    %30 = arith.addf %28, %29 : vector<64x72xf32>
    %cst_14 = arith.constant 0.000000e+00 : f32
    %31 = vector.broadcast %cst_14 : f32 to vector<64x72xf32>
    %32 = arith.maximumf %30, %31 : vector<64x72xf32>
    %33 = vector.broadcast %0 : vector<1x72xf32> to vector<64x72xf32>
    %34 = arith.mulf %32, %33 : vector<64x72xf32>
    %cst_15 = arith.constant 0.000000e+00 : bf16
    %35 = vector.broadcast %cst_15 : bf16 to vector<64x86xbf16>
    %c0_16 = arith.constant 0 : index
    %c0_17 = arith.constant 0 : index
    %36 = vector.load %arg14[%c0_16, %c0_17] : memref<64x86xbf16, #tpu.memory_space<vmem>>, vector<64x86xbf16>
    tpu.vector_store %arg14[%c0_16, %c0_17], %35 {strides = array<i32>} : memref<64x86xbf16, #tpu.memory_space<vmem>>, vector<64x86xbf16>,
    %37 = arith.truncf %34 : vector<64x72xf32> to vector<64x72xbf16>
    %c0_18 = arith.constant 0 : index
    %c7 = arith.constant 7 : index
    %38 = vector.load %arg14[%c0_18, %c7] : memref<64x86xbf16, #tpu.memory_space<vmem>>, vector<64x72xbf16>
    tpu.vector_store %arg14[%c0_18, %c7], %37 {strides = array<i32>} : memref<64x86xbf16, #tpu.memory_space<vmem>>, vector<64x72xbf16>,
    %c0_19 = arith.constant 0 : index
    %c0_20 = arith.constant 0 : index
    %c0_21 = arith.constant 0 : index
    %39 = vector.load %arg9[%c0_19, %c0_20, %c0_21] : memref<9x64x64xbf16, #tpu.memory_space<vmem>>, vector<1x64x64xbf16>
    %40 = vector.shape_cast %39 : vector<1x64x64xbf16> to vector<64x64xbf16>
    %c0_22 = arith.constant 0 : index
    %c0_23 = arith.constant 0 : index
    %41 = vector.load %arg14[%c0_22, %c0_23] : memref<64x86xbf16, #tpu.memory_space<vmem>>, vector<64x72xbf16>
    %cst_24 = arith.constant dense<0.000000e+00> : vector<64x72xf32>
    %42 = tpu.matmul %40, %41, %cst_24 {dimension_numbers = #tpu.dot_dimension_numbers<[1], [0], [0], [1], [0, 0, 1, 1], [], []>} : vector<64x64xbf16>, vector<64x72xbf16>, vector<64x72xf32> -> vector<64x72xf32>
    %c1 = arith.constant 1 : index
    %c0_25 = arith.constant 0 : index
    %c0_26 = arith.constant 0 : index
    %43 = vector.load %arg9[%c1, %c0_25, %c0_26] : memref<9x64x64xbf16, #tpu.memory_space<vmem>>, vector<1x64x64xbf16>
    %44 = vector.shape_cast %43 : vector<1x64x64xbf16> to vector<64x64xbf16>
    %c0_27 = arith.constant 0 : index
    %c1_28 = arith.constant 1 : index
    %45 = vector.load %arg14[%c0_27, %c1_28] : memref<64x86xbf16, #tpu.memory_space<vmem>>, vector<64x72xbf16>
    %cst_29 = arith.constant dense<0.000000e+00> : vector<64x72xf32>
    %46 = tpu.matmul %44, %45, %cst_29 {dimension_numbers = #tpu.dot_dimension_numbers<[1], [0], [0], [1], [0, 0, 1, 1], [], []>} : vector<64x64xbf16>, vector<64x72xbf16>, vector<64x72xf32> -> vector<64x72xf32>
    %47 = arith.addf %42, %46 : vector<64x72xf32>
    %c2 = arith.constant 2 : index
    %c0_30 = arith.constant 0 : index
    %c0_31 = arith.constant 0 : index
    %48 = vector.load %arg9[%c2, %c0_30, %c0_31] : memref<9x64x64xbf16, #tpu.memory_space<vmem>>, vector<1x64x64xbf16>
    %49 = vector.shape_cast %48 : vector<1x64x64xbf16> to vector<64x64xbf16>
    %c0_32 = arith.constant 0 : index
    %c2_33 = arith.constant 2 : index
    %50 = vector.load %arg14[%c0_32, %c2_33] : memref<64x86xbf16, #tpu.memory_space<vmem>>, vector<64x72xbf16>
    %cst_34 = arith.constant dense<0.000000e+00> : vector<64x72xf32>
    %51 = tpu.matmul %49, %50, %cst_34 {dimension_numbers = #tpu.dot_dimension_numbers<[1], [0], [0], [1], [0, 0, 1, 1], [], []>} : vector<64x64xbf16>, vector<64x72xbf16>, vector<64x72xf32> -> vector<64x72xf32>
    %52 = arith.addf %47, %51 : vector<64x72xf32>
    %c3 = arith.constant 3 : index
    %c0_35 = arith.constant 0 : index
    %c0_36 = arith.constant 0 : index
    %53 = vector.load %arg9[%c3, %c0_35, %c0_36] : memref<9x64x64xbf16, #tpu.memory_space<vmem>>, vector<1x64x64xbf16>
    %54 = vector.shape_cast %53 : vector<1x64x64xbf16> to vector<64x64xbf16>
    %c0_37 = arith.constant 0 : index
    %c6 = arith.constant 6 : index
    %55 = vector.load %arg14[%c0_37, %c6] : memref<64x86xbf16, #tpu.memory_space<vmem>>, vector<64x72xbf16>
    %cst_38 = arith.constant dense<0.000000e+00> : vector<64x72xf32>
    %56 = tpu.matmul %54, %55, %cst_38 {dimension_numbers = #tpu.dot_dimension_numbers<[1], [0], [0], [1], [0, 0, 1, 1], [], []>} : vector<64x64xbf16>, vector<64x72xbf16>, vector<64x72xf32> -> vector<64x72xf32>
    %57 = arith.addf %52, %56 : vector<64x72xf32>
    %c4 = arith.constant 4 : index
    %c0_39 = arith.constant 0 : index
    %c0_40 = arith.constant 0 : index
    %58 = vector.load %arg9[%c4, %c0_39, %c0_40] : memref<9x64x64xbf16, #tpu.memory_space<vmem>>, vector<1x64x64xbf16>
    %59 = vector.shape_cast %58 : vector<1x64x64xbf16> to vector<64x64xbf16>
    %c0_41 = arith.constant 0 : index
    %c7_42 = arith.constant 7 : index
    %60 = vector.load %arg14[%c0_41, %c7_42] : memref<64x86xbf16, #tpu.memory_space<vmem>>, vector<64x72xbf16>
    %cst_43 = arith.constant dense<0.000000e+00> : vector<64x72xf32>
    %61 = tpu.matmul %59, %60, %cst_43 {dimension_numbers = #tpu.dot_dimension_numbers<[1], [0], [0], [1], [0, 0, 1, 1], [], []>} : vector<64x64xbf16>, vector<64x72xbf16>, vector<64x72xf32> -> vector<64x72xf32>
    %62 = arith.addf %57, %61 : vector<64x72xf32>
    %c5 = arith.constant 5 : index
    %c0_44 = arith.constant 0 : index
    %c0_45 = arith.constant 0 : index
    %63 = vector.load %arg9[%c5, %c0_44, %c0_45] : memref<9x64x64xbf16, #tpu.memory_space<vmem>>, vector<1x64x64xbf16>
    %64 = vector.shape_cast %63 : vector<1x64x64xbf16> to vector<64x64xbf16>
    %c0_46 = arith.constant 0 : index
    %c8 = arith.constant 8 : index
    %65 = vector.load %arg14[%c0_46, %c8] : memref<64x86xbf16, #tpu.memory_space<vmem>>, vector<64x72xbf16>
    %cst_47 = arith.constant dense<0.000000e+00> : vector<64x72xf32>
    %66 = tpu.matmul %64, %65, %cst_47 {dimension_numbers = #tpu.dot_dimension_numbers<[1], [0], [0], [1], [0, 0, 1, 1], [], []>} : vector<64x64xbf16>, vector<64x72xbf16>, vector<64x72xf32> -> vector<64x72xf32>
    %67 = arith.addf %62, %66 : vector<64x72xf32>
    %c6_48 = arith.constant 6 : index
    %c0_49 = arith.constant 0 : index
    %c0_50 = arith.constant 0 : index
    %68 = vector.load %arg9[%c6_48, %c0_49, %c0_50] : memref<9x64x64xbf16, #tpu.memory_space<vmem>>, vector<1x64x64xbf16>
    %69 = vector.shape_cast %68 : vector<1x64x64xbf16> to vector<64x64xbf16>
    %c0_51 = arith.constant 0 : index
    %c12 = arith.constant 12 : index
    %70 = vector.load %arg14[%c0_51, %c12] : memref<64x86xbf16, #tpu.memory_space<vmem>>, vector<64x72xbf16>
    %cst_52 = arith.constant dense<0.000000e+00> : vector<64x72xf32>
    %71 = tpu.matmul %69, %70, %cst_52 {dimension_numbers = #tpu.dot_dimension_numbers<[1], [0], [0], [1], [0, 0, 1, 1], [], []>} : vector<64x64xbf16>, vector<64x72xbf16>, vector<64x72xf32> -> vector<64x72xf32>
    %72 = arith.addf %67, %71 : vector<64x72xf32>
    %c7_53 = arith.constant 7 : index
    %c0_54 = arith.constant 0 : index
    %c0_55 = arith.constant 0 : index
    %73 = vector.load %arg9[%c7_53, %c0_54, %c0_55] : memref<9x64x64xbf16, #tpu.memory_space<vmem>>, vector<1x64x64xbf16>
    %74 = vector.shape_cast %73 : vector<1x64x64xbf16> to vector<64x64xbf16>
    %c0_56 = arith.constant 0 : index
    %c13 = arith.constant 13 : index
    %75 = vector.load %arg14[%c0_56, %c13] : memref<64x86xbf16, #tpu.memory_space<vmem>>, vector<64x72xbf16>
    %cst_57 = arith.constant dense<0.000000e+00> : vector<64x72xf32>
    %76 = tpu.matmul %74, %75, %cst_57 {dimension_numbers = #tpu.dot_dimension_numbers<[1], [0], [0], [1], [0, 0, 1, 1], [], []>} : vector<64x64xbf16>, vector<64x72xbf16>, vector<64x72xf32> -> vector<64x72xf32>
    %77 = arith.addf %72, %76 : vector<64x72xf32>
    %c8_58 = arith.constant 8 : index
    %c0_59 = arith.constant 0 : index
    %c0_60 = arith.constant 0 : index
    %78 = vector.load %arg9[%c8_58, %c0_59, %c0_60] : memref<9x64x64xbf16, #tpu.memory_space<vmem>>, vector<1x64x64xbf16>
    %79 = vector.shape_cast %78 : vector<1x64x64xbf16> to vector<64x64xbf16>
    %c0_61 = arith.constant 0 : index
    %c14 = arith.constant 14 : index
    %80 = vector.load %arg14[%c0_61, %c14] : memref<64x86xbf16, #tpu.memory_space<vmem>>, vector<64x72xbf16>
    %cst_62 = arith.constant dense<0.000000e+00> : vector<64x72xf32>
    %81 = tpu.matmul %79, %80, %cst_62 {dimension_numbers = #tpu.dot_dimension_numbers<[1], [0], [0], [1], [0, 0, 1, 1], [], []>} : vector<64x64xbf16>, vector<64x72xbf16>, vector<64x72xf32> -> vector<64x72xf32>
    %82 = arith.addf %77, %81 : vector<64x72xf32>
    %83 = vector.broadcast %0 : vector<1x72xf32> to vector<64x72xf32>
    %84 = arith.mulf %82, %83 : vector<64x72xf32>
    %cst_63 = arith.constant dense<0.000000e+00> : vector<64xf32>
    %85 = vector.multi_reduction <add>, %84, %cst_63 [1] : vector<64x72xf32> to vector<64xf32>
    %86 = vector.shape_cast %85 : vector<64xf32> to vector<64x1xf32>
    %cst_64 = arith.constant 3.125000e-02 : f32
    %87 = vector.broadcast %cst_64 : f32 to vector<64x1xf32>
    %88 = arith.mulf %86, %87 : vector<64x1xf32>
    %89 = vector.broadcast %88 : vector<64x1xf32> to vector<64x72xf32>
    %90 = arith.subf %82, %89 : vector<64x72xf32>
    %91 = vector.broadcast %0 : vector<1x72xf32> to vector<64x72xf32>
    %92 = arith.mulf %90, %91 : vector<64x72xf32>
    %93 = arith.mulf %92, %92 : vector<64x72xf32>
    %cst_65 = arith.constant dense<0.000000e+00> : vector<64xf32>
    %94 = vector.multi_reduction <add>, %93, %cst_65 [1] : vector<64x72xf32> to vector<64xf32>
    %95 = vector.shape_cast %94 : vector<64xf32> to vector<64x1xf32>
    %cst_66 = arith.constant 3.125000e-02 : f32
    %96 = vector.broadcast %cst_66 : f32 to vector<64x1xf32>
    %97 = arith.mulf %95, %96 : vector<64x1xf32>
    %c0_67 = arith.constant 0 : index
    %c0_68 = arith.constant 0 : index
    %98 = vector.load %arg10[%c0_67, %c0_68] : memref<64x1xf32, #tpu.memory_space<vmem>>, vector<64x1xf32>
    %cst_69 = arith.constant 9.99999974E-6 : f32
    %99 = vector.broadcast %cst_69 : f32 to vector<64x1xf32>
    %100 = arith.addf %97, %99 : vector<64x1xf32>
    %101 = math.rsqrt %100 : vector<64x1xf32>
    %102 = arith.mulf %98, %101 : vector<64x1xf32>
    %c0_70 = arith.constant 0 : index
    %c0_71 = arith.constant 0 : index
    %103 = vector.load %arg11[%c0_70, %c0_71] : memref<64x1xf32, #tpu.memory_space<vmem>>, vector<64x1xf32>
    %104 = arith.mulf %88, %102 : vector<64x1xf32>
    %105 = arith.subf %103, %104 : vector<64x1xf32>
    %106 = vector.broadcast %102 : vector<64x1xf32> to vector<64x72xf32>
    %107 = arith.mulf %82, %106 : vector<64x72xf32>
    %108 = vector.broadcast %105 : vector<64x1xf32> to vector<64x72xf32>
    %109 = arith.addf %107, %108 : vector<64x72xf32>
    %c0_72 = arith.constant 0 : index
    %c0_73 = arith.constant 0 : index
    %110 = vector.load %arg6[%c0_72, %c0_73] : memref<64x32xbf16, #tpu.memory_space<vmem>>, vector<64x32xbf16>
    %c0_74 = arith.constant 0 : index
    %c0_75 = arith.constant 0 : index
    %111 = vector.load %arg5[%c0_74, %c0_75] : memref<32x72xbf16, #tpu.memory_space<vmem>>, vector<32x72xbf16>
    %cst_76 = arith.constant dense<0.000000e+00> : vector<64x72xf32>
    %112 = tpu.matmul %110, %111, %cst_76 {dimension_numbers = #tpu.dot_dimension_numbers<[1], [0], [0], [1], [0, 0, 1, 1], [], []>} : vector<64x32xbf16>, vector<32x72xbf16>, vector<64x72xf32> -> vector<64x72xf32>
    %113 = vector.broadcast %0 : vector<1x72xf32> to vector<64x72xf32>
    %114 = arith.mulf %112, %113 : vector<64x72xf32>
    %cst_77 = arith.constant dense<0.000000e+00> : vector<64xf32>
    %115 = vector.multi_reduction <add>, %114, %cst_77 [1] : vector<64x72xf32> to vector<64xf32>
    %116 = vector.shape_cast %115 : vector<64xf32> to vector<64x1xf32>
    %cst_78 = arith.constant 3.125000e-02 : f32
    %117 = vector.broadcast %cst_78 : f32 to vector<64x1xf32>
    %118 = arith.mulf %116, %117 : vector<64x1xf32>
    %119 = vector.broadcast %118 : vector<64x1xf32> to vector<64x72xf32>
    %120 = arith.subf %112, %119 : vector<64x72xf32>
    %121 = vector.broadcast %0 : vector<1x72xf32> to vector<64x72xf32>
    %122 = arith.mulf %120, %121 : vector<64x72xf32>
    %123 = arith.mulf %122, %122 : vector<64x72xf32>
    %cst_79 = arith.constant dense<0.000000e+00> : vector<64xf32>
    %124 = vector.multi_reduction <add>, %123, %cst_79 [1] : vector<64x72xf32> to vector<64xf32>
    %125 = vector.shape_cast %124 : vector<64xf32> to vector<64x1xf32>
    %cst_80 = arith.constant 3.125000e-02 : f32
    %126 = vector.broadcast %cst_80 : f32 to vector<64x1xf32>
    %127 = arith.mulf %125, %126 : vector<64x1xf32>
    %c0_81 = arith.constant 0 : index
    %c0_82 = arith.constant 0 : index
    %128 = vector.load %arg7[%c0_81, %c0_82] : memref<64x1xf32, #tpu.memory_space<vmem>>, vector<64x1xf32>
    %cst_83 = arith.constant 9.99999974E-6 : f32
    %129 = vector.broadcast %cst_83 : f32 to vector<64x1xf32>
    %130 = arith.addf %127, %129 : vector<64x1xf32>
    %131 = math.rsqrt %130 : vector<64x1xf32>
    %132 = arith.mulf %128, %131 : vector<64x1xf32>
    %c0_84 = arith.constant 0 : index
    %c0_85 = arith.constant 0 : index
    %133 = vector.load %arg8[%c0_84, %c0_85] : memref<64x1xf32, #tpu.memory_space<vmem>>, vector<64x1xf32>
    %134 = arith.mulf %118, %132 : vector<64x1xf32>
    %135 = arith.subf %133, %134 : vector<64x1xf32>
    %136 = vector.broadcast %132 : vector<64x1xf32> to vector<64x72xf32>
    %137 = arith.mulf %112, %136 : vector<64x72xf32>
    %138 = vector.broadcast %135 : vector<64x1xf32> to vector<64x72xf32>
    %139 = arith.addf %137, %138 : vector<64x72xf32>
    %140 = arith.addf %109, %139 : vector<64x72xf32>
    %cst_86 = arith.constant 0.000000e+00 : f32
    %141 = vector.broadcast %cst_86 : f32 to vector<64x72xf32>
    %142 = arith.maximumf %140, %141 : vector<64x72xf32>
    %143 = vector.broadcast %0 : vector<1x72xf32> to vector<64x72xf32>
    %144 = arith.mulf %142, %143 : vector<64x72xf32>
    %145 = arith.truncf %144 : vector<64x72xf32> to vector<64x72xbf16>
    %c0_87 = arith.constant 0 : index
    %c0_88 = arith.constant 0 : index
    %146 = vector.load %arg13[%c0_87, %c0_88] : memref<64x72xbf16, #tpu.memory_space<vmem>>, vector<64x72xbf16>
    tpu.vector_store %arg13[%c0_87, %c0_88], %145 {strides = array<i32>} : memref<64x72xbf16, #tpu.memory_space<vmem>>, vector<64x72xbf16>,
    return
  }
  func.func @transform_0(%arg0: i32) -> (i32, i32) {
    %c0_i32 = arith.constant 0 : i32
    %c0_i32_0 = arith.constant 0 : i32
    %c0_i32_1 = arith.constant 0 : i32
    return %c0_i32, %c0_i32_0 : i32, i32
  }
  func.func @transform_1(%arg0: i32) -> (i32, i32) {
    %c0_i32 = arith.constant 0 : i32
    %c0_i32_0 = arith.constant 0 : i32
    %c0_i32_1 = arith.constant 0 : i32
    return %c0_i32, %c0_i32_0 : i32, i32
  }
  func.func @transform_2(%arg0: i32) -> (i32, i32) {
    %c0_i32 = arith.constant 0 : i32
    %c0_i32_0 = arith.constant 0 : i32
    %c0_i32_1 = arith.constant 0 : i32
    return %c0_i32, %c0_i32_0 : i32, i32
  }
  func.func @transform_3(%arg0: i32) -> (i32, i32) {
    %c0_i32 = arith.constant 0 : i32
    %c0_i32_0 = arith.constant 0 : i32
    %c0_i32_1 = arith.constant 0 : i32
    return %c0_i32, %c0_i32_0 : i32, i32
  }
  func.func @transform_4(%arg0: i32) -> (i32, i32) {
    %c0_i32 = arith.constant 0 : i32
    %c0_i32_0 = arith.constant 0 : i32
    %c0_i32_1 = arith.constant 0 : i32
    return %c0_i32, %c0_i32_0 : i32, i32
  }
  func.func @transform_5(%arg0: i32) -> (i32, i32) {
    %c0_i32 = arith.constant 0 : i32
    %c0_i32_0 = arith.constant 0 : i32
    %c0_i32_1 = arith.constant 0 : i32
    return %c0_i32, %c0_i32_0 : i32, i32
  }
  func.func @transform_6(%arg0: i32) -> (i32, i32) {
    %c0_i32 = arith.constant 0 : i32
    %c0_i32_0 = arith.constant 0 : i32
    %c0_i32_1 = arith.constant 0 : i32
    return %c0_i32, %c0_i32_0 : i32, i32
  }
  func.func @transform_7(%arg0: i32) -> (i32, i32) {
    %c0_i32 = arith.constant 0 : i32
    %c0_i32_0 = arith.constant 0 : i32
    %c0_i32_1 = arith.constant 0 : i32
    return %c0_i32, %c0_i32_0 : i32, i32
  }
  func.func @transform_8(%arg0: i32) -> (i32, i32, i32) {
    %c0_i32 = arith.constant 0 : i32
    %c0_i32_0 = arith.constant 0 : i32
    %c0_i32_1 = arith.constant 0 : i32
    %c0_i32_2 = arith.constant 0 : i32
    return %c0_i32, %c0_i32_0, %c0_i32_1 : i32, i32, i32
  }
  func.func @transform_9(%arg0: i32) -> (i32, i32) {
    %c0_i32 = arith.constant 0 : i32
    %c0_i32_0 = arith.constant 0 : i32
    %c0_i32_1 = arith.constant 0 : i32
    return %c0_i32, %c0_i32_0 : i32, i32
  }
  func.func @transform_10(%arg0: i32) -> (i32, i32) {
    %c0_i32 = arith.constant 0 : i32
    %c0_i32_0 = arith.constant 0 : i32
    %c0_i32_1 = arith.constant 0 : i32
    return %c0_i32, %c0_i32_0 : i32, i32
  }
  func.func @transform_11(%arg0: i32) -> (i32, i32) {
    %c0_i32 = arith.constant 0 : i32
    %c0_i32_0 = arith.constant 0 : i32
    %c0_i32_1 = arith.constant 0 : i32
    return %c0_i32, %c0_i32_0 : i32, i32
  }
  func.func @transform_12(%arg0: i32) -> (i32, i32) {
    %c0_i32 = arith.constant 0 : i32
    %c0_i32_0 = arith.constant 0 : i32
    %c0_i32_1 = arith.constant 0 : i32
    return %c0_i32, %c0_i32_0 : i32, i32
  }
}

module attributes {stable_mosaic.version = 11 : i64} {
  func.func @_head_kernel(%arg0: i32, %arg1: memref<64x2x16xbf16, #tpu.memory_space<vmem>>, %arg2: memref<10x64xf32, #tpu.memory_space<vmem>>, %arg3: memref<10x1xf32, #tpu.memory_space<vmem>>, %arg4: memref<10x2xf32, #tpu.memory_space<vmem>>) attributes {dimension_semantics = [#tpu.dimension_semantics<arbitrary>], iteration_bounds = array<i64: 1>, scalar_prefetch = 0 : i64, scratch_operands = 0 : i64, tpu.core_type = #tpu.core_type<tc>, window_params = [{pipeline_mode = #tpu.pipeline_mode<synchronous>, transform_indices = @transform_0, window_bounds = array<i64: 64, 2, 16>}, {pipeline_mode = #tpu.pipeline_mode<synchronous>, transform_indices = @transform_1, window_bounds = array<i64: 10, 64>}, {pipeline_mode = #tpu.pipeline_mode<synchronous>, transform_indices = @transform_2, window_bounds = array<i64: 10, 1>}, {pipeline_mode = #tpu.pipeline_mode<synchronous>, transform_indices = @transform_3, window_bounds = array<i64: 10, 2>}]} {
    %c0 = arith.constant 0 : index
    %c0_0 = arith.constant 0 : index
    %c0_1 = arith.constant 0 : index
    %0 = vector.load %arg1[%c0, %c0_0, %c0_1] : memref<64x2x16xbf16, #tpu.memory_space<vmem>>, vector<64x2x16xbf16>
    %1 = arith.extf %0 : vector<64x2x16xbf16> to vector<64x2x16xf32>
    %cst = arith.constant dense<0.000000e+00> : vector<64x2xf32>
    %2 = vector.multi_reduction <add>, %1, %cst [2] : vector<64x2x16xf32> to vector<64x2xf32>
    %cst_2 = arith.constant 1.600000e+01 : f32
    %3 = vector.broadcast %cst_2 : f32 to vector<64x2xf32>
    %4 = arith.divf %2, %3 : vector<64x2xf32>
    %c0_3 = arith.constant 0 : index
    %c0_4 = arith.constant 0 : index
    %5 = vector.load %arg2[%c0_3, %c0_4] : memref<10x64xf32, #tpu.memory_space<vmem>>, vector<10x64xf32>
    %cst_5 = arith.constant dense<0.000000e+00> : vector<10x2xf32>
    %6 = tpu.matmul %5, %4, %cst_5 {dimension_numbers = #tpu.dot_dimension_numbers<[1], [0], [0], [1], [0, 0, 1, 1], [], []>} : vector<10x64xf32>, vector<64x2xf32>, vector<10x2xf32> -> vector<10x2xf32>
    %c0_6 = arith.constant 0 : index
    %c0_7 = arith.constant 0 : index
    %7 = vector.load %arg3[%c0_6, %c0_7] : memref<10x1xf32, #tpu.memory_space<vmem>>, vector<10x1xf32>
    %8 = vector.broadcast %7 : vector<10x1xf32> to vector<10x2xf32>
    %9 = arith.addf %6, %8 : vector<10x2xf32>
    %c0_8 = arith.constant 0 : index
    %c0_9 = arith.constant 0 : index
    %10 = vector.load %arg4[%c0_8, %c0_9] : memref<10x2xf32, #tpu.memory_space<vmem>>, vector<10x2xf32>
    tpu.vector_store %arg4[%c0_8, %c0_9], %9 {strides = array<i32>} : memref<10x2xf32, #tpu.memory_space<vmem>>, vector<10x2xf32>,
    return
  }
  func.func @transform_0(%arg0: i32) -> (i32, i32, i32) {
    %c0_i32 = arith.constant 0 : i32
    %c0_i32_0 = arith.constant 0 : i32
    %c0_i32_1 = arith.constant 0 : i32
    %c0_i32_2 = arith.constant 0 : i32
    return %c0_i32, %c0_i32_0, %c0_i32_1 : i32, i32, i32
  }
  func.func @transform_1(%arg0: i32) -> (i32, i32) {
    %c0_i32 = arith.constant 0 : i32
    %c0_i32_0 = arith.constant 0 : i32
    %c0_i32_1 = arith.constant 0 : i32
    return %c0_i32, %c0_i32_0 : i32, i32
  }
  func.func @transform_2(%arg0: i32) -> (i32, i32) {
    %c0_i32 = arith.constant 0 : i32
    %c0_i32_0 = arith.constant 0 : i32
    %c0_i32_1 = arith.constant 0 : i32
    return %c0_i32, %c0_i32_0 : i32, i32
  }
  func.func @transform_3(%arg0: i32) -> (i32, i32) {
    %c0_i32 = arith.constant 0 : i32
    %c0_i32_0 = arith.constant 0 : i32
    %c0_i32_1 = arith.constant 0 : i32
    return %c0_i32, %c0_i32_0 : i32, i32
  }
}

</mosaic_0001>

<bundles_post_ra>
// kernel: scaled_resnet_forward.7
= control target key start
LH: loop header
LB: loop body
LE: loop exit
PB: predicated region body
PF: predicated region fallthrough
CT: control target
= control target key end

     0   :  { %v687_v1 = vmov 0.0   ;;  %s689_s17 = smov 0   ;;  %s778_s0 = inlined_call_operand.vmem [shape: bf16[147,8192], index: 0, kind: input, shape index: {}]   ;;  %s779_s1 = inlined_call_operand.vmem [shape: bf16[8,147], index: 1, kind: input, shape index: {}]   ;;  %s780_s2 = inlined_call_operand.vmem [shape: f32[8,1], index: 2, kind: input, shape index: {}]   ;;  %s781_s3 = inlined_call_operand.vmem [shape: f32[8,1], index: 3, kind: input, shape index: {}]   ;;  %s782_s4 = inlined_call_operand.vmem [shape: bf16[8,8192], index: 4, kind: output, shape index: {}]  }
   0x1   :  { %v685_v0 = vld [vmem:[%s779_s1] sm:$0xff] }
   0x2 LB: > { %v513_v2 = vcombine.high %v685_v0, %v685_v0  ;;  %vm265_vm0 = vcmask 154624   ;;  %s510_s18 = sshll.u32 %s641_s17, 9  ;;  %vm269_vm1 = vcmask 1040384   ;;  %vm270_vm2 = vcmask 1041408   ;;  %s24_s17 = sadd.s32 1, %s641_s17   ;;  %s641_s17 = sphi %s689_s17, %s24_s17   ;;  %v637_v1 = vphi %v687_v1, %v783_v1  }
   0x3   : > { %s700_s1 = sshra.s32 %s510_s18, 7  ;;  %p21_p0 = scmp.ge.s32.totalorder %s24_s17, 16  }
   0x4   : > { %554 = vmatprep.mubr.msk.bf16.mxu0 %vm265_vm0, %v513_v2  ;;  %555 = vmatprep.mubr.msk.bf16.mxu1 %vm265_vm0, %v513_v2  ;;  %s511_s19 = sshll.u32 %s700_s1, 2  ;;  %s556_s23 = sshll.u32 %s700_s1, 3 }
   0x5   : > { %s706_s22 = scalar_lea.vmem %s778_s0, %s511_s19  ;;  %s368_s24 = scalar_lea.vmem [#allocation2], %s556_s23 }
   0x6   : > { %v31_v3 = vld [vmem:[%s706_s22] sm:$0xff]  ;;  %v32_v5 = vld [vmem:[%s706_s22 + $0x8] sm:$0xff]  ;;  %s755_s25 = smov (%p21_p0), 0  }
   0x7   : > { %v33_v4 = vld [vmem:[%s706_s22 + $0x100] sm:$0xff]  ;;  %v34_v7 = vld [vmem:[%s706_s22 + $0x108] sm:$0xff] }
   0x8   : > { %v515_v6 = vcombine.high %v31_v3, %v33_v4  ;;  %v514_v8 = vcombine.low %v31_v3, %v33_v4  ;;  %v35_v9 = vld [vmem:[%s706_s22 + $0x200] sm:$0xff]  ;;  %v517_v11 = vcombine.high %v32_v5, %v34_v7  ;;  %v516_v12 = vcombine.low %v32_v5, %v34_v7  ;;  %v36_v14 = vld [vmem:[%s706_s22 + $0x208] sm:$0xff] }
   0x9   : > { %v37_v10 = vld [vmem:[%s706_s22 + $0x300] sm:$0xff]  ;;  %v38_v15 = vld [vmem:[%s706_s22 + $0x308] sm:$0xff] }
   0xa   : > { %v519_v13 = vcombine.high %v35_v9, %v37_v10  ;;  %v39_v16 = vld [vmem:[%s706_s22 + $0x400] sm:$0xff]  ;;  %285 = vmatprep.subr.bf16.mxu0 %v515_v6  ;;  %v521_v17 = vcombine.high %v36_v14, %v38_v15  ;;  %v40_v19 = vld [vmem:[%s706_s22 + $0x408] sm:$0xff]  ;;  %326 = vmatprep.subr.bf16.mxu1 %v517_v11  ;;  %v518_v21 = vcombine.low %v35_v9, %v37_v10 }
   0xb   : > { %v41_v18 = vld [vmem:[%s706_s22 + $0x500] sm:$0xff]  ;;  %v42_v20 = vld [vmem:[%s706_s22 + $0x508] sm:$0xff]  ;;  %286 = vmatpush1.bf16.msra.mxu0 %v514_v8  ;;  %327 = vmatpush1.bf16.msra.mxu1 %v516_v12  ;;  %v520_v22 = vcombine.low %v36_v14, %v38_v15  ;;  %v655_v8 = vmov 65535  }
   0xc   : > { %287 = vmatprep.subr.bf16.mxu0 %v519_v13  ;;  %v523_v23 = vcombine.high %v39_v16, %v41_v18  ;;  %328 = vmatprep.subr.bf16.mxu1 %v521_v17  ;;  %v525_v24 = vcombine.high %v40_v19, %v42_v20  ;;  %v43_v25 = vld [vmem:[%s706_s22 + $0x600] sm:$0xff]  ;;  %v44_v27 = vld [vmem:[%s706_s22 + $0x608] sm:$0xff]  ;;  %v522_v29 = vcombine.low %v39_v16, %v41_v18  ;;  %v271_v9 = vsel %vm269_vm1, 4294967295, %v655_v8 }
   0xd   : > { %v45_v26 = vld [vmem:[%s706_s22 + $0x700] sm:$0xff]  ;;  %v46_v28 = vld [vmem:[%s706_s22 + $0x708] sm:$0xff]  ;;  %v524_v30 = vcombine.low %v40_v19, %v42_v20  ;;  %v272_v16 = vsel %vm270_vm2, %v271_v9, 0 }
   0xe   : > { %v527_v31 = vcombine.high %v43_v25, %v45_v26  ;;  %v529_v32 = vcombine.high %v44_v27, %v46_v28  ;;  %v47_v33 = vld [vmem:[%s706_s22 + $0x800] sm:$0xff]  ;;  %v48_v35 = vld [vmem:[%s706_s22 + $0x808] sm:$0xff]  ;;  %v526_v37 = vcombine.low %v43_v25, %v45_v26  ;;  %v528_v38 = vcombine.low %v44_v27, %v46_v28 }
   0xf   : > { %288 = vmatpush1.bf16.msra.mxu0 %v518_v21  ;;  %329 = vmatpush1.bf16.msra.mxu1 %v520_v22  ;;  %v49_v34 = vld [vmem:[%s706_s22 + $0x900] sm:$0xff]  ;;  %v50_v36 = vld [vmem:[%s706_s22 + $0x908] sm:$0xff]  ;;  %v512_v26 = vcombine.low %v685_v0, %v685_v0 }
  0x10   : > { %289 = vmatprep.subr.bf16.mxu0 %v523_v23  ;;  %330 = vmatprep.subr.bf16.mxu1 %v525_v24  ;;  %v531_v39 = vcombine.high %v47_v33, %v49_v34  ;;  %v533_v40 = vcombine.high %v48_v35, %v50_v36  ;;  %v51_v41 = vld [vmem:[%s706_s22 + $0xa00] sm:$0xff]  ;;  %v52_v43 = vld [vmem:[%s706_s22 + $0xa08] sm:$0xff]  ;;  %v530_v45 = vcombine.low %v47_v33, %v49_v34 }
  0x11   : > { %v53_v42 = vld [vmem:[%s706_s22 + $0xb00] sm:$0xff]  ;;  %v54_v44 = vld [vmem:[%s706_s22 + $0xb08] sm:$0xff]  ;;  %v532_v46 = vcombine.low %v48_v35, %v50_v36 }
  0x12   : > { %v535_v47 = vcombine.high %v51_v41, %v53_v42  ;;  %v537_v48 = vcombine.high %v52_v43, %v54_v44  ;;  %v55_v49 = vld [vmem:[%s706_s22 + $0xc00] sm:$0xff]  ;;  %v56_v51 = vld [vmem:[%s706_s22 + $0xc08] sm:$0xff]  ;;  %v534_v53 = vcombine.low %v51_v41, %v53_v42  ;;  %v536_v54 = vcombine.low %v52_v43, %v54_v44 }
  0x13   : > { %290 = vmatpush1.bf16.msra.mxu0 %v522_v29  ;;  %331 = vmatpush1.bf16.msra.mxu1 %v524_v30  ;;  %v57_v50 = vld [vmem:[%s706_s22 + $0xd00] sm:$0xff]  ;;  %v58_v52 = vld [vmem:[%s706_s22 + $0xd08] sm:$0xff]  ;;  %v643_v41 = vmov (%p21_p0), 0.0  }
  0x14   : > { %291 = vmatprep.subr.bf16.mxu0 %v527_v31  ;;  %332 = vmatprep.subr.bf16.mxu1 %v529_v32  ;;  %v539_v55 = vcombine.high %v55_v49, %v57_v50  ;;  %v541_v56 = vcombine.high %v56_v51, %v58_v52  ;;  %v59_v57 = vld [vmem:[%s706_s22 + $0xe00] sm:$0xff]  ;;  %v60_v59 = vld [vmem:[%s706_s22 + $0xe08] sm:$0xff]  ;;  %v538_v61 = vcombine.low %v55_v49, %v57_v50 }
  0x15   : > { %v61_v58 = vld [vmem:[%s706_s22 + $0xf00] sm:$0xff]  ;;  %v62_v60 = vld [vmem:[%s706_s22 + $0xf08] sm:$0xff]  ;;  %v540_v62 = vcombine.low %v56_v51, %v58_v52 }
  0x16   : > { %v543_v63 = vcombine.high %v59_v57, %v61_v58  ;;  %v545_v2 = vcombine.high %v60_v59, %v62_v60  ;;  %v63_v3 = vld [vmem:[%s706_s22 + $0x1000] sm:$0xff]  ;;  %v64_v6 = vld [vmem:[%s706_s22 + $0x1008] sm:$0xff]  ;;  %v542_v11 = vcombine.low %v59_v57, %v61_v58  ;;  %v544_v12 = vcombine.low %v60_v59, %v62_v60 }
  0x17   : > { %292 = vmatpush1.bf16.msra.mxu0 %v526_v37  ;;  %333 = vmatpush1.bf16.msra.mxu1 %v528_v38  ;;  %v65_v4 = vld [vmem:[%s706_s22 + $0x1100] sm:$0xff]  ;;  %v66_v7 = vld [vmem:[%s706_s22 + $0x1108] sm:$0xff] }
  0x18   : > { %293 = vmatprep.subr.bf16.mxu0 %v531_v39  ;;  %334 = vmatprep.subr.bf16.mxu1 %v533_v40  ;;  %v67_v5 = vld [vmem:[%s706_s22 + $0x1200] sm:$0x33]  ;;  %v68_v10 = vld [vmem:[%s706_s22 + $0x1208] sm:$0x33]  ;;  %v547_v13 = vcombine.high %v63_v3, %v65_v4  ;;  %v549_v15 = vcombine.high %v64_v6, %v66_v7  ;;  %v546_v18 = vcombine.low %v63_v3, %v65_v4 }
  0x19   : > { %v551_v14 = vcombine.high %v67_v5, %v67_v5  ;;  %v553_v17 = vcombine.high %v68_v10, %v68_v10  ;;  %v550_v19 = vcombine.low %v67_v5, %v67_v5  ;;  %v548_v20 = vcombine.low %v64_v6, %v66_v7 }
  0x1a   : > { %v552_v22 = vcombine.low %v68_v10, %v68_v10 }
  0x1b   : > { %294 = vmatpush1.bf16.msra.mxu0 %v530_v45  ;;  %335 = vmatpush1.bf16.msra.mxu1 %v532_v46  ;;  %v277_v21 = vand.u32 %v551_v14, %v272_v16  ;;  %v283_v23 = vand.u32 %v553_v17, %v272_v16  ;;  %v274_v24 = vand.u32 %v550_v19, %v272_v16 }
  0x1c   : > { %295 = vmatprep.subr.bf16.mxu0 %v535_v47  ;;  %336 = vmatprep.subr.bf16.mxu1 %v537_v48  ;;  %v280_v25 = vand.u32 %v552_v22, %v272_v16 }
  0x1f   : > { %296 = vmatpush1.bf16.msra.mxu0 %v534_v53  ;;  %337 = vmatpush1.bf16.msra.mxu1 %v536_v54 }
  0x20   : > { %297 = vmatprep.subr.bf16.mxu0 %v539_v55  ;;  %338 = vmatprep.subr.bf16.mxu1 %v541_v56 }
  0x23   : > { %298 = vmatpush1.bf16.msra.mxu0 %v538_v61  ;;  %339 = vmatpush1.bf16.msra.mxu1 %v540_v62 }
  0x24   : > { %299 = vmatprep.subr.bf16.mxu0 %v543_v63  ;;  %340 = vmatprep.subr.bf16.mxu1 %v545_v2 }
  0x27   : > { %300 = vmatpush1.bf16.msra.mxu0 %v542_v11  ;;  %341 = vmatpush1.bf16.msra.mxu1 %v544_v12 }
  0x28   : > { %301 = vmatprep.subr.bf16.mxu0 %v547_v13  ;;  %342 = vmatprep.subr.bf16.mxu1 %v549_v15 }
  0x2b   : > { %302 = vmatpush1.bf16.msra.mxu0 %v546_v18  ;;  %343 = vmatpush1.bf16.msra.mxu1 %v548_v20 }
  0x2c   : > { %303 = vmatprep.subr.bf16.mxu0 %v277_v21  ;;  %344 = vmatprep.subr.bf16.mxu1 %v283_v23 }
  0x2f   : > { %304 = vmatpush1.bf16.msra.mxu0 %v274_v24  ;;  %345 = vmatpush1.bf16.msra.mxu1 %v280_v25 }
  0x32   : > { %318 = vmatmul.mubr.bf16.vlgmr.msra.gmra.mrb[0].mxu0 %v512_v26  ;;  %359 = vmatmul.mubr.bf16.vlgmr.msra.gmra.mrb[0].mxu1 %v512_v26 }
 0x105   : > { %v319_v27 = vpop.f32.mrb[0].mxu0  ;;  %v360_v28 = vpop.f32.mrb[0].mxu1 }
 0x106   : > { %369 = vst [vmem:[%s368_s24] sm:$0xff] %v319_v27  ;;  %v321_v29 = vpop.f32.mrb[1].mxu0  ;;  %371 = vst [vmem:[%s368_s24 + $0x10] sm:$0xff] %v360_v28  ;;  %v362_v31 = vpop.f32.mrb[1].mxu1 }
 0x107   : > { %370 = vst [vmem:[%s368_s24 + $0x8] sm:$0xff] %v321_v29  ;;  %v373_v30 = vadd.f32 %v321_v29, %v319_v27  ;;  %v323_v32 = vpop.f32.mrb[2].mxu0  ;;  %372 = vst [vmem:[%s368_s24 + $0x18] sm:$0xff] %v362_v31  ;;  %v364_v33 = vpop.f32.mrb[2].mxu1 }
 0x108   : > { %v324_v34 = vpop.f32.mrb[3].mxu0  ;;  %v365_v35 = vpop.f32.mrb[3].mxu1 }
 0x109   : > { %v374_v36 = vadd.f32 %v373_v30, %v360_v28 }
 0x10b   : > { %v375_v37 = vadd.f32 %v374_v36, %v362_v31 }
 0x10d   : > { %376 = vadd.xlane.f32.xlu0 %v375_v37 }
 0x197   :  { %23 = sbr.rel (!%p21_p0) target bundleno = 2 (0x2), region = 62 }
 0x19a   : > { %v377_v38 = vpop.xlane.xlu0 %376 }
 0x19b   : > { %v378_v39 = vadd.f32 %v637_v1, %v377_v38  }
 0x19d   : > { %v783_v1 = vmov %v378_v39  ;;  %v379_v40 = vmul.f32 (%p21_p0), 0.00012207031, %v378_v39 }
 0x19e LB: > { %s557_s26 = sshll.u32 %s649_s25, 9  ;;  %s385_s25 = sadd.s32 1, %s649_s25   ;;  %s649_s25 = sphi %s755_s25, %s385_s25   ;;  %v645_v41 = vphi %v643_v41, %v644_v41  }
 0x19f   : > { %s388_s27 = sshra.s32 %s557_s26, 7  ;;  %p382_p1 = scmp.ge.s32.totalorder %s385_s25, 16  }
 0x1a0   : > { %s558_s28 = sshll.u32 %s388_s27, 3  ;;  %v411_v59 = vld [vmem:[%s780_s2] sm:$0xff] (%p382_p1)  ;;  %s766_s7 = smov (%p382_p1), 0  }
 0x1a1   : > { %s391_s29 = scalar_lea.vmem [#allocation2], %s558_s28  ;;  %v415_v62 = vld [vmem:[%s781_s3] sm:$0xff] (%p382_p1) }
 0x1a2   : > { %v392_v1 = vld [vmem:[%s391_s29] sm:$0xff]  ;;  %v393_v42 = vld [vmem:[%s391_s29 + $0x8] sm:$0xff]  ;;  %v394_v43 = vld [vmem:[%s391_s29 + $0x10] sm:$0xff] }
 0x1a3   : > { %v395_v44 = vld [vmem:[%s391_s29 + $0x18] sm:$0xff]  ;;  %v396_v45 = vsub.f32 %v392_v1, %v379_v40  ;;  %v397_v46 = vsub.f32 %v393_v42, %v379_v40  ;;  %v398_v47 = vsub.f32 %v394_v43, %v379_v40 }
 0x1a4   : > { %v399_v0 = vsub.f32 %v395_v44, %v379_v40 }
 0x1a5   : > { %v400_v48 = vmul.f32 %v396_v45, %v396_v45  ;;  %v401_v49 = vmul.f32 %v397_v46, %v397_v46  ;;  %v402_v50 = vmul.f32 %v398_v47, %v398_v47 }
 0x1a6   : > { %v403_v51 = vmul.f32 %v399_v0, %v399_v0 }
 0x1a7   : > { %v404_v52 = vadd.f32 %v401_v49, %v400_v48 }
 0x1a9   : > { %v405_v53 = vadd.f32 %v404_v52, %v402_v50 }
 0x1ab   : > { %v406_v54 = vadd.f32 %v405_v53, %v403_v51 }
 0x1ad   : > { %407 = vadd.xlane.f32.xlu0 %v406_v54 }
 0x237   :  { %384 = sbr.rel (!%p382_p1) target bundleno = 414 (0x19e), region = 73 }
 0x23a   : > { %v408_v55 = vpop.xlane.xlu0 %407 }
 0x23b   : > { %v409_v56 = vadd.f32 %v645_v41, %v408_v55  }
 0x23d   : > { %v644_v41 = vmov %v409_v56   ;;  %v410_v57 = vmul.f32 (%p382_p1), 0.00012207031, %v409_v56 }
 0x23f   :  { %v412_v58 = vadd.f32 1e-05, %v410_v57 }
 0x241   :  { %612 = vrsqrt.f32 %v412_v58 }
 0x24b   :  { %v613_v60 = vpop.eup %612 }
 0x24c   :  { %v414_v61 = vmul.f32 %v613_v60, %v411_v59 }
 0x24e   :  { %v416_v63 = vmul.f32 %v414_v61, %v379_v40 }
 0x250   :  { %v417_v2 = vsub.f32 %v415_v62, %v416_v63 }
 0x251 LB: > { %v656_v3 = vmov 0   ;;  %s559_s2 = sshll.u32 %s653_s7, 9  ;;  %s423_s7 = sadd.s32 1, %s653_s7   ;;  %s653_s7 = sphi %s766_s7, %s423_s7  }
 0x252   : > { %614 = vset.pattern.permute.xlu0 %v656_v3  ;;  %s425_s8 = sshra.s32 %s559_s2, 7  ;;  %p420_p2 = scmp.ge.s32.totalorder %s423_s7, 16  }
 0x253   : > { %435 = vperm.xlu0 %614, %v414_v61   ;;  %s560_s9 = sshll.u32 %s425_s8, 3  ;;  %s563_s3 = sshll.u32 %s425_s8, 2 }
 0x254   : > { %s428_s10 = scalar_lea.vmem [#allocation2], %s560_s9  ;;  %s472_s13 = scalar_lea.vmem %s782_s4, %s563_s3 }
 0x255   : > { %v429_v4 = vld [vmem:[%s428_s10] sm:$0xff]  ;;  %v430_v6 = vld [vmem:[%s428_s10 + $0x8] sm:$0xff]  ;;  %v431_v7 = vld [vmem:[%s428_s10 + $0x10] sm:$0xff] }
 0x256   : > { %v432_v8 = vld [vmem:[%s428_s10 + $0x18] sm:$0xff] }
 0x257   : > { %444 = vperm.xlu0 %614, %v417_v2  }
 0x2d2   : > { %v436_v5 = vpop.permute.xlu0 %435 }
 0x2d3   : > { %v438_v9 = vmul.f32 %v436_v5, %v429_v4  ;;  %v439_v10 = vmul.f32 %v436_v5, %v430_v6  ;;  %v440_v11 = vmul.f32 %v436_v5, %v431_v7  ;;  %v441_v12 = vmul.f32 %v436_v5, %v432_v8 }
 0x2d6   : > { %v445_v13 = vpop.permute.xlu0 %444 }
 0x2d7   : > { %v447_v14 = vadd.f32 %v445_v13, %v438_v9  ;;  %v448_v15 = vadd.f32 %v445_v13, %v439_v10  ;;  %v449_v16 = vadd.f32 %v445_v13, %v440_v11  ;;  %v450_v17 = vadd.f32 %v445_v13, %v441_v12  ;;  %422 = sbr.rel (!%p420_p2) target bundleno = 593 (0x251), region = 84 }
 0x2d9   : > { %v451_v18 = vmax.f32 %v447_v14, 0.0  ;;  %v452_v19 = vmax.f32 %v448_v15, 0.0  ;;  %v453_v20 = vmax.f32 %v449_v16, 0.0  ;;  %v454_v21 = vmax.f32 %v450_v17, 0.0 }
 0x2db   : > { %v564_v22 = vpack.c.bf16 %v452_v19, %v451_v18  ;;  %v565_v23 = vpack.c.bf16 %v454_v21, %v453_v20 }
 0x2dd   : > { %473 = vst [vmem:[%s472_s13] sm:$0xff] %v564_v22  ;;  %474 = vst [vmem:[%s472_s13 + $0x8] sm:$0xff] %v565_v23 }

// kernel: scaled_resnet_forward.8
= control target key start
LH: loop header
LB: loop body
LE: loop exit
PB: predicated region body
PF: predicated region fallthrough
CT: control target
= control target key end

     0   :  { %s475_s10 = smov 127   ;;  %s476_s17 = smov 95   ;;  %vm17_vm0 = vcmask 1043456   ;;  %vm18_vm1 = vcmask 15364   ;;  %v478_v30 = vmov 0   ;;  %vm87_vm3 = vcmask 1039360   ;;  %s965_s0 = inlined_call_operand.vmem [shape: bf16[4,8,2178], index: 0, kind: input, shape index: {}]   ;;  %s966_s1 = inlined_call_operand.vmem [shape: bf16[8,2178], index: 1, kind: output, shape index: {}]  }
   0x1   :  { %v492_v0 = vld [vmem:[%s965_s0 + $0x10] sm:$0xff]  ;;  %v497_v1 = vld [vmem:[%s965_s0] sm:$0xff]  ;;  %v506_v2 = vld [vmem:[%s965_s0 + $0x18] sm:$0xff]  ;;  %s477_s8 = smov 94   ;;  %vm259_vm4 = vcmask 777216   ;;  %vm394_vm5 = vcmask 769024  }
   0x2   :  { %62 = vrot.lane.b32.xlu1 %v492_v0, %s475_s10  ;;  %58 = vrot.lane.b32.xlu0 %v497_v1, %s475_s10  ;;  %v511_v3 = vld [vmem:[%s965_s0 + $0x8] sm:$0xff]  ;;  %v516_v4 = vld [vmem:[%s965_s0 + $0x40] sm:$0xf]  ;;  %vm19_vm2 = vmor %vm18_vm1, %vm17_vm0  ;;  %vm437_vm6 = vcmask 781312  }
   0x3   :  { %v521_v5 = vld [vmem:[%s965_s0 + $0x88] sm:$0xf]  ;;  %v537_v8 = vld [vmem:[%s965_s0 + $0x20] sm:$0xff]  ;;  %v546_v9 = vld [vmem:[%s965_s0 + $0x38] sm:$0xff]  ;;  %20 = vst.msk [vmem:[%s966_s1 + $0x40] sm:$0xff] %vm19_vm2, %v478_v30 }
   0x4   :  { %v48_v6 = vmax.bf16 %v521_v5, %v516_v4  ;;  %v532_v7 = vld [vmem:[%s965_s0 + $0x28] sm:$0xff]  ;;  %v551_v10 = vld [vmem:[%s965_s0 + $0x30] sm:$0xff]  ;;  %v569_v12 = vld [vmem:[%s965_s0 + $0xa0] sm:$0xff] }
   0x5   :  { %v560_v11 = vld [vmem:[%s965_s0 + $0x90] sm:$0xff]  ;;  %v574_v13 = vld [vmem:[%s965_s0 + $0x98] sm:$0xff]  ;;  %v588_v15 = vld [vmem:[%s965_s0 + $0xa8] sm:$0xff] }
   0x6   :  { %64 = vrot.lane.b32.xlu1 %v506_v2, %s475_s10  ;;  %60 = vrot.lane.b32.xlu0 %v511_v3, %s475_s10  ;;  %v583_v14 = vld [vmem:[%s965_s0 + $0xb0] sm:$0xff]  ;;  %v597_v16 = vld [vmem:[%s965_s0 + $0xc0] sm:$0xff] }
   0x7   :  { %v602_v17 = vld [vmem:[%s965_s0 + $0xb8] sm:$0xff]  ;;  %v611_v18 = vld [vmem:[%s965_s0 + $0xd0] sm:$0xf]  ;;  %v616_v19 = vld [vmem:[%s965_s0 + $0xc8] sm:$0xff] }
   0x8   :  { %v443_v20 = vld [vmem:[%s965_s0 + $0x48] sm:$0xff]  ;;  %v229_v21 = vld [vmem:[%s965_s0 + $0x40] sm:$0xff]  ;;  %v445_v22 = vld [vmem:[%s965_s0 + $0x58] sm:$0xff] }
   0x9   :  { %v444_v23 = vld [vmem:[%s965_s0 + $0x50] sm:$0xff]  ;;  %v645_v24 = vld [vmem:[%s965_s0 + $0x68] sm:$0xff]  ;;  %v650_v25 = vld [vmem:[%s965_s0 + $0x60] sm:$0xff]  ;;  %v40_v34 = vmax.bf16 %v443_v20, %v497_v1  ;;  %v42_v35 = vmax.bf16 %v445_v22, %v492_v0 }
   0xa   :  { %68 = vrot.lane.b32.xlu1 %v532_v7, %s475_s10  ;;  %66 = vrot.lane.b32.xlu0 %v537_v8, %s475_s10  ;;  %v657_v26 = vld [vmem:[%s965_s0 + $0x78] sm:$0xff]  ;;  %v662_v27 = vld [vmem:[%s965_s0 + $0x70] sm:$0xff]  ;;  %v41_v38 = vmax.bf16 %v444_v23, %v511_v3  ;;  %v44_v54 = vmax.bf16 %v645_v24, %v537_v8  ;;  %v43_v55 = vmax.bf16 %v650_v25, %v506_v2 }
   0xb   :  { %v470_v28 = vld [vmem:[%s965_s0 + $0x88] sm:$0xff]  ;;  %v672_v29 = vld [vmem:[%s965_s0 + $0x80] sm:$0xff]  ;;  %v461_v59 = vld [vmem:[%s965_s0 + $0xd8] sm:$0xff]  ;;  %v46_v62 = vmax.bf16 %v657_v26, %v551_v10  ;;  %v45_v63 = vmax.bf16 %v662_v27, %v532_v7 }
   0xc   :  { %v462_v58 = vld [vmem:[%s965_s0 + $0xe0] sm:$0xff]  ;;  %v467_v5 = vld [vmem:[%s965_s0 + $0x108] sm:$0xff] }
   0xe   :  { %72 = vrot.lane.b32.xlu1 %v546_v9, %s475_s10  ;;  %70 = vrot.lane.b32.xlu0 %v551_v10, %s475_s10 }
  0x12   :  { %168 = vrot.lane.b32.xlu1 %v560_v11, %s475_s10  ;;  %74 = vrot.lane.b32.xlu0 %v516_v4, %s475_s10  ;;  %v466_v4 = vld [vmem:[%s965_s0 + $0x100] sm:$0xff] }
  0x16   :  { %172 = vrot.lane.b32.xlu1 %v569_v12, %s475_s10  ;;  %170 = vrot.lane.b32.xlu0 %v574_v13, %s475_s10 }
  0x1a   :  { %176 = vrot.lane.b32.xlu1 %v583_v14, %s475_s10  ;;  %174 = vrot.lane.b32.xlu0 %v588_v15, %s475_s10 }
  0x1e   :  { %180 = vrot.lane.b32.xlu1 %v597_v16, %s475_s10  ;;  %178 = vrot.lane.b32.xlu0 %v602_v17, %s475_s10 }
  0x22   :  { %184 = vrot.lane.b32.xlu1 %v611_v18, %s475_s10  ;;  %182 = vrot.lane.b32.xlu0 %v616_v19, %s475_s10 }
  0x26   :  { %233 = vrot.lane.b32.xlu1 %v511_v3, %s476_s17  ;;  %231 = vrot.lane.b32.xlu0 %v497_v1, %s476_s17 }
  0x2a   :  { %237 = vrot.lane.b32.xlu1 %v506_v2, %s476_s17  ;;  %235 = vrot.lane.b32.xlu0 %v492_v0, %s476_s17 }
  0x2e   :  { %241 = vrot.lane.b32.xlu1 %v532_v7, %s476_s17  ;;  %239 = vrot.lane.b32.xlu0 %v537_v8, %s476_s17 }
  0x32   :  { %245 = vrot.lane.b32.xlu1 %v546_v9, %s476_s17  ;;  %243 = vrot.lane.b32.xlu0 %v551_v10, %s476_s17 }
  0x36   :  { %304 = vrot.lane.b32.xlu1 %v443_v20, %s476_s17  ;;  %247 = vrot.lane.b32.xlu0 %v229_v21, %s476_s17 }
  0x3a   :  { %308 = vrot.lane.b32.xlu1 %v445_v22, %s476_s17  ;;  %306 = vrot.lane.b32.xlu0 %v444_v23, %s476_s17 }
  0x3e   :  { %312 = vrot.lane.b32.xlu1 %v645_v24, %s476_s17  ;;  %310 = vrot.lane.b32.xlu0 %v650_v25, %s476_s17  ;;  %v464_v25 = vld [vmem:[%s965_s0 + $0xf0] sm:$0xff] }
  0x42   :  { %316 = vrot.lane.b32.xlu1 %v657_v26, %s476_s17  ;;  %314 = vrot.lane.b32.xlu0 %v662_v27, %s476_s17  ;;  %v465_v27 = vld [vmem:[%s965_s0 + $0xf8] sm:$0xff] }
  0x46   :  { %320 = vrot.lane.b32.xlu1 %v470_v28, %s476_s17  ;;  %318 = vrot.lane.b32.xlu0 %v672_v29, %s476_s17 }
  0x4a   :  { %368 = vrot.lane.b32.xlu1 %v511_v3, %s477_s8  ;;  %366 = vrot.lane.b32.xlu0 %v497_v1, %s477_s8 }
  0x4e   :  { %372 = vrot.lane.b32.xlu1 %v506_v2, %s477_s8  ;;  %370 = vrot.lane.b32.xlu0 %v492_v0, %s477_s8 }
  0x52   :  { %376 = vrot.lane.b32.xlu1 %v532_v7, %s477_s8  ;;  %374 = vrot.lane.b32.xlu0 %v537_v8, %s477_s8  ;;  %v463_v8 = vld [vmem:[%s965_s0 + $0xe8] sm:$0xff] }
  0x56   :  { %380 = vrot.lane.b32.xlu1 %v546_v9, %s477_s8  ;;  %378 = vrot.lane.b32.xlu0 %v551_v10, %s477_s8 }
  0x5a   :  { %382 = vrot.lane.b32.xlu0 %v229_v21, %s477_s8 }
  0x74   :  { %v63_v31 = vpop.permute.xlu1 %62  ;;  %v59_v32 = vpop.permute.xlu0 %58 }
  0x75   :  { %v78_v33 = vrot.slane %v63_v31, 4  ;;  %v76_v39 = vrot.slane %v59_v32, 4 }
  0x78   :  { %v65_v36 = vpop.permute.xlu1 %64  ;;  %v61_v37 = vpop.permute.xlu0 %60 }
  0x79   :  { %v79_v40 = vrot.slane %v65_v36, 4  ;;  %v77_v41 = vrot.slane %v61_v37, 4 }
  0x7b   :  { %v91_v42 = vsel %vm17_vm0, %v78_v33, %v79_v40  ;;  %v86_v43 = vsel %vm17_vm0, %v76_v39, %v77_v41  ;;  %v89_v44 = vsel %vm17_vm0, %v77_v41, %v78_v33 }
  0x7c   :  { %v92_v45 = vsel %vm87_vm3, %v63_v31, %v91_v42  ;;  %v88_v46 = vsel %vm87_vm3, %v59_v32, %v86_v43  ;;  %v90_v47 = vsel %vm87_vm3, %v61_v37, %v89_v44  ;;  %v69_v48 = vpop.permute.xlu1 %68  ;;  %v67_v49 = vpop.permute.xlu0 %66 }
  0x7d   :  { %v114_v50 = vmax.bf16 %v92_v45, %v42_v35  ;;  %v112_v51 = vmax.bf16 %v88_v46, %v40_v34  ;;  %v113_v52 = vmax.bf16 %v90_v47, %v41_v38  ;;  %v81_v53 = vrot.slane %v69_v48, 4 }
  0x7e   :  { %v80_v56 = vrot.slane %v67_v49, 4  ;;  %v47_v35 = vmax.bf16 %v672_v29, %v546_v9 }
  0x7f   :  { %v132_v57 = vmax.bf16 %v574_v13, %v113_v52  ;;  %v131_v60 = vmax.bf16 %v560_v11, %v112_v51  ;;  %v133_v61 = vmax.bf16 %v569_v12, %v114_v50 }
  0x80   :  { %v93_v0 = vsel %vm17_vm0, %v79_v40, %v80_v56  ;;  %v95_v1 = vsel %vm17_vm0, %v80_v56, %v81_v53  ;;  %v73_v2 = vpop.permute.xlu1 %72  ;;  %v71_v3 = vpop.permute.xlu0 %70  ;;  %v469_v40 = vld [vmem:[%s965_s0 + $0x118] sm:$0xf] }
  0x81   :  { %v94_v11 = vsel %vm87_vm3, %v65_v36, %v93_v0  ;;  %v96_v12 = vsel %vm87_vm3, %v67_v49, %v95_v1  ;;  %v83_v13 = vrot.slane %v73_v2, 4  ;;  %v82_v20 = vrot.slane %v71_v3, 4 }
  0x82   :  { %v116_v10 = vmax.bf16 %v96_v12, %v44_v54  ;;  %v720_v21 = vmax.bf16 %v462_v58, %v132_v57  ;;  %v115_v7 = vmax.bf16 %v94_v11, %v43_v55  ;;  %v722_v22 = vmax.bf16 %v461_v59, %v131_v60 }
  0x83   :  { %v97_v23 = vsel %vm17_vm0, %v81_v53, %v82_v20  ;;  %v99_v24 = vsel %vm17_vm0, %v82_v20, %v83_v13  ;;  %v729_v26 = vmax.bf16 %v463_v8, %v133_v61 }
  0x84   :  { %v135_v28 = vmax.bf16 %v583_v14, %v116_v10  ;;  %v98_v30 = vsel %vm87_vm3, %v69_v48, %v97_v23  ;;  %v100_v31 = vsel %vm87_vm3, %v71_v3, %v99_v24  ;;  %v169_v32 = vpop.permute.xlu1 %168  ;;  %v75_v33 = vpop.permute.xlu0 %74  ;;  %v134_v34 = vmax.bf16 %v588_v15, %v115_v7 }
  0x85   :  { %v118_v36 = vmax.bf16 %v100_v31, %v46_v62  ;;  %v84_v37 = vrot.slane %v75_v33, 4  ;;  %v120_v38 = vmax.bf16 %v75_v33, %v48_v6  ;;  %v117_v14 = vmax.bf16 %v98_v30, %v45_v63 }
  0x86   :  { %v743_v39 = vmax.bf16 %v464_v25, %v134_v34  ;;  %v748_v41 = vmax.bf16 %v465_v27, %v135_v28  ;;  %v186_v0 = vrot.slane %v169_v32, 4 }
  0x87   :  { %v137_v15 = vmax.bf16 %v597_v16, %v118_v36  ;;  %v101_v42 = vsel %vm17_vm0, %v83_v13, %v84_v37  ;;  %v139_v9 = vmax.bf16 %v611_v18, %v120_v38  ;;  %v136_v44 = vmax.bf16 %v602_v17, %v117_v14  ;;  %v468_v18 = vld [vmem:[%s965_s0 + $0x110] sm:$0xff] }
  0x88   :  { %v102_v6 = vsel %vm87_vm3, %v73_v2, %v101_v42  ;;  %v173_v29 = vpop.permute.xlu1 %172  ;;  %v171_v43 = vpop.permute.xlu0 %170 }
  0x89   :  { %v761_v45 = vmax.bf16 %v469_v40, %v139_v9  ;;  %v119_v16 = vmax.bf16 %v102_v6, %v47_v35  ;;  %v763_v46 = vmax.bf16 %v466_v4, %v136_v44  ;;  %v768_v47 = vmax.bf16 %v467_v5, %v137_v15 }
  0x8a   :  { %v188_v1 = vrot.slane %v173_v29, 4  ;;  %v187_v2 = vrot.slane %v171_v43, 4 }
  0x8b   :  { %v138_v48 = vmax.bf16 %v616_v19, %v119_v16 }
  0x8c   :  { %v177_v49 = vpop.permute.xlu1 %176  ;;  %v175_v50 = vpop.permute.xlu0 %174  ;;  %v195_v13 = vsel %vm17_vm0, %v186_v0, %v187_v2  ;;  %v197_v20 = vsel %vm17_vm0, %v187_v2, %v188_v1 }
  0x8d   :  { %v771_v51 = vmax.bf16 %v468_v18, %v138_v48  ;;  %v190_v3 = vrot.slane %v177_v49, 4  ;;  %v189_v8 = vrot.slane %v175_v50, 4  ;;  %v198_v28 = vsel %vm87_vm3, %v171_v43, %v197_v20 }
  0x8e   :  { %v196_v31 = vsel %vm87_vm3, %v169_v32, %v195_v13  ;;  %v221_v42 = vmax.bf16 %v198_v28, %v720_v21 }
  0x8f   :  { %v201_v23 = vsel %vm17_vm0, %v189_v8, %v190_v3  ;;  %v199_v30 = vsel %vm17_vm0, %v188_v1, %v189_v8  ;;  %v220_v9 = vmax.bf16 %v196_v31, %v722_v22 }
  0x90   :  { %v181_v52 = vpop.permute.xlu1 %180  ;;  %v179_v53 = vpop.permute.xlu0 %178  ;;  %v202_v35 = vsel %vm87_vm3, %v175_v50, %v201_v23  ;;  %v200_v43 = vsel %vm87_vm3, %v173_v29, %v199_v30 }
  0x91   :  { %v192_v10 = vrot.slane %v181_v52, 4  ;;  %v191_v7 = vrot.slane %v179_v53, 4  ;;  %v223_v6 = vmax.bf16 %v202_v35, %v743_v39 }
  0x93   :  { %v203_v36 = vsel %vm17_vm0, %v190_v3, %v191_v7  ;;  %v205_v37 = vsel %vm17_vm0, %v191_v7, %v192_v10 }
  0x94   :  { %v773_v17 = vpop.permute.xlu1 %184  ;;  %v775_v54 = vpop.permute.xlu0 %182  ;;  %v832_v21 = vsel %vm87_vm3, %v179_v53, %v205_v37  ;;  %v204_v50 = vsel %vm87_vm3, %v177_v49, %v203_v36 }
  0x95   :  { %v193_v24 = vrot.slane %v775_v54, 4  ;;  %v194_v38 = vrot.slane %v773_v17, 4  ;;  %v225_v49 = vmax.bf16 %v832_v21, %v763_v46 }
  0x97   :  { %v207_v14 = vsel %vm17_vm0, %v192_v10, %v193_v24  ;;  %v209_v22 = vsel %vm17_vm0, %v193_v24, %v194_v38 }
  0x98   :  { %v777_v55 = vpop.permute.xlu1 %233  ;;  %v232_v56 = vpop.permute.xlu0 %231  ;;  %v208_v0 = vsel %vm87_vm3, %v181_v52, %v207_v14  ;;  %v222_v52 = vmax.bf16 %v200_v43, %v729_v26  ;;  %v856_v23 = vsel %vm87_vm3, %v775_v54, %v209_v22 }
  0x99   :  { %v250_v25 = vrot.slane %v777_v55, 4  ;;  %v249_v27 = vrot.slane %v232_v56, 4  ;;  %v226_v30 = vmax.bf16 %v208_v0, %v768_v47 }
  0x9b   :  { %v258_v4 = vsel %vm17_vm0, %v249_v27, %v250_v25 }
  0x9c   :  { %v779_v57 = vpop.permute.xlu1 %237  ;;  %v781_v58 = vpop.permute.xlu0 %235  ;;  %v260_v39 = vsel %vm259_vm4, %v232_v56, %v258_v4 }
  0x9d   :  { %v252_v40 = vrot.slane %v779_v57, 4  ;;  %v251_v15 = vrot.slane %v781_v58, 4  ;;  %v285_v27 = vmax.bf16 %v260_v39, %v220_v9 }
  0x9f   :  { %v261_v29 = vsel %vm17_vm0, %v250_v25, %v251_v15  ;;  %v263_v1 = vsel %vm17_vm0, %v251_v15, %v252_v40  ;;  %v224_v25 = vmax.bf16 %v204_v50, %v748_v41 }
  0xa0   :  { %v783_v59 = vpop.permute.xlu1 %241  ;;  %v785_v19 = vpop.permute.xlu0 %239  ;;  %v264_v24 = vsel %vm259_vm4, %v781_v58, %v263_v1  ;;  %v262_v26 = vsel %vm259_vm4, %v777_v55, %v261_v29 }
  0xa1   :  { %v253_v32 = vrot.slane %v785_v19, 4  ;;  %v254_v5 = vrot.slane %v783_v59, 4  ;;  %v287_v35 = vmax.bf16 %v264_v24, %v222_v52  ;;  %v286_v36 = vmax.bf16 %v262_v26, %v221_v42 }
  0xa3   :  { %v265_v2 = vsel %vm17_vm0, %v252_v40, %v253_v32  ;;  %v267_v3 = vsel %vm17_vm0, %v253_v32, %v254_v5 }
  0xa4   :  { %v787_v60 = vpop.permute.xlu1 %245  ;;  %v789_v61 = vpop.permute.xlu0 %243  ;;  %v268_v28 = vsel %vm259_vm4, %v785_v19, %v267_v3  ;;  %v266_v31 = vsel %vm259_vm4, %v779_v57, %v265_v2 }
  0xa5   :  { %v256_v53 = vrot.slane %v787_v60, 4  ;;  %v255_v8 = vrot.slane %v789_v61, 4  ;;  %v289_v57 = vmax.bf16 %v268_v28, %v224_v25 }
  0xa7   :  { %v271_v54 = vsel %vm17_vm0, %v255_v8, %v256_v53  ;;  %v269_v14 = vsel %vm17_vm0, %v254_v5, %v255_v8 }
  0xa8   :  { %v791_v62 = vpop.permute.xlu1 %304  ;;  %v793_v63 = vpop.permute.xlu0 %247  ;;  %v272_v32 = vsel %vm259_vm4, %v789_v61, %v271_v54  ;;  %v270_v5 = vsel %vm259_vm4, %v783_v59, %v269_v14 }
  0xa9   :  { %v322_v44 = vrot.slane %v791_v62, 4  ;;  %v291_v0 = vmax.bf16 %v272_v32, %v226_v30  ;;  %v257_v2 = vrot.slane %v793_v63, 4 }
  0xac   :  { %v795_v11 = vpop.permute.xlu1 %308  ;;  %v797_v12 = vpop.permute.xlu0 %306 }
  0xad   :  { %v323_v16 = vrot.slane %v797_v12, 4  ;;  %v324_v13 = vrot.slane %v795_v11, 4 }
  0xaf   :  { %v331_v56 = vsel %vm17_vm0, %v322_v44, %v323_v16  ;;  %v333_v58 = vsel %vm17_vm0, %v323_v16, %v324_v13 }
  0xb0   :  { %v807_v33 = vpop.permute.xlu1 %312  ;;  %v809_v34 = vpop.permute.xlu0 %310  ;;  %v332_v55 = vsel %vm259_vm4, %v791_v62, %v331_v56  ;;  %v334_v9 = vsel %vm259_vm4, %v797_v12, %v333_v58  ;;  %v288_v62 = vmax.bf16 %v266_v31, %v223_v6  ;;  %v273_v58 = vsel %vm17_vm0, %v256_v53, %v257_v2 }
  0xb1   :  { %v325_v20 = vrot.slane %v809_v34, 4  ;;  %v326_v41 = vrot.slane %v807_v33, 4  ;;  %v357_v4 = vmax.bf16 %v332_v55, %v285_v27  ;;  %v358_v3 = vmax.bf16 %v334_v9, %v286_v36 }
  0xb2   :  { %v290_v55 = vmax.bf16 %v270_v5, %v225_v49  ;;  %v274_v9 = vsel %vm259_vm4, %v787_v60, %v273_v58 }
  0xb3   :  { %v335_v19 = vsel %vm17_vm0, %v324_v13, %v325_v20  ;;  %v337_v42 = vsel %vm17_vm0, %v325_v20, %v326_v41 }
  0xb4   :  { %v827_v18 = vpop.permute.xlu1 %316  ;;  %v829_v48 = vpop.permute.xlu0 %314  ;;  %v336_v16 = vsel %vm259_vm4, %v795_v11, %v335_v19  ;;  %v338_v11 = vsel %vm259_vm4, %v809_v34, %v337_v42 }
  0xb5   :  { %v327_v47 = vrot.slane %v829_v48, 4  ;;  %v328_v43 = vrot.slane %v827_v18, 4  ;;  %v359_v8 = vmax.bf16 %v336_v16, %v287_v35 }
  0xb7   :  { %v339_v22 = vsel %vm17_vm0, %v326_v41, %v327_v47  ;;  %v341_v59 = vsel %vm17_vm0, %v327_v47, %v328_v43  ;;  %v360_v41 = vmax.bf16 %v338_v11, %v288_v62 }
  0xb8   :  { %v850_v10 = vpop.permute.xlu1 %320  ;;  %v852_v7 = vpop.permute.xlu0 %318  ;;  %v340_v56 = vsel %vm259_vm4, %v807_v33, %v339_v22  ;;  %v275_v33 = vsel %vm259_vm4, %v793_v63, %v257_v2  ;;  %v342_v35 = vsel %vm259_vm4, %v829_v48, %v341_v59 }
  0xb9   :  { %v329_v61 = vrot.slane %v852_v7, 4  ;;  %v330_v20 = vrot.slane %v850_v10, 4  ;;  %v361_v53 = vmax.bf16 %v340_v56, %v289_v57  ;;  %v228_v57 = vmax.bf16 %v773_v17, %v761_v45 }
  0xba   :  { %v362_v32 = vmax.bf16 %v342_v35, %v290_v55 }
  0xbb   :  { %v343_v24 = vsel %vm17_vm0, %v328_v43, %v329_v61  ;;  %v345_v19 = vsel %vm17_vm0, %v329_v61, %v330_v20  ;;  %v347_v62 = vsel %vm259_vm4, %v850_v10, %v330_v20  ;;  %v293_v17 = vmax.bf16 %v275_v33, %v228_v57 }
  0xbc   :  { %v369_v37 = vpop.permute.xlu1 %368  ;;  %v367_v38 = vpop.permute.xlu0 %366  ;;  %v344_v49 = vsel %vm259_vm4, %v827_v18, %v343_v24  ;;  %v346_v60 = vsel %vm259_vm4, %v852_v7, %v345_v19 }
  0xbd   :  { %v385_v40 = vrot.slane %v369_v37, 4  ;;  %v384_v15 = vrot.slane %v367_v38, 4  ;;  %v363_v18 = vmax.bf16 %v344_v49, %v291_v0  ;;  %v365_v5 = vmax.bf16 %v347_v62, %v293_v17 }
  0xbf   :  { %v393_v44 = vsel %vm17_vm0, %v384_v15, %v385_v40  ;;  %v227_v15 = vmax.bf16 %v856_v23, %v771_v51 }
  0xc0   :  { %v395_v12 = vsel %vm394_vm5, %v367_v38, %v393_v44  ;;  %v373_v6 = vpop.permute.xlu1 %372  ;;  %v371_v50 = vpop.permute.xlu0 %370 }
  0xc1   :  { %v420_v39 = vmax.bf16 %v395_v12, %v357_v4  ;;  %v387_v29 = vrot.slane %v373_v6, 4  ;;  %v386_v1 = vrot.slane %v371_v50, 4  ;;  %v292_v42 = vmax.bf16 %v274_v9, %v227_v15 }
  0xc3   :  { %429 = vst [vmem:[%s966_s1] sm:$0xff] %v420_v39  ;;  %v396_v13 = vsel %vm17_vm0, %v385_v40, %v386_v1  ;;  %v398_v52 = vsel %vm17_vm0, %v386_v1, %v387_v29  ;;  %v364_v22 = vmax.bf16 %v346_v60, %v292_v42 }
  0xc4   :  { %v397_v34 = vsel %vm394_vm5, %v369_v37, %v396_v13  ;;  %v399_v25 = vsel %vm394_vm5, %v371_v50, %v398_v52  ;;  %v377_v26 = vpop.permute.xlu1 %376  ;;  %v375_v27 = vpop.permute.xlu0 %374 }
  0xc5   :  { %v421_v28 = vmax.bf16 %v397_v34, %v358_v3  ;;  %v422_v30 = vmax.bf16 %v399_v25, %v359_v8  ;;  %v389_v31 = vrot.slane %v377_v26, 4  ;;  %v388_v54 = vrot.slane %v375_v27, 4 }
  0xc7   :  { %430 = vst [vmem:[%s966_s1 + $0x8] sm:$0xff] %v421_v28  ;;  %431 = vst [vmem:[%s966_s1 + $0x10] sm:$0xff] %v422_v30  ;;  %v400_v36 = vsel %vm17_vm0, %v387_v29, %v388_v54  ;;  %v402_v63 = vsel %vm17_vm0, %v388_v54, %v389_v31 }
  0xc8   :  { %v401_v46 = vsel %vm394_vm5, %v373_v6, %v400_v36  ;;  %v403_v21 = vsel %vm394_vm5, %v375_v27, %v402_v63  ;;  %v381_v48 = vpop.permute.xlu1 %380  ;;  %v379_v47 = vpop.permute.xlu0 %378 }
  0xc9   :  { %v423_v37 = vmax.bf16 %v401_v46, %v360_v41  ;;  %v424_v38 = vmax.bf16 %v403_v21, %v361_v53  ;;  %v391_v14 = vrot.slane %v381_v48, 4  ;;  %v390_v40 = vrot.slane %v379_v47, 4 }
  0xcb   :  { %432 = vst [vmem:[%s966_s1 + $0x18] sm:$0xff] %v423_v37  ;;  %433 = vst [vmem:[%s966_s1 + $0x20] sm:$0xff] %v424_v38  ;;  %v404_v45 = vsel %vm17_vm0, %v389_v31, %v390_v40  ;;  %v406_v51 = vsel %vm17_vm0, %v390_v40, %v391_v14 }
  0xcc   :  { %v405_v23 = vsel %vm394_vm5, %v377_v26, %v404_v45  ;;  %v407_v10 = vsel %vm394_vm5, %v379_v47, %v406_v51  ;;  %v383_v4 = vpop.permute.xlu0 %382 }
  0xcd   :  { %v425_v43 = vmax.bf16 %v405_v23, %v362_v32  ;;  %v426_v44 = vmax.bf16 %v407_v10, %v363_v18  ;;  %v392_v16 = vrot.slane %v383_v4, 4 }
  0xcf   :  { %434 = vst [vmem:[%s966_s1 + $0x28] sm:$0xff] %v425_v43  ;;  %435 = vst [vmem:[%s966_s1 + $0x30] sm:$0xff] %v426_v44  ;;  %v408_v7 = vsel %vm17_vm0, %v391_v14, %v392_v16  ;;  %v410_v61 = vsel %vm394_vm5, %v383_v4, %v392_v16 }
  0xd0   :  { %v409_v12 = vsel %vm394_vm5, %v381_v48, %v408_v7  ;;  %v428_v6 = vmax.bf16 %v410_v61, %v365_v5 }
  0xd1   :  { %v427_v50 = vmax.bf16 %v409_v12, %v364_v22 }
  0xd2   :  { %438 = vst.msk [vmem:[%s966_s1 + $0x40] sm:$0xf] %vm437_vm6, %v428_v6 }
  0xd3   :  { %436 = vst [vmem:[%s966_s1 + $0x38] sm:$0xff] %v427_v50 }

// kernel: scaled_resnet_forward.9
= control target key start
LH: loop header
LB: loop body
LE: loop exit
PB: predicated region body
PF: predicated region fallthrough
CT: control target
= control target key end

     0   :  { %v7649_v1 = vmov 0   ;;  %vm563_vm0 = vcmask 1043456   ;;  %vm559_vm1 = vcmask 588800   ;;  %vm7651_vm2 = vmmov 0   ;;  %s7654_s16 = smov 126   ;;  %s7655_s17 = smov 94   ;;  %s10029_s0 = inlined_call_operand.vmem [shape: bf16[72,2312], index: 0, kind: input, shape index: {}]   ;;  %s10030_s1 = inlined_call_operand.vmem [shape: bf16[8,72], index: 1, kind: input, shape index: {}]   ;;  %s10031_s8 = inlined_call_operand.vmem [shape: f32[1,2312], index: 8, kind: input, shape index: {}]   ;;  %s10032_s2 = inlined_call_operand.vmem [shape: f32[8,1], index: 2, kind: input, shape index: {}]   ;;  %s10033_s3 = inlined_call_operand.vmem [shape: f32[8,1], index: 3, kind: input, shape index: {}]   ;;  %s10034_s5 = inlined_call_operand.vmem [shape: bf16[9,8,8], index: 5, kind: input, shape index: {}]   ;;  %s10035_s6 = inlined_call_operand.vmem [shape: f32[8,1], index: 6, kind: input, shape index: {}]   ;;  %s10036_s7 = inlined_call_operand.vmem [shape: f32[8,1], index: 7, kind: input, shape index: {}]   ;;  %s10037_s4 = inlined_call_operand.vmem [shape: bf16[8,2312], index: 4, kind: input, shape index: {}]   ;;  %s10038_s9 = inlined_call_operand.vmem [shape: bf16[8,2312], index: 9, kind: output, shape index: {}]  }
   0x1   :  { %v7509_v0 = vld [vmem:[%s10029_s0 + $0x4] ss:$76 sps:$4 sm:$0xff]   ;;  %653 = vmatprep.mubr.bf16.mxu0 %v7649_v1  ;;  %1342 = vst [vmem:[#allocation2] sm:$0xff] %v7649_v1  ;;  %694 = vmatprep.mubr.bf16.mxu1 %v7649_v1  ;;  %v7511_v2 = vld [vmem:[%s10029_s0 + $0xc] ss:$76 sps:$4 sm:$0xff]   ;;  %vm1164_vm3 = vcmask 64512  }
   0x2   :  { %7507 = vset.pattern.permute.xlu1 %v7649_v1  ;;  %7508 = vset.pattern.permute.xlu0 %v7649_v1  ;;  %v7513_v3 = vld [vmem:[%s10029_s0] ss:$76 sps:$4 sm:$0xff]   ;;  %v7514_v4 = vld [vmem:[%s10029_s0 + $0x8] ss:$76 sps:$4 sm:$0xff]   ;;  %v7517_v6 = vld [vmem:[%s10029_s0 + $0xa4] ss:$76 sps:$4 sm:$0xff]  }
   0x3   :  { %621 = vmatprep.subr.bf16.mxu0 %v7509_v0  ;;  %662 = vmatprep.subr.bf16.mxu1 %v7511_v2  ;;  %v7515_v5 = vld [vmem:[%s10029_s0 + $0x9c] ss:$76 sps:$4 sm:$0xff]   ;;  %v7519_v7 = vld [vmem:[%s10029_s0 + $0x98] ss:$76 sps:$4 sm:$0xff]   ;;  %v7520_v8 = vld [vmem:[%s10029_s0 + $0xa0] ss:$76 sps:$4 sm:$0xff]  }
   0x4   :  { %622 = vmatpush1.bf16.msra.mxu0 %v7513_v3  ;;  %663 = vmatpush1.bf16.msra.mxu1 %v7514_v4  ;;  %v7521_v9 = vld [vmem:[%s10029_s0 + $0x134] ss:$76 sps:$4 sm:$0xff]   ;;  %v7523_v10 = vld [vmem:[%s10029_s0 + $0x13c] ss:$76 sps:$4 sm:$0xff]   ;;  %v7526_v12 = vld [vmem:[%s10029_s0 + $0x138] ss:$76 sps:$4 sm:$0xff]  }
   0x5   :  { %623 = vmatprep.subr.bf16.mxu0 %v7515_v5  ;;  %664 = vmatprep.subr.bf16.mxu1 %v7517_v6  ;;  %v7525_v11 = vld [vmem:[%s10029_s0 + $0x130] ss:$76 sps:$4 sm:$0xff]   ;;  %v7527_v13 = vld [vmem:[%s10029_s0 + $0x1cc] ss:$76 sps:$4 sm:$0xff]   ;;  %v7529_v14 = vld [vmem:[%s10029_s0 + $0x1d4] ss:$76 sps:$4 sm:$0xff]  }
   0x6   :  { %v117_v15 = vld [vmem:[%s10029_s0 + $0x260] sm:$0xff]  ;;  %v118_v16 = vld [vmem:[%s10029_s0 + $0x268] sm:$0xff]  ;;  %v7532_v18 = vld [vmem:[%s10029_s0 + $0x1d0] ss:$76 sps:$4 sm:$0xff]   ;;  %vm1351_vm4 = vcmask 633856   ;;  %vm1479_vm5 = vcmask 1043736  }
   0x7   :  { %v7531_v17 = vld [vmem:[%s10029_s0 + $0x1c8] ss:$76 sps:$4 sm:$0xff]   ;;  %v6808_v19 = vcombine.high %v117_v15, %v117_v15  ;;  %v6810_v20 = vcombine.high %v118_v16, %v118_v16  ;;  %v6807_v21 = vcombine.low %v117_v15, %v117_v15  ;;  %v6809_v22 = vcombine.low %v118_v16, %v118_v16  ;;  %v7783_v27 = vld [vmem:[%s10030_s1] sm:$0xf]  ;;  %v7537_v28 = vld [vmem:[%s10029_s0 + $0x10] ss:$76 sps:$4 sm:$0xff]  }
   0x8   :  { %624 = vmatpush1.bf16.msra.mxu0 %v7519_v7  ;;  %665 = vmatpush1.bf16.msra.mxu1 %v7520_v8  ;;  %v7539_v23 = vld [vmem:[%s10029_s0 + $0x14] ss:$76 sps:$4 sm:$0xff]   ;;  %v7542_v26 = vld [vmem:[%s10029_s0 + $0x1c] ss:$76 sps:$4 sm:$0xff]   ;;  %v7540_v29 = vld [vmem:[%s10029_s0 + $0x18] ss:$76 sps:$4 sm:$0xff]  }
   0x9   :  { %625 = vmatprep.subr.bf16.mxu0 %v7521_v9  ;;  %666 = vmatprep.subr.bf16.mxu1 %v7523_v10  ;;  %v565_v24 = vsel %vm563_vm0, %v6807_v21, 0  ;;  %v571_v25 = vsel %vm563_vm0, %v6809_v22, 0  ;;  %v7545_v30 = vld [vmem:[%s10029_s0 + $0xac] ss:$76 sps:$4 sm:$0xff]   ;;  %v7548_v31 = vld [vmem:[%s10029_s0 + $0xb4] ss:$76 sps:$4 sm:$0xff]  }
   0xa   :  { %v7543_v32 = vld [vmem:[%s10029_s0 + $0xa8] ss:$76 sps:$4 sm:$0xff]   ;;  %v7546_v33 = vld [vmem:[%s10029_s0 + $0xb0] ss:$76 sps:$4 sm:$0xff]   ;;  %v7554_v35 = vld [vmem:[%s10029_s0 + $0x14c] ss:$76 sps:$4 sm:$0xff]  }
   0xb   :  { %v7551_v34 = vld [vmem:[%s10029_s0 + $0x144] ss:$76 sps:$4 sm:$0xff]   ;;  %v7549_v36 = vld [vmem:[%s10029_s0 + $0x140] ss:$76 sps:$4 sm:$0xff]   ;;  %v7552_v37 = vld [vmem:[%s10029_s0 + $0x148] ss:$76 sps:$4 sm:$0xff]  }
   0xc   :  { %626 = vmatpush1.bf16.msra.mxu0 %v7525_v11  ;;  %667 = vmatpush1.bf16.msra.mxu1 %v7526_v12  ;;  %v7557_v38 = vld [vmem:[%s10029_s0 + $0x1dc] ss:$76 sps:$4 sm:$0xff]   ;;  %v7560_v39 = vld [vmem:[%s10029_s0 + $0x1e4] ss:$76 sps:$4 sm:$0xff]   ;;  %v7558_v43 = vld [vmem:[%s10029_s0 + $0x1e0] ss:$76 sps:$4 sm:$0xff]  }
   0xd   :  { %627 = vmatprep.subr.bf16.mxu0 %v7527_v13  ;;  %668 = vmatprep.subr.bf16.mxu1 %v7529_v14  ;;  %v119_v40 = vld [vmem:[%s10029_s0 + $0x270] sm:$0xff]  ;;  %v120_v41 = vld [vmem:[%s10029_s0 + $0x278] sm:$0xff]  ;;  %v7565_v52 = vld [vmem:[%s10029_s0 + $0x20] ss:$76 sps:$4 sm:$0xff]   ;;  %vm1480_vm6 = vcmask 1047556   ;;  %vm1449_vm7 = vcmask 285696  }
   0xe   :  { %v7555_v42 = vld [vmem:[%s10029_s0 + $0x1d8] ss:$76 sps:$4 sm:$0xff]   ;;  %v6812_v44 = vcombine.high %v119_v40, %v119_v40  ;;  %v6814_v45 = vcombine.high %v120_v41, %v120_v41  ;;  %v6811_v46 = vcombine.low %v119_v40, %v119_v40  ;;  %v6813_v47 = vcombine.low %v120_v41, %v120_v41  ;;  %v7568_v53 = vld [vmem:[%s10029_s0 + $0x28] ss:$76 sps:$4 sm:$0xff]   ;;  %v7574_v57 = vld [vmem:[%s10029_s0 + $0xc0] ss:$76 sps:$4 sm:$0xff]  }
   0xf   :  { %v7567_v48 = vld [vmem:[%s10029_s0 + $0x24] ss:$76 sps:$4 sm:$0xff]   ;;  %v7570_v51 = vld [vmem:[%s10029_s0 + $0x2c] ss:$76 sps:$4 sm:$0xff]   ;;  %v7573_v54 = vld [vmem:[%s10029_s0 + $0xbc] ss:$76 sps:$4 sm:$0xff]  }
  0x10   :  { %628 = vmatpush1.bf16.msra.mxu0 %v7531_v17  ;;  %669 = vmatpush1.bf16.msra.mxu1 %v7532_v18  ;;  %v577_v49 = vsel %vm563_vm0, %v6811_v46, 0  ;;  %v583_v50 = vsel %vm563_vm0, %v6813_v47, 0  ;;  %v7576_v55 = vld [vmem:[%s10029_s0 + $0xc4] ss:$76 sps:$4 sm:$0xff]   ;;  %v7579_v58 = vld [vmem:[%s10029_s0 + $0x154] ss:$76 sps:$4 sm:$0xff]   ;;  %vm1481_vm8 = vmor %vm1480_vm6, %vm1479_vm5 }
  0x11   :  { %6826 = vmatprep.subr.msk.bf16.mxu0 %vm563_vm0, %v6808_v19  ;;  %6828 = vmatprep.subr.msk.bf16.mxu1 %vm563_vm0, %v6810_v20  ;;  %v7571_v56 = vld [vmem:[%s10029_s0 + $0xb8] ss:$76 sps:$4 sm:$0xff]   ;;  %v7582_v59 = vld [vmem:[%s10029_s0 + $0x15c] ss:$76 sps:$4 sm:$0xff]   ;;  %v7588_v63 = vld [vmem:[%s10029_s0 + $0x1f4] ss:$76 sps:$4 sm:$0xff]  }
  0x12   :  { %v7577_v60 = vld [vmem:[%s10029_s0 + $0x150] ss:$76 sps:$4 sm:$0xff]   ;;  %v7580_v61 = vld [vmem:[%s10029_s0 + $0x158] ss:$76 sps:$4 sm:$0xff]   ;;  %v122_v2 = vld [vmem:[%s10029_s0 + $0x288] sm:$0xff]  ;;  %vm1491_vm9 = vcmask 347136  }
  0x13   :  { %v7585_v62 = vld [vmem:[%s10029_s0 + $0x1ec] ss:$76 sps:$4 sm:$0xff]   ;;  %v121_v0 = vld [vmem:[%s10029_s0 + $0x280] sm:$0xff]  ;;  %v7583_v3 = vld [vmem:[%s10029_s0 + $0x1e8] ss:$76 sps:$4 sm:$0xff]   ;;  %v6818_v6 = vcombine.high %v122_v2, %v122_v2  ;;  %v6817_v8 = vcombine.low %v122_v2, %v122_v2  ;;  %s7656_s18 = smov 93  }
  0x14   :  { %630 = vmatpush1.bf16.msra.mxu0 %v565_v24  ;;  %671 = vmatpush1.bf16.msra.mxu1 %v571_v25  ;;  %v7586_v4 = vld [vmem:[%s10029_s0 + $0x1f0] ss:$76 sps:$4 sm:$0xff]   ;;  %v6816_v5 = vcombine.high %v121_v0, %v121_v0  ;;  %v6815_v7 = vcombine.low %v121_v0, %v121_v0  ;;  %v7595_v11 = vld [vmem:[%s10029_s0 + $0x34] ss:$76 sps:$4 sm:$0xff]   ;;  %v7596_v14 = vld [vmem:[%s10029_s0 + $0x38] ss:$76 sps:$4 sm:$0xff]  }
  0x15   :  { %703 = vmatprep.subr.bf16.mxu0 %v7539_v23  ;;  %744 = vmatprep.subr.bf16.mxu1 %v7542_v26  ;;  %v595_v10 = vsel %vm563_vm0, %v6817_v8, 0  ;;  %v7598_v12 = vld [vmem:[%s10029_s0 + $0x3c] ss:$76 sps:$4 sm:$0xff]   ;;  %v7601_v15 = vld [vmem:[%s10029_s0 + $0xcc] ss:$76 sps:$4 sm:$0xff]   ;;  %v123_v25 = vld [vmem:[%s10029_s0 + $0x290] sm:$0xff] }
  0x16   :  { %v589_v9 = vsel %vm563_vm0, %v6815_v7, 0  ;;  %v7593_v13 = vld [vmem:[%s10029_s0 + $0x30] ss:$76 sps:$4 sm:$0xff]   ;;  %v7604_v16 = vld [vmem:[%s10029_s0 + $0xd4] ss:$76 sps:$4 sm:$0xff]   ;;  %vm1592_vm10 = vcmask 1039360  }
  0x17   :  { %6827 = vmatmul.mubr.msk.bf16.vlgmr.msra.gmra.mrb[0].mxu0 %vm559_vm1, %v7783_v27  ;;  %6829 = vmatmul.mubr.msk.bf16.vlgmr.msra.gmra.mrb[0].mxu1 %vm559_vm1, %v7783_v27  ;;  %v7599_v17 = vld [vmem:[%s10029_s0 + $0xc8] ss:$76 sps:$4 sm:$0xff]   ;;  %v7602_v18 = vld [vmem:[%s10029_s0 + $0xd0] ss:$76 sps:$4 sm:$0xff]   ;;  %v7610_v20 = vld [vmem:[%s10029_s0 + $0x16c] ss:$76 sps:$4 sm:$0xff]  }
  0x18   :  { %704 = vmatpush1.bf16.msra.mxu0 %v7537_v28  ;;  %745 = vmatpush1.bf16.msra.mxu1 %v7540_v29  ;;  %v7607_v19 = vld [vmem:[%s10029_s0 + $0x164] ss:$76 sps:$4 sm:$0xff]   ;;  %v7605_v21 = vld [vmem:[%s10029_s0 + $0x160] ss:$76 sps:$4 sm:$0xff]   ;;  %v7608_v22 = vld [vmem:[%s10029_s0 + $0x168] ss:$76 sps:$4 sm:$0xff]  }
  0x19   :  { %705 = vmatprep.subr.bf16.mxu0 %v7545_v30  ;;  %746 = vmatprep.subr.bf16.mxu1 %v7548_v31  ;;  %v7613_v23 = vld [vmem:[%s10029_s0 + $0x1fc] ss:$76 sps:$4 sm:$0xff]   ;;  %v7616_v24 = vld [vmem:[%s10029_s0 + $0x204] ss:$76 sps:$4 sm:$0xff]   ;;  %v7614_v29 = vld [vmem:[%s10029_s0 + $0x200] ss:$76 sps:$4 sm:$0xff]   ;;  %v6820_v30 = vcombine.high %v123_v25, %v123_v25 }
  0x1a   :  { %735 = vmatprep.mubr.bf16.mxu0 %v7649_v1  ;;  %776 = vmatprep.mubr.bf16.mxu1 %v7649_v1  ;;  %v124_v26 = vld [vmem:[%s10029_s0 + $0x298] sm:$0xff]  ;;  %v125_v47 = vld [vmem:[%s10029_s0 + $0x2a0] sm:$0xff]  ;;  %s7657_s21 = smov 92   ;;  %vm2589_vm11 = vcmask 1031168   ;;  %s7658_s24 = smov 60   ;;  %vm3136_vm12 = vcmask 769024  }
  0x1b   :  { %v7611_v28 = vld [vmem:[%s10029_s0 + $0x1f8] ss:$76 sps:$4 sm:$0xff]   ;;  %v6822_v31 = vcombine.high %v124_v26, %v124_v26  ;;  %v7627_v40 = vld [vmem:[%s10029_s0 + $0xdc] ss:$76 sps:$4 sm:$0xff]   ;;  %s7659_s27 = smov 59   ;;  %vm3683_vm13 = vcmask 760832  }
  0x1c   :  { %706 = vmatpush1.bf16.msra.mxu0 %v7543_v32  ;;  %747 = vmatpush1.bf16.msra.mxu1 %v7546_v33  ;;  %v6819_v32 = vcombine.low %v123_v25, %v123_v25  ;;  %v6821_v33 = vcombine.low %v124_v26, %v124_v26  ;;  %v7625_v41 = vld [vmem:[%s10029_s0 + $0xd8] ss:$76 sps:$4 sm:$0xff]   ;;  %vm4230_vm14 = vcmask 752640   ;;  %vm4777_vm15 = vcmask 490496  }
  0x1d   :  { %707 = vmatprep.subr.bf16.mxu0 %v7551_v34  ;;  %748 = vmatprep.subr.bf16.mxu1 %v7554_v35  ;;  %v7635_v46 = vld [vmem:[%s10029_s0 + $0x20c] ss:$76 sps:$4 sm:$0xff]  }
  0x1e   :  { %v601_v34 = vsel %vm563_vm0, %v6819_v32, 0  ;;  %v607_v35 = vsel %vm563_vm0, %v6821_v33, 0 }
  0x20   :  { %708 = vmatpush1.bf16.msra.mxu0 %v7549_v36  ;;  %749 = vmatpush1.bf16.msra.mxu1 %v7552_v37  ;;  %v7623_v36 = vld [vmem:[%s10029_s0 + $0x44] ss:$76 sps:$4 sm:$0xff]   ;;  %v7621_v37 = vld [vmem:[%s10029_s0 + $0x40] ss:$76 sps:$4 sm:$0xff]  }
  0x21   :  { %709 = vmatprep.subr.bf16.mxu0 %v7557_v38  ;;  %750 = vmatprep.subr.bf16.mxu1 %v7560_v39  ;;  %v7624_v38 = vld [vmem:[%s10029_s0 + $0x48] ss:$76 sps:$4 sm:$0xff]   ;;  %v10039_v39 = vmov 0.0  }
  0x24   :  { %710 = vmatpush1.bf16.msra.mxu0 %v7555_v42  ;;  %751 = vmatpush1.bf16.msra.mxu1 %v7558_v43  ;;  %v7628_v42 = vld [vmem:[%s10029_s0 + $0xe0] ss:$76 sps:$4 sm:$0xff]  }
  0x25   :  { %6830 = vmatprep.subr.msk.bf16.mxu0 %vm563_vm0, %v6812_v44  ;;  %6832 = vmatprep.subr.msk.bf16.mxu1 %vm563_vm0, %v6814_v45  ;;  %v7631_v43 = vld [vmem:[%s10029_s0 + $0x174] ss:$76 sps:$4 sm:$0xff]   ;;  %v7629_v44 = vld [vmem:[%s10029_s0 + $0x170] ss:$76 sps:$4 sm:$0xff]   ;;  %v7632_v45 = vld [vmem:[%s10029_s0 + $0x178] ss:$76 sps:$4 sm:$0xff]  }
  0x28   :  { %712 = vmatpush1.bf16.msra.mxu0 %v577_v49  ;;  %753 = vmatpush1.bf16.msra.mxu1 %v583_v50  ;;  %v7636_v49 = vld [vmem:[%s10029_s0 + $0x210] ss:$76 sps:$4 sm:$0xff]   ;;  %v6824_v50 = vcombine.high %v125_v47, %v125_v47 }
  0x29   :  { %785 = vmatprep.subr.bf16.mxu0 %v7567_v48  ;;  %826 = vmatprep.subr.bf16.mxu1 %v7570_v51  ;;  %v7633_v48 = vld [vmem:[%s10029_s0 + $0x208] ss:$76 sps:$4 sm:$0xff]   ;;  %v6823_v51 = vcombine.low %v125_v47, %v125_v47 }
  0x2b   :  { %6831 = vmatmul.mubr.msk.bf16.vlgmr.msra.gmra.mrb[4].mxu0 %vm559_vm1, %v7783_v27  ;;  %6833 = vmatmul.mubr.msk.bf16.vlgmr.msra.gmra.mrb[4].mxu1 %vm559_vm1, %v7783_v27 }
  0x2c   :  { %786 = vmatpush1.bf16.msra.mxu0 %v7565_v52  ;;  %827 = vmatpush1.bf16.msra.mxu1 %v7568_v53  ;;  %v7639_v52 = vld [vmem:[%s10029_s0 + $0x2a8] ss:$0 sps:$4 sm:$0xff]   ;;  %v613_v53 = vsel %vm563_vm0, %v6823_v51, 0  ;;  %s7660_s0 = smov 58  }
  0x2d   :  { %787 = vmatprep.subr.bf16.mxu0 %v7573_v54  ;;  %828 = vmatprep.subr.bf16.mxu1 %v7576_v55  ;;  %v619_v54 = vsel %vm563_vm0, %v7639_v52, 0  ;;  %v1033_v55 = vlaneseq }
  0x2e   :  { %817 = vmatprep.mubr.bf16.mxu0 %v7649_v1  ;;  %858 = vmatprep.mubr.bf16.mxu1 %v7649_v1 }
  0x30   :  { %788 = vmatpush1.bf16.msra.mxu0 %v7571_v56  ;;  %829 = vmatpush1.bf16.msra.mxu1 %v7574_v57  ;;  %v8034_v56 = vshrl.u32 %v1033_v55, 7 }
  0x31   :  { %789 = vmatprep.subr.bf16.mxu0 %v7579_v58  ;;  %830 = vmatprep.subr.bf16.mxu1 %v7582_v59  ;;  %v33_v58 = vld [vmem:[%s10031_s8] sm:$0xff] }
  0x32   :  { %v8037_v57 = vsub.s32 0, %v8034_v56  ;;  %v8043_v59 = vsub.s32 1, %v8034_v56 }
  0x34   :  { %790 = vmatpush1.bf16.msra.mxu0 %v7577_v60  ;;  %831 = vmatpush1.bf16.msra.mxu1 %v7580_v61  ;;  %v8046_v60 = vsub.s32 2, %v8034_v56  ;;  %v8053_v61 = vrot.slane %v33_v58, %v8043_v59 }
  0x35   :  { %791 = vmatprep.subr.bf16.mxu0 %v7585_v62  ;;  %832 = vmatprep.subr.bf16.mxu1 %v7588_v63 }
  0x36   :  { %v8056_v62 = vrot.slane %v33_v58, %v8046_v60 }
  0x38   :  { %792 = vmatpush1.bf16.msra.mxu0 %v7583_v3  ;;  %833 = vmatpush1.bf16.msra.mxu1 %v7586_v4 }
  0x39   :  { %6834 = vmatprep.subr.msk.bf16.mxu0 %vm563_vm0, %v6816_v5  ;;  %6836 = vmatprep.subr.msk.bf16.mxu1 %vm563_vm0, %v6818_v6 }
  0x3c   :  { %794 = vmatpush1.bf16.msra.mxu0 %v589_v9  ;;  %835 = vmatpush1.bf16.msra.mxu1 %v595_v10 }
  0x3d   :  { %867 = vmatprep.subr.bf16.mxu0 %v7595_v11  ;;  %908 = vmatprep.subr.bf16.mxu1 %v7598_v12 }
  0x3f   :  { %6835 = vmatmul.mubr.msk.bf16.vlgmr.msra.gmra.mrb[8].mxu0 %vm559_vm1, %v7783_v27  ;;  %6837 = vmatmul.mubr.msk.bf16.vlgmr.msra.gmra.mrb[8].mxu1 %vm559_vm1, %v7783_v27 }
  0x40   :  { %868 = vmatpush1.bf16.msra.mxu0 %v7593_v13  ;;  %909 = vmatpush1.bf16.msra.mxu1 %v7596_v14 }
  0x41   :  { %869 = vmatprep.subr.bf16.mxu0 %v7601_v15  ;;  %910 = vmatprep.subr.bf16.mxu1 %v7604_v16  ;;  %v1051_v16 = vsub.s32 4, %v8034_v56 }
  0x42   :  { %899 = vmatprep.mubr.bf16.mxu0 %v7649_v1  ;;  %940 = vmatprep.mubr.bf16.mxu1 %v7649_v1 }
  0x44   :  { %870 = vmatpush1.bf16.msra.mxu0 %v7599_v17  ;;  %911 = vmatpush1.bf16.msra.mxu1 %v7602_v18  ;;  %v1055_v17 = vsub.s32 5, %v8034_v56  ;;  %v1059_v18 = vsub.s32 6, %v8034_v56 }
  0x45   :  { %871 = vmatprep.subr.bf16.mxu0 %v7607_v19  ;;  %912 = vmatprep.subr.bf16.mxu1 %v7610_v20  ;;  %v8079_v19 = vrot.slane %v33_v58, %v1051_v16 }
  0x46   :  { %v8081_v20 = vrot.slane %v33_v58, %v1055_v17 }
  0x47   :  { %10068 = vst [vmem:[#allocation3_spill] sm:$0xff] %v8079_v19 }
  0x48   :  { %872 = vmatpush1.bf16.msra.mxu0 %v7605_v21  ;;  %913 = vmatpush1.bf16.msra.mxu1 %v7608_v22  ;;  %10069 = vst [vmem:[#allocation4_spill] sm:$0xff] %v8081_v20  ;;  %v8083_v21 = vrot.slane %v33_v58, %v1059_v18  ;;  %v1063_v22 = vsub.s32 7, %v8034_v56 }
  0x49   :  { %873 = vmatprep.subr.bf16.mxu0 %v7613_v23  ;;  %914 = vmatprep.subr.bf16.mxu1 %v7616_v24 }
  0x4a   :  { %10070 = vst [vmem:[#allocation5_spill] sm:$0xff] %v8083_v21 }
  0x4c   :  { %874 = vmatpush1.bf16.msra.mxu0 %v7611_v28  ;;  %915 = vmatpush1.bf16.msra.mxu1 %v7614_v29 }
  0x4d   :  { %6838 = vmatprep.subr.msk.bf16.mxu0 %vm563_vm0, %v6820_v30  ;;  %6840 = vmatprep.subr.msk.bf16.mxu1 %vm563_vm0, %v6822_v31 }
  0x50   :  { %876 = vmatpush1.bf16.msra.mxu0 %v601_v34  ;;  %917 = vmatpush1.bf16.msra.mxu1 %v607_v35  ;;  %v8100_v34 = vrot.slane %v33_v58, %v1063_v22 }
  0x51   :  { %949 = vmatprep.subr.bf16.mxu0 %v7623_v36  ;;  %7107 = vmatprep.subr.bf16.mxu1 %v10039_v39 }
  0x52   :  { %10071 = vst [vmem:[#allocation6_spill] sm:$0xff] %v8100_v34 }
  0x53   :  { %6839 = vmatmul.mubr.msk.bf16.vlgmr.msra.gmra.mrb[12].mxu0 %vm559_vm1, %v7783_v27  ;;  %6841 = vmatmul.mubr.msk.bf16.vlgmr.msra.gmra.mrb[12].mxu1 %vm559_vm1, %v7783_v27 }
  0x54   :  { %950 = vmatpush1.bf16.msra.mxu0 %v7621_v37  ;;  %7108 = vmatpush3.bf16.msra.mxu1 %v7624_v38 }
  0x55   :  { %951 = vmatprep.subr.bf16.mxu0 %v7627_v40  ;;  %7109 = vmatprep.subr.bf16.mxu1 %v10039_v39 }
  0x56   :  { %981 = vmatprep.mubr.bf16.mxu0 %v7649_v1  ;;  %7117 = vmatprep.mubr.msk.bf16.mxu1 %vm7651_vm2, %v10039_v39 }
  0x58   :  { %952 = vmatpush1.bf16.msra.mxu0 %v7625_v41  ;;  %7110 = vmatpush3.bf16.msra.mxu1 %v7628_v42  ;;  %v34_v42 = vld [vmem:[%s10031_s8 + $0x8] sm:$0xff] }
  0x59   :  { %953 = vmatprep.subr.bf16.mxu0 %v7631_v43  ;;  %7111 = vmatprep.subr.bf16.mxu1 %v10039_v39  ;;  %v8108_v43 = vrot.slane %v34_v42, %v8037_v57 }
  0x5b   :  { %10072 = vst [vmem:[#allocation7_spill] sm:$0xff] %v8108_v43 }
  0x5c   :  { %954 = vmatpush1.bf16.msra.mxu0 %v7629_v44  ;;  %7112 = vmatpush3.bf16.msra.mxu1 %v7632_v45  ;;  %v8111_v44 = vrot.slane %v34_v42, %v8043_v59  ;;  %v8114_v45 = vrot.slane %v34_v42, %v8046_v60 }
  0x5d   :  { %955 = vmatprep.subr.bf16.mxu0 %v7635_v46  ;;  %7113 = vmatprep.subr.bf16.mxu1 %v10039_v39 }
  0x5e   :  { %10073 = vst [vmem:[#allocation8_spill] sm:$0xff] %v8111_v44  ;;  %10074 = vst [vmem:[#allocation9_spill] sm:$0xff] %v8114_v45 }
  0x60   :  { %956 = vmatpush1.bf16.msra.mxu0 %v7633_v48  ;;  %7114 = vmatpush3.bf16.msra.mxu1 %v7636_v49 }
  0x61   :  { %6842 = vmatprep.subr.msk.bf16.mxu0 %vm563_vm0, %v6824_v50  ;;  %7115 = vmatprep.subr.bf16.mxu1 %v10039_v39 }
  0x64   :  { %958 = vmatpush1.bf16.msra.mxu0 %v613_v53  ;;  %7116 = vmatpush3.bf16.msra.mxu1 %v619_v54 }
  0x67   :  { %6843 = vmatmul.mubr.msk.bf16.vlgmr.msra.gmra.mrb[16].mxu0 %vm559_vm1, %v7783_v27  ;;  %7118 = vmatmul.mubr.msk.bf16.vlgmr.msra.gmra.mrb[16].mxu1 %vm559_vm1, %v7783_v27  ;;  %v1047_v27 = vsub.s32 3, %v8034_v56  ;;  %vm5324_vm1 = vcmask 482304  }
  0x68   :  { %1703 = vmatprep.mubr.bf16.mxu0 %v7649_v1  ;;  %1744 = vmatprep.mubr.bf16.mxu1 %v7649_v1  ;;  %v8050_v1 = vrot.slane %v33_v58, %v8037_v57 }
  0x69   :  { %v8062_v2 = vrot.slane %v33_v58, %v1047_v27  ;;  %v8130_v56 = vrot.slane %v34_v42, %v1047_v27 }
  0x6b   :  { %10075 = vst [vmem:[#allocation10_spill] sm:$0xff] %v8130_v56 }
  0xea   :  { %v8058_v63 = vpop.f32.mrb[0].mxu0  ;;  %v8060_v0 = vpop.f32.mrb[0].mxu1 }
  0xeb   :  { %v1128_v3 = vmul.f32 %v8050_v1, %v8058_v63  ;;  %v8066_v4 = vpop.f32.mrb[1].mxu0  ;;  %v8068_v5 = vpop.f32.mrb[1].mxu1  ;;  %v1130_v7 = vmul.f32 %v8056_v62, %v8060_v0 }
  0xec   :  { %v1129_v6 = vmul.f32 %v8053_v61, %v8066_v4  ;;  %v659_v8 = vpop.f32.mrb[2].mxu0  ;;  %v700_v9 = vpop.f32.mrb[2].mxu1  ;;  %v1131_v13 = vmul.f32 %v8062_v2, %v8068_v5 }
  0xed   :  { %v660_v10 = vpop.f32.mrb[3].mxu0  ;;  %v701_v11 = vpop.f32.mrb[3].mxu1 }
  0xee   :  { %v1147_v12 = vadd.f32 %v1129_v6, %v1128_v3  ;;  %v8134_v10 = vrot.slane %v34_v42, %v1051_v16  ;;  %v8136_v11 = vrot.slane %v34_v42, %v1055_v17 }
  0xf0   :  { %v1148_v14 = vadd.f32 %v1147_v12, %v1130_v7  ;;  %10076 = vst [vmem:[#allocation11_spill] sm:$0xff] %v8134_v10  ;;  %10077 = vst [vmem:[#allocation12_spill] sm:$0xff] %v8136_v11  ;;  %v8138_v12 = vrot.slane %v34_v42, %v1059_v18 }
  0xf2   :  { %v1149_v15 = vadd.f32 %v1148_v14, %v1131_v13  ;;  %10078 = vst [vmem:[#allocation13_spill] sm:$0xff] %v8138_v12 }
  0xfe   :  { %v8086_v23 = vpop.f32.mrb[4].mxu0  ;;  %v8088_v24 = vpop.f32.mrb[4].mxu1 }
  0xff   :  { %v1132_v25 = vmul.f32 %v8079_v19, %v8086_v23  ;;  %v8092_v26 = vpop.f32.mrb[5].mxu0  ;;  %v8094_v28 = vpop.f32.mrb[5].mxu1  ;;  %v1134_v33 = vmul.f32 %v8083_v21, %v8088_v24 }
 0x100   :  { %v1133_v29 = vmul.f32 %v8081_v20, %v8092_v26  ;;  %v741_v30 = vpop.f32.mrb[6].mxu0  ;;  %v782_v31 = vpop.f32.mrb[6].mxu1  ;;  %v1135_v40 = vmul.f32 %v8100_v34, %v8094_v28 }
 0x101   :  { %v1150_v32 = vadd.f32 %v1149_v15, %v1132_v25  ;;  %v742_v35 = vpop.f32.mrb[7].mxu0  ;;  %v783_v36 = vpop.f32.mrb[7].mxu1  ;;  %v8154_v31 = vrot.slane %v34_v42, %v1063_v22 }
 0x103   :  { %v1151_v37 = vadd.f32 %v1150_v32, %v1133_v29  ;;  %10079 = vst [vmem:[#allocation14_spill] sm:$0xff] %v8154_v31 }
 0x105   :  { %v1152_v38 = vadd.f32 %v1151_v37, %v1134_v33 }
 0x107   :  { %v1153_v41 = vadd.f32 %v1152_v38, %v1135_v40  ;;  %v35_v40 = vld [vmem:[%s10031_s8 + $0x10] sm:$0x7] }
 0x108   :  { %v8168_v22 = vrot.slane %v35_v40, %v8043_v59 }
 0x10a   :  { %10082 = vst [vmem:[#allocation17_spill] sm:$0xff] %v8168_v22 }
 0x112   :  { %v8116_v46 = vpop.f32.mrb[8].mxu0  ;;  %v8118_v47 = vpop.f32.mrb[8].mxu1 }
 0x113   :  { %v1136_v48 = vmul.f32 %v8108_v43, %v8116_v46  ;;  %v8122_v49 = vpop.f32.mrb[9].mxu0  ;;  %v8124_v50 = vpop.f32.mrb[9].mxu1  ;;  %v1138_v55 = vmul.f32 %v8114_v45, %v8118_v47 }
 0x114   :  { %v1137_v51 = vmul.f32 %v8111_v44, %v8122_v49  ;;  %v823_v52 = vpop.f32.mrb[10].mxu0  ;;  %v864_v53 = vpop.f32.mrb[10].mxu1  ;;  %v1139_v8 = vmul.f32 %v8130_v56, %v8124_v50 }
 0x115   :  { %v1154_v54 = vadd.f32 %v1153_v41, %v1136_v48  ;;  %v824_v58 = vpop.f32.mrb[11].mxu0  ;;  %v865_v3 = vpop.f32.mrb[11].mxu1  ;;  %v8162_v41 = vrot.slane %v35_v40, %v8037_v57  ;;  %v8165_v48 = vrot.slane %v35_v40, %v8046_v60 }
 0x117   :  { %v1155_v6 = vadd.f32 %v1154_v54, %v1137_v51  ;;  %10080 = vst [vmem:[#allocation15_spill] sm:$0xff] %v8162_v41  ;;  %10081 = vst [vmem:[#allocation16_spill] sm:$0xff] %v8165_v48 }
 0x119   :  { %v1156_v7 = vadd.f32 %v1155_v6, %v1138_v55 }
 0x11b   :  { %v1157_v9 = vadd.f32 %v1156_v7, %v1139_v8 }
 0x126   :  { %v8140_v13 = vpop.f32.mrb[12].mxu0  ;;  %v8142_v14 = vpop.f32.mrb[12].mxu1 }
 0x127   :  { %v1140_v27 = vmul.f32 %v8134_v10, %v8140_v13  ;;  %v8146_v15 = vpop.f32.mrb[13].mxu0  ;;  %v8148_v25 = vpop.f32.mrb[13].mxu1  ;;  %v1142_v18 = vmul.f32 %v8138_v12, %v8142_v14 }
 0x128   :  { %v1141_v29 = vmul.f32 %v8136_v11, %v8146_v15  ;;  %v905_v16 = vpop.f32.mrb[14].mxu0  ;;  %v946_v30 = vpop.f32.mrb[14].mxu1  ;;  %v1143_v37 = vmul.f32 %v8154_v31, %v8148_v25 }
 0x129   :  { %v1158_v17 = vadd.f32 %v1157_v9, %v1140_v27  ;;  %v906_v32 = vpop.f32.mrb[15].mxu0  ;;  %v947_v33 = vpop.f32.mrb[15].mxu1 }
 0x12b   :  { %v1159_v35 = vadd.f32 %v1158_v17, %v1141_v29 }
 0x12d   :  { %v1160_v36 = vadd.f32 %v1159_v35, %v1142_v18 }
 0x12f   :  { %v1161_v38 = vadd.f32 %v1160_v36, %v1143_v37 }
 0x13a   :  { %v8170_v42 = vpop.f32.mrb[16].mxu0  ;;  %v8172_v51 = vpop.f32.mrb[16].mxu1 }
 0x13b   :  { %v1144_v52 = vmul.f32 %v8162_v41, %v8170_v42  ;;  %v8176_v53 = vpop.f32.mrb[17].mxu0  ;;  %v7119_v54 = vpop.f32.mrb[17].mxu1  ;;  %v1146_v57 = vmul.f32 %v8165_v48, %v8172_v51 }
 0x13c   :  { %v1145_v60 = vmul.f32 %v8168_v22, %v8176_v53  ;;  %v987_v55 = vpop.f32.mrb[18].mxu0  ;;  %v1027_v59 = vpop.f32.mrb[18].mxu1 }
 0x13d   :  { %v988_v58 = vpop.f32.mrb[19].mxu0  ;;  %v7120_v3 = vpop.f32.mrb[19].mxu1  ;;  %v1162_v6 = vadd.f32 %v1161_v38, %v1144_v52  ;;  %v1165_v7 = vsel %vm1164_vm3, %v1146_v57, 0.0 }
 0x13f   :  { %v1163_v8 = vadd.f32 %v1162_v6, %v1145_v60 }
 0x141   :  { %v1166_v9 = vadd.f32 %v1165_v7, %v1163_v8 }
 0x143   :  { %1167 = vadd.xlane.f32.xlu0 %v1166_v9 }
 0x1d0   :  { %v1168_v27 = vpop.xlane.xlu0 %1167 }
 0x1d1   :  { %v8183_v29 = vmul.f32 0.00048828125, %v1168_v27 }
 0x1d3   :  { %v1170_v16 = vsub.f32 %v8058_v63, %v8183_v29  ;;  %v1171_v30 = vsub.f32 %v8066_v4, %v8183_v29  ;;  %v1172_v17 = vsub.f32 %v8060_v0, %v8183_v29  ;;  %v1173_v33 = vsub.f32 %v8068_v5, %v8183_v29 }
 0x1d4   :  { %v1174_v35 = vsub.f32 %v8086_v23, %v8183_v29  ;;  %v1175_v40 = vsub.f32 %v8092_v26, %v8183_v29  ;;  %v1176_v54 = vsub.f32 %v8088_v24, %v8183_v29  ;;  %v1177_v59 = vsub.f32 %v8094_v28, %v8183_v29 }
 0x1d5   :  { %v1189_v18 = vmul.f32 %v1170_v16, %v8050_v1  ;;  %v1190_v32 = vmul.f32 %v1171_v30, %v8053_v61  ;;  %v1191_v36 = vmul.f32 %v1172_v17, %v8056_v62  ;;  %v1192_v52 = vmul.f32 %v1173_v33, %v8062_v2 }
 0x1d6   :  { %v1193_v57 = vmul.f32 %v1174_v35, %v8079_v19  ;;  %v1194_v58 = vmul.f32 %v1175_v40, %v8081_v20  ;;  %v1178_v7 = vsub.f32 %v8116_v46, %v8183_v29  ;;  %v1195_v8 = vmul.f32 %v1176_v54, %v8083_v21 }
 0x1d7   :  { %v1208_v37 = vmul.f32 %v1189_v18, %v1189_v18  ;;  %v1209_v38 = vmul.f32 %v1190_v32, %v1190_v32  ;;  %v1210_v60 = vmul.f32 %v1191_v36, %v1191_v36  ;;  %v1211_v3 = vmul.f32 %v1192_v52, %v1192_v52 }
 0x1d8   :  { %v1212_v9 = vmul.f32 %v1193_v57, %v1193_v57  ;;  %v1179_v16 = vsub.f32 %v8122_v49, %v8183_v29  ;;  %v1196_v30 = vmul.f32 %v1177_v59, %v8100_v34  ;;  %v1213_v17 = vmul.f32 %v1194_v58, %v1194_v58 }
 0x1d9   :  { %v1227_v55 = vadd.f32 %v1209_v38, %v1208_v37  ;;  %v1180_v32 = vsub.f32 %v8118_v47, %v8183_v29  ;;  %v1197_v33 = vmul.f32 %v1178_v7, %v8108_v43  ;;  %v1214_v35 = vmul.f32 %v1195_v8, %v1195_v8 }
 0x1da   :  { %v1181_v37 = vsub.f32 %v8124_v50, %v8183_v29  ;;  %v1198_v38 = vmul.f32 %v1179_v16, %v8111_v44  ;;  %v1215_v40 = vmul.f32 %v1196_v30, %v1196_v30  ;;  %v1182_v54 = vsub.f32 %v8140_v13, %v8183_v29 }
 0x1db   :  { %v1228_v6 = vadd.f32 %v1227_v55, %v1210_v60  ;;  %v1199_v57 = vmul.f32 %v1180_v32, %v8114_v45  ;;  %v1216_v60 = vmul.f32 %v1197_v33, %v1197_v33  ;;  %v1183_v59 = vsub.f32 %v8146_v15, %v8183_v29 }
 0x1dc   :  { %v1200_v58 = vmul.f32 %v1181_v37, %v8130_v56  ;;  %v1184_v7 = vsub.f32 %v8142_v14, %v8183_v29  ;;  %v1201_v8 = vmul.f32 %v1182_v54, %v8134_v10  ;;  %v1185_v16 = vsub.f32 %v8148_v25, %v8183_v29 }
 0x1dd   :  { %v1229_v27 = vadd.f32 %v1228_v6, %v1211_v3  ;;  %v1217_v3 = vmul.f32 %v1198_v38, %v1198_v38  ;;  %v1202_v30 = vmul.f32 %v1183_v59, %v8136_v11  ;;  %v1186_v32 = vsub.f32 %v8170_v42, %v8183_v29 }
 0x1de   :  { %v1203_v33 = vmul.f32 %v1184_v7, %v8138_v12  ;;  %v1188_v37 = vsub.f32 %v8172_v51, %v8183_v29  ;;  %v1187_v38 = vsub.f32 %v8176_v53, %v8183_v29 }
 0x1df   :  { %v1230_v18 = vadd.f32 %v1229_v27, %v1212_v9  ;;  %v1218_v9 = vmul.f32 %v1199_v57, %v1199_v57  ;;  %v1205_v57 = vmul.f32 %v1186_v32, %v8162_v41 }
 0x1e0   :  { %v1207_v59 = vmul.f32 %v1188_v37, %v8165_v48 }
 0x1e1   :  { %v1231_v36 = vadd.f32 %v1230_v18, %v1213_v17  ;;  %v1219_v17 = vmul.f32 %v1200_v58, %v1200_v58  ;;  %v1206_v58 = vmul.f32 %v1187_v38, %v8168_v22  ;;  %v1224_v7 = vmul.f32 %v1205_v57, %v1205_v57 }
 0x1e3   :  { %v1232_v52 = vadd.f32 %v1231_v36, %v1214_v35  ;;  %v1220_v35 = vmul.f32 %v1201_v8, %v1201_v8 }
 0x1e5   :  { %v1233_v55 = vadd.f32 %v1232_v52, %v1215_v40  ;;  %v1204_v40 = vmul.f32 %v1185_v16, %v8154_v31  ;;  %v1221_v52 = vmul.f32 %v1202_v30, %v1202_v30 }
 0x1e7   :  { %v1234_v6 = vadd.f32 %v1233_v55, %v1216_v60  ;;  %v1222_v60 = vmul.f32 %v1203_v33, %v1203_v33 }
 0x1e9   :  { %v1235_v27 = vadd.f32 %v1234_v6, %v1217_v3  ;;  %v1223_v3 = vmul.f32 %v1204_v40, %v1204_v40  ;;  %v1253_v40 = vld [vmem:[%s10033_s3] sm:$0xff]  ;;  %s7653_s3 = smov 127  }
 0x1eb   :  { %v1236_v18 = vadd.f32 %v1235_v27, %v1218_v9  ;;  %v1226_v9 = vmul.f32 %v1207_v59, %v1207_v59  ;;  %v1225_v27 = vmul.f32 %v1206_v58, %v1206_v58 }
 0x1ed   :  { %v1237_v36 = vadd.f32 %v1236_v18, %v1219_v17  ;;  %v1244_v16 = vsel %vm1164_vm3, %v1226_v9, 0.0 }
 0x1ef   :  { %v1238_v54 = vadd.f32 %v1237_v36, %v1220_v35  ;;  %v1249_v36 = vld [vmem:[%s10032_s2] sm:$0xff]  ;;  %s7652_s2 = smov 35  }
 0x1f1   :  { %v1239_v55 = vadd.f32 %v1238_v54, %v1221_v52 }
 0x1f3   :  { %v1240_v6 = vadd.f32 %v1239_v55, %v1222_v60 }
 0x1f5   :  { %v1241_v8 = vadd.f32 %v1240_v6, %v1223_v3 }
 0x1f7   :  { %v1242_v17 = vadd.f32 %v1241_v8, %v1224_v7 }
 0x1f9   :  { %v1243_v18 = vadd.f32 %v1242_v17, %v1225_v27 }
 0x1fb   :  { %v1245_v30 = vadd.f32 %v1244_v16, %v1243_v18 }
 0x1fd   :  { %1246 = vadd.xlane.f32.xlu0 %v1245_v30 }
 0x28a   :  { %v1247_v35 = vpop.xlane.xlu0 %1246 }
 0x28b   :  { %v1248_v32 = vmul.f32 0.00048828125, %v1247_v35 }
 0x28d   :  { %v1250_v33 = vadd.f32 1e-05, %v1248_v32 }
 0x28f   :  { %7643 = vrsqrt.f32 %v1250_v33 }
 0x299   :  { %v7644_v37 = vpop.eup %7643 }
 0x29a   :  { %v1252_v38 = vmul.f32 %v7644_v37, %v1249_v36 }
 0x29c   :  { %1258 = vperm.xlu1 %7507, %v1252_v38   ;;  %v1254_v52 = vmul.f32 %v1252_v38, %v8183_v29 }
 0x29e   :  { %v1255_v54 = vsub.f32 %v1253_v40, %v1254_v52 }
 0x2a0   :  { %1282 = vperm.xlu1 %7507, %v1255_v54  }
 0x31b   :  { %v8250_v57 = vpop.permute.xlu1 %1258 }
 0x31c   :  { %v1263_v60 = vmul.f32 %v8250_v57, %v8060_v0  ;;  %v1264_v55 = vmul.f32 %v8250_v57, %v8068_v5  ;;  %v1261_v59 = vmul.f32 %v8250_v57, %v8058_v63  ;;  %v1262_v58 = vmul.f32 %v8250_v57, %v8066_v4 }
 0x31d   :  { %v1265_v3 = vmul.f32 %v8250_v57, %v8086_v23  ;;  %v1266_v29 = vmul.f32 %v8250_v57, %v8092_v26  ;;  %v1275_v6 = vmul.f32 %v8250_v57, %v8142_v14  ;;  %v1276_v0 = vmul.f32 %v8250_v57, %v8148_v25 }
 0x31e   :  { %v1267_v5 = vmul.f32 %v8250_v57, %v8088_v24  ;;  %v1268_v63 = vmul.f32 %v8250_v57, %v8094_v28  ;;  %v1279_v4 = vmul.f32 %v8250_v57, %v8172_v51  ;;  %v1269_v23 = vmul.f32 %v8250_v57, %v8116_v46 }
 0x31f   :  { %v8276_v7 = vpop.permute.xlu1 %1282  ;;  %v1270_v26 = vmul.f32 %v8250_v57, %v8122_v49  ;;  %v1271_v14 = vmul.f32 %v8250_v57, %v8118_v47  ;;  %v1272_v24 = vmul.f32 %v8250_v57, %v8124_v50  ;;  %v1273_v28 = vmul.f32 %v8250_v57, %v8140_v13 }
 0x320   :  { %v1287_v25 = vadd.f32 %v8276_v7, %v1263_v60  ;;  %v1288_v51 = vadd.f32 %v8276_v7, %v1264_v55  ;;  %v1285_v46 = vadd.f32 %v8276_v7, %v1261_v59  ;;  %v1286_v8 = vadd.f32 %v8276_v7, %v1262_v58 }
 0x321   :  { %v1289_v9 = vadd.f32 %v8276_v7, %v1265_v3  ;;  %v1290_v49 = vadd.f32 %v8276_v7, %v1266_v29  ;;  %v1299_v47 = vadd.f32 %v8276_v7, %v1275_v6  ;;  %v1300_v27 = vadd.f32 %v8276_v7, %v1276_v0 }
 0x322   :  { %v1306_v50 = vmax.f32 %v1287_v25, 0.0  ;;  %v1307_v17 = vmax.f32 %v1288_v51, 0.0  ;;  %v1304_v18 = vmax.f32 %v1285_v46, 0.0  ;;  %v1305_v13 = vmax.f32 %v1286_v8, 0.0 }
 0x323   :  { %v1308_v16 = vmax.f32 %v1289_v9, 0.0  ;;  %v1309_v30 = vmax.f32 %v1290_v49, 0.0  ;;  %v1318_v35 = vmax.f32 %v1299_v47, 0.0  ;;  %v1319_v32 = vmax.f32 %v1300_v27, 0.0 }
 0x324   :  { %v1325_v33 = vmul.f32 %v1306_v50, %v8056_v62  ;;  %v1326_v36 = vmul.f32 %v1307_v17, %v8062_v2  ;;  %v1323_v37 = vmul.f32 %v1304_v18, %v8050_v1  ;;  %v1324_v38 = vmul.f32 %v1305_v13, %v8053_v61 }
 0x325   :  { %v1327_v40 = vmul.f32 %v1308_v16, %v8079_v19  ;;  %v1328_v52 = vmul.f32 %v1309_v30, %v8081_v20  ;;  %v1337_v54 = vmul.f32 %v1318_v35, %v8138_v12  ;;  %v1338_v60 = vmul.f32 %v1319_v32, %v8154_v31  ;;  %v8796_v12 = vld [vmem:[%s10034_s5 + $0x8] sm:$0xf] }
 0x326   :  { %v7064_v55 = vpack.c.bf16 %v1326_v36, %v1325_v33  ;;  %v7063_v59 = vpack.c.bf16 %v1324_v38, %v1323_v37  ;;  %v1291_v58 = vadd.f32 %v8276_v7, %v1267_v5  ;;  %v1292_v3 = vadd.f32 %v8276_v7, %v1268_v63 }
 0x327   :  { %v7065_v29 = vpack.c.bf16 %v1328_v52, %v1327_v40  ;;  %v7070_v6 = vpack.c.bf16 %v1338_v60, %v1337_v54  ;;  %v1303_v0 = vadd.f32 %v8276_v7, %v1279_v4  ;;  %v1293_v25 = vadd.f32 %v8276_v7, %v1269_v23 }
 0x328   :  { %1422 = vrot.lane.b32.xlu1 %v7064_v55, %s7652_s2  ;;  %1420 = vrot.lane.b32.xlu0 %v7063_v59, %s7652_s2  ;;  %v1310_v51 = vmax.f32 %v1291_v58, 0.0  ;;  %v1311_v46 = vmax.f32 %v1292_v3, 0.0  ;;  %v1294_v8 = vadd.f32 %v8276_v7, %v1270_v26  ;;  %v1295_v9 = vadd.f32 %v8276_v7, %v1271_v14  ;;  %v8337_v58 = vld [vmem:[#allocation2] sm:$0xff] }
 0x329   :  { %v1322_v5 = vmax.f32 %v1303_v0, 0.0  ;;  %v1312_v49 = vmax.f32 %v1293_v25, 0.0  ;;  %v1296_v63 = vadd.f32 %v8276_v7, %v1272_v24  ;;  %v1274_v4 = vmul.f32 %v8250_v57, %v8146_v15  ;;  %1352 = vst.msk [vmem:[#allocation2 + $0x48] sm:$0xf] %vm1351_vm4, %v8337_v58 }
 0x32a   :  { %v1329_v23 = vmul.f32 %v1310_v51, %v8083_v21  ;;  %v1330_v47 = vmul.f32 %v1311_v46, %v8100_v34  ;;  %v1313_v27 = vmax.f32 %v1294_v8, 0.0  ;;  %v1314_v50 = vmax.f32 %v1295_v9, 0.0 }
 0x32b   :  { %v1341_v17 = vmul.f32 %v1322_v5, %v8165_v48  ;;  %v1331_v18 = vmul.f32 %v1312_v49, %v8108_v43  ;;  %v1315_v26 = vmax.f32 %v1296_v63, 0.0  ;;  %v1297_v14 = vadd.f32 %v8276_v7, %v1273_v28 }
 0x32c   :  { %1424 = vrot.lane.b32.xlu1 %v7065_v29, %s7652_s2  ;;  %1434 = vrot.lane.b32.xlu0 %v7070_v6, %s7652_s2  ;;  %v7066_v24 = vpack.c.bf16 %v1330_v47, %v1329_v23  ;;  %v1332_v15 = vmul.f32 %v1313_v27, %v8111_v44  ;;  %v1333_v13 = vmul.f32 %v1314_v50, %v8114_v45  ;;  %vm5871_vm4 = vcmask 474112  }
 0x32d   :  { %v1334_v16 = vmul.f32 %v1315_v26, %v8130_v56  ;;  %v1298_v30 = vadd.f32 %v8276_v7, %v1274_v4  ;;  %v1316_v35 = vmax.f32 %v1297_v14, 0.0  ;;  %v7072_v32 = vpack.c.bf16 %v1341_v17, %v1341_v17 }
 0x32e   :  { %v7067_v33 = vpack.c.bf16 %v1332_v15, %v1331_v18  ;;  %v1277_v36 = vmul.f32 %v8250_v57, %v8170_v42  ;;  %v1278_v28 = vmul.f32 %v8250_v57, %v8176_v53 }
 0x32f   :  { %v7068_v37 = vpack.c.bf16 %v1334_v16, %v1333_v13  ;;  %v1317_v38 = vmax.f32 %v1298_v30, 0.0  ;;  %v1335_v40 = vmul.f32 %v1316_v35, %v8134_v10 }
 0x330   :  { %1426 = vrot.lane.b32.xlu1 %v7066_v24, %s7652_s2  ;;  %1438 = vrot.lane.b32.xlu0 %v7072_v32, %s7652_s2  ;;  %v1301_v52 = vadd.f32 %v8276_v7, %v1277_v36  ;;  %v1302_v54 = vadd.f32 %v8276_v7, %v1278_v28 }
 0x331   :  { %v1336_v60 = vmul.f32 %v1317_v38, %v8136_v11  ;;  %v8987_v11 = vld [vmem:[%s10034_s5 + $0xc] sm:$0xf] }
 0x332   :  { %v1320_v55 = vmax.f32 %v1301_v52, 0.0  ;;  %v1321_v59 = vmax.f32 %v1302_v54, 0.0 }
 0x333   :  { %v7069_v42 = vpack.c.bf16 %v1336_v60, %v1335_v40 }
 0x334   :  { %1428 = vrot.lane.b32.xlu1 %v7067_v33, %s7652_s2  ;;  %v1339_v53 = vmul.f32 %v1320_v55, %v8162_v41  ;;  %v1340_v57 = vmul.f32 %v1321_v59, %v8168_v22  ;;  %v10083_v41 = vmov 0.0  }
 0x336   :  { %v7071_v3 = vpack.c.bf16 %v1340_v57, %v1339_v53 }
 0x338   :  { %1430 = vrot.lane.b32.xlu1 %v7068_v37, %s7652_s2 }
 0x33c   :  { %1432 = vrot.lane.b32.xlu1 %v7069_v42, %s7652_s2 }
 0x340   :  { %1436 = vrot.lane.b32.xlu1 %v7071_v3, %s7652_s2 }
 0x39a   :  { %v1423_v7 = vpop.permute.xlu1 %1422  ;;  %v1421_v29 = vpop.permute.xlu0 %1420 }
 0x39b   :  { %v1441_v6 = vrot.slane %v1423_v7, 4  ;;  %v1440_v0 = vrot.slane %v1421_v29, 4 }
 0x39d   :  { %v1450_v25 = vsel %vm1449_vm7, %v1440_v0, %v1421_v29  ;;  %v1452_v51 = vsel %vm563_vm0, %v1440_v0, %v1441_v6 }
 0x39e   :  { %v1453_v46 = vsel %vm1449_vm7, %v1452_v51, %v1423_v7  ;;  %1482 = vst.msk [vmem:[#allocation2] sm:$0xff] %vm1481_vm8, %v1450_v25  ;;  %v1425_v8 = vpop.permute.xlu1 %1424  ;;  %v1435_v35 = vpop.permute.xlu0 %1434 }
 0x39f   :  { %v1442_v9 = vrot.slane %v1425_v8, 4  ;;  %v8360_v13 = vcombine.high %v1453_v46, %v1453_v46  ;;  %v8362_v16 = vcombine.low %v1453_v46, %v1453_v46  ;;  %v1447_v38 = vrot.slane %v1435_v35, 4 }
 0x3a1   :  { %v1454_v5 = vsel %vm563_vm0, %v1441_v6, %v1442_v9 }
 0x3a2   :  { %v1455_v49 = vsel %vm1449_vm7, %v1454_v5, %v1425_v8  ;;  %v1427_v63 = vpop.permute.xlu1 %1426  ;;  %v1439_v3 = vpop.permute.xlu0 %1438 }
 0x3a3   :  { %v1443_v4 = vrot.slane %v1427_v63, 4  ;;  %v8369_v33 = vcombine.low %v1455_v49, %v1455_v49  ;;  %v8371_v36 = vcombine.high %v1455_v49, %v1455_v49 }
 0x3a5   :  { %v1494_v23 = vld [vmem:[#allocation2] sm:$0xff]  ;;  %v1456_v47 = vsel %vm563_vm0, %v1442_v9, %v1443_v4 }
 0x3a6   :  { %v8349_v27 = vcombine.low %v1494_v23, %v1494_v23  ;;  %v8351_v50 = vcombine.high %v1494_v23, %v1494_v23  ;;  %v1457_v17 = vsel %vm1449_vm7, %v1456_v47, %v1427_v63  ;;  %v1429_v18 = vpop.permute.xlu1 %1428 }
 0x3a7   :  { %v1444_v26 = vrot.slane %v1429_v18, 4  ;;  %v8380_v60 = vcombine.low %v1457_v17, %v1457_v17  ;;  %v8382_v55 = vcombine.high %v1457_v17, %v1457_v17 }
 0x3a8   :  { %1556 = vrot.lane.b32.xlu0 %v8351_v50, %s7653_s3  ;;  %1554 = vrot.lane.b32.xlu1 %v8349_v27, %s7653_s3 }
 0x3a9   :  { %v1458_v14 = vsel %vm563_vm0, %v1443_v4, %v1444_v26 }
 0x3aa   :  { %v1459_v24 = vsel %vm1449_vm7, %v1458_v14, %v1429_v18  ;;  %v1431_v15 = vpop.permute.xlu1 %1430 }
 0x3ab   :  { %v1445_v30 = vrot.slane %v1431_v15, 4  ;;  %v8392_v6 = vcombine.low %v1459_v24, %v1459_v24  ;;  %v8394_v0 = vcombine.high %v1459_v24, %v1459_v24 }
 0x3ac   :  { %1560 = vrot.lane.b32.xlu0 %v8360_v13, %s7653_s3  ;;  %1558 = vrot.lane.b32.xlu1 %v8362_v16, %s7653_s3 }
 0x3ad   :  { %v1460_v32 = vsel %vm563_vm0, %v1444_v26, %v1445_v30 }
 0x3ae   :  { %v1461_v28 = vsel %vm1449_vm7, %v1460_v32, %v1431_v15  ;;  %v1433_v37 = vpop.permute.xlu1 %1432 }
 0x3af   :  { %v1446_v40 = vrot.slane %v1433_v37, 4  ;;  %v8401_v51 = vcombine.low %v1461_v28, %v1461_v28  ;;  %v8403_v46 = vcombine.high %v1461_v28, %v1461_v28  ;;  %v8493_v28 = vld [vmem:[%s10034_s5 + $0x4] sm:$0xf] }
 0x3b0   :  { %1564 = vrot.lane.b32.xlu0 %v8371_v36, %s7653_s3  ;;  %1562 = vrot.lane.b32.xlu1 %v8369_v33, %s7653_s3 }
 0x3b1   :  { %v1462_v52 = vsel %vm563_vm0, %v1445_v30, %v1446_v40  ;;  %v1464_v54 = vsel %vm563_vm0, %v1446_v40, %v1447_v38 }
 0x3b2   :  { %v1463_v59 = vsel %vm1449_vm7, %v1462_v52, %v1433_v37  ;;  %v1465_v42 = vsel %vm1449_vm7, %v1464_v54, %v1435_v35  ;;  %v1437_v53 = vpop.permute.xlu1 %1436 }
 0x3b3   :  { %v1448_v57 = vrot.slane %v1437_v53, 4  ;;  %v8409_v8 = vcombine.low %v1463_v59, %v1463_v59  ;;  %v8411_v9 = vcombine.high %v1463_v59, %v1463_v59  ;;  %v8417_v5 = vcombine.high %v1465_v42, %v1465_v42 }
 0x3b4   :  { %1568 = vrot.lane.b32.xlu0 %v8382_v55, %s7653_s3  ;;  %1566 = vrot.lane.b32.xlu1 %v8380_v60, %s7653_s3  ;;  %v8419_v49 = vcombine.low %v1465_v42, %v1465_v42 }
 0x3b5   :  { %v1466_v7 = vsel %vm563_vm0, %v1447_v38, %v1448_v57  ;;  %v1468_v29 = vsel %vm1449_vm7, %v1448_v57, %v1439_v3 }
 0x3b6   :  { %v1467_v25 = vsel %vm1449_vm7, %v1466_v7, %v1437_v53  ;;  %1492 = vst.msk [vmem:[#allocation2 + $0x48] sm:$0xf] %vm1491_vm9, %v1468_v29 }
 0x3b7   :  { %v8425_v63 = vcombine.low %v1467_v25, %v1467_v25  ;;  %v8427_v4 = vcombine.high %v1467_v25, %v1467_v25 }
 0x3b8   :  { %1572 = vrot.lane.b32.xlu0 %v8394_v0, %s7653_s3  ;;  %1570 = vrot.lane.b32.xlu1 %v8392_v6, %s7653_s3 }
 0x3bc   :  { %1576 = vrot.lane.b32.xlu0 %v8403_v46, %s7653_s3  ;;  %1574 = vrot.lane.b32.xlu1 %v8401_v51, %s7653_s3 }
 0x3bd   :  { %v8433_v23 = vld [vmem:[#allocation2 + $0x48] ss:$0 sps:$4 sm:$0xff]  }
 0x3c0   :  { %1580 = vrot.lane.b32.xlu0 %v8411_v9, %s7653_s3  ;;  %1578 = vrot.lane.b32.xlu1 %v8409_v8, %s7653_s3 }
 0x3c4   :  { %1584 = vrot.lane.b32.xlu0 %v8417_v5, %s7653_s3  ;;  %1582 = vrot.lane.b32.xlu1 %v8419_v49, %s7653_s3 }
 0x3c8   :  { %1588 = vrot.lane.b32.xlu0 %v8427_v4, %s7653_s3  ;;  %1586 = vrot.lane.b32.xlu1 %v8425_v63, %s7653_s3 }
 0x3cc   :  { %2551 = vrot.lane.b32.xlu0 %v8349_v27, %s7654_s16  ;;  %1590 = vrot.lane.b32.xlu1 %v8433_v23, %s7653_s3 }
 0x3d0   :  { %2555 = vrot.lane.b32.xlu0 %v8362_v16, %s7654_s16  ;;  %2553 = vrot.lane.b32.xlu1 %v8351_v50, %s7654_s16 }
 0x3d4   :  { %2559 = vrot.lane.b32.xlu0 %v8369_v33, %s7654_s16  ;;  %2557 = vrot.lane.b32.xlu1 %v8360_v13, %s7654_s16 }
 0x3d8   :  { %2563 = vrot.lane.b32.xlu0 %v8380_v60, %s7654_s16  ;;  %2561 = vrot.lane.b32.xlu1 %v8371_v36, %s7654_s16 }
 0x3dc   :  { %2567 = vrot.lane.b32.xlu0 %v8392_v6, %s7654_s16  ;;  %2565 = vrot.lane.b32.xlu1 %v8382_v55, %s7654_s16 }
 0x3e0   :  { %2571 = vrot.lane.b32.xlu0 %v8401_v51, %s7654_s16  ;;  %2569 = vrot.lane.b32.xlu1 %v8394_v0, %s7654_s16 }
 0x3e4   :  { %2575 = vrot.lane.b32.xlu0 %v8409_v8, %s7654_s16  ;;  %2573 = vrot.lane.b32.xlu1 %v8403_v46, %s7654_s16 }
 0x3e8   :  { %2579 = vrot.lane.b32.xlu0 %v8419_v49, %s7654_s16  ;;  %2577 = vrot.lane.b32.xlu1 %v8411_v9, %s7654_s16 }
 0x3ec   :  { %2583 = vrot.lane.b32.xlu0 %v8425_v63, %s7654_s16  ;;  %2581 = vrot.lane.b32.xlu1 %v8417_v5, %s7654_s16 }
 0x3f0   :  { %2587 = vrot.lane.b32.xlu0 %v8433_v23, %s7654_s16  ;;  %2585 = vrot.lane.b32.xlu1 %v8427_v4, %s7654_s16 }
 0x3f4   :  { %3100 = vrot.lane.b32.xlu0 %v8351_v50, %s7655_s17  ;;  %3098 = vrot.lane.b32.xlu1 %v8349_v27, %s7655_s17 }
 0x3f8   :  { %3104 = vrot.lane.b32.xlu0 %v8360_v13, %s7655_s17  ;;  %3102 = vrot.lane.b32.xlu1 %v8362_v16, %s7655_s17 }
 0x3fc   :  { %3108 = vrot.lane.b32.xlu0 %v8371_v36, %s7655_s17  ;;  %3106 = vrot.lane.b32.xlu1 %v8369_v33, %s7655_s17 }
 0x400   :  { %3112 = vrot.lane.b32.xlu0 %v8382_v55, %s7655_s17  ;;  %3110 = vrot.lane.b32.xlu1 %v8380_v60, %s7655_s17 }
 0x404   :  { %3116 = vrot.lane.b32.xlu0 %v8394_v0, %s7655_s17  ;;  %3114 = vrot.lane.b32.xlu1 %v8392_v6, %s7655_s17 }
 0x408   :  { %3120 = vrot.lane.b32.xlu0 %v8403_v46, %s7655_s17  ;;  %3118 = vrot.lane.b32.xlu1 %v8401_v51, %s7655_s17 }
 0x40c   :  { %3124 = vrot.lane.b32.xlu0 %v8411_v9, %s7655_s17  ;;  %3122 = vrot.lane.b32.xlu1 %v8409_v8, %s7655_s17 }
 0x410   :  { %3128 = vrot.lane.b32.xlu0 %v8417_v5, %s7655_s17  ;;  %3126 = vrot.lane.b32.xlu1 %v8419_v49, %s7655_s17 }
 0x414   :  { %3132 = vrot.lane.b32.xlu0 %v8427_v4, %s7655_s17  ;;  %3130 = vrot.lane.b32.xlu1 %v8425_v63, %s7655_s17 }
 0x418   :  { %3645 = vrot.lane.b32.xlu0 %v8349_v27, %s7656_s18  ;;  %3134 = vrot.lane.b32.xlu1 %v8433_v23, %s7655_s17 }
 0x41a   :  { %v1555_v47 = vpop.permute.xlu1 %1554  ;;  %v1557_v17 = vpop.permute.xlu0 %1556 }
 0x41b   :  { %v1593_v18 = vsel %vm1592_vm10, %v1555_v47, %v1557_v17 }
 0x41c   :  { %3649 = vrot.lane.b32.xlu0 %v8362_v16, %s7656_s18  ;;  %3647 = vrot.lane.b32.xlu1 %v8351_v50, %s7656_s18  ;;  %v1615_v15 = vsel %vm563_vm0, %v1593_v18, 0 }
 0x41e   :  { %v1559_v26 = vpop.permute.xlu1 %1558  ;;  %v1561_v14 = vpop.permute.xlu0 %1560 }
 0x41f   :  { %v1594_v24 = vsel %vm1592_vm10, %v1557_v17, %v1559_v26  ;;  %v1595_v30 = vsel %vm1592_vm10, %v1559_v26, %v1561_v14 }
 0x420   :  { %3653 = vrot.lane.b32.xlu0 %v8369_v33, %s7656_s18  ;;  %3651 = vrot.lane.b32.xlu1 %v8360_v13, %s7656_s18  ;;  %v1621_v38 = vsel %vm563_vm0, %v1595_v30, 0 }
 0x421   :  { %6875 = vmatprep.subr.msk.bf16.mxu0 %vm563_vm0, %v1594_v24 }
 0x422   :  { %1672 = vmatpush1.bf16.msra.mxu0 %v1615_v15  ;;  %v1563_v35 = vpop.permute.xlu1 %1562  ;;  %v1565_v32 = vpop.permute.xlu0 %1564 }
 0x423   :  { %v1596_v37 = vsel %vm1592_vm10, %v1561_v14, %v1563_v35  ;;  %v1597_v40 = vsel %vm1592_vm10, %v1563_v35, %v1565_v32 }
 0x424   :  { %3657 = vrot.lane.b32.xlu0 %v8380_v60, %s7656_s18  ;;  %3655 = vrot.lane.b32.xlu1 %v8371_v36, %s7656_s18  ;;  %v1627_v42 = vsel %vm563_vm0, %v1597_v40, 0 }
 0x425   :  { %6876 = vmatmul.mubr.msk.bf16.vlgmr.msra.gmra.mrb[20].mxu0 %vm1164_vm3, %v8493_v28  ;;  %6877 = vmatprep.subr.msk.bf16.mxu1 %vm563_vm0, %v1596_v37 }
 0x426   :  { %1713 = vmatpush1.bf16.msra.mxu1 %v1621_v38  ;;  %v1567_v52 = vpop.permute.xlu1 %1566  ;;  %v1569_v54 = vpop.permute.xlu0 %1568  ;;  %1785 = vmatprep.mubr.bf16.mxu0 %v8337_v58 }
 0x427   :  { %v1598_v59 = vsel %vm1592_vm10, %v1565_v32, %v1567_v52  ;;  %v1599_v53 = vsel %vm1592_vm10, %v1567_v52, %v1569_v54 }
 0x428   :  { %3661 = vrot.lane.b32.xlu0 %v8392_v6, %s7656_s18  ;;  %3659 = vrot.lane.b32.xlu1 %v8382_v55, %s7656_s18  ;;  %v1633_v29 = vsel %vm563_vm0, %v1599_v53, 0 }
 0x429   :  { %6878 = vmatmul.mubr.msk.bf16.vlgmr.msra.gmra.mrb[20].mxu1 %vm1164_vm3, %v8493_v28  ;;  %6879 = vmatprep.subr.msk.bf16.mxu0 %vm563_vm0, %v1598_v59 }
 0x42a   :  { %1754 = vmatpush1.bf16.msra.mxu0 %v1627_v42  ;;  %v1571_v57 = vpop.permute.xlu1 %1570  ;;  %v1573_v3 = vpop.permute.xlu0 %1572  ;;  %1826 = vmatprep.mubr.bf16.mxu1 %v8337_v58 }
 0x42b   :  { %v1600_v7 = vsel %vm1592_vm10, %v1569_v54, %v1571_v57  ;;  %v1601_v25 = vsel %vm1592_vm10, %v1571_v57, %v1573_v3 }
 0x42c   :  { %3665 = vrot.lane.b32.xlu0 %v8401_v51, %s7656_s18  ;;  %3663 = vrot.lane.b32.xlu1 %v8394_v0, %s7656_s18  ;;  %v1639_v26 = vsel %vm563_vm0, %v1601_v25, 0 }
 0x42d   :  { %6880 = vmatmul.mubr.msk.bf16.vlgmr.msra.gmra.mrb[24].mxu0 %vm1164_vm3, %v8493_v28  ;;  %6881 = vmatprep.subr.msk.bf16.mxu1 %vm563_vm0, %v1600_v7 }
 0x42e   :  { %1795 = vmatpush1.bf16.msra.mxu1 %v1633_v29  ;;  %v1575_v47 = vpop.permute.xlu1 %1574  ;;  %v1577_v17 = vpop.permute.xlu0 %1576  ;;  %1867 = vmatprep.mubr.bf16.mxu0 %v8337_v58 }
 0x42f   :  { %v1602_v18 = vsel %vm1592_vm10, %v1573_v3, %v1575_v47  ;;  %v1603_v14 = vsel %vm1592_vm10, %v1575_v47, %v1577_v17 }
 0x430   :  { %3669 = vrot.lane.b32.xlu0 %v8409_v8, %s7656_s18  ;;  %3667 = vrot.lane.b32.xlu1 %v8403_v46, %s7656_s18  ;;  %v1645_v35 = vsel %vm563_vm0, %v1603_v14, 0  ;;  %v2084_v14 = vsel %vm563_vm0, %v8349_v27, 0 }
 0x431   :  { %6882 = vmatmul.mubr.msk.bf16.vlgmr.msra.gmra.mrb[24].mxu1 %vm1164_vm3, %v8493_v28  ;;  %6883 = vmatprep.subr.msk.bf16.mxu0 %vm563_vm0, %v1602_v18 }
 0x432   :  { %1836 = vmatpush1.bf16.msra.mxu0 %v1639_v26  ;;  %v1579_v24 = vpop.permute.xlu1 %1578  ;;  %v1581_v15 = vpop.permute.xlu0 %1580  ;;  %1908 = vmatprep.mubr.bf16.mxu1 %v8337_v58 }
 0x433   :  { %v1604_v30 = vsel %vm1592_vm10, %v1577_v17, %v1579_v24  ;;  %v1605_v32 = vsel %vm1592_vm10, %v1579_v24, %v1581_v15 }
 0x434   :  { %3673 = vrot.lane.b32.xlu0 %v8419_v49, %s7656_s18  ;;  %3671 = vrot.lane.b32.xlu1 %v8411_v9, %s7656_s18  ;;  %v1651_v52 = vsel %vm563_vm0, %v1605_v32, 0 }
 0x435   :  { %6884 = vmatmul.mubr.msk.bf16.vlgmr.msra.gmra.mrb[28].mxu0 %vm1164_vm3, %v8493_v28  ;;  %6885 = vmatprep.subr.msk.bf16.mxu1 %vm563_vm0, %v1604_v30  ;;  %v2090_v30 = vsel %vm563_vm0, %v8362_v16, 0 }
 0x436   :  { %1877 = vmatpush1.bf16.msra.mxu1 %v1645_v35  ;;  %v1583_v37 = vpop.permute.xlu1 %1582  ;;  %v1585_v38 = vpop.permute.xlu0 %1584  ;;  %1949 = vmatprep.mubr.bf16.mxu0 %v8337_v58 }
 0x437   :  { %v1606_v40 = vsel %vm1592_vm10, %v1581_v15, %v1583_v37  ;;  %v1607_v54 = vsel %vm1592_vm10, %v1583_v37, %v1585_v38  ;;  %v8625_v37 = vld [vmem:[%s10034_s5] sm:$0xf] }
 0x438   :  { %3677 = vrot.lane.b32.xlu0 %v8425_v63, %s7656_s18  ;;  %3675 = vrot.lane.b32.xlu1 %v8417_v5, %s7656_s18  ;;  %v1657_v57 = vsel %vm563_vm0, %v1607_v54, 0 }
 0x439   :  { %6886 = vmatmul.mubr.msk.bf16.vlgmr.msra.gmra.mrb[28].mxu1 %vm1164_vm3, %v8493_v28  ;;  %6887 = vmatprep.subr.msk.bf16.mxu0 %vm563_vm0, %v1606_v40 }
 0x43a   :  { %1918 = vmatpush1.bf16.msra.mxu0 %v1651_v52  ;;  %v1587_v59 = vpop.permute.xlu1 %1586  ;;  %v1589_v42 = vpop.permute.xlu0 %1588  ;;  %1990 = vmatprep.mubr.bf16.mxu1 %v8337_v58  ;;  %v2102_v52 = vsel %vm563_vm0, %v8380_v60, 0 }
 0x43b   :  { %v1608_v53 = vsel %vm1592_vm10, %v1585_v38, %v1587_v59  ;;  %v1609_v3 = vsel %vm1592_vm10, %v1587_v59, %v1589_v42 }
 0x43c   :  { %3681 = vrot.lane.b32.xlu0 %v8433_v23, %s7656_s18  ;;  %3679 = vrot.lane.b32.xlu1 %v8427_v4, %s7656_s18  ;;  %v1663_v17 = vsel %vm563_vm0, %v1609_v3, 0  ;;  %v2114_v3 = vsel %vm563_vm0, %v8401_v51, 0 }
 0x43d   :  { %6888 = vmatmul.mubr.msk.bf16.vlgmr.msra.gmra.mrb[32].mxu0 %vm1164_vm3, %v8493_v28  ;;  %6889 = vmatprep.subr.msk.bf16.mxu1 %vm563_vm0, %v1608_v53 }
 0x43e   :  { %1959 = vmatpush1.bf16.msra.mxu1 %v1657_v57  ;;  %v1591_v7 = vpop.permute.xlu1 %1590  ;;  %v8571_v29 = vpop.permute.xlu0 %2551  ;;  %2031 = vmatprep.mubr.bf16.mxu0 %v8337_v58 }
 0x43f   :  { %v1610_v25 = vsel %vm1592_vm10, %v1589_v42, %v1591_v7  ;;  %7121 = vmatprep.subr.bf16.mxu1 %v10039_v39  ;;  %v1669_v47 = vsel %vm563_vm0, %v1591_v7, 0  ;;  %v2108_v42 = vsel %vm563_vm0, %v8392_v6, 0 }
 0x440   :  { %4194 = vrot.lane.b32.xlu0 %v8351_v50, %s7657_s21  ;;  %4192 = vrot.lane.b32.xlu1 %v8349_v27, %s7657_s21 }
 0x441   :  { %6890 = vmatmul.mubr.msk.bf16.vlgmr.msra.gmra.mrb[32].mxu1 %vm1164_vm3, %v8493_v28  ;;  %6891 = vmatprep.subr.msk.bf16.mxu0 %vm563_vm0, %v1610_v25 }
 0x442   :  { %2000 = vmatpush1.bf16.msra.mxu0 %v1663_v17  ;;  %7122 = vmatpush3.bf16.msra.mxu1 %v1669_v47  ;;  %v8585_v18 = vpop.permute.xlu1 %2553  ;;  %v8587_v26 = vpop.permute.xlu0 %2555  ;;  %v2120_v47 = vsel %vm563_vm0, %v8409_v8, 0 }
 0x443   :  { %6894 = vmatprep.subr.msk.bf16.mxu0 %vm563_vm0, %v8351_v50  ;;  %6896 = vmatprep.subr.msk.bf16.mxu1 %vm563_vm0, %v8360_v13 }
 0x444   :  { %4198 = vrot.lane.b32.xlu0 %v8360_v13, %s7657_s21  ;;  %4196 = vrot.lane.b32.xlu1 %v8362_v16, %s7657_s21 }
 0x445   :  { %6892 = vmatmul.mubr.msk.bf16.vlgmr.msra.gmra.mrb[36].mxu0 %vm1164_vm3, %v8493_v28  ;;  %7123 = vmatprep.mubr.msk.bf16.mxu1 %vm7651_vm2, %v10039_v39 }
 0x446   :  { %2141 = vmatpush1.bf16.msra.mxu0 %v2084_v14  ;;  %v8603_v24 = vpop.permute.xlu1 %2557  ;;  %v8605_v15 = vpop.permute.xlu0 %2559  ;;  %2172 = vmatprep.mubr.bf16.mxu0 %v8337_v58 }
 0x447   :  { %6898 = vmatprep.subr.msk.bf16.mxu0 %vm563_vm0, %v8371_v36 }
 0x448   :  { %4202 = vrot.lane.b32.xlu0 %v8371_v36, %s7657_s21  ;;  %4200 = vrot.lane.b32.xlu1 %v8369_v33, %s7657_s21 }
 0x449   :  { %7124 = vmatmul.mubr.msk.bf16.vlgmr.msra.gmra.mrb[36].mxu1 %vm1164_vm3, %v8493_v28  ;;  %v2096_v28 = vsel %vm563_vm0, %v8369_v33, 0 }
 0x44a   :  { %2182 = vmatpush1.bf16.msra.mxu1 %v2090_v30  ;;  %v8618_v35 = vpop.permute.xlu1 %2561  ;;  %v8620_v32 = vpop.permute.xlu0 %2563  ;;  %2213 = vmatprep.mubr.bf16.mxu1 %v8337_v58  ;;  %v2126_v30 = vsel %vm563_vm0, %v8419_v49, 0 }
 0x44b   :  { %6900 = vmatprep.subr.msk.bf16.mxu1 %vm563_vm0, %v8382_v55 }
 0x44c   :  { %4206 = vrot.lane.b32.xlu0 %v8382_v55, %s7657_s21  ;;  %4204 = vrot.lane.b32.xlu1 %v8380_v60, %s7657_s21 }
 0x44d   :  { %6895 = vmatmul.mubr.msk.bf16.vlgmr.msra.gmra.mrb[20].mxu0 %vm1164_vm3, %v8625_v37 }
 0x44e   :  { %2223 = vmatpush1.bf16.msra.mxu0 %v2096_v28  ;;  %v8638_v38 = vpop.permute.xlu1 %2565  ;;  %v8640_v40 = vpop.permute.xlu0 %2567  ;;  %2254 = vmatprep.mubr.bf16.mxu0 %v8337_v58 }
 0x44f   :  { %6902 = vmatprep.subr.msk.bf16.mxu0 %vm563_vm0, %v8394_v0 }
 0x450   :  { %4210 = vrot.lane.b32.xlu0 %v8394_v0, %s7657_s21  ;;  %4208 = vrot.lane.b32.xlu1 %v8392_v6, %s7657_s21 }
 0x451   :  { %6897 = vmatmul.mubr.msk.bf16.vlgmr.msra.gmra.mrb[20].mxu1 %vm1164_vm3, %v8625_v37 }
 0x452   :  { %2264 = vmatpush1.bf16.msra.mxu1 %v2102_v52  ;;  %v8653_v54 = vpop.permute.xlu1 %2569  ;;  %v8655_v59 = vpop.permute.xlu0 %2571  ;;  %2295 = vmatprep.mubr.bf16.mxu1 %v8337_v58 }
 0x453   :  { %6904 = vmatprep.subr.msk.bf16.mxu1 %vm563_vm0, %v8403_v46 }
 0x454   :  { %4214 = vrot.lane.b32.xlu0 %v8403_v46, %s7657_s21  ;;  %4212 = vrot.lane.b32.xlu1 %v8401_v51, %s7657_s21 }
 0x455   :  { %6899 = vmatmul.mubr.msk.bf16.vlgmr.msra.gmra.mrb[24].mxu0 %vm1164_vm3, %v8625_v37 }
 0x456   :  { %2305 = vmatpush1.bf16.msra.mxu0 %v2108_v42  ;;  %v8668_v53 = vpop.permute.xlu1 %2573  ;;  %v8670_v57 = vpop.permute.xlu0 %2575  ;;  %2336 = vmatprep.mubr.bf16.mxu0 %v8337_v58  ;;  %v2132_v42 = vsel %vm563_vm0, %v8425_v63, 0 }
 0x457   :  { %6906 = vmatprep.subr.msk.bf16.mxu0 %vm563_vm0, %v8411_v9 }
 0x458   :  { %4218 = vrot.lane.b32.xlu0 %v8411_v9, %s7657_s21  ;;  %4216 = vrot.lane.b32.xlu1 %v8409_v8, %s7657_s21 }
 0x459   :  { %6901 = vmatmul.mubr.msk.bf16.vlgmr.msra.gmra.mrb[24].mxu1 %vm1164_vm3, %v8625_v37 }
 0x45a   :  { %2346 = vmatpush1.bf16.msra.mxu1 %v2114_v3  ;;  %v8683_v7 = vpop.permute.xlu1 %2577  ;;  %v8685_v25 = vpop.permute.xlu0 %2579  ;;  %2377 = vmatprep.mubr.bf16.mxu1 %v8337_v58  ;;  %v2591_v3 = vsel %vm2589_vm11, %v8585_v18, %v8587_v26 }
 0x45b   :  { %6908 = vmatprep.subr.msk.bf16.mxu1 %vm563_vm0, %v8417_v5 }
 0x45c   :  { %4222 = vrot.lane.b32.xlu0 %v8417_v5, %s7657_s21  ;;  %4220 = vrot.lane.b32.xlu1 %v8419_v49, %s7657_s21 }
 0x45d   :  { %6903 = vmatmul.mubr.msk.bf16.vlgmr.msra.gmra.mrb[28].mxu0 %vm1164_vm3, %v8625_v37 }
 0x45e   :  { %2387 = vmatpush1.bf16.msra.mxu0 %v2120_v47  ;;  %v8698_v17 = vpop.permute.xlu1 %2581  ;;  %v8700_v14 = vpop.permute.xlu0 %2583  ;;  %2418 = vmatprep.mubr.bf16.mxu0 %v8337_v58 }
 0x45f   :  { %6910 = vmatprep.subr.msk.bf16.mxu0 %vm563_vm0, %v8427_v4 }
 0x460   :  { %4226 = vrot.lane.b32.xlu0 %v8427_v4, %s7657_s21  ;;  %4224 = vrot.lane.b32.xlu1 %v8425_v63, %s7657_s21 }
 0x461   :  { %6905 = vmatmul.mubr.msk.bf16.vlgmr.msra.gmra.mrb[28].mxu1 %vm1164_vm3, %v8625_v37 }
 0x462   :  { %2428 = vmatpush1.bf16.msra.mxu1 %v2126_v30  ;;  %v8713_v28 = vpop.permute.xlu1 %2585  ;;  %v8715_v52 = vpop.permute.xlu0 %2587  ;;  %2459 = vmatprep.mubr.bf16.mxu1 %v8337_v58 }
 0x463   :  { %7127 = vmatprep.subr.bf16.mxu1 %v10039_v39  ;;  %v2590_v39 = vsel %vm2589_vm11, %v8571_v29, %v8585_v18  ;;  %v2592_v18 = vsel %vm2589_vm11, %v8587_v26, %v8603_v24  ;;  %v2594_v26 = vsel %vm2589_vm11, %v8605_v15, %v8618_v35 }
 0x464   :  { %4739 = vrot.lane.b32.xlu0 %v8349_v27, %s7658_s24  ;;  %4228 = vrot.lane.b32.xlu1 %v8433_v23, %s7657_s21  ;;  %v2612_v29 = vsel %vm563_vm0, %v2590_v39, 0  ;;  %v2618_v39 = vsel %vm563_vm0, %v2592_v18, 0 }
 0x465   :  { %6907 = vmatmul.mubr.msk.bf16.vlgmr.msra.gmra.mrb[32].mxu0 %vm1164_vm3, %v8625_v37 }
 0x466   :  { %2469 = vmatpush1.bf16.msra.mxu0 %v2132_v42  ;;  %v8730_v47 = vpop.permute.xlu1 %3098  ;;  %v8732_v30 = vpop.permute.xlu0 %3100  ;;  %2500 = vmatprep.mubr.bf16.mxu0 %v8337_v58  ;;  %v2138_v42 = vsel %vm563_vm0, %v8433_v23, 0 }
 0x467   :  { %6914 = vmatprep.subr.msk.bf16.mxu0 %vm563_vm0, %v2591_v3  ;;  %v2593_v3 = vsel %vm2589_vm11, %v8603_v24, %v8605_v15  ;;  %v2597_v24 = vsel %vm2589_vm11, %v8638_v38, %v8640_v40  ;;  %v2624_v15 = vsel %vm563_vm0, %v2594_v26, 0  ;;  %v2601_v26 = vsel %vm2589_vm11, %v8668_v53, %v8670_v57 }
 0x468   :  { %4743 = vrot.lane.b32.xlu0 %v8362_v16, %s7658_s24  ;;  %4741 = vrot.lane.b32.xlu1 %v8351_v50, %s7658_s24 }
 0x469   :  { %6909 = vmatmul.mubr.msk.bf16.vlgmr.msra.gmra.mrb[32].mxu1 %vm1164_vm3, %v8625_v37 }
 0x46a   :  { %7128 = vmatpush3.bf16.msra.mxu1 %v2138_v42  ;;  %v8750_v48 = vpop.permute.xlu1 %3102  ;;  %v8752_v22 = vpop.permute.xlu0 %3104  ;;  %7129 = vmatprep.mubr.msk.bf16.mxu1 %vm7651_vm2, %v10083_v41  ;;  %v2595_v42 = vsel %vm2589_vm11, %v8618_v35, %v8620_v32  ;;  %v2596_v35 = vsel %vm2589_vm11, %v8620_v32, %v8638_v38  ;;  %v2598_v38 = vsel %vm2589_vm11, %v8640_v40, %v8653_v54 }
 0x46b   :  { %6916 = vmatprep.subr.msk.bf16.mxu1 %vm563_vm0, %v2593_v3  ;;  %v2630_v32 = vsel %vm563_vm0, %v2596_v35, 0  ;;  %v2636_v40 = vsel %vm563_vm0, %v2598_v38, 0  ;;  %v2603_v35 = vsel %vm2589_vm11, %v8683_v7, %v8685_v25  ;;  %v2605_v38 = vsel %vm2589_vm11, %v8698_v17, %v8700_v14 }
 0x46c   :  { %4745 = vrot.lane.b32.xlu1 %v8360_v13, %s7658_s24  ;;  %4747 = vrot.lane.b32.xlu0 %v8369_v33, %s7658_s24 }
 0x46d   :  { %6911 = vmatmul.mubr.msk.bf16.vlgmr.msra.gmra.mrb[36].mxu0 %vm1164_vm3, %v8625_v37 }
 0x46e   :  { %2669 = vmatpush1.bf16.msra.mxu0 %v2612_v29  ;;  %v8770_v3 = vpop.permute.xlu1 %3106  ;;  %v8772_v31 = vpop.permute.xlu0 %3108  ;;  %2700 = vmatprep.mubr.bf16.mxu0 %v8337_v58 }
 0x46f   :  { %6918 = vmatprep.subr.msk.bf16.mxu0 %vm563_vm0, %v2595_v42 }
 0x470   :  { %4749 = vrot.lane.b32.xlu1 %v8371_v36, %s7658_s24  ;;  %4751 = vrot.lane.b32.xlu0 %v8380_v60, %s7658_s24 }
 0x471   :  { %7130 = vmatmul.mubr.msk.bf16.vlgmr.msra.gmra.mrb[36].mxu1 %vm1164_vm3, %v8625_v37  ;;  %v2599_v37 = vsel %vm2589_vm11, %v8653_v54, %v8655_v59  ;;  %v2600_v54 = vsel %vm2589_vm11, %v8655_v59, %v8668_v53  ;;  %v2602_v53 = vsel %vm2589_vm11, %v8670_v57, %v8683_v7  ;;  %v2604_v7 = vsel %vm2589_vm11, %v8685_v25, %v8698_v17 }
 0x472   :  { %2710 = vmatpush1.bf16.msra.mxu1 %v2618_v39  ;;  %v8789_v29 = vpop.permute.xlu1 %3110  ;;  %v8791_v42 = vpop.permute.xlu0 %3112  ;;  %2741 = vmatprep.mubr.bf16.mxu1 %v8337_v58  ;;  %v2642_v59 = vsel %vm563_vm0, %v2600_v54, 0  ;;  %v2648_v57 = vsel %vm563_vm0, %v2602_v53, 0  ;;  %v2607_v54 = vsel %vm2589_vm11, %v8713_v28, %v8715_v52  ;;  %v2654_v25 = vsel %vm563_vm0, %v2604_v7, 0 }
 0x473   :  { %6920 = vmatprep.subr.msk.bf16.mxu1 %vm563_vm0, %v2597_v24  ;;  %v2606_v17 = vsel %vm2589_vm11, %v8700_v14, %v8713_v28  ;;  %v3138_v28 = vsel %vm3136_vm12, %v8732_v30, %v8750_v48 }
 0x474   :  { %4753 = vrot.lane.b32.xlu1 %v8382_v55, %s7658_s24  ;;  %4755 = vrot.lane.b32.xlu0 %v8392_v6, %s7658_s24  ;;  %v2660_v14 = vsel %vm563_vm0, %v2606_v17, 0  ;;  %v3140_v17 = vsel %vm3136_vm12, %v8752_v22, %v8770_v3 }
 0x475   :  { %6915 = vmatmul.mubr.msk.bf16.vlgmr.msra.gmra.mrb[20].mxu0 %vm1164_vm3, %v8796_v12 }
 0x476   :  { %2751 = vmatpush1.bf16.msra.mxu0 %v2624_v15  ;;  %v8813_v18 = vpop.permute.xlu1 %3114  ;;  %v8815_v39 = vpop.permute.xlu0 %3116  ;;  %2782 = vmatprep.mubr.bf16.mxu0 %v8337_v58 }
 0x477   :  { %6922 = vmatprep.subr.msk.bf16.mxu0 %vm563_vm0, %v2599_v37 }
 0x478   :  { %4757 = vrot.lane.b32.xlu1 %v8394_v0, %s7658_s24  ;;  %4759 = vrot.lane.b32.xlu0 %v8401_v51, %s7658_s24 }
 0x479   :  { %6917 = vmatmul.mubr.msk.bf16.vlgmr.msra.gmra.mrb[20].mxu1 %vm1164_vm3, %v8796_v12 }
 0x47a   :  { %2792 = vmatpush1.bf16.msra.mxu1 %v2630_v32  ;;  %v8832_v24 = vpop.permute.xlu1 %3118  ;;  %v8834_v15 = vpop.permute.xlu0 %3120  ;;  %2823 = vmatprep.mubr.bf16.mxu1 %v8337_v58 }
 0x47b   :  { %6924 = vmatprep.subr.msk.bf16.mxu1 %vm563_vm0, %v2601_v26 }
 0x47c   :  { %4761 = vrot.lane.b32.xlu1 %v8403_v46, %s7658_s24  ;;  %4763 = vrot.lane.b32.xlu0 %v8409_v8, %s7658_s24 }
 0x47d   :  { %6919 = vmatmul.mubr.msk.bf16.vlgmr.msra.gmra.mrb[24].mxu0 %vm1164_vm3, %v8796_v12 }
 0x47e   :  { %2833 = vmatpush1.bf16.msra.mxu0 %v2636_v40  ;;  %v8851_v37 = vpop.permute.xlu1 %3122  ;;  %v8853_v32 = vpop.permute.xlu0 %3124  ;;  %2864 = vmatprep.mubr.bf16.mxu0 %v8337_v58 }
 0x47f   :  { %6926 = vmatprep.subr.msk.bf16.mxu0 %vm563_vm0, %v2603_v35 }
 0x480   :  { %4765 = vrot.lane.b32.xlu1 %v8411_v9, %s7658_s24  ;;  %4767 = vrot.lane.b32.xlu0 %v8419_v49, %s7658_s24 }
 0x481   :  { %6921 = vmatmul.mubr.msk.bf16.vlgmr.msra.gmra.mrb[24].mxu1 %vm1164_vm3, %v8796_v12 }
 0x482   :  { %2874 = vmatpush1.bf16.msra.mxu1 %v2642_v59  ;;  %v8870_v26 = vpop.permute.xlu1 %3126  ;;  %v8872_v40 = vpop.permute.xlu0 %3128  ;;  %2905 = vmatprep.mubr.bf16.mxu1 %v8337_v58 }
 0x483   :  { %6928 = vmatprep.subr.msk.bf16.mxu1 %vm563_vm0, %v2605_v38 }
 0x484   :  { %4769 = vrot.lane.b32.xlu1 %v8417_v5, %s7658_s24  ;;  %4771 = vrot.lane.b32.xlu0 %v8425_v63, %s7658_s24 }
 0x485   :  { %6923 = vmatmul.mubr.msk.bf16.vlgmr.msra.gmra.mrb[28].mxu0 %vm1164_vm3, %v8796_v12 }
 0x486   :  { %2915 = vmatpush1.bf16.msra.mxu0 %v2648_v57  ;;  %v8889_v35 = vpop.permute.xlu1 %3130  ;;  %v8891_v59 = vpop.permute.xlu0 %3132  ;;  %2946 = vmatprep.mubr.bf16.mxu0 %v8337_v58 }
 0x487   :  { %6930 = vmatprep.subr.msk.bf16.mxu0 %vm563_vm0, %v2607_v54  ;;  %v2666_v54 = vsel %vm563_vm0, %v8715_v52, 0 }
 0x488   :  { %4773 = vrot.lane.b32.xlu1 %v8427_v4, %s7658_s24  ;;  %4775 = vrot.lane.b32.xlu0 %v8433_v23, %s7658_s24 }
 0x489   :  { %6925 = vmatmul.mubr.msk.bf16.vlgmr.msra.gmra.mrb[28].mxu1 %vm1164_vm3, %v8796_v12 }
 0x48a   :  { %2956 = vmatpush1.bf16.msra.mxu1 %v2654_v25  ;;  %v8905_v53 = vpop.permute.xlu1 %3134  ;;  %v8907_v38 = vpop.permute.xlu0 %3645  ;;  %2987 = vmatprep.mubr.bf16.mxu1 %v8337_v58  ;;  %v3137_v25 = vsel %vm3136_vm12, %v8730_v47, %v8732_v30  ;;  %v3139_v47 = vsel %vm3136_vm12, %v8750_v48, %v8752_v22  ;;  %v3142_v30 = vsel %vm3136_vm12, %v8772_v31, %v8789_v29 }
 0x48b   :  { %7133 = vmatprep.subr.bf16.mxu1 %v10083_v41  ;;  %v3159_v52 = vsel %vm563_vm0, %v3137_v25, 0  ;;  %v3165_v48 = vsel %vm563_vm0, %v3139_v47, 0  ;;  %v3141_v22 = vsel %vm3136_vm12, %v8770_v3, %v8772_v31  ;;  %v3144_v25 = vsel %vm3136_vm12, %v8791_v42, %v8813_v18 }
 0x48c   :  { %5286 = vrot.lane.b32.xlu1 %v8349_v27, %s7659_s27  ;;  %5288 = vrot.lane.b32.xlu0 %v8351_v50, %s7659_s27  ;;  %v3143_v31 = vsel %vm3136_vm12, %v8789_v29, %v8791_v42  ;;  %v3146_v3 = vsel %vm3136_vm12, %v8815_v39, %v8832_v24  ;;  %v3145_v42 = vsel %vm3136_vm12, %v8813_v18, %v8815_v39 }
 0x48d   :  { %6927 = vmatmul.mubr.msk.bf16.vlgmr.msra.gmra.mrb[32].mxu0 %vm1164_vm3, %v8796_v12  ;;  %v3177_v29 = vsel %vm563_vm0, %v3143_v31, 0  ;;  %v3183_v18 = vsel %vm563_vm0, %v3145_v42, 0  ;;  %v3147_v39 = vsel %vm3136_vm12, %v8832_v24, %v8834_v15  ;;  %v3150_v31 = vsel %vm3136_vm12, %v8853_v32, %v8870_v26 }
 0x48e   :  { %2997 = vmatpush1.bf16.msra.mxu0 %v2660_v14  ;;  %v8921_v57 = vpop.permute.xlu1 %3647  ;;  %v8923_v7 = vpop.permute.xlu0 %3649  ;;  %3028 = vmatprep.mubr.bf16.mxu0 %v8337_v58  ;;  %v3189_v24 = vsel %vm563_vm0, %v3147_v39, 0  ;;  %v3152_v42 = vsel %vm3136_vm12, %v8872_v40, %v8889_v35  ;;  %v3154_v39 = vsel %vm3136_vm12, %v8891_v59, %v8905_v53 }
 0x48f   :  { %6934 = vmatprep.subr.msk.bf16.mxu0 %vm563_vm0, %v3138_v28 }
 0x490   :  { %5290 = vrot.lane.b32.xlu1 %v8362_v16, %s7659_s27  ;;  %5292 = vrot.lane.b32.xlu0 %v8360_v13, %s7659_s27 }
 0x491   :  { %6929 = vmatmul.mubr.msk.bf16.vlgmr.msra.gmra.mrb[32].mxu1 %vm1164_vm3, %v8796_v12 }
 0x492   :  { %7134 = vmatpush3.bf16.msra.mxu1 %v2666_v54  ;;  %v8941_v14 = vpop.permute.xlu1 %3651  ;;  %v8943_v28 = vpop.permute.xlu0 %3653  ;;  %7135 = vmatprep.mubr.msk.bf16.mxu1 %vm7651_vm2, %v10083_v41 }
 0x493   :  { %6936 = vmatprep.subr.msk.bf16.mxu1 %vm563_vm0, %v3140_v17 }
 0x494   :  { %5294 = vrot.lane.b32.xlu1 %v8369_v33, %s7659_s27  ;;  %5296 = vrot.lane.b32.xlu0 %v8371_v36, %s7659_s27 }
 0x495   :  { %6931 = vmatmul.mubr.msk.bf16.vlgmr.msra.gmra.mrb[36].mxu0 %vm1164_vm3, %v8796_v12 }
 0x496   :  { %3216 = vmatpush1.bf16.msra.mxu0 %v3159_v52  ;;  %v8961_v54 = vpop.permute.xlu1 %3655  ;;  %v8963_v17 = vpop.permute.xlu0 %3657  ;;  %3247 = vmatprep.mubr.bf16.mxu0 %v8337_v58 }
 0x497   :  { %6938 = vmatprep.subr.msk.bf16.mxu0 %vm563_vm0, %v3142_v30 }
 0x498   :  { %5298 = vrot.lane.b32.xlu1 %v8380_v60, %s7659_s27  ;;  %5300 = vrot.lane.b32.xlu0 %v8382_v55, %s7659_s27 }
 0x499   :  { %7136 = vmatmul.mubr.msk.bf16.vlgmr.msra.gmra.mrb[36].mxu1 %vm1164_vm3, %v8796_v12  ;;  %v3171_v12 = vsel %vm563_vm0, %v3141_v22, 0  ;;  %v3148_v22 = vsel %vm3136_vm12, %v8834_v15, %v8851_v37  ;;  %v3149_v15 = vsel %vm3136_vm12, %v8851_v37, %v8853_v32  ;;  %v3151_v32 = vsel %vm3136_vm12, %v8870_v26, %v8872_v40 }
 0x49a   :  { %3257 = vmatpush1.bf16.msra.mxu1 %v3165_v48  ;;  %v8980_v52 = vpop.permute.xlu1 %3659  ;;  %v8982_v30 = vpop.permute.xlu0 %3661  ;;  %3288 = vmatprep.mubr.bf16.mxu1 %v8337_v58  ;;  %v3195_v37 = vsel %vm563_vm0, %v3149_v15, 0  ;;  %v3201_v26 = vsel %vm563_vm0, %v3151_v32, 0  ;;  %v3153_v40 = vsel %vm3136_vm12, %v8889_v35, %v8891_v59 }
 0x49b   :  { %6940 = vmatprep.subr.msk.bf16.mxu1 %vm563_vm0, %v3144_v25 }
 0x49c   :  { %5302 = vrot.lane.b32.xlu1 %v8392_v6, %s7659_s27  ;;  %5304 = vrot.lane.b32.xlu0 %v8394_v0, %s7659_s27 }
 0x49d   :  { %6935 = vmatmul.mubr.msk.bf16.vlgmr.msra.gmra.mrb[20].mxu0 %vm1164_vm3, %v8987_v11 }
 0x49e   :  { %3298 = vmatpush1.bf16.msra.mxu0 %v3171_v12  ;;  %v9004_v47 = vpop.permute.xlu1 %3663  ;;  %v9006_v48 = vpop.permute.xlu0 %3665  ;;  %3329 = vmatprep.mubr.bf16.mxu0 %v8337_v58 }
 0x49f   :  { %6942 = vmatprep.subr.msk.bf16.mxu0 %vm563_vm0, %v3146_v3 }
 0x4a0   :  { %5306 = vrot.lane.b32.xlu1 %v8401_v51, %s7659_s27  ;;  %5308 = vrot.lane.b32.xlu0 %v8403_v46, %s7659_s27 }
 0x4a1   :  { %6937 = vmatmul.mubr.msk.bf16.vlgmr.msra.gmra.mrb[20].mxu1 %vm1164_vm3, %v8987_v11 }
 0x4a2   :  { %3339 = vmatpush1.bf16.msra.mxu1 %v3177_v29  ;;  %v9023_v25 = vpop.permute.xlu1 %3667  ;;  %v9025_v12 = vpop.permute.xlu0 %3669  ;;  %3370 = vmatprep.mubr.bf16.mxu1 %v8337_v58 }
 0x4a3   :  { %6944 = vmatprep.subr.msk.bf16.mxu1 %vm563_vm0, %v3148_v22 }
 0x4a4   :  { %5310 = vrot.lane.b32.xlu1 %v8409_v8, %s7659_s27  ;;  %5312 = vrot.lane.b32.xlu0 %v8411_v9, %s7659_s27 }
 0x4a5   :  { %6939 = vmatmul.mubr.msk.bf16.vlgmr.msra.gmra.mrb[24].mxu0 %vm1164_vm3, %v8987_v11 }
 0x4a6   :  { %3380 = vmatpush1.bf16.msra.mxu0 %v3183_v18  ;;  %v9042_v3 = vpop.permute.xlu1 %3671  ;;  %v9044_v29 = vpop.permute.xlu0 %3673  ;;  %3411 = vmatprep.mubr.bf16.mxu0 %v8337_v58 }
 0x4a7   :  { %6946 = vmatprep.subr.msk.bf16.mxu0 %vm563_vm0, %v3150_v31 }
 0x4a8   :  { %5314 = vrot.lane.b32.xlu1 %v8419_v49, %s7659_s27  ;;  %5316 = vrot.lane.b32.xlu0 %v8417_v5, %s7659_s27 }
 0x4a9   :  { %6941 = vmatmul.mubr.msk.bf16.vlgmr.msra.gmra.mrb[24].mxu1 %vm1164_vm3, %v8987_v11 }
 0x4aa   :  { %3421 = vmatpush1.bf16.msra.mxu1 %v3189_v24  ;;  %v9061_v22 = vpop.permute.xlu1 %3675  ;;  %v9063_v18 = vpop.permute.xlu0 %3677  ;;  %3452 = vmatprep.mubr.bf16.mxu1 %v8337_v58 }
 0x4ab   :  { %6948 = vmatprep.subr.msk.bf16.mxu1 %vm563_vm0, %v3152_v42 }
 0x4ac   :  { %5318 = vrot.lane.b32.xlu1 %v8425_v63, %s7659_s27  ;;  %5320 = vrot.lane.b32.xlu0 %v8427_v4, %s7659_s27 }
 0x4ad   :  { %6943 = vmatmul.mubr.msk.bf16.vlgmr.msra.gmra.mrb[28].mxu0 %vm1164_vm3, %v8987_v11 }
 0x4ae   :  { %3462 = vmatpush1.bf16.msra.mxu0 %v3195_v37  ;;  %v9080_v31 = vpop.permute.xlu1 %3679  ;;  %v9082_v24 = vpop.permute.xlu0 %3681  ;;  %3493 = vmatprep.mubr.bf16.mxu0 %v8337_v58  ;;  %v3687_v37 = vsel %vm3683_vm13, %v8941_v14, %v8943_v28 }
 0x4af   :  { %6950 = vmatprep.subr.msk.bf16.mxu0 %vm563_vm0, %v3154_v39 }
 0x4b0   :  { %5322 = vrot.lane.b32.xlu1 %v8433_v23, %s7659_s27  ;;  %5833 = vrot.lane.b32.xlu0 %v8349_v27, %s7660_s0  ;;  %v3207_v27 = vsel %vm563_vm0, %v3153_v40, 0  ;;  %v3685_v23 = vsel %vm3683_vm13, %v8921_v57, %v8923_v7 }
 0x4b1   :  { %6945 = vmatmul.mubr.msk.bf16.vlgmr.msra.gmra.mrb[28].mxu1 %vm1164_vm3, %v8987_v11 }
 0x4b2   :  { %3503 = vmatpush1.bf16.msra.mxu1 %v3201_v26  ;;  %v9096_v15 = vpop.permute.xlu1 %4192  ;;  %v9098_v42 = vpop.permute.xlu0 %4194  ;;  %3534 = vmatprep.mubr.bf16.mxu1 %v8337_v58 }
 0x4b3   :  { %7139 = vmatprep.subr.bf16.mxu1 %v10083_v41 }
 0x4b4   :  { %5835 = vrot.lane.b32.xlu1 %v8351_v50, %s7660_s0  ;;  %5837 = vrot.lane.b32.xlu0 %v8362_v16, %s7660_s0  ;;  %v3213_v50 = vsel %vm563_vm0, %v8905_v53, 0  ;;  %v3684_v16 = vsel %vm3683_vm13, %v8907_v38, %v8921_v57  ;;  %v3686_v53 = vsel %vm3683_vm13, %v8923_v7, %v8941_v14  ;;  %v3689_v38 = vsel %vm3683_vm13, %v8961_v54, %v8963_v17 }
 0x4b5   :  { %6947 = vmatmul.mubr.msk.bf16.vlgmr.msra.gmra.mrb[32].mxu0 %vm1164_vm3, %v8987_v11  ;;  %v3688_v7 = vsel %vm3683_vm13, %v8943_v28, %v8961_v54  ;;  %v3691_v14 = vsel %vm3683_vm13, %v8980_v52, %v8982_v30  ;;  %v3690_v28 = vsel %vm3683_vm13, %v8963_v17, %v8980_v52  ;;  %v3693_v54 = vsel %vm3683_vm13, %v9004_v47, %v9006_v48 }
 0x4b6   :  { %3544 = vmatpush1.bf16.msra.mxu0 %v3207_v27  ;;  %v9112_v35 = vpop.permute.xlu1 %4196  ;;  %v9114_v59 = vpop.permute.xlu0 %4198  ;;  %3575 = vmatprep.mubr.bf16.mxu0 %v8337_v58  ;;  %v3692_v17 = vsel %vm3683_vm13, %v8982_v30, %v9004_v47  ;;  %v3695_v52 = vsel %vm3683_vm13, %v9023_v25, %v9025_v12  ;;  %v3694_v30 = vsel %vm3683_vm13, %v9006_v48, %v9023_v25 }
 0x4b7   :  { %6954 = vmatprep.subr.msk.bf16.mxu0 %vm563_vm0, %v3685_v23  ;;  %v3697_v47 = vsel %vm3683_vm13, %v9042_v3, %v9044_v29  ;;  %v3696_v48 = vsel %vm3683_vm13, %v9025_v12, %v9042_v3  ;;  %v3699_v25 = vsel %vm3683_vm13, %v9061_v22, %v9063_v18  ;;  %v3698_v3 = vsel %vm3683_vm13, %v9044_v29, %v9061_v22 }
 0x4b8   :  { %5839 = vrot.lane.b32.xlu1 %v8360_v13, %s7660_s0  ;;  %5841 = vrot.lane.b32.xlu0 %v8369_v33, %s7660_s0  ;;  %v3706_v33 = vsel %vm563_vm0, %v3684_v16, 0  ;;  %v3742_v12 = vsel %vm563_vm0, %v3696_v48, 0  ;;  %v3700_v29 = vsel %vm3683_vm13, %v9063_v18, %v9080_v31 }
 0x4b9   :  { %6949 = vmatmul.mubr.msk.bf16.vlgmr.msra.gmra.mrb[32].mxu1 %vm1164_vm3, %v8987_v11 }
 0x4ba   :  { %7140 = vmatpush3.bf16.msra.mxu1 %v3213_v50  ;;  %v9132_v32 = vpop.permute.xlu1 %4200  ;;  %v9134_v13 = vpop.permute.xlu0 %4202  ;;  %7141 = vmatprep.mubr.msk.bf16.mxu1 %vm7651_vm2, %v10083_v41  ;;  %v3701_v50 = vsel %vm3683_vm13, %v9080_v31, %v9082_v24 }
 0x4bb   :  { %6956 = vmatprep.subr.msk.bf16.mxu1 %vm563_vm0, %v3687_v37  ;;  %v3748_v37 = vsel %vm563_vm0, %v3698_v3, 0 }
 0x4bc   :  { %5843 = vrot.lane.b32.xlu1 %v8371_v36, %s7660_s0  ;;  %5845 = vrot.lane.b32.xlu0 %v8380_v60, %s7660_s0  ;;  %v3712_v60 = vsel %vm563_vm0, %v3686_v53, 0  ;;  %v3754_v53 = vsel %vm563_vm0, %v3700_v29, 0 }
 0x4bd   :  { %6951 = vmatmul.mubr.msk.bf16.vlgmr.msra.gmra.mrb[36].mxu0 %vm1164_vm3, %v8987_v11 }
 0x4be   :  { %3763 = vmatpush1.bf16.msra.mxu0 %v3706_v33  ;;  %v9152_v57 = vpop.permute.xlu1 %4204  ;;  %v9154_v36 = vpop.permute.xlu0 %4206  ;;  %3794 = vmatprep.mubr.bf16.mxu0 %v8337_v58 }
 0x4bf   :  { %6958 = vmatprep.subr.msk.bf16.mxu0 %vm563_vm0, %v3689_v38  ;;  %v4232_v38 = vsel %vm4230_vm14, %v9098_v42, %v9112_v35 }
 0x4c0   :  { %5847 = vrot.lane.b32.xlu1 %v8382_v55, %s7660_s0  ;;  %5849 = vrot.lane.b32.xlu0 %v8392_v6, %s7660_s0  ;;  %v9178_v6 = vld [vmem:[%s10034_s5 + $0x10] sm:$0xf] }
 0x4c1   :  { %7142 = vmatmul.mubr.msk.bf16.vlgmr.msra.gmra.mrb[36].mxu1 %vm1164_vm3, %v8987_v11  ;;  %v3718_v11 = vsel %vm563_vm0, %v3688_v7, 0  ;;  %v4231_v7 = vsel %vm4230_vm14, %v9096_v15, %v9098_v42  ;;  %v4233_v15 = vsel %vm4230_vm14, %v9112_v35, %v9114_v59  ;;  %v4236_v42 = vsel %vm4230_vm14, %v9134_v13, %v9152_v57 }
 0x4c2   :  { %3804 = vmatpush1.bf16.msra.mxu1 %v3712_v60  ;;  %v9171_v39 = vpop.permute.xlu1 %4208  ;;  %v9173_v55 = vpop.permute.xlu0 %4210  ;;  %3835 = vmatprep.mubr.bf16.mxu1 %v8337_v58  ;;  %v3760_v60 = vsel %vm563_vm0, %v9082_v24, 0  ;;  %v4253_v24 = vsel %vm563_vm0, %v4231_v7, 0  ;;  %v4235_v35 = vsel %vm4230_vm14, %v9132_v32, %v9134_v13  ;;  %v4237_v13 = vsel %vm4230_vm14, %v9152_v57, %v9154_v36 }
 0x4c3   :  { %6960 = vmatprep.subr.msk.bf16.mxu1 %vm563_vm0, %v3691_v14  ;;  %v4234_v14 = vsel %vm4230_vm14, %v9114_v59, %v9132_v32  ;;  %v4238_v59 = vsel %vm4230_vm14, %v9154_v36, %v9171_v39  ;;  %v4265_v32 = vsel %vm563_vm0, %v4235_v35, 0  ;;  %v4271_v48 = vsel %vm563_vm0, %v4237_v13, 0 }
 0x4c4   :  { %5851 = vrot.lane.b32.xlu1 %v8394_v0, %s7660_s0  ;;  %5853 = vrot.lane.b32.xlu0 %v8401_v51, %s7660_s0  ;;  %v3724_v51 = vsel %vm563_vm0, %v3690_v28, 0  ;;  %v4239_v57 = vsel %vm4230_vm14, %v9171_v39, %v9173_v55 }
 0x4c5   :  { %6955 = vmatmul.mubr.msk.bf16.vlgmr.msra.gmra.mrb[20].mxu0 %vm1164_vm3, %v9178_v6 }
 0x4c6   :  { %3845 = vmatpush1.bf16.msra.mxu0 %v3718_v11  ;;  %v9195_v26 = vpop.permute.xlu1 %4212  ;;  %v9197_v0 = vpop.permute.xlu0 %4214  ;;  %3876 = vmatprep.mubr.bf16.mxu0 %v8337_v58 }
 0x4c7   :  { %6962 = vmatprep.subr.msk.bf16.mxu0 %vm563_vm0, %v3693_v54  ;;  %v4241_v39 = vsel %vm4230_vm14, %v9195_v26, %v9197_v0 }
 0x4c8   :  { %5855 = vrot.lane.b32.xlu1 %v8403_v46, %s7660_s0  ;;  %5857 = vrot.lane.b32.xlu0 %v8409_v8, %s7660_s0  ;;  %v3730_v8 = vsel %vm563_vm0, %v3692_v17, 0  ;;  %v4259_v17 = vsel %vm563_vm0, %v4233_v15, 0  ;;  %v4283_v3 = vsel %vm563_vm0, %v4241_v39, 0 }
 0x4c9   :  { %6957 = vmatmul.mubr.msk.bf16.vlgmr.msra.gmra.mrb[20].mxu1 %vm1164_vm3, %v9178_v6 }
 0x4ca   :  { %3886 = vmatpush1.bf16.msra.mxu1 %v3724_v51  ;;  %v9214_v40 = vpop.permute.xlu1 %4216  ;;  %v9216_v46 = vpop.permute.xlu0 %4218  ;;  %3917 = vmatprep.mubr.bf16.mxu1 %v8337_v58 }
 0x4cb   :  { %6964 = vmatprep.subr.msk.bf16.mxu1 %vm563_vm0, %v3695_v52  ;;  %v4242_v36 = vsel %vm4230_vm14, %v9197_v0, %v9214_v40 }
 0x4cc   :  { %5859 = vrot.lane.b32.xlu1 %v8411_v9, %s7660_s0  ;;  %5861 = vrot.lane.b32.xlu0 %v8419_v49, %s7660_s0  ;;  %v3736_v49 = vsel %vm563_vm0, %v3694_v30, 0  ;;  %v9348_v30 = vld [vmem:[%s10034_s5 + $0x14] sm:$0xf] }
 0x4cd   :  { %6959 = vmatmul.mubr.msk.bf16.vlgmr.msra.gmra.mrb[24].mxu0 %vm1164_vm3, %v9178_v6 }
 0x4ce   :  { %3927 = vmatpush1.bf16.msra.mxu0 %v3730_v8  ;;  %v9233_v27 = vpop.permute.xlu1 %4220  ;;  %v9235_v9 = vpop.permute.xlu0 %4222  ;;  %3958 = vmatprep.mubr.bf16.mxu0 %v8337_v58 }
 0x4cf   :  { %6966 = vmatprep.subr.msk.bf16.mxu0 %vm563_vm0, %v3697_v47 }
 0x4d0   :  { %5863 = vrot.lane.b32.xlu1 %v8417_v5, %s7660_s0  ;;  %5865 = vrot.lane.b32.xlu0 %v8425_v63, %s7660_s0  ;;  %v7648_v63 = vld [vmem:[#allocation2 + $0x48] ss:$0 sps:$4 sm:$0xff]  }
 0x4d1   :  { %6961 = vmatmul.mubr.msk.bf16.vlgmr.msra.gmra.mrb[24].mxu1 %vm1164_vm3, %v9178_v6 }
 0x4d2   :  { %3968 = vmatpush1.bf16.msra.mxu1 %v3736_v49  ;;  %v9252_v23 = vpop.permute.xlu1 %4224  ;;  %v9254_v5 = vpop.permute.xlu0 %4226  ;;  %3999 = vmatprep.mubr.bf16.mxu1 %v8337_v58 }
 0x4d3   :  { %6968 = vmatprep.subr.msk.bf16.mxu1 %vm563_vm0, %v3699_v25  ;;  %v4277_v25 = vsel %vm563_vm0, %v4239_v57, 0 }
 0x4d4   :  { %5867 = vrot.lane.b32.xlu1 %v8427_v4, %s7660_s0  ;;  %5869 = vrot.lane.b32.xlu0 %v7648_v63, %s7660_s0 }
 0x4d5   :  { %6963 = vmatmul.mubr.msk.bf16.vlgmr.msra.gmra.mrb[28].mxu0 %vm1164_vm3, %v9178_v6 }
 0x4d6   :  { %4009 = vmatpush1.bf16.msra.mxu0 %v3742_v12  ;;  %v9270_v16 = vpop.permute.xlu1 %4228  ;;  %v9272_v4 = vpop.permute.xlu0 %4739  ;;  %4040 = vmatprep.mubr.bf16.mxu0 %v8337_v58 }
 0x4d7   :  { %6970 = vmatprep.subr.msk.bf16.mxu0 %vm563_vm0, %v3701_v50  ;;  %v4243_v50 = vsel %vm4230_vm14, %v9214_v40, %v9216_v46  ;;  %v4245_v40 = vsel %vm4230_vm14, %v9233_v27, %v9235_v9 }
 0x4d8   :  { %v4289_v29 = vsel %vm563_vm0, %v4243_v50, 0 }
 0x4d9   :  { %6965 = vmatmul.mubr.msk.bf16.vlgmr.msra.gmra.mrb[28].mxu1 %vm1164_vm3, %v9178_v6 }
 0x4da   :  { %4050 = vmatpush1.bf16.msra.mxu1 %v3748_v37  ;;  %v9282_v22 = vpop.permute.xlu1 %4741  ;;  %v9284_v33 = vpop.permute.xlu0 %4743  ;;  %4081 = vmatprep.mubr.bf16.mxu1 %v8337_v58 }
 0x4db   :  { %7145 = vmatprep.subr.bf16.mxu1 %v10083_v41  ;;  %v4779_v7 = vsel %vm4777_vm15, %v9282_v22, %v9284_v33 }
 0x4dd   :  { %6967 = vmatmul.mubr.msk.bf16.vlgmr.msra.gmra.mrb[32].mxu0 %vm1164_vm3, %v9178_v6 }
 0x4de   :  { %4091 = vmatpush1.bf16.msra.mxu0 %v3754_v53  ;;  %v9294_v18 = vpop.permute.xlu1 %4745  ;;  %v9296_v31 = vpop.permute.xlu0 %4747  ;;  %4122 = vmatprep.mubr.bf16.mxu0 %v8337_v58  ;;  %v4295_v53 = vsel %vm563_vm0, %v4245_v40, 0 }
 0x4df   :  { %6974 = vmatprep.subr.msk.bf16.mxu0 %vm563_vm0, %v4232_v38  ;;  %v4781_v15 = vsel %vm4777_vm15, %v9294_v18, %v9296_v31 }
 0x4e1   :  { %6969 = vmatmul.mubr.msk.bf16.vlgmr.msra.gmra.mrb[32].mxu1 %vm1164_vm3, %v9178_v6 }
 0x4e2   :  { %7146 = vmatpush3.bf16.msra.mxu1 %v3760_v60  ;;  %v9310_v11 = vpop.permute.xlu1 %4749  ;;  %v9312_v28 = vpop.permute.xlu0 %4751  ;;  %7147 = vmatprep.mubr.msk.bf16.mxu1 %vm7651_vm2, %v10083_v41 }
 0x4e3   :  { %6976 = vmatprep.subr.msk.bf16.mxu1 %vm563_vm0, %v4234_v14 }
 0x4e5   :  { %6971 = vmatmul.mubr.msk.bf16.vlgmr.msra.gmra.mrb[36].mxu0 %vm1164_vm3, %v9178_v6 }
 0x4e6   :  { %4310 = vmatpush1.bf16.msra.mxu0 %v4253_v24  ;;  %v9326_v54 = vpop.permute.xlu1 %4753  ;;  %v9328_v51 = vpop.permute.xlu0 %4755  ;;  %4341 = vmatprep.mubr.bf16.mxu0 %v8337_v58  ;;  %v4778_v24 = vsel %vm4777_vm15, %v9272_v4, %v9282_v22  ;;  %v4780_v4 = vsel %vm4777_vm15, %v9284_v33, %v9294_v18  ;;  %v4783_v22 = vsel %vm4777_vm15, %v9310_v11, %v9312_v28  ;;  %v9483_v18 = vld [vmem:[%s10034_s5 + $0x18] sm:$0xf] }
 0x4e7   :  { %6978 = vmatprep.subr.msk.bf16.mxu0 %vm563_vm0, %v4236_v42  ;;  %v4800_v42 = vsel %vm563_vm0, %v4778_v24, 0  ;;  %v4806_v35 = vsel %vm563_vm0, %v4780_v4, 0  ;;  %v4785_v33 = vsel %vm4777_vm15, %v9326_v54, %v9328_v51 }
 0x4e9   :  { %7148 = vmatmul.mubr.msk.bf16.vlgmr.msra.gmra.mrb[36].mxu1 %vm1164_vm3, %v9178_v6  ;;  %v4240_v6 = vsel %vm4230_vm14, %v9173_v55, %v9195_v26  ;;  %v4244_v55 = vsel %vm4230_vm14, %v9216_v46, %v9233_v27  ;;  %v4246_v26 = vsel %vm4230_vm14, %v9235_v9, %v9252_v23  ;;  %v4248_v46 = vsel %vm4230_vm14, %v9254_v5, %v9270_v16 }
 0x4ea   :  { %4351 = vmatpush1.bf16.msra.mxu1 %v4259_v17  ;;  %v9341_v52 = vpop.permute.xlu1 %4757  ;;  %v9343_v8 = vpop.permute.xlu0 %4759  ;;  %4382 = vmatprep.mubr.bf16.mxu1 %v8337_v58  ;;  %v4247_v27 = vsel %vm4230_vm14, %v9252_v23, %v9254_v5  ;;  %v4307_v5 = vsel %vm563_vm0, %v9270_v16, 0 }
 0x4eb   :  { %6980 = vmatprep.subr.msk.bf16.mxu1 %vm563_vm0, %v4238_v59  ;;  %v4301_v9 = vsel %vm563_vm0, %v4247_v27, 0  ;;  %v4782_v59 = vsel %vm4777_vm15, %v9296_v31, %v9310_v11  ;;  %v4784_v11 = vsel %vm4777_vm15, %v9312_v28, %v9326_v54  ;;  %v4786_v28 = vsel %vm4777_vm15, %v9328_v51, %v9341_v52 }
 0x4ec   :  { %v4812_v31 = vsel %vm563_vm0, %v4782_v59, 0 }
 0x4ed   :  { %6975 = vmatmul.mubr.msk.bf16.vlgmr.msra.gmra.mrb[20].mxu0 %vm1164_vm3, %v9348_v30 }
 0x4ee   :  { %4392 = vmatpush1.bf16.msra.mxu0 %v4265_v32  ;;  %4423 = vmatprep.mubr.bf16.mxu0 %v8337_v58  ;;  %v9363_v47 = vpop.permute.xlu1 %4761  ;;  %v9365_v49 = vpop.permute.xlu0 %4763 }
 0x4ef   :  { %6982 = vmatprep.subr.msk.bf16.mxu0 %vm563_vm0, %v4240_v6  ;;  %v4818_v6 = vsel %vm563_vm0, %v4784_v11, 0  ;;  %v4789_v54 = vsel %vm4777_vm15, %v9363_v47, %v9365_v49 }
 0x4f1   :  { %6977 = vmatmul.mubr.msk.bf16.vlgmr.msra.gmra.mrb[20].mxu1 %vm1164_vm3, %v9348_v30 }
 0x4f2   :  { %4433 = vmatpush1.bf16.msra.mxu1 %v4271_v48  ;;  %4464 = vmatprep.mubr.bf16.mxu1 %v8337_v58  ;;  %v9379_v63 = vpop.permute.xlu1 %4765  ;;  %v9381_v12 = vpop.permute.xlu0 %4767 }
 0x4f3   :  { %6984 = vmatprep.subr.msk.bf16.mxu1 %vm563_vm0, %v4242_v36  ;;  %v4824_v36 = vsel %vm563_vm0, %v4786_v28, 0  ;;  %v4791_v51 = vsel %vm4777_vm15, %v9379_v63, %v9381_v12 }
 0x4f5   :  { %6979 = vmatmul.mubr.msk.bf16.vlgmr.msra.gmra.mrb[24].mxu0 %vm1164_vm3, %v9348_v30 }
 0x4f6   :  { %4474 = vmatpush1.bf16.msra.mxu0 %v4277_v25  ;;  %4505 = vmatprep.mubr.bf16.mxu0 %v8337_v58  ;;  %v9403_v0 = vpop.permute.xlu1 %4769  ;;  %v9405_v37 = vpop.permute.xlu0 %4771  ;;  %v4788_v25 = vsel %vm4777_vm15, %v9343_v8, %v9363_v47 }
 0x4f7   :  { %6986 = vmatprep.subr.msk.bf16.mxu0 %vm563_vm0, %v4244_v55  ;;  %v4830_v55 = vsel %vm563_vm0, %v4788_v25, 0  ;;  %v4793_v47 = vsel %vm4777_vm15, %v9403_v0, %v9405_v37 }
 0x4f9   :  { %6981 = vmatmul.mubr.msk.bf16.vlgmr.msra.gmra.mrb[24].mxu1 %vm1164_vm3, %v9348_v30 }
 0x4fa   :  { %4515 = vmatpush1.bf16.msra.mxu1 %v4283_v3  ;;  %4546 = vmatprep.mubr.bf16.mxu1 %v8337_v58  ;;  %v9420_v38 = vpop.permute.xlu1 %4773  ;;  %v9422_v60 = vpop.permute.xlu0 %4775 }
 0x4fb   :  { %6988 = vmatprep.subr.msk.bf16.mxu1 %vm563_vm0, %v4246_v26  ;;  %v4794_v40 = vsel %vm4777_vm15, %v9405_v37, %v9420_v38  ;;  %v4854_v37 = vsel %vm563_vm0, %v9422_v60, 0 }
 0x4fd   :  { %6983 = vmatmul.mubr.msk.bf16.vlgmr.msra.gmra.mrb[28].mxu0 %vm1164_vm3, %v9348_v30 }
 0x4fe   :  { %4556 = vmatpush1.bf16.msra.mxu0 %v4289_v29  ;;  %4587 = vmatprep.mubr.bf16.mxu0 %v8337_v58  ;;  %v9438_v14 = vpop.permute.xlu1 %5286  ;;  %v9440_v23 = vpop.permute.xlu0 %5288 }
 0x4ff   :  { %6990 = vmatprep.subr.msk.bf16.mxu0 %vm563_vm0, %v4248_v46  ;;  %v4848_v46 = vsel %vm563_vm0, %v4794_v40, 0 }
 0x501   :  { %6985 = vmatmul.mubr.msk.bf16.vlgmr.msra.gmra.mrb[28].mxu1 %vm1164_vm3, %v9348_v30 }
 0x502   :  { %4597 = vmatpush1.bf16.msra.mxu1 %v4295_v53  ;;  %4628 = vmatprep.mubr.bf16.mxu1 %v8337_v58  ;;  %v9457_v16 = vpop.permute.xlu1 %5290  ;;  %v9459_v17 = vpop.permute.xlu0 %5292 }
 0x503   :  { %7151 = vmatprep.subr.bf16.mxu1 %v10083_v41  ;;  %v5326_v53 = vsel %vm5324_vm1, %v9440_v23, %v9457_v16 }
 0x505   :  { %6987 = vmatmul.mubr.msk.bf16.vlgmr.msra.gmra.mrb[32].mxu0 %vm1164_vm3, %v9348_v30 }
 0x506   :  { %4638 = vmatpush1.bf16.msra.mxu0 %v4301_v9  ;;  %4669 = vmatprep.mubr.bf16.mxu0 %v8337_v58  ;;  %v9486_v32 = vpop.permute.xlu1 %5294  ;;  %v9488_v13 = vpop.permute.xlu0 %5296  ;;  %v5325_v9 = vsel %vm5324_vm1, %v9438_v14, %v9440_v23 }
 0x507   :  { %6994 = vmatprep.subr.msk.bf16.mxu0 %vm563_vm0, %v4779_v7  ;;  %v5328_v7 = vsel %vm5324_vm1, %v9459_v17, %v9486_v32 }
 0x509   :  { %6989 = vmatmul.mubr.msk.bf16.vlgmr.msra.gmra.mrb[32].mxu1 %vm1164_vm3, %v9348_v30 }
 0x50a   :  { %7152 = vmatpush3.bf16.msra.mxu1 %v4307_v5  ;;  %7153 = vmatprep.mubr.msk.bf16.mxu1 %vm7651_vm2, %v10083_v41  ;;  %v9503_v48 = vpop.permute.xlu1 %5298  ;;  %v9505_v57 = vpop.permute.xlu0 %5300  ;;  %v5327_v5 = vsel %vm5324_vm1, %v9457_v16, %v9459_v17  ;;  %v9614_v17 = vld [vmem:[%s10034_s5 + $0x1c] sm:$0xf] }
 0x50b   :  { %6996 = vmatprep.subr.msk.bf16.mxu1 %vm563_vm0, %v4781_v15  ;;  %v5330_v14 = vsel %vm5324_vm1, %v9488_v13, %v9503_v48  ;;  %v5353_v15 = vsel %vm563_vm0, %v5327_v5, 0  ;;  %v5331_v59 = vsel %vm5324_vm1, %v9503_v48, %v9505_v57 }
 0x50d   :  { %6991 = vmatmul.mubr.msk.bf16.vlgmr.msra.gmra.mrb[36].mxu0 %vm1164_vm3, %v9348_v30 }
 0x50e   :  { %4857 = vmatpush1.bf16.msra.mxu0 %v4800_v42  ;;  %4888 = vmatprep.mubr.bf16.mxu0 %v8337_v58  ;;  %v9529_v39 = vpop.permute.xlu0 %5304  ;;  %v5329_v42 = vsel %vm5324_vm1, %v9486_v32, %v9488_v13 }
 0x50f   :  { %6998 = vmatprep.subr.msk.bf16.mxu0 %vm563_vm0, %v4783_v22  ;;  %v5359_v4 = vsel %vm563_vm0, %v5329_v42, 0 }
 0x511   :  { %7154 = vmatmul.mubr.msk.bf16.vlgmr.msra.gmra.mrb[36].mxu1 %vm1164_vm3, %v9348_v30  ;;  %v4787_v30 = vsel %vm4777_vm15, %v9341_v52, %v9343_v8  ;;  %v9527_v52 = vpop.permute.xlu1 %5302  ;;  %v4790_v8 = vsel %vm4777_vm15, %v9365_v49, %v9379_v63  ;;  %v4792_v49 = vsel %vm4777_vm15, %v9381_v12, %v9403_v0  ;;  %v4795_v63 = vsel %vm4777_vm15, %v9420_v38, %v9422_v60 }
 0x512   :  { %4898 = vmatpush1.bf16.msra.mxu1 %v4806_v35  ;;  %4929 = vmatprep.mubr.bf16.mxu1 %v8337_v58  ;;  %v4836_v3 = vsel %vm563_vm0, %v4790_v8, 0  ;;  %v9546_v26 = vpop.permute.xlu0 %5308  ;;  %v4842_v29 = vsel %vm563_vm0, %v4792_v49, 0  ;;  %v5347_v60 = vsel %vm563_vm0, %v5325_v9, 0  ;;  %v5332_v16 = vsel %vm5324_vm1, %v9505_v57, %v9527_v52 }
 0x513   :  { %7000 = vmatprep.subr.msk.bf16.mxu1 %vm563_vm0, %v4785_v33  ;;  %v5333_v32 = vsel %vm5324_vm1, %v9527_v52, %v9529_v39 }
 0x515   :  { %6995 = vmatmul.mubr.msk.bf16.vlgmr.msra.gmra.mrb[20].mxu0 %vm1164_vm3, %v9483_v18  ;;  %v9544_v50 = vpop.permute.xlu1 %5306 }
 0x516   :  { %4939 = vmatpush1.bf16.msra.mxu0 %v4812_v31  ;;  %4970 = vmatprep.mubr.bf16.mxu0 %v8337_v58  ;;  %v9567_v0 = vpop.permute.xlu0 %5312  ;;  %v5334_v33 = vsel %vm5324_vm1, %v9529_v39, %v9544_v50 }
 0x517   :  { %7002 = vmatprep.subr.msk.bf16.mxu0 %vm563_vm0, %v4787_v30  ;;  %v5371_v30 = vsel %vm563_vm0, %v5333_v32, 0 }
 0x519   :  { %6997 = vmatmul.mubr.msk.bf16.vlgmr.msra.gmra.mrb[20].mxu1 %vm1164_vm3, %v9483_v18  ;;  %v9565_v12 = vpop.permute.xlu1 %5310 }
 0x51a   :  { %4980 = vmatpush1.bf16.msra.mxu1 %v4818_v6  ;;  %5011 = vmatprep.mubr.bf16.mxu1 %v8337_v58  ;;  %v5317_v27 = vpop.permute.xlu0 %5316  ;;  %v5336_v13 = vsel %vm5324_vm1, %v9546_v26, %v9565_v12  ;;  %v5335_v6 = vsel %vm5324_vm1, %v9544_v50, %v9546_v26 }
 0x51b   :  { %7004 = vmatprep.subr.msk.bf16.mxu1 %vm563_vm0, %v4789_v54  ;;  %v5377_v57 = vsel %vm563_vm0, %v5335_v6, 0 }
 0x51d   :  { %6999 = vmatmul.mubr.msk.bf16.vlgmr.msra.gmra.mrb[24].mxu0 %vm1164_vm3, %v9483_v18  ;;  %v5315_v38 = vpop.permute.xlu1 %5314 }
 0x51e   :  { %5021 = vmatpush1.bf16.msra.mxu0 %v4824_v36  ;;  %5052 = vmatprep.mubr.bf16.mxu0 %v8337_v58  ;;  %v5321_v24 = vpop.permute.xlu0 %5320  ;;  %v5338_v48 = vsel %vm5324_vm1, %v9567_v0, %v5315_v38  ;;  %v5337_v36 = vsel %vm5324_vm1, %v9565_v12, %v9567_v0  ;;  %v5339_v52 = vsel %vm5324_vm1, %v5315_v38, %v5317_v27 }
 0x51f   :  { %7006 = vmatprep.subr.msk.bf16.mxu0 %vm563_vm0, %v4791_v51  ;;  %v5383_v51 = vsel %vm563_vm0, %v5337_v36, 0 }
 0x521   :  { %7001 = vmatmul.mubr.msk.bf16.vlgmr.msra.gmra.mrb[24].mxu1 %vm1164_vm3, %v9483_v18  ;;  %v5319_v23 = vpop.permute.xlu1 %5318 }
 0x522   :  { %5062 = vmatpush1.bf16.msra.mxu1 %v4830_v55  ;;  %5093 = vmatprep.mubr.bf16.mxu1 %v8337_v58  ;;  %v5834_v35 = vpop.permute.xlu0 %5833  ;;  %v5340_v25 = vsel %vm5324_vm1, %v5317_v27, %v5319_v23 }
 0x523   :  { %7008 = vmatprep.subr.msk.bf16.mxu1 %vm563_vm0, %v4793_v47  ;;  %v5389_v47 = vsel %vm563_vm0, %v5339_v52, 0 }
 0x525   :  { %7003 = vmatmul.mubr.msk.bf16.vlgmr.msra.gmra.mrb[28].mxu0 %vm1164_vm3, %v9483_v18  ;;  %v5323_v22 = vpop.permute.xlu1 %5322 }
 0x526   :  { %5103 = vmatpush1.bf16.msra.mxu0 %v4836_v3  ;;  %5134 = vmatprep.mubr.bf16.mxu0 %v8337_v58  ;;  %v5838_v11 = vpop.permute.xlu0 %5837  ;;  %v5342_v39 = vsel %vm5324_vm1, %v5321_v24, %v5323_v22  ;;  %v5341_v3 = vsel %vm5324_vm1, %v5319_v23, %v5321_v24 }
 0x527   :  { %7010 = vmatprep.subr.msk.bf16.mxu0 %vm563_vm0, %v4795_v63  ;;  %v5395_v50 = vsel %vm563_vm0, %v5341_v3, 0 }
 0x529   :  { %7005 = vmatmul.mubr.msk.bf16.vlgmr.msra.gmra.mrb[28].mxu1 %vm1164_vm3, %v9483_v18  ;;  %v5836_v31 = vpop.permute.xlu1 %5835 }
 0x52a   :  { %5144 = vmatpush1.bf16.msra.mxu1 %v4842_v29  ;;  %5175 = vmatprep.mubr.bf16.mxu1 %v8337_v58  ;;  %v5842_v54 = vpop.permute.xlu0 %5841  ;;  %v5873_v63 = vsel %vm5871_vm4, %v5836_v31, %v5838_v11  ;;  %v5401_v29 = vsel %vm563_vm0, %v5323_v22, 0  ;;  %v5872_v40 = vsel %vm5871_vm4, %v5834_v35, %v5836_v31 }
 0x52b   :  { %7157 = vmatprep.subr.bf16.mxu1 %v10083_v41 }
 0x52d   :  { %7007 = vmatmul.mubr.msk.bf16.vlgmr.msra.gmra.mrb[32].mxu0 %vm1164_vm3, %v9483_v18  ;;  %v5840_v28 = vpop.permute.xlu1 %5839 }
 0x52e   :  { %5185 = vmatpush1.bf16.msra.mxu0 %v4848_v46  ;;  %5216 = vmatprep.mubr.bf16.mxu0 %v8337_v58  ;;  %v5846_v8 = vpop.permute.xlu0 %5845  ;;  %v5875_v12 = vsel %vm5871_vm4, %v5840_v28, %v5842_v54 }
 0x52f   :  { %7014 = vmatprep.subr.msk.bf16.mxu0 %vm563_vm0, %v5326_v53  ;;  %v5894_v53 = vsel %vm563_vm0, %v5872_v40, 0 }
 0x531   :  { %7009 = vmatmul.mubr.msk.bf16.vlgmr.msra.gmra.mrb[32].mxu1 %vm1164_vm3, %v9483_v18  ;;  %v5844_v55 = vpop.permute.xlu1 %5843 }
 0x532   :  { %7158 = vmatpush3.bf16.msra.mxu1 %v4854_v37  ;;  %7159 = vmatprep.mubr.msk.bf16.mxu1 %vm7651_vm2, %v10083_v41  ;;  %v5850_v49 = vpop.permute.xlu0 %5849  ;;  %v5874_v37 = vsel %vm5871_vm4, %v5838_v11, %v5840_v28  ;;  %v5877_v38 = vsel %vm5871_vm4, %v5844_v55, %v5846_v8 }
 0x533   :  { %7016 = vmatprep.subr.msk.bf16.mxu1 %vm563_vm0, %v5328_v7  ;;  %v5900_v27 = vsel %vm563_vm0, %v5874_v37, 0 }
 0x535   :  { %7011 = vmatmul.mubr.msk.bf16.vlgmr.msra.gmra.mrb[36].mxu0 %vm1164_vm3, %v9483_v18  ;;  %v5848_v26 = vpop.permute.xlu1 %5847 }
 0x536   :  { %5404 = vmatpush1.bf16.msra.mxu0 %v5347_v60  ;;  %5435 = vmatprep.mubr.bf16.mxu0 %v8337_v58  ;;  %v5854_v46 = vpop.permute.xlu0 %5853  ;;  %v5876_v60 = vsel %vm5871_vm4, %v5842_v54, %v5844_v55  ;;  %v5879_v5 = vsel %vm5871_vm4, %v5848_v26, %v5850_v49  ;;  %v5878_v24 = vsel %vm5871_vm4, %v5846_v8, %v5848_v26 }
 0x537   :  { %7018 = vmatprep.subr.msk.bf16.mxu0 %vm563_vm0, %v5330_v14  ;;  %v7033_v14 = vld [vmem:[%s10034_s5 + $0x20] sm:$0xf]  ;;  %v5906_v23 = vsel %vm563_vm0, %v5876_v60, 0 }
 0x539   :  { %7160 = vmatmul.mubr.msk.bf16.vlgmr.msra.gmra.mrb[36].mxu1 %vm1164_vm3, %v9483_v18  ;;  %v5365_v18 = vsel %vm563_vm0, %v5331_v59, 0  ;;  %v5852_v0 = vpop.permute.xlu1 %5851 }
 0x53a   :  { %5445 = vmatpush1.bf16.msra.mxu1 %v5353_v15  ;;  %5476 = vmatprep.mubr.bf16.mxu1 %v8337_v58  ;;  %v5858_v7 = vpop.permute.xlu0 %5857  ;;  %v5881_v15 = vsel %vm5871_vm4, %v5852_v0, %v5854_v46 }
 0x53b   :  { %7020 = vmatprep.subr.msk.bf16.mxu1 %vm563_vm0, %v5332_v16 }
 0x53d   :  { %7015 = vmatmul.mubr.msk.bf16.vlgmr.msra.gmra.mrb[20].mxu0 %vm1164_vm3, %v9614_v17  ;;  %v5856_v9 = vpop.permute.xlu1 %5855 }
 0x53e   :  { %5486 = vmatpush1.bf16.msra.mxu0 %v5359_v4  ;;  %5517 = vmatprep.mubr.bf16.mxu0 %v8337_v58  ;;  %v5862_v16 = vpop.permute.xlu0 %5861  ;;  %v5880_v4 = vsel %vm5871_vm4, %v5850_v49, %v5852_v0  ;;  %v5883_v22 = vsel %vm5871_vm4, %v5856_v9, %v5858_v7 }
 0x53f   :  { %7022 = vmatprep.subr.msk.bf16.mxu0 %vm563_vm0, %v5334_v33  ;;  %v5918_v35 = vsel %vm563_vm0, %v5880_v4, 0 }
 0x541   :  { %7017 = vmatmul.mubr.msk.bf16.vlgmr.msra.gmra.mrb[20].mxu1 %vm1164_vm3, %v9614_v17  ;;  %v5860_v42 = vpop.permute.xlu1 %5859 }
 0x542   :  { %5527 = vmatpush1.bf16.msra.mxu1 %v5365_v18  ;;  %5558 = vmatprep.mubr.bf16.mxu1 %v8337_v58  ;;  %v5866_v33 = vpop.permute.xlu0 %5865  ;;  %v5882_v18 = vsel %vm5871_vm4, %v5854_v46, %v5856_v9  ;;  %v5885_v32 = vsel %vm5871_vm4, %v5860_v42, %v5862_v16  ;;  %v5884_v31 = vsel %vm5871_vm4, %v5858_v7, %v5860_v42 }
 0x543   :  { %7024 = vmatprep.subr.msk.bf16.mxu1 %vm563_vm0, %v5336_v13  ;;  %v5924_v13 = vsel %vm563_vm0, %v5882_v18, 0 }
 0x545   :  { %7019 = vmatmul.mubr.msk.bf16.vlgmr.msra.gmra.mrb[24].mxu0 %vm1164_vm3, %v9614_v17  ;;  %v5864_v59 = vpop.permute.xlu1 %5863 }
 0x546   :  { %5568 = vmatpush1.bf16.msra.mxu0 %v5371_v30  ;;  %5599 = vmatprep.mubr.bf16.mxu0 %v8337_v58  ;;  %v5887_v11 = vsel %vm5871_vm4, %v5864_v59, %v5866_v33  ;;  %v5870_v6 = vpop.permute.xlu0 %5869 }
 0x547   :  { %7026 = vmatprep.subr.msk.bf16.mxu0 %vm563_vm0, %v5338_v48  ;;  %v5930_v48 = vsel %vm563_vm0, %v5884_v31, 0 }
 0x549   :  { %7021 = vmatmul.mubr.msk.bf16.vlgmr.msra.gmra.mrb[24].mxu1 %vm1164_vm3, %v9614_v17  ;;  %v5868_v30 = vpop.permute.xlu1 %5867 }
 0x54a   :  { %5609 = vmatpush1.bf16.msra.mxu1 %v5377_v57  ;;  %5640 = vmatprep.mubr.bf16.mxu1 %v8337_v58  ;;  %v5886_v57 = vsel %vm5871_vm4, %v5862_v16, %v5864_v59  ;;  %v5889_v28 = vsel %vm5871_vm4, %v5868_v30, %v5870_v6  ;;  %v5888_v36 = vsel %vm5871_vm4, %v5866_v33, %v5868_v30 }
 0x54b   :  { %7028 = vmatprep.subr.msk.bf16.mxu1 %vm563_vm0, %v5340_v25  ;;  %v5936_v54 = vsel %vm563_vm0, %v5886_v57, 0  ;;  %v5942_v25 = vsel %vm563_vm0, %v5888_v36, 0 }
 0x54d   :  { %7023 = vmatmul.mubr.msk.bf16.vlgmr.msra.gmra.mrb[28].mxu0 %vm1164_vm3, %v9614_v17 }
 0x54e   :  { %5650 = vmatpush1.bf16.msra.mxu0 %v5383_v51  ;;  %5681 = vmatprep.mubr.bf16.mxu0 %v8337_v58  ;;  %v5948_v51 = vsel %vm563_vm0, %v5870_v6, 0 }
 0x54f   :  { %7030 = vmatprep.subr.msk.bf16.mxu0 %vm563_vm0, %v5342_v39 }
 0x551   :  { %7025 = vmatmul.mubr.msk.bf16.vlgmr.msra.gmra.mrb[28].mxu1 %vm1164_vm3, %v9614_v17 }
 0x552   :  { %5691 = vmatpush1.bf16.msra.mxu1 %v5389_v47  ;;  %5722 = vmatprep.mubr.bf16.mxu1 %v8337_v58 }
 0x553   :  { %7163 = vmatprep.subr.bf16.mxu1 %v10083_v41 }
 0x555   :  { %7027 = vmatmul.mubr.msk.bf16.vlgmr.msra.gmra.mrb[32].mxu0 %vm1164_vm3, %v9614_v17 }
 0x556   :  { %5732 = vmatpush1.bf16.msra.mxu0 %v5395_v50  ;;  %5763 = vmatprep.mubr.bf16.mxu0 %v8337_v58 }
 0x557   :  { %7034 = vmatprep.subr.msk.bf16.mxu0 %vm563_vm0, %v5873_v63 }
 0x559   :  { %7029 = vmatmul.mubr.msk.bf16.vlgmr.msra.gmra.mrb[32].mxu1 %vm1164_vm3, %v9614_v17 }
 0x55a   :  { %7164 = vmatpush3.bf16.msra.mxu1 %v5401_v29  ;;  %7165 = vmatprep.mubr.msk.bf16.mxu1 %vm7651_vm2, %v10083_v41 }
 0x55b   :  { %7036 = vmatprep.subr.msk.bf16.mxu1 %vm563_vm0, %v5875_v12 }
 0x55d   :  { %7031 = vmatmul.mubr.msk.bf16.vlgmr.msra.gmra.mrb[36].mxu0 %vm1164_vm3, %v9614_v17 }
 0x55e   :  { %5951 = vmatpush1.bf16.msra.mxu0 %v5894_v53  ;;  %5982 = vmatprep.mubr.bf16.mxu0 %v8337_v58 }
 0x55f   :  { %7038 = vmatprep.subr.msk.bf16.mxu0 %vm563_vm0, %v5877_v38 }
 0x561   :  { %7166 = vmatmul.mubr.msk.bf16.vlgmr.msra.gmra.mrb[36].mxu1 %vm1164_vm3, %v9614_v17  ;;  %v5912_v17 = vsel %vm563_vm0, %v5878_v24, 0 }
 0x562   :  { %5992 = vmatpush1.bf16.msra.mxu1 %v5900_v27  ;;  %6023 = vmatprep.mubr.bf16.mxu1 %v8337_v58 }
 0x563   :  { %7040 = vmatprep.subr.msk.bf16.mxu1 %vm563_vm0, %v5879_v5 }
 0x565   :  { %7035 = vmatmul.mubr.msk.bf16.vlgmr.msra.gmra.mrb[20].mxu0 %vm1164_vm3, %v7033_v14 }
 0x566   :  { %6033 = vmatpush1.bf16.msra.mxu0 %v5906_v23  ;;  %6064 = vmatprep.mubr.bf16.mxu0 %v8337_v58 }
 0x567   :  { %7042 = vmatprep.subr.msk.bf16.mxu0 %vm563_vm0, %v5881_v15 }
 0x569   :  { %7037 = vmatmul.mubr.msk.bf16.vlgmr.msra.gmra.mrb[20].mxu1 %vm1164_vm3, %v7033_v14 }
 0x56a   :  { %6074 = vmatpush1.bf16.msra.mxu1 %v5912_v17  ;;  %6105 = vmatprep.mubr.bf16.mxu1 %v8337_v58 }
 0x56b   :  { %7044 = vmatprep.subr.msk.bf16.mxu1 %vm563_vm0, %v5883_v22 }
 0x56d   :  { %7039 = vmatmul.mubr.msk.bf16.vlgmr.msra.gmra.mrb[24].mxu0 %vm1164_vm3, %v7033_v14 }
 0x56e   :  { %6115 = vmatpush1.bf16.msra.mxu0 %v5918_v35  ;;  %6146 = vmatprep.mubr.bf16.mxu0 %v8337_v58 }
 0x56f   :  { %7046 = vmatprep.subr.msk.bf16.mxu0 %vm563_vm0, %v5885_v32 }
 0x571   :  { %7041 = vmatmul.mubr.msk.bf16.vlgmr.msra.gmra.mrb[24].mxu1 %vm1164_vm3, %v7033_v14 }
 0x572   :  { %6156 = vmatpush1.bf16.msra.mxu1 %v5924_v13  ;;  %6187 = vmatprep.mubr.bf16.mxu1 %v8337_v58 }
 0x573   :  { %7048 = vmatprep.subr.msk.bf16.mxu1 %vm563_vm0, %v5887_v11 }
 0x575   :  { %7043 = vmatmul.mubr.msk.bf16.vlgmr.msra.gmra.mrb[28].mxu0 %vm1164_vm3, %v7033_v14 }
 0x576   :  { %6197 = vmatpush1.bf16.msra.mxu0 %v5930_v48  ;;  %6228 = vmatprep.mubr.bf16.mxu0 %v8337_v58 }
 0x577   :  { %7050 = vmatprep.subr.msk.bf16.mxu0 %vm563_vm0, %v5889_v28  ;;  %vm6725_vm0 = vcmask 60416  }
 0x579   :  { %7045 = vmatmul.mubr.msk.bf16.vlgmr.msra.gmra.mrb[28].mxu1 %vm1164_vm3, %v7033_v14 }
 0x57a   :  { %6238 = vmatpush1.bf16.msra.mxu1 %v5936_v54  ;;  %6269 = vmatprep.mubr.bf16.mxu1 %v8337_v58 }
 0x57b   :  { %7169 = vmatprep.subr.bf16.mxu1 %v10083_v41 }
 0x57d   :  { %7047 = vmatmul.mubr.msk.bf16.vlgmr.msra.gmra.mrb[32].mxu0 %vm1164_vm3, %v7033_v14 }
 0x57e   :  { %6279 = vmatpush1.bf16.msra.mxu0 %v5942_v25  ;;  %6310 = vmatprep.mubr.bf16.mxu0 %v8337_v58 }
 0x581   :  { %7049 = vmatmul.mubr.msk.bf16.vlgmr.msra.gmra.mrb[32].mxu1 %vm1164_vm3, %v7033_v14 }
 0x582   :  { %7170 = vmatpush3.bf16.msra.mxu1 %v5948_v51  ;;  %7171 = vmatprep.mubr.msk.bf16.mxu1 %vm7651_vm2, %v10083_v41  ;;  %v10084_v51 = vld [vmem:[#allocation12_spill] sm:$0xff] }
 0x585   :  { %7051 = vmatmul.mubr.msk.bf16.vlgmr.msra.gmra.mrb[36].mxu0 %vm1164_vm3, %v7033_v14 }
 0x589   :  { %7172 = vmatmul.mubr.msk.bf16.vlgmr.msra.gmra.mrb[36].mxu1 %vm1164_vm3, %v7033_v14 }
 0x638   :  { %v9747_v52 = vpop.f32.mrb[20].mxu0 }
 0x639   :  { %v6378_v39 = vmul.f32 %v9747_v52, %v8050_v1  ;;  %v9751_v55 = vpop.f32.mrb[21].mxu0 }
 0x63a   :  { %v6379_v58 = vmul.f32 %v9751_v55, %v8053_v61  ;;  %v5988_v8 = vpop.f32.mrb[22].mxu0 }
 0x63b   :  { %v5989_v47 = vpop.f32.mrb[23].mxu0 }
 0x63c   :  { %v6397_v3 = vadd.f32 %v6379_v58, %v6378_v39  ;;  %v9755_v50 = vpop.f32.mrb[20].mxu1 }
 0x63d   :  { %v6380_v41 = vmul.f32 %v9755_v50, %v8056_v62  ;;  %v9759_v26 = vpop.f32.mrb[21].mxu1 }
 0x63e   :  { %v6381_v49 = vmul.f32 %v9759_v26, %v8062_v2  ;;  %v6029_v63 = vpop.f32.mrb[22].mxu1 }
 0x63f   :  { %v6398_v29 = vadd.f32 %v6397_v3, %v6380_v41  ;;  %v6030_v40 = vpop.f32.mrb[23].mxu1 }
 0x640   :  { %v9763_v12 = vpop.f32.mrb[24].mxu0  ;;  %v10086_v40 = vld [vmem:[#allocation14_spill] sm:$0xff] }
 0x641   :  { %v6399_v0 = vadd.f32 %v6398_v29, %v6381_v49  ;;  %v6382_v46 = vmul.f32 %v9763_v12, %v8079_v19  ;;  %v9767_v53 = vpop.f32.mrb[25].mxu0  ;;  %v10085_v49 = vld [vmem:[#allocation13_spill] sm:$0xff] }
 0x642   :  { %v6383_v37 = vmul.f32 %v9767_v53, %v8081_v20  ;;  %v6070_v38 = vpop.f32.mrb[26].mxu0 }
 0x643   :  { %v6400_v27 = vadd.f32 %v6399_v0, %v6382_v46  ;;  %v6071_v9 = vpop.f32.mrb[27].mxu0 }
 0x644   :  { %v9771_v7 = vpop.f32.mrb[24].mxu1 }
 0x645   :  { %v6401_v60 = vadd.f32 %v6400_v27, %v6383_v37  ;;  %v6384_v5 = vmul.f32 %v9771_v7, %v8083_v21  ;;  %v9775_v14 = vpop.f32.mrb[25].mxu1 }
 0x646   :  { %v6385_v23 = vmul.f32 %v9775_v14, %v8100_v34  ;;  %v6111_v24 = vpop.f32.mrb[26].mxu1 }
 0x647   :  { %v6402_v15 = vadd.f32 %v6401_v60, %v6384_v5  ;;  %v6112_v42 = vpop.f32.mrb[27].mxu1  ;;  %v10087_v60 = vld [vmem:[#allocation15_spill] sm:$0xff]  ;;  %v10088_v24 = vld [vmem:[#allocation17_spill] sm:$0xff] }
 0x648   :  { %v9779_v16 = vpop.f32.mrb[28].mxu0 }
 0x649   :  { %v6403_v17 = vadd.f32 %v6402_v15, %v6385_v23  ;;  %v6386_v4 = vmul.f32 %v9779_v16, %v8108_v43  ;;  %v9783_v22 = vpop.f32.mrb[29].mxu0 }
 0x64a   :  { %v6387_v35 = vmul.f32 %v9783_v22, %v8111_v44  ;;  %v6152_v59 = vpop.f32.mrb[30].mxu0 }
 0x64b   :  { %v6404_v33 = vadd.f32 %v6403_v17, %v6386_v4  ;;  %v6153_v18 = vpop.f32.mrb[31].mxu0 }
 0x64c   :  { %v9787_v32 = vpop.f32.mrb[28].mxu1 }
 0x64d   :  { %v6405_v13 = vadd.f32 %v6404_v33, %v6387_v35  ;;  %v6388_v31 = vmul.f32 %v9787_v32, %v8114_v45  ;;  %v9791_v11 = vpop.f32.mrb[29].mxu1  ;;  %v10089_v33 = vld [vmem:[#allocation16_spill] sm:$0xff] }
 0x64e   :  { %v6389_v30 = vmul.f32 %v9791_v11, %v8130_v56  ;;  %v6193_v6 = vpop.f32.mrb[30].mxu1 }
 0x64f   :  { %v6406_v48 = vadd.f32 %v6405_v13, %v6388_v31  ;;  %v6194_v57 = vpop.f32.mrb[31].mxu1 }
 0x650   :  { %v9795_v28 = vpop.f32.mrb[32].mxu0 }
 0x651   :  { %v6407_v54 = vadd.f32 %v6406_v48, %v6389_v30  ;;  %v6390_v36 = vmul.f32 %v9795_v28, %v8134_v10  ;;  %v9799_v25 = vpop.f32.mrb[33].mxu0 }
 0x652   :  { %v6391_v39 = vmul.f32 %v9799_v25, %v10084_v51  ;;  %v6234_v58 = vpop.f32.mrb[34].mxu0 }
 0x653   :  { %v6408_v8 = vadd.f32 %v6407_v54, %v6390_v36  ;;  %v6235_v47 = vpop.f32.mrb[35].mxu0 }
 0x654   :  { %v9803_v3 = vpop.f32.mrb[32].mxu1 }
 0x655   :  { %v6409_v41 = vadd.f32 %v6408_v8, %v6391_v39  ;;  %v6392_v63 = vmul.f32 %v9803_v3, %v10085_v49  ;;  %v9807_v29 = vpop.f32.mrb[33].mxu1 }
 0x656   :  { %v6393_v0 = vmul.f32 %v9807_v29, %v10086_v40  ;;  %v6275_v46 = vpop.f32.mrb[34].mxu1 }
 0x657   :  { %v6410_v37 = vadd.f32 %v6409_v41, %v6392_v63  ;;  %v6276_v38 = vpop.f32.mrb[35].mxu1 }
 0x658   :  { %v9811_v27 = vpop.f32.mrb[36].mxu0 }
 0x659   :  { %v6411_v9 = vadd.f32 %v6410_v37, %v6393_v0  ;;  %v6394_v5 = vmul.f32 %v9811_v27, %v10087_v60  ;;  %v9815_v23 = vpop.f32.mrb[37].mxu0 }
 0x65a   :  { %v6395_v15 = vmul.f32 %v9815_v23, %v10088_v24  ;;  %v6316_v42 = vpop.f32.mrb[38].mxu0 }
 0x65b   :  { %v6412_v17 = vadd.f32 %v6411_v9, %v6394_v5  ;;  %v6317_v4 = vpop.f32.mrb[39].mxu0 }
 0x65c   :  { %v9819_v35 = vpop.f32.mrb[36].mxu1 }
 0x65d   :  { %v6413_v59 = vadd.f32 %v6412_v17, %v6395_v15  ;;  %v6396_v18 = vmul.f32 %v9819_v35, %v10089_v33  ;;  %v7173_v13 = vpop.f32.mrb[37].mxu1 }
 0x65e   :  { %v6356_v31 = vpop.f32.mrb[38].mxu1 }
 0x65f   :  { %v7174_v30 = vpop.f32.mrb[39].mxu1  ;;  %v6414_v6 = vsel %vm1164_vm3, %v6396_v18, 0.0 }
 0x660   :  { %v6415_v48 = vadd.f32 %v6414_v6, %v6413_v59 }
 0x662   :  { %6416 = vadd.xlane.f32.xlu1 %v6415_v48 }
 0x6ef   :  { %v6417_v57 = vpop.xlane.xlu1 %6416 }
 0x6f0   :  { %v9824_v54 = vmul.f32 0.00048828125, %v6417_v57 }
 0x6f2   :  { %v6419_v36 = vsub.f32 %v9747_v52, %v9824_v54  ;;  %v6420_v39 = vsub.f32 %v9751_v55, %v9824_v54  ;;  %v6421_v58 = vsub.f32 %v9755_v50, %v9824_v54  ;;  %v6422_v41 = vsub.f32 %v9759_v26, %v9824_v54 }
 0x6f3   :  { %v6423_v63 = vsub.f32 %v9763_v12, %v9824_v54  ;;  %v6424_v38 = vsub.f32 %v9767_v53, %v9824_v54  ;;  %v6425_v5 = vsub.f32 %v9771_v7, %v9824_v54  ;;  %v6426_v4 = vsub.f32 %v9775_v14, %v9824_v54 }
 0x6f4   :  { %v6438_v8 = vmul.f32 %v6419_v36, %v8050_v1  ;;  %v6439_v47 = vmul.f32 %v6420_v39, %v8053_v61  ;;  %v6440_v0 = vmul.f32 %v6421_v58, %v8056_v62  ;;  %v6441_v9 = vmul.f32 %v6422_v41, %v8062_v2 }
 0x6f5   :  { %v6442_v15 = vmul.f32 %v6423_v63, %v8079_v19  ;;  %v6443_v59 = vmul.f32 %v6424_v38, %v8081_v20  ;;  %v6427_v31 = vsub.f32 %v9779_v16, %v9824_v54  ;;  %v6444_v30 = vmul.f32 %v6425_v5, %v8083_v21 }
 0x6f6   :  { %v6457_v46 = vmul.f32 %v6438_v8, %v6438_v8  ;;  %v6458_v37 = vmul.f32 %v6439_v47, %v6439_v47  ;;  %v6459_v42 = vmul.f32 %v6440_v0, %v6440_v0  ;;  %v6460_v18 = vmul.f32 %v6441_v9, %v6441_v9 }
 0x6f7   :  { %v6461_v6 = vmul.f32 %v6442_v15, %v6442_v15  ;;  %v6428_v57 = vsub.f32 %v9783_v22, %v9824_v54  ;;  %v6445_v36 = vmul.f32 %v6426_v4, %v8100_v34  ;;  %v6462_v39 = vmul.f32 %v6443_v59, %v6443_v59 }
 0x6f8   :  { %v6476_v17 = vadd.f32 %v6458_v37, %v6457_v46  ;;  %v6429_v8 = vsub.f32 %v9787_v32, %v9824_v54  ;;  %v6446_v47 = vmul.f32 %v6427_v31, %v8108_v43  ;;  %v6463_v41 = vmul.f32 %v6444_v30, %v6444_v30 }
 0x6f9   :  { %v6430_v0 = vsub.f32 %v9791_v11, %v9824_v54  ;;  %v6447_v46 = vmul.f32 %v6428_v57, %v8111_v44  ;;  %v6464_v37 = vmul.f32 %v6445_v36, %v6445_v36  ;;  %v6431_v9 = vsub.f32 %v9795_v28, %v9824_v54 }
 0x6fa   :  { %v6477_v13 = vadd.f32 %v6476_v17, %v6459_v42  ;;  %v6448_v5 = vmul.f32 %v6429_v8, %v8114_v45  ;;  %v6465_v15 = vmul.f32 %v6446_v47, %v6446_v47  ;;  %v6432_v17 = vsub.f32 %v9799_v25, %v9824_v54 }
 0x6fb   :  { %v6449_v4 = vmul.f32 %v6430_v0, %v8130_v56  ;;  %v6466_v59 = vmul.f32 %v6447_v46, %v6447_v46  ;;  %v6450_v31 = vmul.f32 %v6431_v9, %v8134_v10  ;;  %v6436_v0 = vsub.f32 %v9815_v23, %v9824_v54 }
 0x6fc   :  { %v6478_v48 = vadd.f32 %v6477_v13, %v6460_v18  ;;  %v6433_v13 = vsub.f32 %v9803_v3, %v9824_v54  ;;  %v6467_v30 = vmul.f32 %v6448_v5, %v6448_v5  ;;  %v6451_v57 = vmul.f32 %v6432_v17, %v10084_v51 }
 0x6fd   :  { %v6468_v36 = vmul.f32 %v6449_v4, %v6449_v4  ;;  %v6469_v47 = vmul.f32 %v6450_v31, %v6450_v31  ;;  %v6455_v17 = vmul.f32 %v6436_v0, %v10088_v24  ;;  %v6502_v0 = vld [vmem:[%s10036_s7] sm:$0xff] }
 0x6fe   :  { %v6479_v58 = vadd.f32 %v6478_v48, %v6461_v6  ;;  %v6434_v48 = vsub.f32 %v9807_v29, %v9824_v54  ;;  %v6452_v8 = vmul.f32 %v6433_v13, %v10085_v49 }
 0x700   :  { %v6480_v63 = vadd.f32 %v6479_v58, %v6462_v39  ;;  %v6435_v58 = vsub.f32 %v9811_v27, %v9824_v54  ;;  %v6453_v46 = vmul.f32 %v6434_v48, %v10086_v40  ;;  %v6471_v5 = vmul.f32 %v6452_v8, %v6452_v8 }
 0x702   :  { %v6481_v38 = vadd.f32 %v6480_v63, %v6463_v41  ;;  %v6437_v63 = vsub.f32 %v9819_v35, %v9824_v54  ;;  %v6454_v9 = vmul.f32 %v6435_v58, %v10087_v60  ;;  %v6472_v4 = vmul.f32 %v6453_v46, %v6453_v46 }
 0x704   :  { %v6482_v42 = vadd.f32 %v6481_v38, %v6464_v37  ;;  %v6470_v37 = vmul.f32 %v6451_v57, %v6451_v57 }
 0x706   :  { %v6483_v18 = vadd.f32 %v6482_v42, %v6465_v15  ;;  %v6456_v42 = vmul.f32 %v6437_v63, %v10089_v33 }
 0x708   :  { %v6484_v6 = vadd.f32 %v6483_v18, %v6466_v59  ;;  %v6473_v18 = vmul.f32 %v6454_v9, %v6454_v9  ;;  %v6475_v31 = vmul.f32 %v6456_v42, %v6456_v42  ;;  %v9899_v9 = vld [vmem:[%s10037_s4 + $0x8] sm:$0xff] }
 0x709   :  { %v9919_v42 = vld [vmem:[%s10037_s4 + $0x28] sm:$0xff] }
 0x70a   :  { %v6485_v39 = vadd.f32 %v6484_v6, %v6467_v30  ;;  %v6474_v30 = vmul.f32 %v6455_v17, %v6455_v17  ;;  %v6493_v48 = vsel %vm1164_vm3, %v6475_v31, 0.0  ;;  %v9924_v17 = vld [vmem:[%s10037_s4 + $0x30] sm:$0xff]  ;;  %v9937_v31 = vld [vmem:[%s10037_s4 + $0x40] sm:$0xff] }
 0x70c   :  { %v6486_v41 = vadd.f32 %v6485_v39, %v6468_v36 }
 0x70e   :  { %v6487_v38 = vadd.f32 %v6486_v41, %v6469_v47  ;;  %v6498_v47 = vld [vmem:[%s10035_s6] sm:$0xff] }
 0x710   :  { %v6488_v15 = vadd.f32 %v6487_v38, %v6470_v37  ;;  %v9894_v38 = vld [vmem:[%s10037_s4] sm:$0xff] }
 0x712   :  { %v6489_v59 = vadd.f32 %v6488_v15, %v6471_v5  ;;  %v9904_v5 = vld [vmem:[%s10037_s4 + $0x10] sm:$0xff]  ;;  %v9914_v15 = vld [vmem:[%s10037_s4 + $0x20] sm:$0xff] }
 0x714   :  { %v6490_v13 = vadd.f32 %v6489_v59, %v6472_v4  ;;  %v9929_v4 = vld [vmem:[%s10037_s4 + $0x38] sm:$0xff]  ;;  %v6563_v59 = vunpack.c.l.bf16 %v9894_v38 }
 0x716   :  { %v6491_v6 = vadd.f32 %v6490_v13, %v6473_v18  ;;  %v6564_v18 = vunpack.c.h.bf16 %v9894_v38  ;;  %v6565_v13 = vunpack.c.l.bf16 %v9899_v9  ;;  %v6578_v38 = vunpack.c.h.bf16 %v9929_v4 }
 0x718   :  { %v6492_v36 = vadd.f32 %v6491_v6, %v6474_v30  ;;  %v9942_v30 = vld [vmem:[%s10037_s4 + $0x48] sm:$0xf]  ;;  %v6566_v6 = vunpack.c.h.bf16 %v9899_v9  ;;  %v6579_v9 = vunpack.c.l.bf16 %v9937_v31 }
 0x71a   :  { %v6494_v57 = vadd.f32 %v6493_v48, %v6492_v36  ;;  %v6567_v36 = vunpack.c.l.bf16 %v9904_v5  ;;  %v6568_v48 = vunpack.c.h.bf16 %v9904_v5  ;;  %v6580_v5 = vunpack.c.h.bf16 %v9937_v31 }
 0x71c   :  { %6495 = vadd.xlane.f32.xlu0 %v6494_v57 }
 0x7a9   :  { %v6496_v39 = vpop.xlane.xlu0 %6495 }
 0x7aa   :  { %v6497_v58 = vmul.f32 0.00048828125, %v6496_v39 }
 0x7ac   :  { %v6499_v8 = vadd.f32 1e-05, %v6497_v58  ;;  %v6571_v58 = vunpack.c.l.bf16 %v9914_v15 }
 0x7ae   :  { %7645 = vrsqrt.f32 %v6499_v8  ;;  %v6572_v8 = vunpack.c.h.bf16 %v9914_v15 }
 0x7b8   :  { %v7646_v41 = vpop.eup %7645 }
 0x7b9   :  { %v6501_v63 = vmul.f32 %v7646_v41, %v6498_v47  ;;  %v6573_v47 = vunpack.c.l.bf16 %v9919_v42  ;;  %v6574_v41 = vunpack.c.h.bf16 %v9919_v42 }
 0x7bb   :  { %6507 = vperm.xlu0 %7508, %v6501_v63   ;;  %v6503_v46 = vmul.f32 %v6501_v63, %v9824_v54  ;;  %v9909_v54 = vld [vmem:[%s10037_s4 + $0x18] sm:$0xff]  ;;  %v6575_v63 = vunpack.c.l.bf16 %v9924_v17 }
 0x7bc   :  { %v6569_v57 = vunpack.c.l.bf16 %v9909_v54  ;;  %v6570_v39 = vunpack.c.h.bf16 %v9909_v54  ;;  %v6581_v54 = vunpack.c.l.bf16 %v9942_v30 }
 0x7bd   :  { %v6504_v37 = vsub.f32 %v6502_v0, %v6503_v46  ;;  %v6576_v0 = vunpack.c.h.bf16 %v9924_v17  ;;  %v6577_v46 = vunpack.c.l.bf16 %v9929_v4 }
 0x7bf   :  { %6531 = vperm.xlu1 %7507, %v6504_v37  }
 0x83a   :  { %v6508_v37 = vpop.permute.xlu0 %6507 }
 0x83b   :  { %v6510_v15 = vmul.f32 %v6508_v37, %v9747_v52  ;;  %v6511_v33 = vmul.f32 %v6508_v37, %v9751_v55  ;;  %v6512_v42 = vmul.f32 %v6508_v37, %v9755_v50  ;;  %v6513_v24 = vmul.f32 %v6508_v37, %v9759_v26 }
 0x83c   :  { %v6514_v17 = vmul.f32 %v6508_v37, %v9763_v12  ;;  %v6515_v60 = vmul.f32 %v6508_v37, %v9767_v53  ;;  %v6516_v4 = vmul.f32 %v6508_v37, %v9771_v7  ;;  %v6517_v40 = vmul.f32 %v6508_v37, %v9775_v14 }
 0x83d   :  { %v6518_v31 = vmul.f32 %v6508_v37, %v9779_v16  ;;  %v6519_v30 = vmul.f32 %v6508_v37, %v9783_v22  ;;  %v6520_v52 = vmul.f32 %v6508_v37, %v9787_v32  ;;  %v6521_v55 = vmul.f32 %v6508_v37, %v9791_v11 }
 0x83e   :  { %v6522_v50 = vmul.f32 %v6508_v37, %v9795_v28  ;;  %v6523_v26 = vmul.f32 %v6508_v37, %v9799_v25  ;;  %v6524_v12 = vmul.f32 %v6508_v37, %v9803_v3  ;;  %v6525_v53 = vmul.f32 %v6508_v37, %v9807_v29  ;;  %v6532_v49 = vpop.permute.xlu1 %6531 }
 0x83f   :  { %v6526_v7 = vmul.f32 %v6508_v37, %v9811_v27  ;;  %v6527_v14 = vmul.f32 %v6508_v37, %v9815_v23  ;;  %v6528_v16 = vmul.f32 %v6508_v37, %v9819_v35  ;;  %v6534_v22 = vadd.f32 %v6532_v49, %v6510_v15 }
 0x840   :  { %v6535_v51 = vadd.f32 %v6532_v49, %v6511_v33  ;;  %v6536_v32 = vadd.f32 %v6532_v49, %v6512_v42  ;;  %v6537_v10 = vadd.f32 %v6532_v49, %v6513_v24  ;;  %v6538_v11 = vadd.f32 %v6532_v49, %v6514_v17 }
 0x841   :  { %v6539_v56 = vadd.f32 %v6532_v49, %v6515_v60  ;;  %v6540_v28 = vadd.f32 %v6532_v49, %v6516_v4  ;;  %v6541_v45 = vadd.f32 %v6532_v49, %v6517_v40  ;;  %v6542_v25 = vadd.f32 %v6532_v49, %v6518_v31 }
 0x842   :  { %v6543_v44 = vadd.f32 %v6532_v49, %v6519_v30  ;;  %v6544_v3 = vadd.f32 %v6532_v49, %v6520_v52  ;;  %v6545_v43 = vadd.f32 %v6532_v49, %v6521_v55  ;;  %v6546_v29 = vadd.f32 %v6532_v49, %v6522_v50 }
 0x843   :  { %v6547_v34 = vadd.f32 %v6532_v49, %v6523_v26  ;;  %v6548_v21 = vadd.f32 %v6532_v49, %v6524_v12  ;;  %v6549_v27 = vadd.f32 %v6532_v49, %v6525_v53  ;;  %v6550_v20 = vadd.f32 %v6532_v49, %v6526_v7 }
 0x844   :  { %v6551_v23 = vadd.f32 %v6532_v49, %v6527_v14  ;;  %v6552_v19 = vadd.f32 %v6532_v49, %v6528_v16  ;;  %v6582_v35 = vadd.f32 %v6563_v59, %v6534_v22  ;;  %v6583_v37 = vadd.f32 %v6564_v18, %v6535_v51  ;;  %v10094_v16 = vld [vmem:[#allocation7_spill] sm:$0xff] }
 0x845   :  { %v6584_v33 = vadd.f32 %v6565_v13, %v6536_v32  ;;  %v6585_v15 = vadd.f32 %v6566_v6, %v6537_v10  ;;  %v6586_v24 = vadd.f32 %v6567_v36, %v6538_v11  ;;  %v6587_v42 = vadd.f32 %v6568_v48, %v6539_v56  ;;  %v10095_v32 = vld [vmem:[#allocation8_spill] sm:$0xff] }
 0x846   :  { %v6588_v60 = vadd.f32 %v6569_v57, %v6540_v28  ;;  %v6589_v17 = vadd.f32 %v6570_v39, %v6541_v45  ;;  %v6590_v40 = vadd.f32 %v6571_v58, %v6542_v25  ;;  %v6591_v4 = vadd.f32 %v6572_v8, %v6543_v44  ;;  %v10096_v28 = vld [vmem:[#allocation9_spill] sm:$0xff]  ;;  %v10097_v25 = vld [vmem:[#allocation10_spill] sm:$0xff] }
 0x847   :  { %v6592_v31 = vadd.f32 %v6573_v47, %v6544_v3  ;;  %v6593_v30 = vadd.f32 %v6574_v41, %v6545_v43  ;;  %v6594_v52 = vadd.f32 %v6575_v63, %v6546_v29  ;;  %v6595_v55 = vadd.f32 %v6576_v0, %v6547_v34  ;;  %v10090_v63 = vld [vmem:[#allocation3_spill] sm:$0xff]  ;;  %v10099_v29 = vld [vmem:[#allocation12_spill] sm:$0xff] }
 0x848   :  { %v6596_v50 = vadd.f32 %v6577_v46, %v6548_v21  ;;  %v6597_v26 = vadd.f32 %v6578_v38, %v6549_v27  ;;  %v6598_v12 = vadd.f32 %v6579_v9, %v6550_v20  ;;  %v6599_v53 = vadd.f32 %v6580_v5, %v6551_v23  ;;  %v10091_v46 = vld [vmem:[#allocation4_spill] sm:$0xff]  ;;  %v10092_v9 = vld [vmem:[#allocation5_spill] sm:$0xff]  ;;  %v10098_v3 = vld [vmem:[#allocation11_spill] sm:$0xff] }
 0x849   :  { %v6600_v7 = vadd.f32 %v6581_v54, %v6552_v19  ;;  %v6601_v49 = vmax.f32 %v6582_v35, 0.0  ;;  %v6602_v59 = vmax.f32 %v6583_v37, 0.0  ;;  %v6603_v51 = vmax.f32 %v6584_v33, 0.0  ;;  %v10093_v54 = vld [vmem:[#allocation6_spill] sm:$0xff]  ;;  %v10100_v27 = vld [vmem:[#allocation13_spill] sm:$0xff]  ;;  %v10102_v33 = vld [vmem:[#allocation15_spill] sm:$0xff] }
 0x84a   :  { %v6604_v18 = vmax.f32 %v6585_v15, 0.0  ;;  %v6605_v10 = vmax.f32 %v6586_v24, 0.0  ;;  %v6606_v13 = vmax.f32 %v6587_v42, 0.0  ;;  %v6607_v56 = vmax.f32 %v6588_v60, 0.0  ;;  %v10101_v35 = vld [vmem:[#allocation14_spill] sm:$0xff]  ;;  %v10103_v24 = vld [vmem:[#allocation17_spill] sm:$0xff] }
 0x84b   :  { %v6608_v6 = vmax.f32 %v6589_v17, 0.0  ;;  %v6609_v45 = vmax.f32 %v6590_v40, 0.0  ;;  %v6610_v36 = vmax.f32 %v6591_v4, 0.0  ;;  %v6611_v44 = vmax.f32 %v6592_v31, 0.0  ;;  %v10104_v60 = vld [vmem:[#allocation16_spill] sm:$0xff] }
 0x84c   :  { %v6612_v43 = vmax.f32 %v6593_v30, 0.0  ;;  %v6613_v48 = vmax.f32 %v6594_v52, 0.0  ;;  %v6614_v34 = vmax.f32 %v6595_v55, 0.0  ;;  %v6615_v21 = vmax.f32 %v6596_v50, 0.0 }
 0x84d   :  { %v6616_v57 = vmax.f32 %v6597_v26, 0.0  ;;  %v6617_v20 = vmax.f32 %v6598_v12, 0.0  ;;  %v6618_v39 = vmax.f32 %v6599_v53, 0.0  ;;  %v6619_v19 = vmax.f32 %v6600_v7, 0.0 }
 0x84e   :  { %v6620_v58 = vmul.f32 %v6601_v49, %v8050_v1  ;;  %v6621_v8 = vmul.f32 %v6602_v59, %v8053_v61  ;;  %v6622_v47 = vmul.f32 %v6603_v51, %v8056_v62  ;;  %v6623_v41 = vmul.f32 %v6604_v18, %v8062_v2 }
 0x84f   :  { %v6624_v0 = vmul.f32 %v6605_v10, %v10090_v63  ;;  %v6625_v38 = vmul.f32 %v6606_v13, %v10091_v46  ;;  %v6626_v5 = vmul.f32 %v6607_v56, %v10092_v9  ;;  %v6627_v14 = vmul.f32 %v6608_v6, %v10093_v54 }
 0x850   :  { %v6628_v22 = vmul.f32 %v6609_v45, %v10094_v16  ;;  %v6629_v11 = vmul.f32 %v6610_v36, %v10095_v32  ;;  %v6630_v1 = vmul.f32 %v6611_v44, %v10096_v28  ;;  %v6631_v61 = vmul.f32 %v6612_v43, %v10097_v25 }
 0x851   :  { %v6632_v62 = vmul.f32 %v6613_v48, %v10098_v3  ;;  %v6633_v2 = vmul.f32 %v6614_v34, %v10099_v29  ;;  %v6634_v23 = vmul.f32 %v6615_v21, %v10100_v27  ;;  %v6635_v37 = vmul.f32 %v6616_v57, %v10101_v35 }
 0x852   :  { %v6636_v15 = vmul.f32 %v6617_v20, %v10102_v33  ;;  %v6637_v42 = vmul.f32 %v6618_v39, %v10103_v24  ;;  %v6638_v17 = vmul.f32 %v6619_v19, %v10104_v60  ;;  %v7073_v40 = vpack.c.bf16 %v6621_v8, %v6620_v58 }
 0x853   :  { %v7074_v4 = vpack.c.bf16 %v6623_v41, %v6622_v47  ;;  %v7075_v31 = vpack.c.bf16 %v6625_v38, %v6624_v0  ;;  %v7076_v30 = vpack.c.bf16 %v6627_v14, %v6626_v5  ;;  %v7077_v52 = vpack.c.bf16 %v6629_v11, %v6628_v22 }
 0x854   :  { %v7078_v55 = vpack.c.bf16 %v6631_v61, %v6630_v1  ;;  %v7079_v50 = vpack.c.bf16 %v6633_v2, %v6632_v62  ;;  %v7080_v26 = vpack.c.bf16 %v6635_v37, %v6634_v23  ;;  %v7081_v12 = vpack.c.bf16 %v6637_v42, %v6636_v15  ;;  %6716 = vst [vmem:[%s10038_s9] sm:$0xff] %v7073_v40 }
 0x855   :  { %v7082_v53 = vpack.c.bf16 %v6638_v17, %v6638_v17  ;;  %6717 = vst [vmem:[%s10038_s9 + $0x8] sm:$0xff] %v7074_v4  ;;  %6718 = vst [vmem:[%s10038_s9 + $0x10] sm:$0xff] %v7075_v31 }
 0x856   :  { %6719 = vst [vmem:[%s10038_s9 + $0x18] sm:$0xff] %v7076_v30  ;;  %6720 = vst [vmem:[%s10038_s9 + $0x20] sm:$0xff] %v7077_v52 }
 0x857   :  { %6721 = vst [vmem:[%s10038_s9 + $0x28] sm:$0xff] %v7078_v55  ;;  %6722 = vst [vmem:[%s10038_s9 + $0x30] sm:$0xff] %v7079_v50 }
 0x858   :  { %6723 = vst [vmem:[%s10038_s9 + $0x38] sm:$0xff] %v7080_v26  ;;  %6724 = vst [vmem:[%s10038_s9 + $0x40] sm:$0xff] %v7081_v12 }
 0x859   :  { %6726 = vst.msk [vmem:[%s10038_s9 + $0x48] sm:$0xf] %vm6725_vm0, %v7082_v53 }

// kernel: scaled_resnet_forward.10
= control target key start
LH: loop header
LB: loop body
LE: loop exit
PB: predicated region body
PF: predicated region fallthrough
CT: control target
= control target key end

     0   :  { %v2997_v1 = vmov 0   ;;  %vm216_vm0 = vcmask 1043456   ;;  %vm212_vm1 = vcmask 588800   ;;  %v365_v38 = vlaneseq  ;;  %s3000_s29 = smov 110   ;;  %s3001_s30 = smov 109   ;;  %s3867_s0 = inlined_call_operand.vmem [shape: bf16[72,648], index: 0, kind: input, shape index: {}]   ;;  %s3868_s1 = inlined_call_operand.vmem [shape: bf16[16,72], index: 1, kind: input, shape index: {}]   ;;  %s3869_s11 = inlined_call_operand.vmem [shape: f32[1,648], index: 11, kind: input, shape index: {}]   ;;  %s3870_s2 = inlined_call_operand.vmem [shape: f32[16,1], index: 2, kind: input, shape index: {}]   ;;  %s3871_s3 = inlined_call_operand.vmem [shape: f32[16,1], index: 3, kind: input, shape index: {}]   ;;  %s3872_s8 = inlined_call_operand.vmem [shape: bf16[9,16,16], index: 8, kind: input, shape index: {}]   ;;  %s3873_s5 = inlined_call_operand.vmem [shape: bf16[16,8], index: 5, kind: input, shape index: {}]   ;;  %s3874_s4 = inlined_call_operand.vmem [shape: bf16[8,648], index: 4, kind: input, shape index: {}]   ;;  %s3875_s6 = inlined_call_operand.vmem [shape: f32[16,1], index: 6, kind: input, shape index: {}]   ;;  %s3876_s9 = inlined_call_operand.vmem [shape: f32[16,1], index: 9, kind: input, shape index: {}]   ;;  %s3877_s10 = inlined_call_operand.vmem [shape: f32[16,1], index: 10, kind: input, shape index: {}]   ;;  %s3878_s7 = inlined_call_operand.vmem [shape: f32[16,1], index: 7, kind: input, shape index: {}]   ;;  %s3879_s12 = inlined_call_operand.vmem [shape: bf16[16,648], index: 12, kind: output, shape index: {}]  }
   0x1   :  { %v2926_v0 = vld [vmem:[%s3867_s0 + $0x4] ss:$24 sps:$4 sm:$0xff]   ;;  %267 = vmatprep.mubr.bf16.mxu0 %v2997_v1  ;;  %562 = vst [vmem:[#allocation2] sm:$0xff] %v2997_v1  ;;  %2924 = vset.pattern.permute.xlu0 %v2997_v1  ;;  %v2928_v2 = vld [vmem:[%s3867_s0] ss:$24 sps:$4 sm:$0xff]   ;;  %v70_v21 = vld [vmem:[%s3867_s0 + $0xc8] sm:$0xff] }
   0x2   :  { %2925 = vset.pattern.permute.xlu1 %v2997_v1  ;;  %1082 = vmatprep.mubr.bf16.mxu1 %v2997_v1  ;;  %v2929_v3 = vld [vmem:[%s3867_s0 + $0x34] ss:$24 sps:$4 sm:$0xff]   ;;  %v2931_v4 = vld [vmem:[%s3867_s0 + $0x30] ss:$24 sps:$4 sm:$0xff]   ;;  %v2932_v5 = vld [vmem:[%s3867_s0 + $0x64] ss:$24 sps:$4 sm:$0xff]   ;;  %v2732_v23 = vcombine.high %v70_v21, %v70_v21  ;;  %v2731_v24 = vcombine.low %v70_v21, %v70_v21 }
   0x3   :  { %235 = vmatprep.subr.bf16.mxu0 %v2926_v0  ;;  %v2934_v6 = vld [vmem:[%s3867_s0 + $0x60] ss:$24 sps:$4 sm:$0xff]   ;;  %v2935_v7 = vld [vmem:[%s3867_s0 + $0x94] ss:$24 sps:$4 sm:$0xff]   ;;  %v2937_v9 = vld [vmem:[%s3867_s0 + $0x90] ss:$24 sps:$4 sm:$0xff]  }
   0x4   :  { %236 = vmatpush1.bf16.msra.mxu0 %v2928_v2  ;;  %v69_v8 = vld [vmem:[%s3867_s0 + $0xc0] sm:$0xff]  ;;  %v2946_v16 = vld [vmem:[%s3867_s0 + $0x3c] ss:$24 sps:$4 sm:$0xff]   ;;  %v2944_v17 = vld [vmem:[%s3867_s0 + $0x38] ss:$24 sps:$4 sm:$0xff]   ;;  %v224_v25 = vsel %vm216_vm0, %v2731_v24, 0 }
   0x5   :  { %237 = vmatprep.subr.bf16.mxu0 %v2929_v3  ;;  %v2730_v10 = vcombine.high %v69_v8, %v69_v8  ;;  %v2729_v11 = vcombine.low %v69_v8, %v69_v8  ;;  %v2943_v13 = vld [vmem:[%s3867_s0 + $0xc] ss:$24 sps:$4 sm:$0xff]   ;;  %v2941_v15 = vld [vmem:[%s3867_s0 + $0x8] ss:$24 sps:$4 sm:$0xff]   ;;  %v2952_v20 = vld [vmem:[%s3867_s0 + $0x9c] ss:$24 sps:$4 sm:$0xff]  }
   0x6   :  { %v2940_v14 = vld [vmem:[%s3868_s1] sm:$0xff]   ;;  %v2950_v22 = vld [vmem:[%s3867_s0 + $0x98] ss:$24 sps:$4 sm:$0xff]   ;;  %v2957_v26 = vld [vmem:[%s3867_s0 + $0x14] ss:$24 sps:$4 sm:$0xff]   ;;  %v366_v39 = vshrl.u32 %v365_v38, 7 }
   0x7   :  { %v218_v12 = vsel %vm216_vm0, %v2729_v11, 0  ;;  %v2949_v18 = vld [vmem:[%s3867_s0 + $0x6c] ss:$24 sps:$4 sm:$0xff]   ;;  %v2947_v19 = vld [vmem:[%s3867_s0 + $0x68] ss:$24 sps:$4 sm:$0xff]   ;;  %v71_v33 = vld [vmem:[%s3867_s0 + $0xd0] sm:$0xff] }
   0x8   :  { %238 = vmatpush1.bf16.msra.mxu0 %v2931_v4  ;;  %v2955_v27 = vld [vmem:[%s3867_s0 + $0x10] ss:$24 sps:$4 sm:$0xff]   ;;  %v2960_v28 = vld [vmem:[%s3867_s0 + $0x44] ss:$24 sps:$4 sm:$0xff]   ;;  %v2958_v29 = vld [vmem:[%s3867_s0 + $0x40] ss:$24 sps:$4 sm:$0xff]   ;;  %v2734_v35 = vcombine.high %v71_v33, %v71_v33  ;;  %v2733_v36 = vcombine.low %v71_v33, %v71_v33 }
   0x9   :  { %239 = vmatprep.subr.bf16.mxu0 %v2932_v5  ;;  %v2963_v30 = vld [vmem:[%s3867_s0 + $0x74] ss:$24 sps:$4 sm:$0xff]   ;;  %v2961_v31 = vld [vmem:[%s3867_s0 + $0x70] ss:$24 sps:$4 sm:$0xff]   ;;  %v2966_v32 = vld [vmem:[%s3867_s0 + $0xa4] ss:$24 sps:$4 sm:$0xff]  }
   0xa   :  { %v2964_v34 = vld [vmem:[%s3867_s0 + $0xa0] ss:$24 sps:$4 sm:$0xff]   ;;  %v230_v37 = vsel %vm216_vm0, %v2733_v36, 0  ;;  %v367_v40 = vsub.s32 0, %v366_v39  ;;  %v371_v42 = vsub.s32 1, %v366_v39  ;;  %v375_v55 = vsub.s32 2, %v366_v39 }
   0xb   :  { %v42_v41 = vld [vmem:[%s3869_s11] sm:$0x3f]  ;;  %v379_v56 = vsub.s32 3, %v366_v39  ;;  %v383_v8 = vsub.s32 4, %v366_v39  ;;  %vm411_vm2 = vcmask 64512   ;;  %vm567_vm3 = vcmask 375808  }
   0xc   :  { %240 = vmatpush1.bf16.msra.mxu0 %v2934_v6  ;;  %v3176_v43 = vrot.slane %v42_v41, %v367_v40  ;;  %v3178_v44 = vrot.slane %v42_v41, %v371_v42  ;;  %v3196_v57 = vrot.slane %v42_v41, %v375_v55  ;;  %568 = vst.msk [vmem:[#allocation2 + $0x28] sm:$0xff] %vm567_vm3, %v2997_v1  ;;  %vm593_vm4 = vcmask 154624   ;;  %s3002_s1 = smov 108   ;;  %s3003_s13 = smov 127  }
   0xd   :  { %241 = vmatprep.subr.bf16.mxu0 %v2935_v7  ;;  %v3198_v58 = vrot.slane %v42_v41, %v379_v56  ;;  %vm611_vm5 = vcmask 220160   ;;  %vm605_vm6 = vcmask 1047704   ;;  %s3004_s14 = smov 92   ;;  %s3005_s15 = smov 91   ;;  %vm949_vm7 = vcmask 1031168  }
   0xe   :  { %s3006_s16 = smov 90   ;;  %vm659_vm8 = vcmask 130048   ;;  %vm1125_vm9 = vcmask 900096   ;;  %vm1301_vm10 = vcmask 891904   ;;  %vm647_vm11 = vcmask 1039360  }
   0xf   :  { %vm1477_vm12 = vcmask 883712   ;;  %vm1653_vm13 = vcmask 752640   ;;  %vm1829_vm14 = vcmask 744448   ;;  %vm2005_vm15 = vcmask 736256  }
  0x10   :  { %242 = vmatpush1.bf16.msra.mxu0 %v2937_v9  ;;  %v387_v9 = vsub.s32 5, %v366_v39 }
  0x11   :  { %2735 = vmatprep.subr.msk.bf16.mxu0 %vm216_vm0, %v2730_v10  ;;  %v3216_v10 = vrot.slane %v42_v41, %v383_v8 }
  0x12   :  { %v3218_v11 = vrot.slane %v42_v41, %v387_v9 }
  0x14   :  { %244 = vmatpush1.bf16.msra.mxu0 %v218_v12 }
  0x15   :  { %278 = vmatprep.subr.bf16.mxu0 %v2943_v13 }
  0x17   :  { %2736 = vmatmul.mubr.msk.bf16.vlgmr.msra.gmra.mrb[0].mxu0 %vm212_vm1, %v2940_v14 }
  0x18   :  { %279 = vmatpush1.bf16.msra.mxu0 %v2941_v15  ;;  %310 = vmatprep.mubr.bf16.mxu0 %v2997_v1 }
  0x19   :  { %280 = vmatprep.subr.bf16.mxu0 %v2946_v16 }
  0x1c   :  { %281 = vmatpush1.bf16.msra.mxu0 %v2944_v17 }
  0x1d   :  { %282 = vmatprep.subr.bf16.mxu0 %v2949_v18 }
  0x20   :  { %283 = vmatpush1.bf16.msra.mxu0 %v2947_v19 }
  0x21   :  { %284 = vmatprep.subr.bf16.mxu0 %v2952_v20 }
  0x24   :  { %285 = vmatpush1.bf16.msra.mxu0 %v2950_v22 }
  0x25   :  { %2737 = vmatprep.subr.msk.bf16.mxu0 %vm216_vm0, %v2732_v23 }
  0x28   :  { %287 = vmatpush1.bf16.msra.mxu0 %v224_v25 }
  0x29   :  { %321 = vmatprep.subr.bf16.mxu0 %v2957_v26 }
  0x2b   :  { %2738 = vmatmul.mubr.msk.bf16.vlgmr.msra.gmra.mrb[4].mxu0 %vm212_vm1, %v2940_v14 }
  0x2c   :  { %322 = vmatpush1.bf16.msra.mxu0 %v2955_v27  ;;  %353 = vmatprep.mubr.bf16.mxu0 %v2997_v1 }
  0x2d   :  { %323 = vmatprep.subr.bf16.mxu0 %v2960_v28 }
  0x30   :  { %324 = vmatpush1.bf16.msra.mxu0 %v2958_v29 }
  0x31   :  { %325 = vmatprep.subr.bf16.mxu0 %v2963_v30 }
  0x34   :  { %326 = vmatpush1.bf16.msra.mxu0 %v2961_v31 }
  0x35   :  { %327 = vmatprep.subr.bf16.mxu0 %v2966_v32 }
  0x38   :  { %328 = vmatpush1.bf16.msra.mxu0 %v2964_v34 }
  0x39   :  { %2739 = vmatprep.subr.msk.bf16.mxu0 %vm216_vm0, %v2734_v35 }
  0x3c   :  { %330 = vmatpush1.bf16.msra.mxu0 %v230_v37 }
  0x3f   :  { %2740 = vmatmul.mubr.msk.bf16.vlgmr.msra.gmra.mrb[8].mxu0 %vm212_vm1, %v2940_v14  ;;  %vm2694_vm1 = vcmask 64516  }
  0x40   :  { %695 = vmatprep.mubr.bf16.mxu0 %v2997_v1 }
  0xea   :  { %v3180_v45 = vpop.f32.mrb[0].mxu0 }
  0xeb   :  { %v395_v46 = vmul.f32 %v3176_v43, %v3180_v45  ;;  %v3184_v47 = vpop.f32.mrb[1].mxu0 }
  0xec   :  { %v396_v48 = vmul.f32 %v3178_v44, %v3184_v47  ;;  %v3188_v49 = vpop.f32.mrb[2].mxu0 }
  0xed   :  { %v401_v50 = vmul.f32 %v3176_v43, %v3188_v49  ;;  %v3192_v51 = vpop.f32.mrb[3].mxu0 }
  0xee   :  { %v407_v52 = vadd.f32 %v396_v48, %v395_v46  ;;  %v402_v53 = vmul.f32 %v3178_v44, %v3192_v51 }
  0xf0   :  { %v416_v54 = vadd.f32 %v402_v53, %v401_v50 }
  0xfe   :  { %v3200_v59 = vpop.f32.mrb[4].mxu0 }
  0xff   :  { %v397_v60 = vmul.f32 %v3196_v57, %v3200_v59  ;;  %v3204_v61 = vpop.f32.mrb[5].mxu0 }
 0x100   :  { %v398_v62 = vmul.f32 %v3198_v58, %v3204_v61  ;;  %v3208_v63 = vpop.f32.mrb[6].mxu0 }
 0x101   :  { %v408_v0 = vadd.f32 %v407_v52, %v397_v60  ;;  %v403_v2 = vmul.f32 %v3196_v57, %v3208_v63  ;;  %v3212_v3 = vpop.f32.mrb[7].mxu0 }
 0x102   :  { %v404_v4 = vmul.f32 %v3198_v58, %v3212_v3 }
 0x103   :  { %v417_v5 = vadd.f32 %v416_v54, %v403_v2  ;;  %v409_v6 = vadd.f32 %v408_v0, %v398_v62 }
 0x105   :  { %v418_v7 = vadd.f32 %v417_v5, %v404_v4 }
 0x112   :  { %v3220_v12 = vpop.f32.mrb[8].mxu0 }
 0x113   :  { %v399_v13 = vmul.f32 %v3216_v10, %v3220_v12  ;;  %v3224_v14 = vpop.f32.mrb[9].mxu0 }
 0x114   :  { %v3226_v15 = vpop.f32.mrb[10].mxu0  ;;  %v400_v16 = vmul.f32 %v3218_v11, %v3224_v14 }
 0x115   :  { %v405_v17 = vmul.f32 %v3216_v10, %v3226_v15  ;;  %v3232_v18 = vpop.f32.mrb[11].mxu0  ;;  %v410_v19 = vadd.f32 %v409_v6, %v399_v13 }
 0x116   :  { %v406_v20 = vmul.f32 %v3218_v11, %v3232_v18  ;;  %v412_v21 = vsel %vm411_vm2, %v400_v16, 0.0 }
 0x117   :  { %v413_v22 = vadd.f32 %v412_v21, %v410_v19  ;;  %v419_v23 = vadd.f32 %v418_v7, %v405_v17 }
 0x118   :  { %v420_v24 = vsel %vm411_vm2, %v406_v20, 0.0 }
 0x119   :  { %414 = vadd.xlane.f32.xlu0 %v413_v22  ;;  %v421_v25 = vadd.f32 %v420_v24, %v419_v23 }
 0x11d   :  { %422 = vadd.xlane.f32.xlu0 %v421_v25 }
 0x1a6   :  { %v415_v26 = vpop.xlane.xlu0 %414 }
 0x1a7   :  { %v3238_v27 = vmul.f32 0.001953125, %v415_v26 }
 0x1a9   :  { %v426_v28 = vsub.f32 %v3180_v45, %v3238_v27  ;;  %v427_v29 = vsub.f32 %v3184_v47, %v3238_v27  ;;  %v428_v30 = vsub.f32 %v3200_v59, %v3238_v27  ;;  %v429_v31 = vsub.f32 %v3204_v61, %v3238_v27 }
 0x1aa   :  { %v423_v32 = vpop.xlane.xlu0 %422  ;;  %v430_v33 = vsub.f32 %v3220_v12, %v3238_v27  ;;  %v431_v34 = vsub.f32 %v3224_v14, %v3238_v27 }
 0x1ab   :  { %v3252_v35 = vmul.f32 0.001953125, %v423_v32  ;;  %v438_v36 = vmul.f32 %v426_v28, %v3176_v43  ;;  %v439_v37 = vmul.f32 %v427_v29, %v3178_v44  ;;  %v440_v38 = vmul.f32 %v428_v30, %v3196_v57 }
 0x1ac   :  { %v441_v39 = vmul.f32 %v429_v31, %v3198_v58  ;;  %v442_v46 = vmul.f32 %v430_v33, %v3216_v10  ;;  %v443_v48 = vmul.f32 %v431_v34, %v3218_v11 }
 0x1ad   :  { %v450_v40 = vmul.f32 %v438_v36, %v438_v36  ;;  %v451_v41 = vmul.f32 %v439_v37, %v439_v37  ;;  %v432_v42 = vsub.f32 %v3188_v49, %v3252_v35  ;;  %v433_v50 = vsub.f32 %v3192_v51, %v3252_v35 }
 0x1ae   :  { %v452_v52 = vmul.f32 %v440_v38, %v440_v38  ;;  %v434_v54 = vsub.f32 %v3208_v63, %v3252_v35  ;;  %v435_v55 = vsub.f32 %v3212_v3, %v3252_v35  ;;  %v436_v56 = vsub.f32 %v3226_v15, %v3252_v35 }
 0x1af   :  { %v462_v53 = vadd.f32 %v451_v41, %v450_v40  ;;  %v437_v60 = vsub.f32 %v3232_v18, %v3252_v35  ;;  %v444_v62 = vmul.f32 %v432_v42, %v3176_v43  ;;  %v445_v0 = vmul.f32 %v433_v50, %v3178_v44  ;;  %v480_v41 = vld [vmem:[%s3870_s2] sm:$0xff] }
 0x1b0   :  { %v453_v2 = vmul.f32 %v441_v39, %v441_v39  ;;  %v446_v5 = vmul.f32 %v434_v54, %v3196_v57  ;;  %v455_v6 = vmul.f32 %v443_v48, %v443_v48  ;;  %v447_v7 = vmul.f32 %v435_v55, %v3198_v58  ;;  %v481_v48 = vld [vmem:[%s3870_s2 + $0x8] sm:$0xff]  ;;  %v488_v54 = vld [vmem:[%s3871_s3] sm:$0xff]  ;;  %s2998_s2 = smov 19  }
 0x1b1   :  { %v463_v4 = vadd.f32 %v462_v53, %v452_v52  ;;  %v456_v8 = vmul.f32 %v444_v62, %v444_v62  ;;  %v457_v9 = vmul.f32 %v445_v0, %v445_v0  ;;  %v454_v13 = vmul.f32 %v442_v46, %v442_v46 }
 0x1b2   :  { %v449_v17 = vmul.f32 %v437_v60, %v3218_v11  ;;  %v448_v19 = vmul.f32 %v436_v56, %v3216_v10  ;;  %v458_v20 = vmul.f32 %v446_v5, %v446_v5  ;;  %v466_v23 = vsel %vm411_vm2, %v455_v6, 0.0  ;;  %v489_v60 = vld [vmem:[%s3871_s3 + $0x8] sm:$0xff]  ;;  %s2999_s3 = smov 126  }
 0x1b3   :  { %v464_v16 = vadd.f32 %v463_v4, %v453_v2  ;;  %v470_v21 = vadd.f32 %v457_v9, %v456_v8  ;;  %v459_v24 = vmul.f32 %v447_v7, %v447_v7 }
 0x1b4   :  { %v461_v28 = vmul.f32 %v449_v17, %v449_v17  ;;  %v460_v29 = vmul.f32 %v448_v19, %v448_v19 }
 0x1b5   :  { %v465_v22 = vadd.f32 %v464_v16, %v454_v13  ;;  %v471_v25 = vadd.f32 %v470_v21, %v458_v20 }
 0x1b6   :  { %v474_v32 = vsel %vm411_vm2, %v461_v28, 0.0 }
 0x1b7   :  { %v467_v26 = vadd.f32 %v466_v23, %v465_v22  ;;  %v472_v30 = vadd.f32 %v471_v25, %v459_v24 }
 0x1b9   :  { %468 = vadd.xlane.f32.xlu1 %v467_v26  ;;  %v473_v31 = vadd.f32 %v472_v30, %v460_v29 }
 0x1bb   :  { %v475_v33 = vadd.f32 %v474_v32, %v473_v31 }
 0x1bd   :  { %476 = vadd.xlane.f32.xlu1 %v475_v33 }
 0x246   :  { %v469_v34 = vpop.xlane.xlu1 %468 }
 0x247   :  { %v478_v36 = vmul.f32 0.001953125, %v469_v34 }
 0x249   :  { %v482_v37 = vadd.f32 1e-05, %v478_v36 }
 0x24a   :  { %v477_v38 = vpop.xlane.xlu1 %476 }
 0x24b   :  { %2985 = vrsqrt.f32 %v482_v37  ;;  %v479_v39 = vmul.f32 0.001953125, %v477_v38 }
 0x24d   :  { %v483_v40 = vadd.f32 1e-05, %v479_v39 }
 0x24f   :  { %2987 = vrsqrt.f32 %v483_v40 }
 0x255   :  { %v2986_v42 = vpop.eup %2985 }
 0x256   :  { %v486_v46 = vmul.f32 %v2986_v42, %v480_v41 }
 0x258   :  { %496 = vperm.xlu0 %2924, %v486_v46   ;;  %v490_v53 = vmul.f32 %v486_v46, %v3238_v27 }
 0x259   :  { %v2988_v50 = vpop.eup %2987 }
 0x25a   :  { %v487_v52 = vmul.f32 %v2988_v50, %v481_v48  ;;  %v492_v55 = vsub.f32 %v488_v54, %v490_v53 }
 0x25c   :  { %501 = vperm.xlu1 %2925, %v487_v52   ;;  %v491_v56 = vmul.f32 %v487_v52, %v3252_v35 }
 0x25e   :  { %v493_v62 = vsub.f32 %v489_v60, %v491_v56 }
 0x260   :  { %518 = vperm.xlu1 %2925, %v492_v55  }
 0x264   :  { %523 = vperm.xlu1 %2925, %v493_v62  }
 0x2d7   :  { %v497_v0 = vpop.permute.xlu0 %496 }
 0x2d8   :  { %v507_v4 = vmul.f32 %v497_v0, %v3204_v61  ;;  %v506_v27 = vmul.f32 %v497_v0, %v3200_v59  ;;  %v508_v5 = vmul.f32 %v497_v0, %v3220_v12  ;;  %v509_v6 = vmul.f32 %v497_v0, %v3224_v14 }
 0x2d9   :  { %v504_v35 = vmul.f32 %v497_v0, %v3180_v45  ;;  %v505_v8 = vmul.f32 %v497_v0, %v3184_v47 }
 0x2db   :  { %v502_v2 = vpop.permute.xlu1 %501 }
 0x2dc   :  { %v513_v19 = vmul.f32 %v502_v2, %v3212_v3  ;;  %v512_v59 = vmul.f32 %v502_v2, %v3208_v63  ;;  %v514_v12 = vmul.f32 %v502_v2, %v3226_v15  ;;  %v515_v45 = vmul.f32 %v502_v2, %v3232_v18 }
 0x2dd   :  { %v510_v47 = vmul.f32 %v502_v2, %v3188_v49  ;;  %v511_v24 = vmul.f32 %v502_v2, %v3192_v51 }
 0x2df   :  { %v519_v7 = vpop.permute.xlu1 %518 }
 0x2e0   :  { %v529_v9 = vadd.f32 %v519_v7, %v507_v4  ;;  %v528_v13 = vadd.f32 %v519_v7, %v506_v27  ;;  %v530_v16 = vadd.f32 %v519_v7, %v508_v5  ;;  %v531_v17 = vadd.f32 %v519_v7, %v509_v6 }
 0x2e1   :  { %v526_v20 = vadd.f32 %v519_v7, %v504_v35  ;;  %v527_v21 = vadd.f32 %v519_v7, %v505_v8 }
 0x2e2   :  { %v541_v61 = vmax.f32 %v529_v9, 0.0  ;;  %v540_v22 = vmax.f32 %v528_v13, 0.0  ;;  %v542_v23 = vmax.f32 %v530_v16, 0.0  ;;  %v543_v28 = vmax.f32 %v531_v17, 0.0 }
 0x2e3   :  { %v524_v14 = vpop.permute.xlu1 %523  ;;  %v538_v3 = vmax.f32 %v526_v20, 0.0  ;;  %v539_v63 = vmax.f32 %v527_v21, 0.0 }
 0x2e4   :  { %v535_v25 = vadd.f32 %v524_v14, %v513_v19  ;;  %v534_v26 = vadd.f32 %v524_v14, %v512_v59  ;;  %v553_v29 = vmul.f32 %v541_v61, %v3198_v58  ;;  %v536_v30 = vadd.f32 %v524_v14, %v514_v12 }
 0x2e5   :  { %v537_v31 = vadd.f32 %v524_v14, %v515_v45  ;;  %v552_v15 = vmul.f32 %v540_v22, %v3196_v57  ;;  %v532_v34 = vadd.f32 %v524_v14, %v510_v47  ;;  %v554_v18 = vmul.f32 %v542_v23, %v3216_v10  ;;  %v3397_v22 = vld [vmem:[%s3872_s8 + $0x10] sm:$0xff]  }
 0x2e6   :  { %v547_v32 = vmax.f32 %v535_v25, 0.0  ;;  %v546_v33 = vmax.f32 %v534_v26, 0.0  ;;  %v548_v36 = vmax.f32 %v536_v30, 0.0  ;;  %v533_v37 = vadd.f32 %v524_v14, %v511_v24  ;;  %v2970_v25 = vld [vmem:[%s3872_s8 + $0x18] sm:$0xff]  }
 0x2e7   :  { %v549_v49 = vmax.f32 %v537_v31, 0.0  ;;  %v544_v39 = vmax.f32 %v532_v34, 0.0  ;;  %v555_v41 = vmul.f32 %v543_v28, %v3218_v11  ;;  %v550_v52 = vmul.f32 %v538_v3, %v3176_v43 }
 0x2e8   :  { %v559_v51 = vmul.f32 %v547_v32, %v3198_v58  ;;  %v558_v38 = vmul.f32 %v546_v33, %v3196_v57  ;;  %v560_v40 = vmul.f32 %v548_v36, %v3216_v10  ;;  %v545_v46 = vmax.f32 %v533_v37, 0.0 }
 0x2e9   :  { %v561_v42 = vmul.f32 %v549_v49, %v3218_v11  ;;  %v556_v53 = vmul.f32 %v544_v39, %v3176_v43  ;;  %v551_v56 = vmul.f32 %v539_v63, %v3178_v44 }
 0x2ea   :  { %v572_v48 = vpack.c.bf16 %v559_v51, %v553_v29  ;;  %v571_v50 = vpack.c.bf16 %v558_v38, %v552_v15  ;;  %v573_v54 = vpack.c.bf16 %v560_v40, %v554_v18  ;;  %v557_v60 = vmul.f32 %v545_v46, %v3178_v44  ;;  %v2971_v40 = vld [vmem:[%s3872_s8 + $0x20] sm:$0xff]  }
 0x2eb   :  { %v574_v55 = vpack.c.bf16 %v561_v42, %v555_v41  ;;  %v569_v62 = vpack.c.bf16 %v556_v53, %v550_v52 }
 0x2ec   :  { %587 = vrot.lane.b32.xlu1 %v572_v48, %s2998_s2  ;;  %585 = vrot.lane.b32.xlu0 %v571_v50, %s2998_s2  ;;  %v570_v0 = vpack.c.bf16 %v557_v60, %v551_v56 }
 0x2f0   :  { %589 = vrot.lane.b32.xlu1 %v573_v54, %s2998_s2  ;;  %v2972_v54 = vld [vmem:[%s3872_s8 + $0x8] sm:$0xff]  }
 0x2f4   :  { %591 = vrot.lane.b32.xlu1 %v574_v55, %s2998_s2 }
 0x2f8   :  { %581 = vrot.lane.b32.xlu1 %v569_v62, %s2998_s2 }
 0x2fc   :  { %583 = vrot.lane.b32.xlu1 %v570_v0, %s2998_s2 }
 0x35e   :  { %v588_v2 = vpop.permute.xlu1 %587  ;;  %v586_v4 = vpop.permute.xlu0 %585 }
 0x35f   :  { %v3320_v27 = vsel %vm593_vm4, %v586_v4, %v588_v2 }
 0x362   :  { %v590_v5 = vpop.permute.xlu1 %589 }
 0x363   :  { %v3323_v6 = vsel %vm593_vm4, %v588_v2, %v590_v5 }
 0x364   :  { %945 = vrot.lane.b32.xlu1 %v3323_v6, %s2999_s3 }
 0x366   :  { %v592_v7 = vpop.permute.xlu1 %591 }
 0x367   :  { %v598_v35 = vsel %vm593_vm4, %v590_v5, %v592_v7 }
 0x368   :  { %612 = vst.msk [vmem:[#allocation2 + $0x28] sm:$0xff] %vm611_vm5, %v598_v35 }
 0x36a   :  { %v582_v8 = vpop.permute.xlu1 %581 }
 0x36b   :  { %606 = vst.msk [vmem:[#allocation2] sm:$0xff] %vm605_vm6, %v582_v8 }
 0x36e   :  { %v584_v9 = vpop.permute.xlu1 %583 }
 0x36f   :  { %v3329_v13 = vsel %vm593_vm4, %v582_v8, %v584_v9  ;;  %v3332_v16 = vsel %vm593_vm4, %v584_v9, %v586_v4  ;;  %v3334_v17 = vld [vmem:[#allocation2 + $0x28] sm:$0xff] }
 0x370   :  { %947 = vrot.lane.b32.xlu0 %v3334_v17, %s2999_s3  ;;  %1115 = vrot.lane.b32.xlu1 %v3329_v13, %s3000_s29 }
 0x372   :  { %v3339_v19 = vld [vmem:[#allocation2] sm:$0xff] }
 0x374   :  { %1117 = vrot.lane.b32.xlu0 %v3332_v16, %s3000_s29  ;;  %1113 = vrot.lane.b32.xlu1 %v3339_v19, %s3000_s29 }
 0x378   :  { %1119 = vrot.lane.b32.xlu0 %v3320_v27, %s3000_s29  ;;  %1121 = vrot.lane.b32.xlu1 %v3323_v6, %s3000_s29 }
 0x37c   :  { %1123 = vrot.lane.b32.xlu0 %v3334_v17, %s3000_s29  ;;  %1291 = vrot.lane.b32.xlu1 %v3329_v13, %s3001_s30 }
 0x380   :  { %1293 = vrot.lane.b32.xlu0 %v3332_v16, %s3001_s30  ;;  %1289 = vrot.lane.b32.xlu1 %v3339_v19, %s3001_s30 }
 0x384   :  { %1295 = vrot.lane.b32.xlu0 %v3320_v27, %s3001_s30  ;;  %1297 = vrot.lane.b32.xlu1 %v3323_v6, %s3001_s30 }
 0x388   :  { %1299 = vrot.lane.b32.xlu0 %v3334_v17, %s3001_s30  ;;  %1467 = vrot.lane.b32.xlu1 %v3329_v13, %s3002_s1 }
 0x38c   :  { %1469 = vrot.lane.b32.xlu0 %v3332_v16, %s3002_s1  ;;  %1465 = vrot.lane.b32.xlu1 %v3339_v19, %s3002_s1 }
 0x390   :  { %1471 = vrot.lane.b32.xlu0 %v3320_v27, %s3002_s1  ;;  %1473 = vrot.lane.b32.xlu1 %v3323_v6, %s3002_s1 }
 0x394   :  { %637 = vrot.lane.b32.xlu0 %v3329_v13, %s3003_s13  ;;  %639 = vrot.lane.b32.xlu1 %v3332_v16, %s3003_s13 }
 0x398   :  { %635 = vrot.lane.b32.xlu0 %v3339_v19, %s3003_s13  ;;  %1475 = vrot.lane.b32.xlu1 %v3334_v17, %s3002_s1 }
 0x39c   :  { %641 = vrot.lane.b32.xlu0 %v3320_v27, %s3003_s13  ;;  %643 = vrot.lane.b32.xlu1 %v3323_v6, %s3003_s13 }
 0x3a0   :  { %1643 = vrot.lane.b32.xlu0 %v3329_v13, %s3004_s14  ;;  %1645 = vrot.lane.b32.xlu1 %v3332_v16, %s3004_s14 }
 0x3a4   :  { %1641 = vrot.lane.b32.xlu0 %v3339_v19, %s3004_s14  ;;  %645 = vrot.lane.b32.xlu1 %v3334_v17, %s3003_s13 }
 0x3a8   :  { %1647 = vrot.lane.b32.xlu0 %v3320_v27, %s3004_s14  ;;  %1649 = vrot.lane.b32.xlu1 %v3323_v6, %s3004_s14 }
 0x3ac   :  { %1651 = vrot.lane.b32.xlu0 %v3334_v17, %s3004_s14  ;;  %1819 = vrot.lane.b32.xlu1 %v3329_v13, %s3005_s15 }
 0x3b0   :  { %1821 = vrot.lane.b32.xlu0 %v3332_v16, %s3005_s15  ;;  %1817 = vrot.lane.b32.xlu1 %v3339_v19, %s3005_s15 }
 0x3b4   :  { %1823 = vrot.lane.b32.xlu0 %v3320_v27, %s3005_s15  ;;  %1825 = vrot.lane.b32.xlu1 %v3323_v6, %s3005_s15 }
 0x3b8   :  { %939 = vrot.lane.b32.xlu0 %v3329_v13, %s2999_s3  ;;  %941 = vrot.lane.b32.xlu1 %v3332_v16, %s2999_s3 }
 0x3bc   :  { %937 = vrot.lane.b32.xlu0 %v3339_v19, %s2999_s3  ;;  %1827 = vrot.lane.b32.xlu1 %v3334_v17, %s3005_s15 }
 0x3c0   :  { %943 = vrot.lane.b32.xlu0 %v3320_v27, %s2999_s3  ;;  %1995 = vrot.lane.b32.xlu1 %v3329_v13, %s3006_s16 }
 0x3c4   :  { %1997 = vrot.lane.b32.xlu0 %v3332_v16, %s3006_s16  ;;  %1993 = vrot.lane.b32.xlu1 %v3339_v19, %s3006_s16 }
 0x3c8   :  { %1999 = vrot.lane.b32.xlu0 %v3320_v27, %s3006_s16  ;;  %2001 = vrot.lane.b32.xlu1 %v3323_v6, %s3006_s16 }
 0x3cc   :  { %2003 = vrot.lane.b32.xlu0 %v3334_v17, %s3006_s16 }
 0x3d6   :  { %v3390_v20 = vpop.permute.xlu1 %945 }
 0x3e2   :  { %v948_v21 = vpop.permute.xlu0 %947  ;;  %v1116_v61 = vpop.permute.xlu1 %1115 }
 0x3e3   :  { %1050 = vmatprep.subr.bf16.mxu1 %v948_v21  ;;  %v954_v59 = vsel %vm949_vm7, %v3390_v20, %v948_v21 }
 0x3e4   :  { %1051 = vmatpush1.bf16.msra.mxu1 %v954_v59 }
 0x3e6   :  { %v1118_v12 = vpop.permute.xlu0 %1117  ;;  %v1114_v14 = vpop.permute.xlu1 %1113 }
 0x3e7   :  { %2756 = vmatmul.mubr.msk.bf16.vlgmr.msra.gmra.mrb[0].mxu1 %vm659_vm8, %v3397_v22  ;;  %v1127_v23 = vsel %vm1125_vm9, %v1116_v61, %v1118_v12  ;;  %v1126_v45 = vsel %vm1125_vm9, %v1114_v14, %v1116_v61 }
 0x3e8   :  { %1140 = vmatprep.subr.bf16.mxu1 %v1127_v23  ;;  %1172 = vmatprep.mubr.bf16.mxu1 %v2997_v1 }
 0x3e9   :  { %1141 = vmatpush1.bf16.msra.mxu1 %v1126_v45 }
 0x3ea   :  { %v1120_v47 = vpop.permute.xlu0 %1119  ;;  %v1122_v24 = vpop.permute.xlu1 %1121 }
 0x3eb   :  { %v1129_v26 = vsel %vm1125_vm9, %v1120_v47, %v1122_v24  ;;  %v1128_v29 = vsel %vm1125_vm9, %v1118_v12, %v1120_v47  ;;  %v2973_v12 = vld [vmem:[%s3872_s8 + $0x28] sm:$0xff]  }
 0x3ec   :  { %1183 = vmatprep.subr.bf16.mxu1 %v1129_v26 }
 0x3ee   :  { %v1124_v28 = vpop.permute.xlu0 %1123  ;;  %v1292_v3 = vpop.permute.xlu1 %1291 }
 0x3ef   :  { %2760 = vmatmul.mubr.msk.bf16.vlgmr.msra.gmra.mrb[4].mxu1 %vm659_vm8, %v2970_v25  ;;  %v1130_v33 = vsel %vm1125_vm9, %v1122_v24, %v1124_v28  ;;  %v2974_v24 = vld [vmem:[%s3872_s8] sm:$0xff]  }
 0x3f0   :  { %1184 = vmatpush1.bf16.msra.mxu1 %v1128_v29  ;;  %1215 = vmatprep.mubr.bf16.mxu1 %v2997_v1 }
 0x3f1   :  { %1226 = vmatprep.subr.bf16.mxu1 %v1124_v28 }
 0x3f2   :  { %v1294_v30 = vpop.permute.xlu0 %1293  ;;  %v1290_v31 = vpop.permute.xlu1 %1289 }
 0x3f3   :  { %v1303_v15 = vsel %vm1301_vm10, %v1292_v3, %v1294_v30  ;;  %v1302_v37 = vsel %vm1301_vm10, %v1290_v31, %v1292_v3  ;;  %v2975_v31 = vld [vmem:[%s3872_s8 + $0x30] sm:$0xff]  }
 0x3f6   :  { %v1296_v63 = vpop.permute.xlu0 %1295  ;;  %v1298_v32 = vpop.permute.xlu1 %1297 }
 0x3f7   :  { %2761 = vmatmul.mubr.msk.bf16.vlgmr.msra.gmra.mrb[8].mxu1 %vm659_vm8, %v2970_v25  ;;  %v1305_v51 = vsel %vm1301_vm10, %v1296_v63, %v1298_v32  ;;  %v1304_v46 = vsel %vm1301_vm10, %v1294_v30, %v1296_v63 }
 0x3f8   :  { %1227 = vmatpush1.bf16.msra.mxu1 %v1130_v33  ;;  %1258 = vmatprep.mubr.bf16.mxu1 %v2997_v1 }
 0x3f9   :  { %1316 = vmatprep.subr.bf16.mxu1 %v1303_v15  ;;  %v2305_v15 = vld [vmem:[%s3874_s4] sm:$0xff] }
 0x3fa   :  { %v1300_v34 = vpop.permute.xlu0 %1299  ;;  %v1468_v36 = vpop.permute.xlu1 %1467 }
 0x3fb   :  { %v1306_v60 = vsel %vm1301_vm10, %v1298_v32, %v1300_v34 }
 0x3fe   :  { %v3415_v18 = vpop.permute.xlu0 %1469  ;;  %v1466_v49 = vpop.permute.xlu1 %1465 }
 0x3ff   :  { %2762 = vmatmul.mubr.msk.bf16.vlgmr.msra.gmra.mrb[0].mxu1 %vm659_vm8, %v2970_v25  ;;  %v1479_v2 = vsel %vm1477_vm12, %v1468_v36, %v3415_v18  ;;  %v1478_v8 = vsel %vm1477_vm12, %v1466_v49, %v1468_v36  ;;  %v2794_v49 = vcombine.low %v2305_v15, %v2305_v15 }
 0x400   :  { %1317 = vmatpush1.bf16.msra.mxu1 %v1302_v37  ;;  %1348 = vmatprep.mubr.bf16.mxu1 %v2997_v1  ;;  %v2306_v37 = vld [vmem:[%s3874_s4 + $0x8] sm:$0xff] }
 0x401   :  { %1359 = vmatprep.subr.bf16.mxu1 %v1305_v51  ;;  %v2332_v51 = vsel %vm216_vm0, %v2794_v49, 0 }
 0x402   :  { %v1472_v38 = vpop.permute.xlu0 %1471  ;;  %v3421_v39 = vpop.permute.xlu1 %1473 }
 0x403   :  { %v1481_v21 = vsel %vm1477_vm12, %v1472_v38, %v3421_v39  ;;  %v1480_v45 = vsel %vm1477_vm12, %v3415_v18, %v1472_v38  ;;  %v2797_v38 = vcombine.high %v2306_v37, %v2306_v37 }
 0x406   :  { %v638_v41 = vpop.permute.xlu0 %637  ;;  %v640_v42 = vpop.permute.xlu1 %639 }
 0x407   :  { %2766 = vmatmul.mubr.msk.bf16.vlgmr.msra.gmra.mrb[4].mxu1 %vm659_vm8, %v2971_v40  ;;  %v649_v48 = vsel %vm647_vm11, %v638_v41, %v640_v42 }
 0x408   :  { %1360 = vmatpush1.bf16.msra.mxu1 %v1304_v46  ;;  %663 = vmatprep.subr.bf16.mxu0 %v649_v48  ;;  %v2976_v46 = vld [vmem:[%s3872_s8 + $0x38] sm:$0xff]   ;;  %v2307_v48 = vld [vmem:[%s3874_s4 + $0x10] sm:$0xff] }
 0x409   :  { %1402 = vmatprep.subr.bf16.mxu1 %v1300_v34  ;;  %1391 = vmatprep.mubr.bf16.mxu1 %v2997_v1  ;;  %v2795_v34 = vcombine.high %v2305_v15, %v2305_v15 }
 0x40a   :  { %v636_v50 = vpop.permute.xlu0 %635  ;;  %v1476_v52 = vpop.permute.xlu1 %1475 }
 0x40b   :  { %v648_v53 = vsel %vm647_vm11, %v636_v50, %v638_v41  ;;  %v2796_v41 = vcombine.low %v2306_v37, %v2306_v37 }
 0x40c   :  { %664 = vmatpush1.bf16.msra.mxu0 %v648_v53 }
 0x40d   :  { %v2338_v50 = vsel %vm216_vm0, %v2796_v41, 0 }
 0x40e   :  { %v642_v55 = vpop.permute.xlu0 %641  ;;  %v644_v56 = vpop.permute.xlu1 %643 }
 0x40f   :  { %v650_v62 = vsel %vm647_vm11, %v640_v42, %v642_v55  ;;  %2767 = vmatmul.mubr.msk.bf16.vlgmr.msra.gmra.mrb[8].mxu1 %vm659_vm8, %v2971_v40  ;;  %2744 = vmatmul.mubr.msk.bf16.vlgmr.msra.gmra.mrb[12].mxu0 %vm659_vm8, %v2972_v54  ;;  %v651_v0 = vsel %vm647_vm11, %v642_v55, %v644_v56  ;;  %v2798_v55 = vcombine.low %v2307_v48, %v2307_v48 }
 0x410   :  { %1403 = vmatpush1.bf16.msra.mxu1 %v1306_v60  ;;  %706 = vmatprep.subr.bf16.mxu0 %v651_v0 }
 0x411   :  { %1492 = vmatprep.subr.bf16.mxu1 %v1479_v2  ;;  %707 = vmatpush1.bf16.msra.mxu0 %v650_v62  ;;  %v2344_v60 = vsel %vm216_vm0, %v2798_v55, 0 }
 0x412   :  { %v1644_v4 = vpop.permute.xlu0 %1643  ;;  %1434 = vmatprep.mubr.bf16.mxu1 %v2997_v1  ;;  %v3442_v5 = vpop.permute.xlu1 %1645  ;;  %738 = vmatprep.mubr.bf16.mxu0 %v2997_v1 }
 0x413   :  { %v1655_v26 = vsel %vm1653_vm13, %v1644_v4, %v3442_v5 }
 0x416   :  { %v1642_v7 = vpop.permute.xlu0 %1641  ;;  %v646_v35 = vpop.permute.xlu1 %645 }
 0x417   :  { %2768 = vmatmul.mubr.msk.bf16.vlgmr.msra.gmra.mrb[0].mxu1 %vm659_vm8, %v2971_v40  ;;  %2745 = vmatmul.mubr.msk.bf16.vlgmr.msra.gmra.mrb[16].mxu0 %vm659_vm8, %v2972_v54  ;;  %v652_v9 = vsel %vm647_vm11, %v644_v56, %v646_v35  ;;  %v1654_v29 = vsel %vm1653_vm13, %v1642_v7, %v1644_v4 }
 0x418   :  { %1493 = vmatpush1.bf16.msra.mxu1 %v1478_v8  ;;  %749 = vmatprep.subr.bf16.mxu0 %v646_v35  ;;  %v2980_v8 = vld [vmem:[%s3872_s8 + $0x40] sm:$0xff]  }
 0x419   :  { %1535 = vmatprep.subr.bf16.mxu1 %v1481_v21  ;;  %750 = vmatpush1.bf16.msra.mxu0 %v652_v9 }
 0x41a   :  { %v1648_v61 = vpop.permute.xlu0 %1647  ;;  %800 = vmatprep.subr.bf16.mxu0 %v3329_v13  ;;  %1524 = vmatprep.mubr.bf16.mxu1 %v2997_v1  ;;  %v1650_v59 = vpop.permute.xlu1 %1649 }
 0x41b   :  { %781 = vmatprep.mubr.bf16.mxu0 %v2997_v1  ;;  %v1656_v32 = vsel %vm1653_vm13, %v3442_v5, %v1648_v61 }
 0x41e   :  { %v1652_v14 = vpop.permute.xlu0 %1651  ;;  %v3457_v23 = vpop.permute.xlu1 %1819 }
 0x41f   :  { %2772 = vmatmul.mubr.msk.bf16.vlgmr.msra.gmra.mrb[4].mxu1 %vm659_vm8, %v2973_v12  ;;  %2746 = vmatmul.mubr.msk.bf16.vlgmr.msra.gmra.mrb[20].mxu0 %vm659_vm8, %v2972_v54  ;;  %v1658_v36 = vsel %vm1653_vm13, %v1650_v59, %v1652_v14 }
 0x420   :  { %1536 = vmatpush1.bf16.msra.mxu1 %v1480_v45  ;;  %801 = vmatpush1.bf16.msra.mxu0 %v3339_v19  ;;  %v1482_v19 = vsel %vm1477_vm12, %v3421_v39, %v1476_v52 }
 0x421   :  { %1578 = vmatprep.subr.bf16.mxu1 %v1476_v52  ;;  %843 = vmatprep.subr.bf16.mxu0 %v3320_v27  ;;  %v2799_v52 = vcombine.high %v2307_v48, %v2307_v48 }
 0x422   :  { %v3465_v13 = vpop.permute.xlu0 %1821  ;;  %1567 = vmatprep.mubr.bf16.mxu1 %v2997_v1  ;;  %v3468_v47 = vpop.permute.xlu1 %1817  ;;  %832 = vmatprep.mubr.bf16.mxu0 %v2997_v1 }
 0x423   :  { %v1830_v39 = vsel %vm1829_vm14, %v3468_v47, %v3457_v23 }
 0x426   :  { %v3474_v25 = vpop.permute.xlu0 %1823  ;;  %v3480_v27 = vpop.permute.xlu1 %1825 }
 0x427   :  { %2773 = vmatmul.mubr.msk.bf16.vlgmr.msra.gmra.mrb[8].mxu1 %vm659_vm8, %v2973_v12  ;;  %2748 = vmatmul.mubr.msk.bf16.vlgmr.msra.gmra.mrb[12].mxu0 %vm659_vm8, %v2974_v24  ;;  %v1833_v40 = vsel %vm1829_vm14, %v3474_v25, %v3480_v27  ;;  %v1832_v53 = vsel %vm1829_vm14, %v3465_v13, %v3474_v25 }
 0x428   :  { %1579 = vmatpush1.bf16.msra.mxu1 %v1482_v19  ;;  %844 = vmatpush1.bf16.msra.mxu0 %v3332_v16  ;;  %v1657_v16 = vsel %vm1653_vm13, %v1648_v61, %v1650_v59 }
 0x429   :  { %1668 = vmatprep.subr.bf16.mxu1 %v1655_v26  ;;  %886 = vmatprep.subr.bf16.mxu0 %v3334_v17 }
 0x42a   :  { %v940_v28 = vpop.permute.xlu0 %939  ;;  %1610 = vmatprep.mubr.bf16.mxu1 %v2997_v1  ;;  %875 = vmatprep.mubr.bf16.mxu0 %v2997_v1  ;;  %v942_v3 = vpop.permute.xlu1 %941 }
 0x42b   :  { %v951_v17 = vsel %vm949_vm7, %v940_v28, %v942_v3 }
 0x42e   :  { %v938_v30 = vpop.permute.xlu0 %937  ;;  %v1828_v42 = vpop.permute.xlu1 %1827 }
 0x42f   :  { %2774 = vmatmul.mubr.msk.bf16.vlgmr.msra.gmra.mrb[0].mxu1 %vm659_vm8, %v2973_v12  ;;  %2749 = vmatmul.mubr.msk.bf16.vlgmr.msra.gmra.mrb[16].mxu0 %vm659_vm8, %v2974_v24  ;;  %v1834_v62 = vsel %vm1829_vm14, %v3480_v27, %v1828_v42 }
 0x430   :  { %1669 = vmatpush1.bf16.msra.mxu1 %v1654_v29  ;;  %887 = vmatpush1.bf16.msra.mxu0 %v3323_v6  ;;  %v950_v6 = vsel %vm949_vm7, %v938_v30, %v940_v28 }
 0x431   :  { %1711 = vmatprep.subr.bf16.mxu1 %v1657_v16  ;;  %964 = vmatprep.subr.bf16.mxu0 %v951_v17 }
 0x432   :  { %1700 = vmatprep.mubr.bf16.mxu1 %v2997_v1  ;;  %918 = vmatprep.mubr.bf16.mxu0 %v2997_v1  ;;  %v944_v63 = vpop.permute.xlu0 %943  ;;  %v1996_v54 = vpop.permute.xlu1 %1995 }
 0x433   :  { %v953_v33 = vsel %vm949_vm7, %v944_v63, %v3390_v20  ;;  %v952_v18 = vsel %vm949_vm7, %v942_v3, %v944_v63  ;;  %v1831_v20 = vsel %vm1829_vm14, %v3457_v23, %v3465_v13 }
 0x436   :  { %v1998_v56 = vpop.permute.xlu0 %1997  ;;  %v1994_v0 = vpop.permute.xlu1 %1993 }
 0x437   :  { %2778 = vmatmul.mubr.msk.bf16.vlgmr.msra.gmra.mrb[4].mxu1 %vm659_vm8, %v2975_v31  ;;  %2750 = vmatmul.mubr.msk.bf16.vlgmr.msra.gmra.mrb[20].mxu0 %vm659_vm8, %v2974_v24  ;;  %v2007_v2 = vsel %vm2005_vm15, %v1996_v54, %v1998_v56  ;;  %v2006_v7 = vsel %vm2005_vm15, %v1994_v0, %v1996_v54 }
 0x438   :  { %1712 = vmatpush1.bf16.msra.mxu1 %v1656_v32  ;;  %965 = vmatpush1.bf16.msra.mxu0 %v950_v6 }
 0x439   :  { %1754 = vmatprep.subr.bf16.mxu1 %v1652_v14  ;;  %1007 = vmatprep.subr.bf16.mxu0 %v953_v33 }
 0x43a   :  { %1743 = vmatprep.mubr.bf16.mxu1 %v2997_v1  ;;  %996 = vmatprep.mubr.bf16.mxu0 %v2997_v1  ;;  %v2000_v4 = vpop.permute.xlu0 %1999  ;;  %v2002_v5 = vpop.permute.xlu1 %2001 }
 0x43b   :  { %v2009_v35 = vsel %vm2005_vm15, %v2000_v4, %v2002_v5  ;;  %v2008_v9 = vsel %vm2005_vm15, %v1998_v56, %v2000_v4 }
 0x43e   :  { %v2004_v21 = vpop.permute.xlu0 %2003 }
 0x43f   :  { %2779 = vmatmul.mubr.msk.bf16.vlgmr.msra.gmra.mrb[8].mxu1 %vm659_vm8, %v2975_v31  ;;  %2754 = vmatmul.mubr.msk.bf16.vlgmr.msra.gmra.mrb[12].mxu0 %vm659_vm8, %v3397_v22  ;;  %v2010_v61 = vsel %vm2005_vm15, %v2002_v5, %v2004_v21 }
 0x440   :  { %1755 = vmatpush1.bf16.msra.mxu1 %v1658_v36  ;;  %1008 = vmatpush1.bf16.msra.mxu0 %v952_v18 }
 0x441   :  { %1844 = vmatprep.subr.bf16.mxu1 %v1831_v20  ;;  %1786 = vmatprep.mubr.bf16.mxu1 %v2997_v1 }
 0x442   :  { %1039 = vmatprep.mubr.bf16.mxu0 %v2997_v1  ;;  %2800 = vmatprep.subr.msk.bf16.mxu0 %vm216_vm0, %v2795_v34 }
 0x447   :  { %2780 = vmatmul.mubr.msk.bf16.vlgmr.msra.gmra.mrb[0].mxu1 %vm659_vm8, %v2975_v31  ;;  %2755 = vmatmul.mubr.msk.bf16.vlgmr.msra.gmra.mrb[16].mxu0 %vm659_vm8, %v3397_v22  ;;  %v2979_v22 = vld [vmem:[%s3873_s5] sm:$0xff]  }
 0x448   :  { %1845 = vmatpush1.bf16.msra.mxu1 %v1830_v39  ;;  %1876 = vmatprep.mubr.bf16.mxu1 %v2997_v1 }
 0x449   :  { %1887 = vmatprep.subr.bf16.mxu1 %v1833_v40  ;;  %2350 = vmatpush1.bf16.msra.mxu0 %v2332_v51 }
 0x44a   :  { %2381 = vmatprep.mubr.bf16.mxu0 %v2997_v1  ;;  %2802 = vmatprep.subr.msk.bf16.mxu0 %vm216_vm0, %v2797_v38 }
 0x44f   :  { %2784 = vmatmul.mubr.msk.bf16.vlgmr.msra.gmra.mrb[4].mxu1 %vm659_vm8, %v2976_v46  ;;  %2801 = vmatmul.mubr.msk.bf16.vlgmr.msra.gmra.mrb[24].mxu0 %vm411_vm2, %v2979_v22 }
 0x450   :  { %1888 = vmatpush1.bf16.msra.mxu1 %v1832_v53  ;;  %1919 = vmatprep.mubr.bf16.mxu1 %v2997_v1 }
 0x451   :  { %1930 = vmatprep.subr.bf16.mxu1 %v1828_v42  ;;  %2393 = vmatpush1.bf16.msra.mxu0 %v2338_v50 }
 0x452   :  { %2424 = vmatprep.mubr.bf16.mxu0 %v2997_v1  ;;  %2804 = vmatprep.subr.msk.bf16.mxu0 %vm216_vm0, %v2799_v52 }
 0x457   :  { %2785 = vmatmul.mubr.msk.bf16.vlgmr.msra.gmra.mrb[8].mxu1 %vm659_vm8, %v2976_v46  ;;  %2803 = vmatmul.mubr.msk.bf16.vlgmr.msra.gmra.mrb[28].mxu0 %vm411_vm2, %v2979_v22 }
 0x458   :  { %1931 = vmatpush1.bf16.msra.mxu1 %v1834_v62  ;;  %1962 = vmatprep.mubr.bf16.mxu1 %v2997_v1 }
 0x459   :  { %2020 = vmatprep.subr.bf16.mxu1 %v2007_v2  ;;  %2436 = vmatpush1.bf16.msra.mxu0 %v2344_v60 }
 0x45a   :  { %2467 = vmatprep.mubr.bf16.mxu0 %v2997_v1 }
 0x45f   :  { %2786 = vmatmul.mubr.msk.bf16.vlgmr.msra.gmra.mrb[0].mxu1 %vm659_vm8, %v2976_v46  ;;  %2805 = vmatmul.mubr.msk.bf16.vlgmr.msra.gmra.mrb[32].mxu0 %vm411_vm2, %v2979_v22 }
 0x460   :  { %2021 = vmatpush1.bf16.msra.mxu1 %v2006_v7  ;;  %2052 = vmatprep.mubr.bf16.mxu1 %v2997_v1 }
 0x461   :  { %2063 = vmatprep.subr.bf16.mxu1 %v2009_v35 }
 0x467   :  { %2790 = vmatmul.mubr.msk.bf16.vlgmr.msra.gmra.mrb[4].mxu1 %vm659_vm8, %v2980_v8 }
 0x468   :  { %2064 = vmatpush1.bf16.msra.mxu1 %v2008_v9  ;;  %2095 = vmatprep.mubr.bf16.mxu1 %v2997_v1 }
 0x469   :  { %2106 = vmatprep.subr.bf16.mxu1 %v2004_v21 }
 0x46f   :  { %2791 = vmatmul.mubr.msk.bf16.vlgmr.msra.gmra.mrb[8].mxu1 %vm659_vm8, %v2980_v8 }
 0x470   :  { %2107 = vmatpush1.bf16.msra.mxu1 %v2010_v61  ;;  %2138 = vmatprep.mubr.bf16.mxu1 %v2997_v1 }
 0x477   :  { %2792 = vmatmul.mubr.msk.bf16.vlgmr.msra.gmra.mrb[0].mxu1 %vm659_vm8, %v2980_v8 }
 0x50a   :  { %v3579_v59 = vpop.f32.mrb[20].mxu0 }
 0x50b   :  { %v3581_v12 = vpop.f32.mrb[21].mxu0 }
 0x50c   :  { %v3583_v14 = vpop.f32.mrb[22].mxu0 }
 0x50d   :  { %v3585_v23 = vpop.f32.mrb[23].mxu0 }
 0x512   :  { %v998_v45 = vpop.f32.mrb[12].mxu0 }
 0x513   :  { %v1000_v13 = vpop.f32.mrb[13].mxu0 }
 0x514   :  { %v1002_v47 = vpop.f32.mrb[14].mxu0 }
 0x515   :  { %v1004_v24 = vpop.f32.mrb[15].mxu0 }
 0x51a   :  { %v1041_v25 = vpop.f32.mrb[16].mxu0 }
 0x51b   :  { %v1043_v19 = vpop.f32.mrb[17].mxu0 }
 0x51c   :  { %v1045_v27 = vpop.f32.mrb[18].mxu0 }
 0x51d   :  { %v1047_v26 = vpop.f32.mrb[19].mxu0 }
 0x522   :  { %v3587_v28 = vpop.f32.mrb[24].mxu0 }
 0x523   :  { %v2478_v1 = vmul.f32 %v3587_v28, %v3176_v43  ;;  %v3591_v3 = vpop.f32.mrb[25].mxu0 }
 0x524   :  { %v2479_v29 = vmul.f32 %v3591_v3, %v3178_v44  ;;  %v3595_v30 = vpop.f32.mrb[26].mxu0 }
 0x525   :  { %v2484_v16 = vmul.f32 %v3595_v30, %v3176_v43  ;;  %v3599_v17 = vpop.f32.mrb[27].mxu0 }
 0x526   :  { %v2490_v31 = vadd.f32 %v2479_v29, %v2478_v1  ;;  %v2485_v63 = vmul.f32 %v3599_v17, %v3178_v44 }
 0x528   :  { %v2498_v32 = vadd.f32 %v2485_v63, %v2484_v16 }
 0x52a   :  { %v3603_v6 = vpop.f32.mrb[28].mxu0 }
 0x52b   :  { %v2480_v33 = vmul.f32 %v3603_v6, %v3196_v57  ;;  %v3607_v15 = vpop.f32.mrb[29].mxu0 }
 0x52c   :  { %v2481_v34 = vmul.f32 %v3607_v15, %v3198_v58  ;;  %v3611_v36 = vpop.f32.mrb[30].mxu0 }
 0x52d   :  { %v2491_v18 = vadd.f32 %v2490_v31, %v2480_v33  ;;  %v2486_v20 = vmul.f32 %v3611_v36, %v3196_v57  ;;  %v3615_v49 = vpop.f32.mrb[31].mxu0 }
 0x52e   :  { %v2487_v37 = vmul.f32 %v3615_v49, %v3198_v58 }
 0x52f   :  { %v2499_v51 = vadd.f32 %v2498_v32, %v2486_v20  ;;  %v2492_v38 = vadd.f32 %v2491_v18, %v2481_v34 }
 0x531   :  { %v2500_v39 = vadd.f32 %v2499_v51, %v2487_v37 }
 0x532   :  { %v3619_v40 = vpop.f32.mrb[32].mxu0 }
 0x533   :  { %v2482_v41 = vmul.f32 %v3619_v40, %v3216_v10  ;;  %v3623_v42 = vpop.f32.mrb[33].mxu0 }
 0x534   :  { %v2483_v46 = vmul.f32 %v3623_v42, %v3218_v11  ;;  %v3627_v22 = vpop.f32.mrb[34].mxu0 }
 0x535   :  { %v2488_v48 = vmul.f32 %v3627_v22, %v3216_v10  ;;  %v3631_v50 = vpop.f32.mrb[35].mxu0  ;;  %v2493_v52 = vadd.f32 %v2492_v38, %v2482_v41 }
 0x536   :  { %v2489_v53 = vmul.f32 %v3631_v50, %v3218_v11  ;;  %v2494_v54 = vsel %vm411_vm2, %v2483_v46, 0.0 }
 0x537   :  { %v2501_v55 = vadd.f32 %v2500_v39, %v2488_v48  ;;  %v2495_v56 = vadd.f32 %v2494_v54, %v2493_v52 }
 0x538   :  { %v2502_v60 = vsel %vm411_vm2, %v2489_v53, 0.0 }
 0x539   :  { %v2503_v62 = vadd.f32 %v2502_v60, %v2501_v55 }
 0x53a   :  { %v2054_v0 = vpop.f32.mrb[4].mxu1 }
 0x53b   :  { %v3637_v2 = vadd.f32 %v2054_v0, %v998_v45  ;;  %v2056_v4 = vpop.f32.mrb[5].mxu1 }
 0x53c   :  { %v3639_v5 = vadd.f32 %v2056_v4, %v1000_v13  ;;  %v2058_v7 = vpop.f32.mrb[6].mxu1 }
 0x53d   :  { %v3641_v35 = vadd.f32 %v2058_v7, %v1002_v47  ;;  %v2060_v8 = vpop.f32.mrb[7].mxu1  ;;  %v2161_v61 = vmul.f32 %v3637_v2, %v3176_v43 }
 0x53e   :  { %v3643_v9 = vadd.f32 %v2060_v8, %v1004_v24  ;;  %v2162_v1 = vmul.f32 %v3639_v5, %v3178_v44 }
 0x53f   :  { %v2167_v47 = vmul.f32 %v3641_v35, %v3176_v43 }
 0x540   :  { %v2168_v24 = vmul.f32 %v3643_v9, %v3178_v44 }
 0x542   :  { %v2097_v21 = vpop.f32.mrb[8].mxu1  ;;  %v2181_v34 = vadd.f32 %v2168_v24, %v2167_v47 }
 0x543   :  { %v3649_v29 = vadd.f32 %v2097_v21, %v1041_v25  ;;  %v2099_v45 = vpop.f32.mrb[9].mxu1  ;;  %v2173_v25 = vadd.f32 %v2162_v1, %v2161_v61 }
 0x544   :  { %v3651_v16 = vadd.f32 %v2099_v45, %v1043_v19  ;;  %v2101_v13 = vpop.f32.mrb[10].mxu1 }
 0x545   :  { %v2163_v31 = vmul.f32 %v3649_v29, %v3196_v57  ;;  %v3659_v63 = vadd.f32 %v2101_v13, %v1045_v27  ;;  %v2103_v32 = vpop.f32.mrb[11].mxu1 }
 0x546   :  { %v3661_v33 = vadd.f32 %v2103_v32, %v1047_v26  ;;  %v2164_v20 = vmul.f32 %v3651_v16, %v3198_v58 }
 0x547   :  { %v2169_v19 = vmul.f32 %v3659_v63, %v3196_v57  ;;  %v2174_v18 = vadd.f32 %v2173_v25, %v2163_v31 }
 0x548   :  { %v2170_v38 = vmul.f32 %v3661_v33, %v3198_v58 }
 0x549   :  { %v2182_v51 = vadd.f32 %v2181_v34, %v2169_v19  ;;  %v2175_v53 = vadd.f32 %v2174_v18, %v2164_v20 }
 0x54a   :  { %v2140_v37 = vpop.f32.mrb[0].mxu1 }
 0x54b   :  { %v3670_v27 = vadd.f32 %v2140_v37, %v3579_v59  ;;  %v2142_v39 = vpop.f32.mrb[1].mxu1  ;;  %v2183_v60 = vadd.f32 %v2182_v51, %v2170_v38 }
 0x54c   :  { %v3673_v26 = vadd.f32 %v2142_v39, %v3581_v12  ;;  %v2144_v41 = vpop.f32.mrb[2].mxu1 }
 0x54d   :  { %v2165_v46 = vmul.f32 %v3670_v27, %v3216_v10  ;;  %v3678_v48 = vadd.f32 %v2144_v41, %v3583_v14  ;;  %v2146_v52 = vpop.f32.mrb[3].mxu1 }
 0x54e   :  { %v3681_v54 = vadd.f32 %v2146_v52, %v3585_v23  ;;  %v2166_v59 = vmul.f32 %v3673_v26, %v3218_v11 }
 0x54f   :  { %v2171_v55 = vmul.f32 %v3678_v48, %v3216_v10  ;;  %v2176_v12 = vadd.f32 %v2175_v53, %v2165_v46 }
 0x550   :  { %v2177_v0 = vsel %vm411_vm2, %v2166_v59, 0.0  ;;  %v2172_v4 = vmul.f32 %v3681_v54, %v3218_v11 }
 0x551   :  { %v2178_v14 = vadd.f32 %v2177_v0, %v2176_v12  ;;  %v2184_v7 = vadd.f32 %v2183_v60, %v2171_v55 }
 0x552   :  { %v2185_v8 = vsel %vm411_vm2, %v2172_v4, 0.0 }
 0x553   :  { %2179 = vadd.xlane.f32.xlu1 %v2178_v14  ;;  %v2186_v23 = vadd.f32 %v2185_v8, %v2184_v7 }
 0x555   :  { %2187 = vadd.xlane.f32.xlu0 %v2186_v23 }
 0x557   :  { %2504 = vadd.xlane.f32.xlu1 %v2503_v62 }
 0x559   :  { %2496 = vadd.xlane.f32.xlu0 %v2495_v56 }
 0x5e0   :  { %v2180_v21 = vpop.xlane.xlu1 %2179 }
 0x5e1   :  { %v3691_v61 = vmul.f32 0.001953125, %v2180_v21 }
 0x5e2   :  { %v2188_v1 = vpop.xlane.xlu0 %2187 }
 0x5e3   :  { %v3693_v45 = vmul.f32 0.001953125, %v2188_v1  ;;  %v2191_v13 = vsub.f32 %v3637_v2, %v3691_v61  ;;  %v2192_v47 = vsub.f32 %v3639_v5, %v3691_v61  ;;  %v2193_v24 = vsub.f32 %v3649_v29, %v3691_v61 }
 0x5e4   :  { %v2194_v31 = vsub.f32 %v3651_v16, %v3691_v61  ;;  %v2195_v56 = vsub.f32 %v3670_v27, %v3691_v61  ;;  %v2196_v62 = vsub.f32 %v3673_v26, %v3691_v61  ;;  %v2505_v32 = vpop.xlane.xlu1 %2504 }
 0x5e5   :  { %v2203_v25 = vmul.f32 %v2191_v13, %v3176_v43  ;;  %v2204_v19 = vmul.f32 %v2192_v47, %v3178_v44  ;;  %v2205_v34 = vmul.f32 %v2193_v24, %v3196_v57  ;;  %v2197_v20 = vsub.f32 %v3641_v35, %v3693_v45 }
 0x5e6   :  { %v2208_v18 = vmul.f32 %v2196_v62, %v3218_v11  ;;  %v2497_v37 = vpop.xlane.xlu0 %2496  ;;  %v2206_v51 = vmul.f32 %v2194_v31, %v3198_v58  ;;  %v2207_v38 = vmul.f32 %v2195_v56, %v3216_v10  ;;  %v3715_v46 = vmul.f32 0.001953125, %v2505_v32 }
 0x5e7   :  { %v2215_v39 = vmul.f32 %v2203_v25, %v2203_v25  ;;  %v2216_v41 = vmul.f32 %v2204_v19, %v2204_v19  ;;  %v2217_v52 = vmul.f32 %v2205_v34, %v2205_v34  ;;  %v2198_v59 = vsub.f32 %v3643_v9, %v3693_v45 }
 0x5e8   :  { %v2220_v53 = vmul.f32 %v2208_v18, %v2208_v18  ;;  %v2199_v12 = vsub.f32 %v3659_v63, %v3693_v45  ;;  %v2200_v60 = vsub.f32 %v3661_v33, %v3693_v45  ;;  %v2201_v0 = vsub.f32 %v3678_v48, %v3693_v45 }
 0x5e9   :  { %v2227_v55 = vadd.f32 %v2216_v41, %v2215_v39  ;;  %v3725_v4 = vmul.f32 0.001953125, %v2497_v37  ;;  %v2202_v14 = vsub.f32 %v3681_v54, %v3693_v45  ;;  %v2209_v7 = vmul.f32 %v2197_v20, %v3176_v43 }
 0x5ea   :  { %v2210_v8 = vmul.f32 %v2198_v59, %v3178_v44  ;;  %v2218_v23 = vmul.f32 %v2206_v51, %v2206_v51  ;;  %v2219_v21 = vmul.f32 %v2207_v38, %v2207_v38  ;;  %v2211_v13 = vmul.f32 %v2199_v12, %v3196_v57 }
 0x5eb   :  { %v2228_v1 = vadd.f32 %v2227_v55, %v2217_v52  ;;  %v2212_v47 = vmul.f32 %v2200_v60, %v3198_v58  ;;  %v2221_v24 = vmul.f32 %v2209_v7, %v2209_v7  ;;  %v2514_v56 = vsub.f32 %v3595_v30, %v3715_v46 }
 0x5ec   :  { %v2222_v31 = vmul.f32 %v2210_v8, %v2210_v8  ;;  %v2231_v32 = vsel %vm411_vm2, %v2220_v53, 0.0  ;;  %v2213_v25 = vmul.f32 %v2201_v0, %v3216_v10  ;;  %v2214_v19 = vmul.f32 %v2202_v14, %v3218_v11 }
 0x5ed   :  { %v2229_v62 = vadd.f32 %v2228_v1, %v2218_v23  ;;  %v2223_v34 = vmul.f32 %v2211_v13, %v2211_v13  ;;  %v2515_v20 = vsub.f32 %v3599_v17, %v3715_v46  ;;  %v2516_v37 = vsub.f32 %v3611_v36, %v3715_v46 }
 0x5ee   :  { %v2235_v18 = vadd.f32 %v2222_v31, %v2221_v24  ;;  %v2517_v38 = vsub.f32 %v3615_v49, %v3715_v46  ;;  %v2518_v39 = vsub.f32 %v3627_v22, %v3715_v46  ;;  %v2519_v41 = vsub.f32 %v3631_v50, %v3715_v46 }
 0x5ef   :  { %v2230_v51 = vadd.f32 %v2229_v62, %v2219_v21  ;;  %v2224_v52 = vmul.f32 %v2212_v47, %v2212_v47  ;;  %v2526_v59 = vmul.f32 %v2514_v56, %v3176_v43  ;;  %v2527_v55 = vmul.f32 %v2515_v20, %v3178_v44 }
 0x5f0   :  { %v2236_v53 = vadd.f32 %v2235_v18, %v2223_v34  ;;  %v2226_v60 = vmul.f32 %v2214_v19, %v2214_v19  ;;  %v2528_v0 = vmul.f32 %v2516_v37, %v3196_v57  ;;  %v2529_v14 = vmul.f32 %v2517_v38, %v3198_v58 }
 0x5f1   :  { %v2232_v12 = vadd.f32 %v2231_v32, %v2230_v51  ;;  %v2225_v7 = vmul.f32 %v2213_v25, %v2213_v25  ;;  %v2538_v23 = vmul.f32 %v2526_v59, %v2526_v59  ;;  %v2539_v21 = vmul.f32 %v2527_v55, %v2527_v55 }
 0x5f2   :  { %v2237_v8 = vadd.f32 %v2236_v53, %v2224_v52  ;;  %v2530_v1 = vmul.f32 %v2518_v39, %v3216_v10  ;;  %v2531_v13 = vmul.f32 %v2519_v41, %v3218_v11  ;;  %v2508_v47 = vsub.f32 %v3587_v28, %v3725_v4 }
 0x5f3   :  { %2233 = vadd.xlane.f32.xlu0 %v2232_v12  ;;  %v2540_v31 = vmul.f32 %v2528_v0, %v2528_v0  ;;  %v2552_v56 = vadd.f32 %v2539_v21, %v2538_v23  ;;  %v2509_v62 = vsub.f32 %v3591_v3, %v3725_v4  ;;  %v2239_v32 = vsel %vm411_vm2, %v2226_v60, 0.0 }
 0x5f4   :  { %v2238_v24 = vadd.f32 %v2237_v8, %v2225_v7  ;;  %v2541_v25 = vmul.f32 %v2529_v14, %v2529_v14  ;;  %v2510_v19 = vsub.f32 %v3603_v6, %v3725_v4  ;;  %v2511_v34 = vsub.f32 %v3607_v15, %v3725_v4 }
 0x5f5   :  { %v2553_v20 = vadd.f32 %v2552_v56, %v2540_v31  ;;  %v2513_v37 = vsub.f32 %v3623_v42, %v3725_v4  ;;  %v2520_v51 = vmul.f32 %v2508_v47, %v3176_v43  ;;  %v2543_v38 = vmul.f32 %v2531_v13, %v2531_v13 }
 0x5f6   :  { %v2240_v18 = vadd.f32 %v2239_v32, %v2238_v24  ;;  %v2512_v39 = vsub.f32 %v3619_v40, %v3725_v4  ;;  %v2521_v41 = vmul.f32 %v2509_v62, %v3178_v44  ;;  %v2522_v52 = vmul.f32 %v2510_v19, %v3196_v57 }
 0x5f7   :  { %v2542_v53 = vmul.f32 %v2530_v1, %v2530_v1  ;;  %v2554_v59 = vadd.f32 %v2553_v20, %v2541_v25  ;;  %v2532_v55 = vmul.f32 %v2520_v51, %v2520_v51  ;;  %v2523_v12 = vmul.f32 %v2511_v34, %v3198_v58 }
 0x5f8   :  { %2241 = vadd.xlane.f32.xlu1 %v2240_v18  ;;  %v2533_v60 = vmul.f32 %v2521_v41, %v2521_v41  ;;  %v2525_v14 = vmul.f32 %v2513_v37, %v3218_v11  ;;  %v2556_v7 = vsel %vm411_vm2, %v2543_v38, 0.0  ;;  %v2524_v8 = vmul.f32 %v2512_v39, %v3216_v10 }
 0x5f9   :  { %v2555_v0 = vadd.f32 %v2554_v59, %v2542_v53  ;;  %v2534_v23 = vmul.f32 %v2522_v52, %v2522_v52  ;;  %v2535_v47 = vmul.f32 %v2523_v12, %v2523_v12  ;;  %v2563_v12 = vld [vmem:[%s3875_s6 + $0x8] sm:$0xff] }
 0x5fa   :  { %v2544_v21 = vadd.f32 %v2533_v60, %v2532_v55  ;;  %v2537_v31 = vmul.f32 %v2525_v14, %v2525_v14  ;;  %v2536_v1 = vmul.f32 %v2524_v8, %v2524_v8  ;;  %v2246_v60 = vld [vmem:[%s3876_s9 + $0x8] sm:$0xff] }
 0x5fb   :  { %v2557_v13 = vadd.f32 %v2556_v7, %v2555_v0 }
 0x5fc   :  { %v2545_v24 = vadd.f32 %v2544_v21, %v2534_v23  ;;  %v2548_v32 = vsel %vm411_vm2, %v2537_v31, 0.0  ;;  %v2245_v23 = vld [vmem:[%s3876_s9] sm:$0xff]  ;;  %vm3837_vm2 = vmor %vm2694_vm1, %vm216_vm0 }
 0x5fd   :  { %2558 = vadd.xlane.f32.xlu1 %v2557_v13  ;;  %v2562_v21 = vld [vmem:[%s3875_s6] sm:$0xff] }
 0x5fe   :  { %v2546_v56 = vadd.f32 %v2545_v24, %v2535_v47  ;;  %v2254_v24 = vld [vmem:[%s3877_s10 + $0x8] sm:$0xff] }
 0x600   :  { %v2547_v62 = vadd.f32 %v2546_v56, %v2536_v1 }
 0x602   :  { %v2549_v25 = vadd.f32 %v2548_v32, %v2547_v62  ;;  %v2571_v32 = vld [vmem:[%s3878_s7 + $0x8] sm:$0xff] }
 0x604   :  { %2550 = vadd.xlane.f32.xlu0 %v2549_v25 }
 0x680   :  { %v2234_v18 = vpop.xlane.xlu0 %2233 }
 0x681   :  { %v2243_v20 = vmul.f32 0.001953125, %v2234_v18 }
 0x683   :  { %v2247_v39 = vadd.f32 1e-05, %v2243_v20 }
 0x685   :  { %v2242_v19 = vpop.xlane.xlu1 %2241 }
 0x686   :  { %v2244_v34 = vmul.f32 0.001953125, %v2242_v19 }
 0x688   :  { %v2248_v37 = vadd.f32 1e-05, %v2244_v34 }
 0x68a   :  { %v2559_v51 = vpop.xlane.xlu1 %2558  ;;  %2989 = vrsqrt.f32 %v2248_v37 }
 0x68b   :  { %v2561_v38 = vmul.f32 0.001953125, %v2559_v51 }
 0x68d   :  { %v2565_v41 = vadd.f32 1e-05, %v2561_v38 }
 0x68f   :  { %2991 = vrsqrt.f32 %v2565_v41 }
 0x690   :  { %2993 = vrsqrt.f32 %v2247_v39 }
 0x691   :  { %v2551_v52 = vpop.xlane.xlu0 %2550 }
 0x692   :  { %v2560_v53 = vmul.f32 0.001953125, %v2551_v52 }
 0x694   :  { %v2564_v59 = vadd.f32 1e-05, %v2560_v53  ;;  %v2990_v55 = vpop.eup %2989 }
 0x695   :  { %v2252_v7 = vmul.f32 %v2990_v55, %v2246_v60 }
 0x696   :  { %2995 = vrsqrt.f32 %v2564_v59 }
 0x697   :  { %v2256_v47 = vmul.f32 %v2252_v7, %v3693_v45  ;;  %v2253_v45 = vld [vmem:[%s3877_s10] sm:$0xff] }
 0x699   :  { %v2992_v0 = vpop.eup %2991  ;;  %v2258_v56 = vsub.f32 %v2254_v24, %v2256_v47 }
 0x69a   :  { %v2569_v14 = vmul.f32 %v2992_v0, %v2563_v12  ;;  %v2994_v8 = vpop.eup %2993 }
 0x69b   :  { %v2251_v13 = vmul.f32 %v2994_v8, %v2245_v23 }
 0x69c   :  { %2583 = vperm.xlu0 %2924, %v2569_v14   ;;  %v2573_v62 = vmul.f32 %v2569_v14, %v3715_v46  ;;  %v2570_v46 = vld [vmem:[%s3878_s7] sm:$0xff] }
 0x69d   :  { %v2255_v25 = vmul.f32 %v2251_v13, %v3691_v61 }
 0x69e   :  { %v2575_v19 = vsub.f32 %v2571_v32, %v2573_v62 }
 0x69f   :  { %v2257_v34 = vsub.f32 %v2253_v45, %v2255_v25 }
 0x6a0   :  { %v2996_v31 = vpop.eup %2995  ;;  %2261 = vperm.xlu0 %2924, %v2251_v13  }
 0x6a1   :  { %v2568_v1 = vmul.f32 %v2996_v31, %v2562_v21 }
 0x6a3   :  { %2578 = vperm.xlu1 %2925, %v2568_v1   ;;  %v2572_v18 = vmul.f32 %v2568_v1, %v3725_v4 }
 0x6a4   :  { %2288 = vperm.xlu0 %2924, %v2258_v56  }
 0x6a5   :  { %v2574_v20 = vsub.f32 %v2570_v46, %v2572_v18 }
 0x6a7   :  { %2266 = vperm.xlu1 %2925, %v2252_v7  }
 0x6a8   :  { %2605 = vperm.xlu0 %2924, %v2575_v19  }
 0x6ab   :  { %2283 = vperm.xlu1 %2925, %v2257_v34  }
 0x6af   :  { %2600 = vperm.xlu1 %2925, %v2574_v20  }
 0x71b   :  { %v2584_v37 = vpop.permute.xlu0 %2583 }
 0x71c   :  { %v2592_v39 = vmul.f32 %v2584_v37, %v3595_v30  ;;  %v2593_v41 = vmul.f32 %v2584_v37, %v3599_v17  ;;  %v2594_v52 = vmul.f32 %v2584_v37, %v3611_v36  ;;  %v2595_v53 = vmul.f32 %v2584_v37, %v3615_v49 }
 0x71d   :  { %v2596_v55 = vmul.f32 %v2584_v37, %v3627_v22  ;;  %v2597_v12 = vmul.f32 %v2584_v37, %v3631_v50 }
 0x71f   :  { %v2262_v51 = vpop.permute.xlu0 %2261 }
 0x720   :  { %v2269_v4 = vmul.f32 %v3637_v2, %v2262_v51  ;;  %v2270_v59 = vmul.f32 %v3639_v5, %v2262_v51  ;;  %v2271_v60 = vmul.f32 %v3649_v29, %v2262_v51  ;;  %v2272_v0 = vmul.f32 %v3651_v16, %v2262_v51 }
 0x721   :  { %v2273_v30 = vmul.f32 %v3670_v27, %v2262_v51  ;;  %v2274_v17 = vmul.f32 %v3673_v26, %v2262_v51 }
 0x722   :  { %v2579_v61 = vpop.permute.xlu1 %2578 }
 0x723   :  { %v2289_v38 = vpop.permute.xlu0 %2288  ;;  %v2586_v36 = vmul.f32 %v2579_v61, %v3587_v28  ;;  %v2587_v49 = vmul.f32 %v2579_v61, %v3591_v3  ;;  %v2588_v2 = vmul.f32 %v2579_v61, %v3603_v6  ;;  %v2589_v5 = vmul.f32 %v2579_v61, %v3607_v15 }
 0x724   :  { %v2590_v29 = vmul.f32 %v2579_v61, %v3619_v40  ;;  %v2591_v16 = vmul.f32 %v2579_v61, %v3623_v42 }
 0x726   :  { %v2267_v14 = vpop.permute.xlu1 %2266 }
 0x727   :  { %v2275_v22 = vmul.f32 %v3641_v35, %v2267_v14  ;;  %v2276_v50 = vmul.f32 %v3643_v9, %v2267_v14  ;;  %v2606_v27 = vpop.permute.xlu0 %2605  ;;  %v2277_v26 = vmul.f32 %v3659_v63, %v2267_v14  ;;  %v2278_v7 = vmul.f32 %v3661_v33, %v2267_v14 }
 0x728   :  { %v2279_v28 = vmul.f32 %v3678_v48, %v2267_v14  ;;  %v2280_v3 = vmul.f32 %v3681_v54, %v2267_v14  ;;  %v2614_v15 = vadd.f32 %v2606_v27, %v2592_v39  ;;  %v2615_v23 = vadd.f32 %v2606_v27, %v2593_v41 }
 0x729   :  { %v2297_v6 = vadd.f32 %v2289_v38, %v2275_v22  ;;  %v2298_v8 = vadd.f32 %v2289_v38, %v2276_v50  ;;  %v2299_v21 = vadd.f32 %v2289_v38, %v2277_v26  ;;  %v2300_v9 = vadd.f32 %v2289_v38, %v2278_v7 }
 0x72a   :  { %v2284_v35 = vpop.permute.xlu1 %2283  ;;  %v2616_v13 = vadd.f32 %v2606_v27, %v2594_v52  ;;  %v2617_v40 = vadd.f32 %v2606_v27, %v2595_v53  ;;  %v2301_v24 = vadd.f32 %v2289_v38, %v2279_v28  ;;  %v2302_v31 = vadd.f32 %v2289_v38, %v2280_v3 }
 0x72b   :  { %v2291_v47 = vadd.f32 %v2284_v35, %v2269_v4  ;;  %v2292_v42 = vadd.f32 %v2284_v35, %v2270_v59  ;;  %v2293_v63 = vadd.f32 %v2284_v35, %v2271_v60  ;;  %v2294_v1 = vadd.f32 %v2284_v35, %v2272_v0 }
 0x72c   :  { %v2618_v33 = vadd.f32 %v2606_v27, %v2596_v55  ;;  %v2619_v48 = vadd.f32 %v2606_v27, %v2597_v12  ;;  %v2295_v56 = vadd.f32 %v2284_v35, %v2273_v30  ;;  %v2296_v54 = vadd.f32 %v2284_v35, %v2274_v17 }
 0x72d   :  { %v2626_v62 = vadd.f32 %v2614_v15, %v2297_v6  ;;  %v2627_v32 = vadd.f32 %v2615_v23, %v2298_v8  ;;  %v2628_v45 = vadd.f32 %v2616_v13, %v2299_v21  ;;  %v2629_v19 = vadd.f32 %v2617_v40, %v2300_v9 }
 0x72e   :  { %v2601_v25 = vpop.permute.xlu1 %2600  ;;  %v2630_v34 = vadd.f32 %v2618_v33, %v2301_v24  ;;  %v2631_v18 = vadd.f32 %v2619_v48, %v2302_v31 }
 0x72f   :  { %v2608_v46 = vadd.f32 %v2601_v25, %v2586_v36  ;;  %v2609_v20 = vadd.f32 %v2601_v25, %v2587_v49  ;;  %v2610_v37 = vadd.f32 %v2601_v25, %v2588_v2  ;;  %v2611_v51 = vadd.f32 %v2601_v25, %v2589_v5 }
 0x730   :  { %v2612_v61 = vadd.f32 %v2601_v25, %v2590_v29  ;;  %v2613_v38 = vadd.f32 %v2601_v25, %v2591_v16  ;;  %v2638_v39 = vmax.f32 %v2626_v62, 0.0  ;;  %v2639_v41 = vmax.f32 %v2627_v32, 0.0 }
 0x731   :  { %v2620_v52 = vadd.f32 %v2608_v46, %v2291_v47  ;;  %v2621_v53 = vadd.f32 %v2609_v20, %v2292_v42  ;;  %v2622_v4 = vadd.f32 %v2610_v37, %v2293_v63  ;;  %v2623_v59 = vadd.f32 %v2611_v51, %v2294_v1 }
 0x732   :  { %v2624_v55 = vadd.f32 %v2612_v61, %v2295_v56  ;;  %v2625_v12 = vadd.f32 %v2613_v38, %v2296_v54  ;;  %v2640_v60 = vmax.f32 %v2628_v45, 0.0  ;;  %v2641_v0 = vmax.f32 %v2629_v19, 0.0 }
 0x733   :  { %v2632_v30 = vmax.f32 %v2620_v52, 0.0  ;;  %v2633_v17 = vmax.f32 %v2621_v53, 0.0  ;;  %v2634_v14 = vmax.f32 %v2622_v4, 0.0  ;;  %v2635_v22 = vmax.f32 %v2623_v59, 0.0 }
 0x734   :  { %v2636_v36 = vmax.f32 %v2624_v55, 0.0  ;;  %v2637_v49 = vmax.f32 %v2625_v12, 0.0  ;;  %v2642_v2 = vmax.f32 %v2630_v34, 0.0  ;;  %v2643_v5 = vmax.f32 %v2631_v18, 0.0 }
 0x735   :  { %v2644_v50 = vmul.f32 %v2632_v30, %v3176_v43  ;;  %v2645_v29 = vmul.f32 %v2633_v17, %v3178_v44  ;;  %v2646_v16 = vmul.f32 %v2634_v14, %v3196_v57  ;;  %v2647_v27 = vmul.f32 %v2635_v22, %v3198_v58 }
 0x736   :  { %v2648_v26 = vmul.f32 %v2636_v36, %v3216_v10  ;;  %v2649_v7 = vmul.f32 %v2637_v49, %v3218_v11  ;;  %v2650_v28 = vmul.f32 %v2638_v39, %v3176_v43  ;;  %v2651_v3 = vmul.f32 %v2639_v41, %v3178_v44 }
 0x737   :  { %v2812_v8 = vpack.c.bf16 %v2645_v29, %v2644_v50  ;;  %v2813_v15 = vpack.c.bf16 %v2647_v27, %v2646_v16  ;;  %v2652_v23 = vmul.f32 %v2640_v60, %v3196_v57  ;;  %v2653_v35 = vmul.f32 %v2641_v0, %v3198_v58 }
 0x738   :  { %v2814_v21 = vpack.c.bf16 %v2649_v7, %v2648_v26  ;;  %v2654_v9 = vmul.f32 %v2642_v2, %v3216_v10  ;;  %v2655_v13 = vmul.f32 %v2643_v5, %v3218_v11  ;;  %v2815_v43 = vpack.c.bf16 %v2651_v3, %v2650_v28 }
 0x739   :  { %2692 = vst [vmem:[%s3879_s12] sm:$0xff] %v2812_v8  ;;  %2693 = vst [vmem:[%s3879_s12 + $0x8] sm:$0xff] %v2813_v15  ;;  %v2816_v44 = vpack.c.bf16 %v2653_v35, %v2652_v23 }
 0x73a   :  { %2696 = vst.msk [vmem:[%s3879_s12 + $0x10] sm:$0xff] %vm3837_vm2, %v2814_v21  ;;  %v2817_v57 = vpack.c.bf16 %v2655_v13, %v2654_v9  ;;  %2697 = vst [vmem:[%s3879_s12 + $0x18] sm:$0xff] %v2815_v43 }
 0x73b   :  { %2698 = vst [vmem:[%s3879_s12 + $0x20] sm:$0xff] %v2816_v44 }
 0x73c   :  { %2699 = vst.msk [vmem:[%s3879_s12 + $0x28] sm:$0xff] %vm3837_vm2, %v2817_v57 }

// kernel: scaled_resnet_forward.11
= control target key start
LH: loop header
LB: loop body
LE: loop exit
PB: predicated region body
PF: predicated region fallthrough
CT: control target
= control target key end

     0   :  { %vm173_vm0 = vcmask 130048   ;;  %v234_v22 = vlaneseq  ;;  %vm252_vm1 = vcmask 588800   ;;  %vm418_vm2 = vcmask 769024   ;;  %s2026_s26 = smov 118   ;;  %s2027_s27 = smov 117   ;;  %s2717_s0 = inlined_call_operand.vmem [shape: bf16[144,200], index: 0, kind: input, shape index: {}]   ;;  %s2718_s1 = inlined_call_operand.vmem [shape: bf16[32,144], index: 1, kind: input, shape index: {}]   ;;  %s2719_s11 = inlined_call_operand.vmem [shape: f32[1,200], index: 11, kind: input, shape index: {}]   ;;  %s2720_s2 = inlined_call_operand.vmem [shape: f32[32,1], index: 2, kind: input, shape index: {}]   ;;  %s2721_s3 = inlined_call_operand.vmem [shape: f32[32,1], index: 3, kind: input, shape index: {}]   ;;  %s2722_s8 = inlined_call_operand.vmem [shape: bf16[9,32,32], index: 8, kind: input, shape index: {}]   ;;  %s2723_s4 = inlined_call_operand.vmem [shape: bf16[16,200], index: 4, kind: input, shape index: {}]   ;;  %s2724_s5 = inlined_call_operand.vmem [shape: bf16[32,16], index: 5, kind: input, shape index: {}]   ;;  %s2725_s6 = inlined_call_operand.vmem [shape: f32[32,1], index: 6, kind: input, shape index: {}]   ;;  %s2726_s7 = inlined_call_operand.vmem [shape: f32[32,1], index: 7, kind: input, shape index: {}]   ;;  %s2727_s9 = inlined_call_operand.vmem [shape: f32[32,1], index: 9, kind: input, shape index: {}]   ;;  %s2728_s10 = inlined_call_operand.vmem [shape: f32[32,1], index: 10, kind: input, shape index: {}]   ;;  %s2729_s12 = inlined_call_operand.vmem [shape: bf16[32,200], index: 12, kind: output, shape index: {}]  }
   0x1   :  { %v1943_v0 = vld [vmem:[%s2717_s0 + $0x4] ss:$8 sps:$4 sm:$0xff]   ;;  %v1945_v1 = vld [vmem:[%s2717_s0] ss:$8 sps:$4 sm:$0xff]   ;;  %v1946_v2 = vld [vmem:[%s2717_s0 + $0x14] ss:$8 sps:$4 sm:$0xff]  }
   0x2   :  { %180 = vmatprep.subr.bf16.mxu0 %v1943_v0  ;;  %v1948_v3 = vld [vmem:[%s2717_s0 + $0x10] ss:$8 sps:$4 sm:$0xff]   ;;  %v1949_v4 = vld [vmem:[%s2717_s0 + $0x24] ss:$8 sps:$4 sm:$0xff]   ;;  %v1951_v5 = vld [vmem:[%s2717_s0 + $0x20] ss:$8 sps:$4 sm:$0xff]  }
   0x3   :  { %181 = vmatpush1.bf16.msra.mxu0 %v1945_v1  ;;  %v1952_v6 = vld [vmem:[%s2717_s0 + $0x34] ss:$8 sps:$4 sm:$0xff]   ;;  %v1954_v7 = vld [vmem:[%s2717_s0 + $0x30] ss:$8 sps:$4 sm:$0xff]   ;;  %v1955_v8 = vld [vmem:[%s2717_s0 + $0x44] ss:$8 sps:$4 sm:$0xff]  }
   0x4   :  { %182 = vmatprep.subr.bf16.mxu0 %v1946_v2  ;;  %v1972_v9 = vld [vmem:[%s2718_s1 + $0x4] ss:$8 sps:$4 sm:$0xff]   ;;  %v1957_v10 = vld [vmem:[%s2717_s0 + $0x40] ss:$8 sps:$4 sm:$0xff]   ;;  %v1958_v11 = vld [vmem:[%s2717_s0 + $0x54] ss:$8 sps:$4 sm:$0xff]  }
   0x5   :  { %1779 = vmatprep.mubr.msk.bf16.mxu0 %vm173_vm0, %v1972_v9  ;;  %v1960_v12 = vld [vmem:[%s2717_s0 + $0x50] ss:$8 sps:$4 sm:$0xff]   ;;  %v1961_v13 = vld [vmem:[%s2717_s0 + $0x64] ss:$8 sps:$4 sm:$0xff]   ;;  %v1963_v14 = vld [vmem:[%s2717_s0 + $0x60] ss:$8 sps:$4 sm:$0xff]  }
   0x6   :  { %v1964_v15 = vld [vmem:[%s2717_s0 + $0x74] ss:$8 sps:$4 sm:$0xff]   ;;  %v1966_v16 = vld [vmem:[%s2717_s0 + $0x70] ss:$8 sps:$4 sm:$0xff]   ;;  %v1967_v17 = vld [vmem:[%s2717_s0 + $0x84] ss:$8 sps:$4 sm:$0xff]  }
   0x7   :  { %183 = vmatpush1.bf16.msra.mxu0 %v1948_v3  ;;  %v1969_v18 = vld [vmem:[%s2717_s0 + $0x80] ss:$8 sps:$4 sm:$0xff]   ;;  %v1973_v20 = vld [vmem:[%s2718_s1 + $0x14] ss:$8 sps:$4 sm:$0xff]   ;;  %v1975_v21 = vld [vmem:[%s2718_s1 + $0x10] ss:$8 sps:$4 sm:$0xff]  }
   0x8   :  { %184 = vmatprep.subr.bf16.mxu0 %v1949_v4  ;;  %v1970_v19 = vld [vmem:[%s2718_s1] ss:$8 sps:$4 sm:$0xff]   ;;  %v235_v23 = vshrl.u32 %v234_v22, 7  ;;  %vm438_vm3 = vcmask 89088   ;;  %vm445_vm4 = vcmask 1047640   ;;  %vm447_vm5 = vcmask 678912  }
   0x9   :  { %v42_v25 = vld [vmem:[%s2719_s11] sm:$0x3]  ;;  %s2028_s28 = smov 116   ;;  %s2029_s0 = smov 127   ;;  %vm645_vm6 = vcmask 1031168   ;;  %vm742_vm7 = vcmask 965632  }
   0xa   :  { %v240_v24 = vsub.s32 1, %v235_v23  ;;  %v236_v26 = vsub.s32 0, %v235_v23  ;;  %s2030_s29 = smov 108   ;;  %s2031_s1 = smov 107   ;;  %vm493_vm8 = vcmask 261120   ;;  %vm839_vm9 = vcmask 957440  }
   0xb   :  { %185 = vmatpush1.bf16.msra.mxu0 %v1951_v5  ;;  %s2032_s11 = smov 106   ;;  %vm936_vm10 = vcmask 949248   ;;  %vm486_vm11 = vcmask 1039360   ;;  %vm1033_vm12 = vcmask 883712   ;;  %vm1130_vm13 = vcmask 875520  }
   0xc   :  { %186 = vmatprep.subr.bf16.mxu0 %v1952_v6  ;;  %v2169_v27 = vrot.slane %v42_v25, %v240_v24  ;;  %v2171_v28 = vrot.slane %v42_v25, %v236_v26  ;;  %vm1227_vm14 = vcmask 867328   ;;  %vm1746_vm15 = vcmask 1043456  }
   0xf   :  { %187 = vmatpush1.bf16.msra.mxu0 %v1954_v7 }
  0x10   :  { %188 = vmatprep.subr.bf16.mxu0 %v1955_v8 }
  0x13   :  { %189 = vmatpush1.bf16.msra.mxu0 %v1957_v10 }
  0x14   :  { %190 = vmatprep.subr.bf16.mxu0 %v1958_v11 }
  0x17   :  { %191 = vmatpush1.bf16.msra.mxu0 %v1960_v12 }
  0x18   :  { %192 = vmatprep.subr.bf16.mxu0 %v1961_v13 }
  0x1b   :  { %193 = vmatpush1.bf16.msra.mxu0 %v1963_v14 }
  0x1c   :  { %194 = vmatprep.subr.bf16.mxu0 %v1964_v15 }
  0x1f   :  { %195 = vmatpush1.bf16.msra.mxu0 %v1966_v16 }
  0x20   :  { %196 = vmatprep.subr.bf16.mxu0 %v1967_v17 }
  0x23   :  { %197 = vmatpush1.bf16.msra.mxu0 %v1969_v18 }
  0x26   :  { %213 = vmatmul.mubr.bf16.vlgmr.msra.gmra.mrb[0].mxu0 %v1970_v19 }
  0x27   :  { %1780 = vmatprep.mubr.msk.bf16.mxu0 %vm173_vm0, %v1973_v20 }
  0x2e   :  { %223 = vmatmul.mubr.bf16.gmra.mrb[4].mxu0 %v1975_v21 }
  0xf9   :  { %v2173_v29 = vpop.f32.mrb[0].mxu0 }
  0xfa   :  { %v2175_v30 = vpop.f32.mrb[1].mxu0  ;;  %v244_v34 = vmul.f32 %v2171_v28, %v2173_v29 }
  0xfb   :  { %v2177_v31 = vpop.f32.mrb[2].mxu0  ;;  %v245_v32 = vmul.f32 %v2169_v27, %v2175_v30 }
  0xfc   :  { %v2181_v33 = vpop.f32.mrb[3].mxu0  ;;  %v246_v38 = vmul.f32 %v2171_v28, %v2177_v31 }
  0xfd   :  { %v247_v35 = vmul.f32 %v2169_v27, %v2181_v33  ;;  %v253_v36 = vsel %vm252_vm1, %v245_v32, 0.0 }
  0xfe   :  { %v254_v37 = vadd.f32 %v253_v36, %v244_v34 }
  0xff   :  { %v257_v39 = vsel %vm252_vm1, %v247_v35, 0.0  ;;  %v2023_v35 = vmov 0  }
 0x100   :  { %255 = vadd.xlane.f32.xlu0 %v254_v37  ;;  %v258_v40 = vadd.f32 %v257_v39, %v246_v38  ;;  %417 = vst [vmem:[#allocation2] sm:$0xff] %v2023_v35  ;;  %420 = vst [vmem:[#allocation2 + $0x10] sm:$0xff] %v2023_v35  ;;  %1942 = vset.pattern.permute.xlu1 %v2023_v35 }
 0x101   :  { %v2191_v41 = vpop.f32.mrb[4].mxu0  ;;  %1941 = vset.pattern.permute.xlu0 %v2023_v35  ;;  %700 = vmatprep.mubr.bf16.mxu1 %v2023_v35  ;;  %419 = vst.msk [vmem:[#allocation2 + $0x8] sm:$0xff] %vm418_vm2, %v2023_v35  ;;  %421 = vst.msk [vmem:[#allocation2 + $0x18] sm:$0xff] %vm418_vm2, %v2023_v35 }
 0x102   :  { %v2193_v42 = vpop.f32.mrb[5].mxu0  ;;  %v248_v43 = vmul.f32 %v2171_v28, %v2191_v41  ;;  %532 = vmatprep.mubr.bf16.mxu0 %v2023_v35 }
 0x103   :  { %v2197_v44 = vpop.f32.mrb[6].mxu0  ;;  %v249_v45 = vmul.f32 %v2169_v27, %v2193_v42 }
 0x104   :  { %259 = vadd.xlane.f32.xlu0 %v258_v40  ;;  %v2201_v46 = vpop.f32.mrb[7].mxu0  ;;  %v250_v47 = vmul.f32 %v2171_v28, %v2197_v44 }
 0x105   :  { %v251_v48 = vmul.f32 %v2169_v27, %v2201_v46  ;;  %v261_v49 = vsel %vm252_vm1, %v249_v45, 0.0 }
 0x106   :  { %v262_v50 = vadd.f32 %v261_v49, %v248_v43  ;;  %v317_v49 = vld [vmem:[%s2720_s2] sm:$0xff] }
 0x107   :  { %v265_v51 = vsel %vm252_vm1, %v251_v48, 0.0 }
 0x108   :  { %263 = vadd.xlane.f32.xlu1 %v262_v50  ;;  %v266_v52 = vadd.f32 %v265_v51, %v250_v47 }
 0x10c   :  { %267 = vadd.xlane.f32.xlu1 %v266_v52 }
 0x18d   :  { %v256_v53 = vpop.xlane.xlu0 %255 }
 0x18e   :  { %v2209_v54 = vmul.f32 0.0078125, %v256_v53 }
 0x190   :  { %v273_v55 = vsub.f32 %v2173_v29, %v2209_v54  ;;  %v274_v56 = vsub.f32 %v2175_v30, %v2209_v54 }
 0x191   :  { %v260_v57 = vpop.xlane.xlu0 %259 }
 0x192   :  { %v2215_v58 = vmul.f32 0.0078125, %v260_v57  ;;  %v281_v59 = vmul.f32 %v273_v55, %v2171_v28  ;;  %v282_v60 = vmul.f32 %v274_v56, %v2169_v27  ;;  %v318_v55 = vld [vmem:[%s2720_s2 + $0x8] sm:$0xff] }
 0x194   :  { %v275_v61 = vsub.f32 %v2177_v31, %v2215_v58  ;;  %v276_v62 = vsub.f32 %v2181_v33, %v2215_v58  ;;  %v289_v63 = vmul.f32 %v281_v59, %v281_v59  ;;  %v290_v0 = vmul.f32 %v282_v60, %v282_v60 }
 0x195   :  { %v264_v1 = vpop.xlane.xlu1 %263 }
 0x196   :  { %v2223_v2 = vmul.f32 0.0078125, %v264_v1  ;;  %v297_v3 = vsel %vm252_vm1, %v290_v0, 0.0  ;;  %v283_v4 = vmul.f32 %v275_v61, %v2171_v28  ;;  %v284_v5 = vmul.f32 %v276_v62, %v2169_v27  ;;  %v333_v61 = vld [vmem:[%s2721_s3] sm:$0xff]  ;;  %v334_v0 = vld [vmem:[%s2721_s3 + $0x8] sm:$0xff] }
 0x197   :  { %v298_v6 = vadd.f32 %v297_v3, %v289_v63 }
 0x198   :  { %v277_v7 = vsub.f32 %v2191_v41, %v2223_v2  ;;  %v278_v8 = vsub.f32 %v2193_v42, %v2223_v2  ;;  %v291_v9 = vmul.f32 %v283_v4, %v283_v4  ;;  %v292_v10 = vmul.f32 %v284_v5, %v284_v5 }
 0x199   :  { %299 = vadd.xlane.f32.xlu0 %v298_v6  ;;  %v268_v11 = vpop.xlane.xlu1 %267  ;;  %v320_v6 = vld [vmem:[%s2720_s2 + $0x18] sm:$0xff] }
 0x19a   :  { %v2232_v12 = vmul.f32 0.0078125, %v268_v11  ;;  %v301_v13 = vsel %vm252_vm1, %v292_v10, 0.0  ;;  %v285_v14 = vmul.f32 %v277_v7, %v2171_v28  ;;  %v286_v15 = vmul.f32 %v278_v8, %v2169_v27  ;;  %v335_v8 = vld [vmem:[%s2721_s3 + $0x10] sm:$0xff]  ;;  %v336_v11 = vld [vmem:[%s2721_s3 + $0x18] sm:$0xff]  ;;  %s2025_s3 = smov 126  }
 0x19b   :  { %v302_v16 = vadd.f32 %v301_v13, %v291_v9 }
 0x19c   :  { %v279_v17 = vsub.f32 %v2197_v44, %v2232_v12  ;;  %v280_v18 = vsub.f32 %v2201_v46, %v2232_v12  ;;  %v293_v19 = vmul.f32 %v285_v14, %v285_v14  ;;  %v294_v20 = vmul.f32 %v286_v15, %v286_v15 }
 0x19d   :  { %303 = vadd.xlane.f32.xlu1 %v302_v16 }
 0x19e   :  { %v305_v21 = vsel %vm252_vm1, %v294_v20, 0.0  ;;  %v287_v22 = vmul.f32 %v279_v17, %v2171_v28  ;;  %v288_v23 = vmul.f32 %v280_v18, %v2169_v27 }
 0x19f   :  { %v306_v24 = vadd.f32 %v305_v21, %v293_v19 }
 0x1a0   :  { %v295_v25 = vmul.f32 %v287_v22, %v287_v22  ;;  %v296_v26 = vmul.f32 %v288_v23, %v288_v23 }
 0x1a1   :  { %307 = vadd.xlane.f32.xlu0 %v306_v24 }
 0x1a2   :  { %v309_v32 = vsel %vm252_vm1, %v296_v26, 0.0 }
 0x1a3   :  { %v310_v34 = vadd.f32 %v309_v32, %v295_v25 }
 0x1a5   :  { %311 = vadd.xlane.f32.xlu1 %v310_v34 }
 0x226   :  { %v300_v36 = vpop.xlane.xlu0 %299 }
 0x227   :  { %v313_v37 = vmul.f32 0.0078125, %v300_v36 }
 0x229   :  { %v321_v38 = vadd.f32 1e-05, %v313_v37 }
 0x22a   :  { %v304_v39 = vpop.xlane.xlu1 %303 }
 0x22b   :  { %1999 = vrsqrt.f32 %v321_v38  ;;  %v314_v40 = vmul.f32 0.0078125, %v304_v39 }
 0x22d   :  { %v322_v43 = vadd.f32 1e-05, %v314_v40 }
 0x22e   :  { %v308_v45 = vpop.xlane.xlu0 %307 }
 0x22f   :  { %2001 = vrsqrt.f32 %v322_v43  ;;  %v315_v47 = vmul.f32 0.0078125, %v308_v45 }
 0x231   :  { %v323_v51 = vadd.f32 1e-05, %v315_v47 }
 0x232   :  { %v312_v48 = vpop.xlane.xlu1 %311 }
 0x233   :  { %v316_v52 = vmul.f32 0.0078125, %v312_v48  ;;  %2003 = vrsqrt.f32 %v323_v51 }
 0x235   :  { %v2000_v50 = vpop.eup %1999  ;;  %v324_v57 = vadd.f32 1e-05, %v316_v52 }
 0x236   :  { %v329_v53 = vmul.f32 %v2000_v50, %v317_v49 }
 0x237   :  { %2005 = vrsqrt.f32 %v324_v57 }
 0x238   :  { %347 = vperm.xlu0 %1941, %v329_v53   ;;  %v337_v60 = vmul.f32 %v329_v53, %v2209_v54  ;;  %v319_v54 = vld [vmem:[%s2720_s2 + $0x10] sm:$0xff]  ;;  %s2024_s2 = smov 11  }
 0x239   :  { %v2002_v56 = vpop.eup %2001 }
 0x23a   :  { %v330_v59 = vmul.f32 %v2002_v56, %v318_v55  ;;  %v341_v62 = vsub.f32 %v333_v61, %v337_v60 }
 0x23c   :  { %352 = vperm.xlu1 %1942, %v330_v59   ;;  %v338_v63 = vmul.f32 %v330_v59, %v2215_v58 }
 0x23d   :  { %v2004_v3 = vpop.eup %2003 }
 0x23e   :  { %v342_v1 = vsub.f32 %v334_v0, %v338_v63  ;;  %v331_v4 = vmul.f32 %v2004_v3, %v319_v54 }
 0x240   :  { %375 = vperm.xlu1 %1942, %v341_v62   ;;  %v339_v7 = vmul.f32 %v331_v4, %v2223_v2 }
 0x241   :  { %v2006_v5 = vpop.eup %2005 }
 0x242   :  { %v332_v58 = vmul.f32 %v2006_v5, %v320_v6  ;;  %v343_v9 = vsub.f32 %v335_v8, %v339_v7 }
 0x244   :  { %380 = vperm.xlu1 %1942, %v342_v1   ;;  %v340_v10 = vmul.f32 %v332_v58, %v2232_v12 }
 0x246   :  { %v344_v13 = vsub.f32 %v336_v11, %v340_v10 }
 0x248   :  { %357 = vperm.xlu1 %1942, %v331_v4  }
 0x24c   :  { %362 = vperm.xlu1 %1942, %v332_v58  }
 0x250   :  { %385 = vperm.xlu1 %1942, %v343_v9  }
 0x254   :  { %390 = vperm.xlu1 %1942, %v344_v13   ;;  %v1976_v13 = vld [vmem:[%s2722_s8 + $0x28] sm:$0xff]  }
 0x2b7   :  { %v348_v14 = vpop.permute.xlu0 %347 }
 0x2b8   :  { %v365_v16 = vmul.f32 %v348_v14, %v2173_v29  ;;  %v366_v2 = vmul.f32 %v348_v14, %v2175_v30 }
 0x2bb   :  { %v353_v15 = vpop.permute.xlu1 %352 }
 0x2bc   :  { %v367_v19 = vmul.f32 %v353_v15, %v2177_v31  ;;  %v368_v20 = vmul.f32 %v353_v15, %v2181_v33 }
 0x2bf   :  { %v376_v17 = vpop.permute.xlu1 %375 }
 0x2c0   :  { %v393_v12 = vadd.f32 %v376_v17, %v365_v16  ;;  %v394_v18 = vadd.f32 %v376_v17, %v366_v2 }
 0x2c2   :  { %v401_v22 = vmax.f32 %v393_v12, 0.0  ;;  %v402_v23 = vmax.f32 %v394_v18, 0.0  ;;  %v1977_v18 = vld [vmem:[%s2722_s8 + $0x30] sm:$0xff]  }
 0x2c3   :  { %v381_v21 = vpop.permute.xlu1 %380 }
 0x2c4   :  { %v395_v24 = vadd.f32 %v381_v21, %v367_v19  ;;  %v396_v25 = vadd.f32 %v381_v21, %v368_v20  ;;  %v409_v32 = vmul.f32 %v401_v22, %v2171_v28  ;;  %v410_v34 = vmul.f32 %v402_v23, %v2169_v27 }
 0x2c6   :  { %v403_v29 = vmax.f32 %v395_v24, 0.0  ;;  %v404_v26 = vmax.f32 %v396_v25, 0.0  ;;  %v1978_v25 = vld [vmem:[%s2722_s8 + $0x38] sm:$0xff]  }
 0x2c7   :  { %v358_v30 = vpop.permute.xlu1 %357 }
 0x2c8   :  { %v411_v36 = vmul.f32 %v403_v29, %v2171_v28  ;;  %v412_v37 = vmul.f32 %v404_v26, %v2169_v27  ;;  %v369_v33 = vmul.f32 %v358_v30, %v2191_v41  ;;  %v370_v40 = vmul.f32 %v358_v30, %v2193_v42 }
 0x2ca   :  { %v423_v38 = vpack.c.bf16 %v412_v37, %v410_v34  ;;  %v422_v31 = vpack.c.bf16 %v411_v36, %v409_v32  ;;  %v1979_v34 = vld [vmem:[%s2722_s8 + $0x40] sm:$0xff]  }
 0x2cb   :  { %v363_v39 = vpop.permute.xlu1 %362 }
 0x2cc   :  { %432 = vrot.lane.b32.xlu0 %v423_v38, %s2024_s2  ;;  %430 = vrot.lane.b32.xlu1 %v422_v31, %s2024_s2  ;;  %v371_v48 = vmul.f32 %v363_v39, %v2197_v44  ;;  %v372_v49 = vmul.f32 %v363_v39, %v2201_v46 }
 0x2cf   :  { %v386_v43 = vpop.permute.xlu1 %385 }
 0x2d0   :  { %v397_v45 = vadd.f32 %v386_v43, %v369_v33  ;;  %v398_v47 = vadd.f32 %v386_v43, %v370_v40 }
 0x2d2   :  { %v405_v51 = vmax.f32 %v397_v45, 0.0  ;;  %v406_v52 = vmax.f32 %v398_v47, 0.0  ;;  %v1980_v45 = vld [vmem:[%s2722_s8 + $0x10] sm:$0xff]   ;;  %v1981_v47 = vld [vmem:[%s2722_s8 + $0x48] sm:$0xff]  }
 0x2d3   :  { %v391_v50 = vpop.permute.xlu1 %390 }
 0x2d4   :  { %v399_v53 = vadd.f32 %v391_v50, %v371_v48  ;;  %v400_v55 = vadd.f32 %v391_v50, %v372_v49  ;;  %v413_v59 = vmul.f32 %v405_v51, %v2171_v28  ;;  %v414_v41 = vmul.f32 %v406_v52, %v2169_v27  ;;  %v1982_v50 = vld [vmem:[%s2722_s8 + $0x18] sm:$0xff]   ;;  %v1983_v51 = vld [vmem:[%s2722_s8 + $0x50] sm:$0xff]  }
 0x2d6   :  { %v407_v56 = vmax.f32 %v399_v53, 0.0  ;;  %v408_v57 = vmax.f32 %v400_v55, 0.0 }
 0x2d8   :  { %v415_v42 = vmul.f32 %v407_v56, %v2171_v28  ;;  %v416_v60 = vmul.f32 %v408_v57, %v2169_v27  ;;  %v1984_v57 = vld [vmem:[%s2722_s8] sm:$0xff]  }
 0x2da   :  { %v425_v61 = vpack.c.bf16 %v416_v60, %v414_v41  ;;  %v424_v62 = vpack.c.bf16 %v415_v42, %v413_v59  ;;  %v1985_v59 = vld [vmem:[%s2722_s8 + $0x58] sm:$0xff]   ;;  %v1992_v42 = vld [vmem:[%s2723_s4 + $0x4] ss:$8 sps:$4 sm:$0xff]  }
 0x2dc   :  { %436 = vrot.lane.b32.xlu0 %v425_v61, %s2024_s2  ;;  %434 = vrot.lane.b32.xlu1 %v424_v62, %s2024_s2  ;;  %v1986_v61 = vld [vmem:[%s2722_s8 + $0x8] sm:$0xff]   ;;  %v1987_v62 = vld [vmem:[%s2722_s8 + $0x60] sm:$0xff]  }
 0x33e   :  { %v433_v44 = vpop.permute.xlu0 %432  ;;  %v431_v46 = vpop.permute.xlu1 %430 }
 0x33f   :  { %v439_v63 = vsel %vm438_vm3, %v431_v46, %v433_v44  ;;  %446 = vst.msk [vmem:[#allocation2] sm:$0xff] %vm445_vm4, %v431_v46 }
 0x340   :  { %448 = vst.msk [vmem:[#allocation2 + $0x8] sm:$0xff] %vm447_vm5, %v439_v63 }
 0x346   :  { %v2300_v0 = vld [vmem:[#allocation2] sm:$0xff] }
 0x347   :  { %637 = vrot.lane.b32.xlu1 %v2300_v0, %s2025_s3  ;;  %v2303_v1 = vld [vmem:[#allocation2 + $0x8] sm:$0xff] }
 0x348   :  { %639 = vrot.lane.b32.xlu0 %v2303_v1, %s2025_s3 }
 0x34e   :  { %v437_v3 = vpop.permute.xlu0 %436  ;;  %v435_v54 = vpop.permute.xlu1 %434 }
 0x34f   :  { %v440_v4 = vsel %vm438_vm3, %v435_v54, %v437_v3  ;;  %449 = vst.msk [vmem:[#allocation2 + $0x10] sm:$0xff] %vm445_vm4, %v435_v54  ;;  %v1989_v3 = vld [vmem:[%s2722_s8 + $0x68] sm:$0xff]  }
 0x350   :  { %450 = vst.msk [vmem:[#allocation2 + $0x18] sm:$0xff] %vm447_vm5, %v440_v4  ;;  %v1990_v4 = vld [vmem:[%s2723_s4] ss:$8 sps:$4 sm:$0xff]  }
 0x356   :  { %v2309_v5 = vld [vmem:[#allocation2 + $0x10] sm:$0xff] }
 0x357   :  { %641 = vrot.lane.b32.xlu1 %v2309_v5, %s2025_s3  ;;  %v2312_v6 = vld [vmem:[#allocation2 + $0x18] sm:$0xff] }
 0x358   :  { %643 = vrot.lane.b32.xlu0 %v2312_v6, %s2025_s3 }
 0x35b   :  { %734 = vrot.lane.b32.xlu1 %v2300_v0, %s2026_s26 }
 0x35c   :  { %736 = vrot.lane.b32.xlu0 %v2303_v1, %s2026_s26 }
 0x35f   :  { %738 = vrot.lane.b32.xlu1 %v2309_v5, %s2026_s26 }
 0x360   :  { %740 = vrot.lane.b32.xlu0 %v2312_v6, %s2026_s26 }
 0x363   :  { %831 = vrot.lane.b32.xlu1 %v2300_v0, %s2027_s27 }
 0x364   :  { %833 = vrot.lane.b32.xlu0 %v2303_v1, %s2027_s27 }
 0x367   :  { %835 = vrot.lane.b32.xlu1 %v2309_v5, %s2027_s27 }
 0x368   :  { %837 = vrot.lane.b32.xlu0 %v2312_v6, %s2027_s27 }
 0x36b   :  { %928 = vrot.lane.b32.xlu1 %v2300_v0, %s2028_s28 }
 0x36c   :  { %930 = vrot.lane.b32.xlu0 %v2303_v1, %s2028_s28 }
 0x36f   :  { %932 = vrot.lane.b32.xlu1 %v2309_v5, %s2028_s28 }
 0x370   :  { %934 = vrot.lane.b32.xlu0 %v2312_v6, %s2028_s28 }
 0x373   :  { %478 = vrot.lane.b32.xlu1 %v2300_v0, %s2029_s0 }
 0x374   :  { %480 = vrot.lane.b32.xlu0 %v2303_v1, %s2029_s0 }
 0x377   :  { %482 = vrot.lane.b32.xlu1 %v2309_v5, %s2029_s0 }
 0x378   :  { %484 = vrot.lane.b32.xlu0 %v2312_v6, %s2029_s0 }
 0x37b   :  { %1025 = vrot.lane.b32.xlu1 %v2300_v0, %s2030_s29 }
 0x37c   :  { %1027 = vrot.lane.b32.xlu0 %v2303_v1, %s2030_s29 }
 0x37f   :  { %1029 = vrot.lane.b32.xlu1 %v2309_v5, %s2030_s29 }
 0x380   :  { %1031 = vrot.lane.b32.xlu0 %v2312_v6, %s2030_s29 }
 0x383   :  { %1122 = vrot.lane.b32.xlu1 %v2300_v0, %s2031_s1 }
 0x384   :  { %1124 = vrot.lane.b32.xlu0 %v2303_v1, %s2031_s1 }
 0x387   :  { %1126 = vrot.lane.b32.xlu1 %v2309_v5, %s2031_s1 }
 0x388   :  { %1128 = vrot.lane.b32.xlu0 %v2312_v6, %s2031_s1 }
 0x38b   :  { %1219 = vrot.lane.b32.xlu1 %v2300_v0, %s2032_s11 }
 0x38c   :  { %1221 = vrot.lane.b32.xlu0 %v2303_v1, %s2032_s11 }
 0x38f   :  { %1223 = vrot.lane.b32.xlu1 %v2309_v5, %s2032_s11 }
 0x390   :  { %1225 = vrot.lane.b32.xlu0 %v2312_v6, %s2032_s11 }
 0x3b9   :  { %v638_v58 = vpop.permute.xlu1 %637 }
 0x3ba   :  { %v2343_v7 = vpop.permute.xlu0 %639 }
 0x3bb   :  { %1863 = vmatprep.subr.bf16.mxu1 %v2343_v7  ;;  %v2347_v8 = vsel %vm645_vm6, %v638_v58, %v2343_v7  ;;  %v1994_v58 = vld [vmem:[%s2724_s5] sm:$0xff]  }
 0x3bc   :  { %1865 = vmatpush1.bf16.msra.mxu1 %v2347_v8 }
 0x3c9   :  { %v642_v9 = vpop.permute.xlu1 %641 }
 0x3ca   :  { %v2350_v10 = vpop.permute.xlu0 %643 }
 0x3cb   :  { %1864 = vmatprep.subr.bf16.mxu1 %v2350_v10  ;;  %v2354_v11 = vsel %vm645_vm6, %v642_v9, %v2350_v10 }
 0x3cc   :  { %1866 = vmatpush1.bf16.msra.mxu1 %v2354_v11 }
 0x3cd   :  { %v735_v14 = vpop.permute.xlu1 %734 }
 0x3ce   :  { %v737_v15 = vpop.permute.xlu0 %736 }
 0x3cf   :  { %v743_v16 = vsel %vm742_vm7, %v735_v14, %v737_v15  ;;  %1800 = vmatmul.mubr.msk.bf16.vlgmr.msra.gmra.mrb[0].mxu1 %vm493_vm8, %v1976_v13  ;;  %755 = vmatprep.subr.bf16.mxu1 %v737_v15  ;;  %v1998_v13 = vld [vmem:[%s2724_s5 + $0x8] sm:$0xff]   ;;  %v1996_v14 = vld [vmem:[%s2722_s8 + $0x80] sm:$0xff]  }
 0x3d0   :  { %756 = vmatpush1.bf16.msra.mxu1 %v743_v16  ;;  %787 = vmatprep.mubr.bf16.mxu1 %v2023_v35  ;;  %v1997_v15 = vld [vmem:[%s2722_s8 + $0x88] sm:$0xff]  }
 0x3d1   :  { %v739_v2 = vpop.permute.xlu1 %738 }
 0x3d2   :  { %v741_v17 = vpop.permute.xlu0 %740 }
 0x3d3   :  { %v744_v12 = vsel %vm742_vm7, %v739_v2, %v741_v17  ;;  %757 = vmatprep.subr.bf16.mxu1 %v741_v17 }
 0x3d4   :  { %758 = vmatpush1.bf16.msra.mxu1 %v744_v12 }
 0x3d5   :  { %v832_v19 = vpop.permute.xlu1 %831 }
 0x3d6   :  { %v834_v20 = vpop.permute.xlu0 %833 }
 0x3d7   :  { %v840_v21 = vsel %vm839_vm9, %v832_v19, %v834_v20  ;;  %1807 = vmatmul.mubr.msk.bf16.vlgmr.msra.gmra.mrb[4].mxu1 %vm493_vm8, %v1977_v18  ;;  %852 = vmatprep.subr.bf16.mxu1 %v834_v20 }
 0x3d8   :  { %853 = vmatpush1.bf16.msra.mxu1 %v840_v21  ;;  %797 = vmatprep.mubr.bf16.mxu1 %v2023_v35 }
 0x3d9   :  { %v836_v22 = vpop.permute.xlu1 %835 }
 0x3da   :  { %v838_v23 = vpop.permute.xlu0 %837 }
 0x3db   :  { %v841_v24 = vsel %vm839_vm9, %v836_v22, %v838_v23  ;;  %854 = vmatprep.subr.bf16.mxu1 %v838_v23 }
 0x3dc   :  { %855 = vmatpush1.bf16.msra.mxu1 %v841_v24 }
 0x3dd   :  { %v929_v29 = vpop.permute.xlu1 %928 }
 0x3de   :  { %v931_v26 = vpop.permute.xlu0 %930 }
 0x3df   :  { %1808 = vmatmul.mubr.msk.bf16.gmra.mrb[0].mxu1 %vm493_vm8, %v1978_v25  ;;  %949 = vmatprep.subr.bf16.mxu1 %v931_v26  ;;  %v937_v38 = vsel %vm936_vm10, %v929_v29, %v931_v26 }
 0x3e0   :  { %884 = vmatprep.mubr.bf16.mxu1 %v2023_v35 }
 0x3e1   :  { %v933_v30 = vpop.permute.xlu1 %932 }
 0x3e2   :  { %v935_v32 = vpop.permute.xlu0 %934 }
 0x3e3   :  { %v938_v40 = vsel %vm936_vm10, %v933_v30, %v935_v32 }
 0x3e5   :  { %v479_v36 = vpop.permute.xlu1 %478 }
 0x3e6   :  { %v481_v37 = vpop.permute.xlu0 %480 }
 0x3e7   :  { %v487_v31 = vsel %vm486_vm11, %v479_v36, %v481_v37  ;;  %500 = vmatprep.subr.bf16.mxu0 %v481_v37  ;;  %1815 = vmatmul.mubr.msk.bf16.vlgmr.msra.gmra.mrb[4].mxu1 %vm493_vm8, %v1979_v34 }
 0x3e8   :  { %950 = vmatpush1.bf16.msra.mxu1 %v937_v38  ;;  %501 = vmatpush1.bf16.msra.mxu0 %v487_v31 }
 0x3e9   :  { %951 = vmatprep.subr.bf16.mxu1 %v935_v32  ;;  %v483_v39 = vpop.permute.xlu1 %482  ;;  %894 = vmatprep.mubr.bf16.mxu1 %v2023_v35 }
 0x3ea   :  { %v485_v33 = vpop.permute.xlu0 %484 }
 0x3eb   :  { %v488_v43 = vsel %vm486_vm11, %v483_v39, %v485_v33  ;;  %502 = vmatprep.subr.bf16.mxu0 %v485_v33 }
 0x3ec   :  { %952 = vmatpush1.bf16.msra.mxu1 %v938_v40  ;;  %503 = vmatpush1.bf16.msra.mxu0 %v488_v43 }
 0x3ed   :  { %569 = vmatprep.subr.bf16.mxu0 %v2303_v1  ;;  %v1026_v49 = vpop.permute.xlu1 %1025  ;;  %v1988_v1 = vld [vmem:[%s2722_s8 + $0x20] sm:$0xff]  }
 0x3ee   :  { %v1028_v48 = vpop.permute.xlu0 %1027 }
 0x3ef   :  { %1787 = vmatmul.mubr.msk.bf16.vlgmr.msra.gmra.mrb[8].mxu0 %vm493_vm8, %v1980_v45  ;;  %1816 = vmatmul.mubr.msk.bf16.gmra.mrb[0].mxu1 %vm493_vm8, %v1981_v47  ;;  %v1034_v53 = vsel %vm1033_vm12, %v1026_v49, %v1028_v48 }
 0x3f0   :  { %1046 = vmatprep.subr.bf16.mxu1 %v1028_v48  ;;  %570 = vmatpush1.bf16.msra.mxu0 %v2300_v0 }
 0x3f1   :  { %571 = vmatprep.subr.bf16.mxu0 %v2312_v6  ;;  %542 = vmatprep.mubr.bf16.mxu0 %v2023_v35  ;;  %v1030_v55 = vpop.permute.xlu1 %1029  ;;  %v1993_v6 = vld [vmem:[%s2722_s8 + $0x70] sm:$0xff]  }
 0x3f2   :  { %981 = vmatprep.mubr.bf16.mxu1 %v2023_v35  ;;  %v1032_v52 = vpop.permute.xlu0 %1031 }
 0x3f3   :  { %v1035_v56 = vsel %vm1033_vm12, %v1030_v55, %v1032_v52 }
 0x3f4   :  { %572 = vmatpush1.bf16.msra.mxu0 %v2309_v5 }
 0x3f5   :  { %658 = vmatprep.subr.bf16.mxu0 %v2343_v7  ;;  %v1123_v60 = vpop.permute.xlu1 %1122 }
 0x3f6   :  { %v1125_v41 = vpop.permute.xlu0 %1124 }
 0x3f7   :  { %1788 = vmatmul.mubr.msk.bf16.gmra.mrb[12].mxu0 %vm493_vm8, %v1982_v50  ;;  %1823 = vmatmul.mubr.msk.bf16.vlgmr.msra.gmra.mrb[4].mxu1 %vm493_vm8, %v1983_v51  ;;  %v1131_v46 = vsel %vm1130_vm13, %v1123_v60, %v1125_v41 }
 0x3f8   :  { %1047 = vmatpush1.bf16.msra.mxu1 %v1034_v53  ;;  %601 = vmatprep.mubr.bf16.mxu0 %v2023_v35 }
 0x3f9   :  { %1048 = vmatprep.subr.bf16.mxu1 %v1032_v52  ;;  %991 = vmatprep.mubr.bf16.mxu1 %v2023_v35  ;;  %v1127_v63 = vpop.permute.xlu1 %1126 }
 0x3fa   :  { %v1129_v44 = vpop.permute.xlu0 %1128 }
 0x3fb   :  { %v1132_v0 = vsel %vm1130_vm13, %v1127_v63, %v1129_v44 }
 0x3fc   :  { %1049 = vmatpush1.bf16.msra.mxu1 %v1035_v56 }
 0x3fd   :  { %1143 = vmatprep.subr.bf16.mxu1 %v1125_v41  ;;  %v1220_v5 = vpop.permute.xlu1 %1219 }
 0x3fe   :  { %v1222_v54 = vpop.permute.xlu0 %1221 }
 0x3ff   :  { %1791 = vmatmul.mubr.msk.bf16.vlgmr.msra.gmra.mrb[8].mxu0 %vm493_vm8, %v1984_v57  ;;  %1824 = vmatmul.mubr.msk.bf16.gmra.mrb[0].mxu1 %vm493_vm8, %v1985_v59  ;;  %v1228_v7 = vsel %vm1227_vm14, %v1220_v5, %v1222_v54 }
 0x400   :  { %659 = vmatpush1.bf16.msra.mxu0 %v2347_v8  ;;  %611 = vmatprep.mubr.bf16.mxu0 %v2023_v35 }
 0x401   :  { %660 = vmatprep.subr.bf16.mxu0 %v2350_v10  ;;  %1078 = vmatprep.mubr.bf16.mxu1 %v2023_v35  ;;  %v1224_v8 = vpop.permute.xlu1 %1223 }
 0x402   :  { %v1226_v9 = vpop.permute.xlu0 %1225 }
 0x403   :  { %v1229_v10 = vsel %vm1227_vm14, %v1224_v8, %v1226_v9 }
 0x404   :  { %661 = vmatpush1.bf16.msra.mxu0 %v2354_v11  ;;  %v1995_v11 = vld [vmem:[%s2722_s8 + $0x78] sm:$0xff]  }
 0x405   :  { %1489 = vmatprep.subr.bf16.mxu0 %v1992_v42 }
 0x407   :  { %1792 = vmatmul.mubr.msk.bf16.gmra.mrb[12].mxu0 %vm493_vm8, %v1986_v61  ;;  %1831 = vmatmul.mubr.msk.bf16.vlgmr.msra.gmra.mrb[4].mxu1 %vm493_vm8, %v1987_v62 }
 0x408   :  { %1144 = vmatpush1.bf16.msra.mxu1 %v1131_v46  ;;  %690 = vmatprep.mubr.bf16.mxu0 %v2023_v35 }
 0x409   :  { %1145 = vmatprep.subr.bf16.mxu1 %v1129_v44  ;;  %1088 = vmatprep.mubr.bf16.mxu1 %v2023_v35 }
 0x40c   :  { %1146 = vmatpush1.bf16.msra.mxu1 %v1132_v0 }
 0x40d   :  { %1240 = vmatprep.subr.bf16.mxu1 %v1222_v54 }
 0x40f   :  { %1799 = vmatmul.mubr.msk.bf16.vlgmr.msra.gmra.mrb[8].mxu0 %vm493_vm8, %v1988_v1  ;;  %1832 = vmatmul.mubr.msk.bf16.gmra.mrb[0].mxu1 %vm493_vm8, %v1989_v3 }
 0x410   :  { %1490 = vmatpush1.bf16.msra.mxu0 %v1990_v4  ;;  %1175 = vmatprep.mubr.bf16.mxu1 %v2023_v35 }
 0x411   :  { %1521 = vmatprep.mubr.bf16.mxu0 %v2023_v35 }
 0x417   :  { %1839 = vmatmul.mubr.msk.bf16.vlgmr.msra.gmra.mrb[4].mxu1 %vm493_vm8, %v1993_v6  ;;  %1853 = vmatmul.mubr.msk.bf16.vlgmr.msra.gmra.mrb[16].mxu0 %vm173_vm0, %v1994_v58 }
 0x418   :  { %1241 = vmatpush1.bf16.msra.mxu1 %v1228_v7  ;;  %1185 = vmatprep.mubr.bf16.mxu1 %v2023_v35 }
 0x419   :  { %1242 = vmatprep.subr.bf16.mxu1 %v1226_v9  ;;  %1531 = vmatprep.mubr.bf16.mxu0 %v2023_v35 }
 0x41c   :  { %1243 = vmatpush1.bf16.msra.mxu1 %v1229_v10 }
 0x41f   :  { %1840 = vmatmul.mubr.msk.bf16.gmra.mrb[0].mxu1 %vm493_vm8, %v1995_v11  ;;  %1854 = vmatmul.mubr.msk.bf16.gmra.mrb[20].mxu0 %vm173_vm0, %v1998_v13  ;;  %vm1747_vm0 = vcmask 588804  }
 0x420   :  { %1272 = vmatprep.mubr.bf16.mxu1 %v2023_v35 }
 0x427   :  { %1847 = vmatmul.mubr.msk.bf16.vlgmr.msra.gmra.mrb[4].mxu1 %vm493_vm8, %v1996_v14 }
 0x428   :  { %1282 = vmatprep.mubr.bf16.mxu1 %v2023_v35 }
 0x42f   :  { %1848 = vmatmul.mubr.msk.bf16.gmra.mrb[0].mxu1 %vm493_vm8, %v1997_v15 }
 0x4da   :  { %v613_v16 = vpop.f32.mrb[12].mxu0 }
 0x4db   :  { %v615_v2 = vpop.f32.mrb[13].mxu0 }
 0x4dc   :  { %v617_v17 = vpop.f32.mrb[14].mxu0 }
 0x4dd   :  { %v619_v12 = vpop.f32.mrb[15].mxu0 }
 0x4e2   :  { %v692_v18 = vpop.f32.mrb[8].mxu0 }
 0x4e3   :  { %v694_v19 = vpop.f32.mrb[9].mxu0 }
 0x4e4   :  { %v696_v20 = vpop.f32.mrb[10].mxu0 }
 0x4e5   :  { %v698_v21 = vpop.f32.mrb[11].mxu0 }
 0x4ea   :  { %v2469_v22 = vpop.f32.mrb[16].mxu0 }
 0x4eb   :  { %v2471_v23 = vpop.f32.mrb[17].mxu0  ;;  %v1542_v35 = vmul.f32 %v2469_v22, %v2171_v28 }
 0x4ec   :  { %v1543_v24 = vmul.f32 %v2471_v23, %v2169_v27  ;;  %v2477_v25 = vpop.f32.mrb[18].mxu0 }
 0x4ed   :  { %v2479_v29 = vpop.f32.mrb[19].mxu0  ;;  %v1544_v26 = vmul.f32 %v2477_v25, %v2171_v28 }
 0x4ee   :  { %v1545_v30 = vmul.f32 %v2479_v29, %v2169_v27  ;;  %v1550_v32 = vsel %vm252_vm1, %v1543_v24, 0.0 }
 0x4ef   :  { %v1551_v34 = vadd.f32 %v1550_v32, %v1542_v35 }
 0x4f0   :  { %v1554_v36 = vsel %vm252_vm1, %v1545_v30, 0.0 }
 0x4f1   :  { %1552 = vadd.xlane.f32.xlu0 %v1551_v34  ;;  %v1555_v37 = vadd.f32 %v1554_v36, %v1544_v26 }
 0x4f2   :  { %v2487_v38 = vpop.f32.mrb[20].mxu0 }
 0x4f3   :  { %1556 = vadd.xlane.f32.xlu1 %v1555_v37  ;;  %v2489_v31 = vpop.f32.mrb[21].mxu0  ;;  %v1546_v39 = vmul.f32 %v2487_v38, %v2171_v28 }
 0x4f4   :  { %v1547_v33 = vmul.f32 %v2489_v31, %v2169_v27  ;;  %v2495_v40 = vpop.f32.mrb[22].mxu0 }
 0x4f5   :  { %v2497_v43 = vpop.f32.mrb[23].mxu0  ;;  %v1548_v45 = vmul.f32 %v2495_v40, %v2171_v28 }
 0x4f6   :  { %v1549_v47 = vmul.f32 %v2497_v43, %v2169_v27  ;;  %v1558_v48 = vsel %vm252_vm1, %v1547_v33, 0.0 }
 0x4f7   :  { %v1559_v49 = vadd.f32 %v1558_v48, %v1546_v39 }
 0x4f8   :  { %v1562_v50 = vsel %vm252_vm1, %v1549_v47, 0.0 }
 0x4f9   :  { %v1563_v51 = vadd.f32 %v1562_v50, %v1548_v45 }
 0x4fa   :  { %v1274_v52 = vpop.f32.mrb[4].mxu1 }
 0x4fb   :  { %v2505_v53 = vadd.f32 %v1274_v52, %v692_v18  ;;  %v1276_v55 = vpop.f32.mrb[5].mxu1 }
 0x4fc   :  { %v2507_v56 = vadd.f32 %v1276_v55, %v694_v19  ;;  %v1278_v57 = vpop.f32.mrb[6].mxu1 }
 0x4fd   :  { %v2509_v59 = vadd.f32 %v1278_v57, %v696_v20  ;;  %v1280_v41 = vpop.f32.mrb[7].mxu1  ;;  %v1301_v61 = vmul.f32 %v2505_v53, %v2171_v28 }
 0x4fe   :  { %v2511_v42 = vadd.f32 %v1280_v41, %v698_v21  ;;  %v1302_v60 = vmul.f32 %v2507_v56, %v2169_v27 }
 0x4ff   :  { %v1303_v63 = vmul.f32 %v2509_v59, %v2171_v28 }
 0x500   :  { %v1309_v62 = vsel %vm252_vm1, %v1302_v60, 0.0  ;;  %v1304_v44 = vmul.f32 %v2511_v42, %v2169_v27 }
 0x501   :  { %v1310_v46 = vadd.f32 %v1309_v62, %v1301_v61 }
 0x502   :  { %v1284_v0 = vpop.f32.mrb[0].mxu1  ;;  %v1313_v1 = vsel %vm252_vm1, %v1304_v44, 0.0 }
 0x503   :  { %v2523_v3 = vadd.f32 %v1284_v0, %v613_v16  ;;  %1311 = vadd.xlane.f32.xlu1 %v1310_v46  ;;  %v1286_v54 = vpop.f32.mrb[1].mxu1  ;;  %v1314_v4 = vadd.f32 %v1313_v1, %v1303_v63 }
 0x504   :  { %v2525_v5 = vadd.f32 %v1286_v54, %v615_v2  ;;  %v1288_v6 = vpop.f32.mrb[2].mxu1 }
 0x505   :  { %v2527_v58 = vadd.f32 %v1288_v6, %v617_v17  ;;  %1315 = vadd.xlane.f32.xlu0 %v1314_v4  ;;  %v1290_v7 = vpop.f32.mrb[3].mxu1  ;;  %v1305_v10 = vmul.f32 %v2523_v3, %v2171_v28 }
 0x506   :  { %v2529_v8 = vadd.f32 %v1290_v7, %v619_v12  ;;  %v1306_v9 = vmul.f32 %v2525_v5, %v2169_v27 }
 0x507   :  { %v1307_v15 = vmul.f32 %v2527_v58, %v2171_v28 }
 0x508   :  { %v1317_v11 = vsel %vm252_vm1, %v1306_v9, 0.0  ;;  %v1308_v13 = vmul.f32 %v2529_v8, %v2169_v27 }
 0x509   :  { %v1318_v14 = vadd.f32 %v1317_v11, %v1305_v10 }
 0x50a   :  { %v1321_v16 = vsel %vm252_vm1, %v1308_v13, 0.0 }
 0x50b   :  { %1319 = vadd.xlane.f32.xlu0 %v1318_v14  ;;  %v1322_v2 = vadd.f32 %v1321_v16, %v1307_v15 }
 0x50d   :  { %1323 = vadd.xlane.f32.xlu1 %v1322_v2 }
 0x50f   :  { %1560 = vadd.xlane.f32.xlu0 %v1559_v49 }
 0x511   :  { %1564 = vadd.xlane.f32.xlu1 %v1563_v51 }
 0x57e   :  { %v1553_v17 = vpop.xlane.xlu0 %1552 }
 0x57f   :  { %v2541_v12 = vmul.f32 0.0078125, %v1553_v17 }
 0x580   :  { %v1557_v18 = vpop.xlane.xlu1 %1556 }
 0x581   :  { %v1570_v19 = vsub.f32 %v2469_v22, %v2541_v12  ;;  %v1571_v20 = vsub.f32 %v2471_v23, %v2541_v12  ;;  %v2547_v21 = vmul.f32 0.0078125, %v1557_v18 }
 0x583   :  { %v1572_v35 = vsub.f32 %v2477_v25, %v2547_v21  ;;  %v1573_v24 = vsub.f32 %v2479_v29, %v2547_v21  ;;  %v1578_v26 = vmul.f32 %v1570_v19, %v2171_v28  ;;  %v1579_v30 = vmul.f32 %v1571_v20, %v2169_v27 }
 0x585   :  { %v1586_v32 = vmul.f32 %v1578_v26, %v1578_v26  ;;  %v1587_v34 = vmul.f32 %v1579_v30, %v1579_v30  ;;  %v1580_v36 = vmul.f32 %v1572_v35, %v2171_v28  ;;  %v1581_v37 = vmul.f32 %v1573_v24, %v2169_v27 }
 0x587   :  { %v1594_v39 = vsel %vm252_vm1, %v1587_v34, 0.0  ;;  %v1588_v33 = vmul.f32 %v1580_v36, %v1580_v36  ;;  %v1589_v45 = vmul.f32 %v1581_v37, %v1581_v37 }
 0x588   :  { %v1595_v47 = vadd.f32 %v1594_v39, %v1586_v32 }
 0x589   :  { %v1598_v48 = vsel %vm252_vm1, %v1589_v45, 0.0 }
 0x58a   :  { %1596 = vadd.xlane.f32.xlu0 %v1595_v47  ;;  %v1599_v49 = vadd.f32 %v1598_v48, %v1588_v33 }
 0x58c   :  { %1600 = vadd.xlane.f32.xlu1 %v1599_v49 }
 0x590   :  { %v1312_v50 = vpop.xlane.xlu1 %1311 }
 0x591   :  { %v2559_v51 = vmul.f32 0.0078125, %v1312_v50 }
 0x592   :  { %v1316_v52 = vpop.xlane.xlu0 %1315 }
 0x593   :  { %v1329_v55 = vsub.f32 %v2505_v53, %v2559_v51  ;;  %v1330_v57 = vsub.f32 %v2507_v56, %v2559_v51  ;;  %v2565_v41 = vmul.f32 0.0078125, %v1316_v52 }
 0x595   :  { %v1331_v60 = vsub.f32 %v2509_v59, %v2565_v41  ;;  %v1332_v61 = vsub.f32 %v2511_v42, %v2565_v41  ;;  %v1337_v62 = vmul.f32 %v1329_v55, %v2171_v28  ;;  %v1338_v44 = vmul.f32 %v1330_v57, %v2169_v27 }
 0x597   :  { %v1345_v46 = vmul.f32 %v1337_v62, %v1337_v62  ;;  %v1346_v63 = vmul.f32 %v1338_v44, %v1338_v44  ;;  %v1339_v0 = vmul.f32 %v1331_v60, %v2171_v28  ;;  %v1340_v1 = vmul.f32 %v1332_v61, %v2169_v27 }
 0x598   :  { %v1320_v54 = vpop.xlane.xlu0 %1319 }
 0x599   :  { %v2575_v4 = vmul.f32 0.0078125, %v1320_v54  ;;  %v1353_v6 = vsel %vm252_vm1, %v1346_v63, 0.0  ;;  %v1347_v7 = vmul.f32 %v1339_v0, %v1339_v0  ;;  %v1348_v9 = vmul.f32 %v1340_v1, %v1340_v1 }
 0x59a   :  { %v1324_v10 = vpop.xlane.xlu1 %1323  ;;  %v1354_v11 = vadd.f32 %v1353_v6, %v1345_v46 }
 0x59b   :  { %v1333_v13 = vsub.f32 %v2523_v3, %v2575_v4  ;;  %v1334_v14 = vsub.f32 %v2525_v5, %v2575_v4  ;;  %v2582_v15 = vmul.f32 0.0078125, %v1324_v10  ;;  %v1357_v16 = vsel %vm252_vm1, %v1348_v9, 0.0 }
 0x59c   :  { %v1561_v2 = vpop.xlane.xlu0 %1560  ;;  %1355 = vadd.xlane.f32.xlu0 %v1354_v11  ;;  %v1358_v17 = vadd.f32 %v1357_v16, %v1347_v7 }
 0x59d   :  { %v1335_v18 = vsub.f32 %v2527_v58, %v2582_v15  ;;  %v1336_v19 = vsub.f32 %v2529_v8, %v2582_v15  ;;  %v2589_v20 = vmul.f32 0.0078125, %v1561_v2  ;;  %v1341_v35 = vmul.f32 %v1333_v13, %v2171_v28 }
 0x59e   :  { %1359 = vadd.xlane.f32.xlu1 %v1358_v17  ;;  %v1565_v24 = vpop.xlane.xlu1 %1564  ;;  %v1342_v26 = vmul.f32 %v1334_v14, %v2169_v27  ;;  %v1614_v17 = vld [vmem:[%s2725_s6] sm:$0xff] }
 0x59f   :  { %v1574_v30 = vsub.f32 %v2487_v38, %v2589_v20  ;;  %v1575_v32 = vsub.f32 %v2489_v31, %v2589_v20  ;;  %v2597_v34 = vmul.f32 0.0078125, %v1565_v24  ;;  %v1349_v36 = vmul.f32 %v1341_v35, %v1341_v35 }
 0x5a0   :  { %v1350_v37 = vmul.f32 %v1342_v26, %v1342_v26  ;;  %v1343_v39 = vmul.f32 %v1335_v18, %v2171_v28  ;;  %v1344_v33 = vmul.f32 %v1336_v19, %v2169_v27  ;;  %v1615_v19 = vld [vmem:[%s2725_s6 + $0x8] sm:$0xff] }
 0x5a1   :  { %v1576_v45 = vsub.f32 %v2495_v40, %v2597_v34  ;;  %v1577_v47 = vsub.f32 %v2497_v43, %v2597_v34  ;;  %v1582_v48 = vmul.f32 %v1574_v30, %v2171_v28  ;;  %v1583_v49 = vmul.f32 %v1575_v32, %v2169_v27  ;;  %v1630_v32 = vld [vmem:[%s2726_s7] sm:$0xff] }
 0x5a2   :  { %v1361_v50 = vsel %vm252_vm1, %v1350_v37, 0.0  ;;  %v1351_v52 = vmul.f32 %v1343_v39, %v1343_v39  ;;  %v1352_v55 = vmul.f32 %v1344_v33, %v1344_v33 }
 0x5a3   :  { %v1362_v57 = vadd.f32 %v1361_v50, %v1349_v36  ;;  %v1590_v60 = vmul.f32 %v1582_v48, %v1582_v48  ;;  %v1591_v61 = vmul.f32 %v1583_v49, %v1583_v49  ;;  %v1584_v62 = vmul.f32 %v1576_v45, %v2171_v28  ;;  %v1631_v36 = vld [vmem:[%s2726_s7 + $0x8] sm:$0xff] }
 0x5a4   :  { %v1365_v44 = vsel %vm252_vm1, %v1352_v55, 0.0  ;;  %v1585_v46 = vmul.f32 %v1577_v47, %v2169_v27 }
 0x5a5   :  { %1363 = vadd.xlane.f32.xlu0 %v1362_v57  ;;  %v1366_v63 = vadd.f32 %v1365_v44, %v1351_v52  ;;  %v1602_v0 = vsel %vm252_vm1, %v1591_v61, 0.0  ;;  %v1592_v1 = vmul.f32 %v1584_v62, %v1584_v62 }
 0x5a6   :  { %v1603_v54 = vadd.f32 %v1602_v0, %v1590_v60  ;;  %v1593_v6 = vmul.f32 %v1585_v46, %v1585_v46 }
 0x5a7   :  { %1367 = vadd.xlane.f32.xlu1 %v1366_v63 }
 0x5a8   :  { %v1606_v7 = vsel %vm252_vm1, %v1593_v6, 0.0  ;;  %v1616_v6 = vld [vmem:[%s2725_s6 + $0x10] sm:$0xff]  ;;  %vm2679_vm1 = vmor %vm1747_vm0, %vm1746_vm15 }
 0x5a9   :  { %1604 = vadd.xlane.f32.xlu0 %v1603_v54  ;;  %v1607_v9 = vadd.f32 %v1606_v7, %v1592_v1  ;;  %v1374_v7 = vld [vmem:[%s2727_s9 + $0x8] sm:$0xff] }
 0x5ab   :  { %1608 = vadd.xlane.f32.xlu1 %v1607_v9 }
 0x617   :  { %v1597_v10 = vpop.xlane.xlu0 %1596 }
 0x618   :  { %v1610_v11 = vmul.f32 0.0078125, %v1597_v10 }
 0x619   :  { %v1601_v13 = vpop.xlane.xlu1 %1600 }
 0x61a   :  { %v1618_v14 = vadd.f32 1e-05, %v1610_v11  ;;  %v1611_v16 = vmul.f32 0.0078125, %v1601_v13  ;;  %v1617_v11 = vld [vmem:[%s2725_s6 + $0x18] sm:$0xff]  ;;  %v1373_v13 = vld [vmem:[%s2727_s9] sm:$0xff] }
 0x61c   :  { %2007 = vrsqrt.f32 %v1618_v14  ;;  %v1619_v2 = vadd.f32 1e-05, %v1611_v16 }
 0x61e   :  { %2009 = vrsqrt.f32 %v1619_v2 }
 0x626   :  { %v2008_v18 = vpop.eup %2007 }
 0x627   :  { %v1626_v35 = vmul.f32 %v2008_v18, %v1614_v17 }
 0x628   :  { %v2010_v24 = vpop.eup %2009 }
 0x629   :  { %1644 = vperm.xlu0 %1941, %v1626_v35   ;;  %v1627_v26 = vmul.f32 %v2010_v24, %v1615_v19  ;;  %v1634_v30 = vmul.f32 %v1626_v35, %v2541_v12  ;;  %v1356_v45 = vpop.xlane.xlu0 %1355  ;;  %v1390_v24 = vld [vmem:[%s2728_s10 + $0x8] sm:$0xff] }
 0x62a   :  { %v1369_v49 = vmul.f32 0.0078125, %v1356_v45 }
 0x62b   :  { %1649 = vperm.xlu1 %1942, %v1627_v26   ;;  %v1635_v37 = vmul.f32 %v1627_v26, %v2547_v21  ;;  %v1638_v39 = vsub.f32 %v1630_v32, %v1634_v30  ;;  %v1360_v47 = vpop.xlane.xlu1 %1359  ;;  %v1376_v26 = vld [vmem:[%s2727_s9 + $0x18] sm:$0xff] }
 0x62c   :  { %v1370_v48 = vmul.f32 0.0078125, %v1360_v47  ;;  %v1377_v55 = vadd.f32 1e-05, %v1369_v49  ;;  %v1391_v49 = vld [vmem:[%s2728_s10 + $0x10] sm:$0xff] }
 0x62d   :  { %v1639_v33 = vsub.f32 %v1631_v36, %v1635_v37  ;;  %v1389_v36 = vld [vmem:[%s2728_s10] sm:$0xff] }
 0x62e   :  { %v1378_v52 = vadd.f32 1e-05, %v1370_v48 }
 0x62f   :  { %1672 = vperm.xlu1 %1942, %v1638_v39   ;;  %1677 = vperm.xlu0 %1941, %v1639_v33  }
 0x630   :  { %2011 = vrsqrt.f32 %v1378_v52  ;;  %v1633_v52 = vld [vmem:[%s2726_s7 + $0x18] sm:$0xff] }
 0x631   :  { %2013 = vrsqrt.f32 %v1377_v55 }
 0x632   :  { %v1364_v12 = vpop.xlane.xlu0 %1363 }
 0x633   :  { %v1371_v21 = vmul.f32 0.0078125, %v1364_v12 }
 0x634   :  { %v1368_v50 = vpop.xlane.xlu1 %1367 }
 0x635   :  { %v1372_v62 = vmul.f32 0.0078125, %v1368_v50  ;;  %v1379_v1 = vadd.f32 1e-05, %v1371_v21 }
 0x636   :  { %v1605_v57 = vpop.xlane.xlu0 %1604 }
 0x637   :  { %v1612_v60 = vmul.f32 0.0078125, %v1605_v57  ;;  %v1380_v0 = vadd.f32 1e-05, %v1372_v62 }
 0x638   :  { %v1609_v61 = vpop.xlane.xlu1 %1608 }
 0x639   :  { %v1620_v44 = vadd.f32 1e-05, %v1612_v60  ;;  %v1613_v46 = vmul.f32 0.0078125, %v1609_v61 }
 0x63a   :  { %v2012_v54 = vpop.eup %2011 }
 0x63b   :  { %2015 = vrsqrt.f32 %v1620_v44  ;;  %v1621_v63 = vadd.f32 1e-05, %v1613_v46  ;;  %v2014_v9 = vpop.eup %2013  ;;  %v1386_v16 = vmul.f32 %v2012_v54, %v1374_v7 }
 0x63c   :  { %v1385_v18 = vmul.f32 %v2014_v9, %v1373_v13 }
 0x63d   :  { %2017 = vrsqrt.f32 %v1621_v63  ;;  %v1394_v19 = vmul.f32 %v1386_v16, %v2565_v41  ;;  %v1375_v41 = vld [vmem:[%s2727_s9 + $0x10] sm:$0xff] }
 0x63e   :  { %2019 = vrsqrt.f32 %v1380_v0  ;;  %v1393_v30 = vmul.f32 %v1385_v18, %v2559_v51  ;;  %v1392_v51 = vld [vmem:[%s2728_s10 + $0x18] sm:$0xff] }
 0x63f   :  { %2021 = vrsqrt.f32 %v1379_v1  ;;  %v1398_v37 = vsub.f32 %v1390_v24, %v1394_v19 }
 0x640   :  { %v1397_v33 = vsub.f32 %v1389_v36, %v1393_v30 }
 0x645   :  { %v2016_v10 = vpop.eup %2015 }
 0x646   :  { %v1628_v14 = vmul.f32 %v2016_v10, %v1616_v6 }
 0x647   :  { %v2018_v2 = vpop.eup %2017 }
 0x648   :  { %1654 = vperm.xlu0 %1941, %v1628_v14   ;;  %v1629_v17 = vmul.f32 %v2018_v2, %v1617_v11  ;;  %v2020_v35 = vpop.eup %2019  ;;  %v1636_v55 = vmul.f32 %v1628_v14, %v2589_v20 }
 0x649   :  { %v2022_v32 = vpop.eup %2021  ;;  %v1388_v39 = vmul.f32 %v2020_v35, %v1376_v26 }
 0x64a   :  { %1659 = vperm.xlu1 %1942, %v1629_v17   ;;  %v1387_v45 = vmul.f32 %v2022_v32, %v1375_v41  ;;  %v1637_v50 = vmul.f32 %v1629_v17, %v2597_v34 }
 0x64b   :  { %v1396_v47 = vmul.f32 %v1388_v39, %v2582_v15 }
 0x64c   :  { %1403 = vperm.xlu0 %1941, %v1385_v18   ;;  %v1395_v48 = vmul.f32 %v1387_v45, %v2575_v4  ;;  %v1632_v4 = vld [vmem:[%s2726_s7 + $0x10] sm:$0xff]  ;;  %v1641_v57 = vsub.f32 %v1633_v52, %v1637_v50 }
 0x64d   :  { %v1400_v12 = vsub.f32 %v1392_v51, %v1396_v47  ;;  %v1640_v60 = vsub.f32 %v1632_v4, %v1636_v55 }
 0x64e   :  { %1408 = vperm.xlu1 %1942, %v1386_v16   ;;  %v1399_v15 = vsub.f32 %v1391_v49, %v1395_v48 }
 0x650   :  { %1436 = vperm.xlu0 %1941, %v1398_v37  }
 0x652   :  { %1431 = vperm.xlu1 %1942, %v1397_v33  }
 0x654   :  { %1418 = vperm.xlu0 %1941, %v1388_v39  }
 0x656   :  { %1413 = vperm.xlu1 %1942, %v1387_v45  }
 0x658   :  { %1446 = vperm.xlu0 %1941, %v1400_v12  }
 0x65a   :  { %1441 = vperm.xlu1 %1942, %v1399_v15  }
 0x65c   :  { %1687 = vperm.xlu0 %1941, %v1641_v57  }
 0x65e   :  { %1682 = vperm.xlu1 %1942, %v1640_v60  }
 0x6a8   :  { %v1645_v61 = vpop.permute.xlu0 %1644 }
 0x6a9   :  { %v1662_v7 = vmul.f32 %v1645_v61, %v2469_v22  ;;  %v1663_v9 = vmul.f32 %v1645_v61, %v2471_v23 }
 0x6aa   :  { %v1650_v62 = vpop.permute.xlu1 %1649 }
 0x6ab   :  { %v1664_v0 = vmul.f32 %v1650_v62, %v2477_v25  ;;  %v1665_v20 = vmul.f32 %v1650_v62, %v2479_v29 }
 0x6ae   :  { %v1678_v34 = vpop.permute.xlu0 %1677  ;;  %v1673_v44 = vpop.permute.xlu1 %1672 }
 0x6af   :  { %v1692_v10 = vadd.f32 %v1678_v34, %v1664_v0  ;;  %v1693_v11 = vadd.f32 %v1678_v34, %v1665_v20  ;;  %v1690_v17 = vadd.f32 %v1673_v44, %v1662_v7  ;;  %v1691_v29 = vadd.f32 %v1673_v44, %v1663_v9 }
 0x6c7   :  { %v1655_v46 = vpop.permute.xlu0 %1654 }
 0x6c8   :  { %v1666_v15 = vmul.f32 %v1655_v46, %v2487_v38  ;;  %v1667_v55 = vmul.f32 %v1655_v46, %v2489_v31 }
 0x6c9   :  { %v1660_v21 = vpop.permute.xlu1 %1659 }
 0x6ca   :  { %v1668_v51 = vmul.f32 %v1660_v21, %v2495_v40  ;;  %v1669_v49 = vmul.f32 %v1660_v21, %v2497_v43 }
 0x6cb   :  { %v1404_v63 = vpop.permute.xlu0 %1403 }
 0x6cc   :  { %v1421_v14 = vmul.f32 %v2505_v53, %v1404_v63  ;;  %v1422_v16 = vmul.f32 %v2507_v56, %v1404_v63 }
 0x6cd   :  { %v1409_v1 = vpop.permute.xlu1 %1408 }
 0x6ce   :  { %v1423_v54 = vmul.f32 %v2509_v59, %v1409_v1  ;;  %v1424_v6 = vmul.f32 %v2511_v42, %v1409_v1 }
 0x6cf   :  { %v1437_v13 = vpop.permute.xlu0 %1436 }
 0x6d0   :  { %v1451_v2 = vadd.f32 %v1437_v13, %v1423_v54  ;;  %v1452_v25 = vadd.f32 %v1437_v13, %v1424_v6 }
 0x6d1   :  { %v1432_v18 = vpop.permute.xlu1 %1431 }
 0x6d2   :  { %v1700_v19 = vadd.f32 %v1692_v10, %v1451_v2  ;;  %v1701_v59 = vadd.f32 %v1693_v11, %v1452_v25  ;;  %v1449_v35 = vadd.f32 %v1432_v18, %v1421_v14  ;;  %v1450_v42 = vadd.f32 %v1432_v18, %v1422_v16 }
 0x6d3   :  { %v1419_v22 = vpop.permute.xlu0 %1418 }
 0x6d4   :  { %v1708_v23 = vmax.f32 %v1700_v19, 0.0  ;;  %v1709_v24 = vmax.f32 %v1701_v59, 0.0  ;;  %v1698_v26 = vadd.f32 %v1690_v17, %v1449_v35  ;;  %v1699_v30 = vadd.f32 %v1691_v29, %v1450_v42 }
 0x6d5   :  { %v1414_v32 = vpop.permute.xlu1 %1413  ;;  %v1427_v50 = vmul.f32 %v2527_v58, %v1419_v22  ;;  %v1428_v52 = vmul.f32 %v2529_v8, %v1419_v22 }
 0x6d6   :  { %v1716_v53 = vmul.f32 %v1708_v23, %v2171_v28  ;;  %v1717_v56 = vmul.f32 %v1709_v24, %v2169_v27  ;;  %v1706_v36 = vmax.f32 %v1698_v26, 0.0  ;;  %v1707_v41 = vmax.f32 %v1699_v30, 0.0 }
 0x6d7   :  { %v1447_v39 = vpop.permute.xlu0 %1446  ;;  %v1425_v40 = vmul.f32 %v2523_v3, %v1414_v32  ;;  %v1426_v4 = vmul.f32 %v2525_v5, %v1414_v32 }
 0x6d8   :  { %v1860_v33 = vpack.c.bf16 %v1717_v56, %v1716_v53  ;;  %v1714_v45 = vmul.f32 %v1706_v36, %v2171_v28  ;;  %v1715_v47 = vmul.f32 %v1707_v41, %v2169_v27  ;;  %v1455_v57 = vadd.f32 %v1447_v39, %v1427_v50 }
 0x6d9   :  { %v1442_v48 = vpop.permute.xlu1 %1441  ;;  %v1456_v60 = vadd.f32 %v1447_v39, %v1428_v52 }
 0x6da   :  { %1750 = vst.msk [vmem:[%s2729_s12 + $0x8] sm:$0xff] %vm2679_vm1, %v1860_v33  ;;  %v1859_v12 = vpack.c.bf16 %v1715_v47, %v1714_v45  ;;  %v1453_v8 = vadd.f32 %v1442_v48, %v1425_v40  ;;  %v1454_v62 = vadd.f32 %v1442_v48, %v1426_v4 }
 0x6db   :  { %v1688_v43 = vpop.permute.xlu0 %1687 }
 0x6dc   :  { %1749 = vst.msk [vmem:[%s2729_s12] sm:$0xff] %vm2679_vm1, %v1859_v12  ;;  %v1696_v58 = vadd.f32 %v1688_v43, %v1668_v51  ;;  %v1697_v61 = vadd.f32 %v1688_v43, %v1669_v49 }
 0x6dd   :  { %v1683_v38 = vpop.permute.xlu1 %1682 }
 0x6de   :  { %v1704_v34 = vadd.f32 %v1696_v58, %v1455_v57  ;;  %v1705_v31 = vadd.f32 %v1697_v61, %v1456_v60  ;;  %v1694_v44 = vadd.f32 %v1683_v38, %v1666_v15  ;;  %v1695_v3 = vadd.f32 %v1683_v38, %v1667_v55 }
 0x6e0   :  { %v1712_v46 = vmax.f32 %v1704_v34, 0.0  ;;  %v1713_v5 = vmax.f32 %v1705_v31, 0.0  ;;  %v1702_v21 = vadd.f32 %v1694_v44, %v1453_v8  ;;  %v1703_v63 = vadd.f32 %v1695_v3, %v1454_v62 }
 0x6e2   :  { %v1720_v0 = vmul.f32 %v1712_v46, %v2171_v28  ;;  %v1721_v20 = vmul.f32 %v1713_v5, %v2169_v27  ;;  %v1710_v1 = vmax.f32 %v1702_v21, 0.0  ;;  %v1711_v54 = vmax.f32 %v1703_v63, 0.0 }
 0x6e4   :  { %v1862_v6 = vpack.c.bf16 %v1721_v20, %v1720_v0  ;;  %v1718_v7 = vmul.f32 %v1710_v1, %v2171_v28  ;;  %v1719_v9 = vmul.f32 %v1711_v54, %v2169_v27 }
 0x6e6   :  { %1752 = vst.msk [vmem:[%s2729_s12 + $0x18] sm:$0xff] %vm2679_vm1, %v1862_v6  ;;  %v1861_v10 = vpack.c.bf16 %v1719_v9, %v1718_v7 }
 0x6e8   :  { %1751 = vst.msk [vmem:[%s2729_s12 + $0x10] sm:$0xff] %vm2679_vm1, %v1861_v10 }

// kernel: scaled_resnet_forward.13
= control target key start
LH: loop header
LB: loop body
LE: loop exit
PB: predicated region body
PF: predicated region fallthrough
CT: control target
= control target key end

     0   :  { %vm142_vm0 = vcmask 123904   ;;  %vm807_vm1 = vcmask 523264   ;;  %vm736_vm2 = vcmask 1041409   ;;  %vm738_vm3 = vcmask 1042434   ;;  %s1518_s0 = inlined_call_operand.vmem [shape: bf16[64,2,16], index: 0, kind: input, shape index: {}]   ;;  %s1519_s1 = inlined_call_operand.vmem [shape: f32[10,64], index: 1, kind: input, shape index: {}]   ;;  %s1520_s2 = inlined_call_operand.vmem [shape: f32[10,1], index: 2, kind: input, shape index: {}]   ;;  %s1521_s3 = inlined_call_operand.vmem [shape: f32[10,2], index: 3, kind: output, shape index: {}]  }
   0x1   :  { %v22_v0 = vld [vmem:[%s1518_s0 + $0x8] sm:$0x1]  ;;  %v14_v1 = vld [vmem:[%s1518_s0] sm:$0x1]  ;;  %v23_v2 = vld [vmem:[%s1518_s0 + $0x9] sm:$0x1] }
   0x2   :  { %v86_v3 = vunpack.c.l.bf16 %v22_v0  ;;  %v78_v4 = vunpack.c.l.bf16 %v14_v1  ;;  %v87_v5 = vunpack.c.l.bf16 %v23_v2  ;;  %v15_v6 = vld [vmem:[%s1518_s0 + $0x1] sm:$0x1]  ;;  %v24_v8 = vld [vmem:[%s1518_s0 + $0xa] sm:$0x1]  ;;  %v16_v9 = vld [vmem:[%s1518_s0 + $0x2] sm:$0x1] }
   0x3   :  { %v79_v7 = vunpack.c.l.bf16 %v15_v6  ;;  %v88_v14 = vunpack.c.l.bf16 %v24_v8  ;;  %v80_v15 = vunpack.c.l.bf16 %v16_v9  ;;  %v25_v16 = vld [vmem:[%s1518_s0 + $0xb] sm:$0x1]  ;;  %v17_v17 = vld [vmem:[%s1518_s0 + $0x3] sm:$0x1]  ;;  %v26_v18 = vld [vmem:[%s1518_s0 + $0xc] sm:$0x1] }
   0x4   :  { %v167_v10 = vsel %vm142_vm0, %v86_v3, 0.0  ;;  %v143_v11 = vsel %vm142_vm0, %v78_v4, 0.0  ;;  %v170_v12 = vsel %vm142_vm0, %v87_v5, 0.0  ;;  %v18_v19 = vld [vmem:[%s1518_s0 + $0x4] sm:$0x1]  ;;  %v89_v24 = vunpack.c.l.bf16 %v25_v16 }
   0x5   :  { %168 = vadd.xlane.f32.xlu1 %v167_v10  ;;  %144 = vadd.xlane.f32.xlu0 %v143_v11  ;;  %v146_v13 = vsel %vm142_vm0, %v79_v7, 0.0  ;;  %v27_v20 = vld [vmem:[%s1518_s0 + $0xd] sm:$0x1]  ;;  %v19_v21 = vld [vmem:[%s1518_s0 + $0x5] sm:$0x1]  ;;  %v173_v22 = vsel %vm142_vm0, %v88_v14, 0.0  ;;  %v81_v25 = vunpack.c.l.bf16 %v17_v17  ;;  %v90_v28 = vunpack.c.l.bf16 %v26_v18 }
   0x6   :  { %v149_v23 = vsel %vm142_vm0, %v80_v15, 0.0  ;;  %v31_v26 = vld [vmem:[%s1518_s0 + $0x11] sm:$0x1]  ;;  %v30_v27 = vld [vmem:[%s1518_s0 + $0x10] sm:$0x1]  ;;  %v82_v29 = vunpack.c.l.bf16 %v18_v19  ;;  %v91_v32 = vunpack.c.l.bf16 %v27_v20  ;;  %v83_v33 = vunpack.c.l.bf16 %v19_v21 }
   0x7   :  { %v39_v30 = vld [vmem:[%s1518_s0 + $0x19] sm:$0x1]  ;;  %v38_v31 = vld [vmem:[%s1518_s0 + $0x18] sm:$0x1]  ;;  %v95_v34 = vunpack.c.l.bf16 %v31_v26  ;;  %v94_v35 = vunpack.c.l.bf16 %v30_v27  ;;  %v176_v36 = vsel %vm142_vm0, %v89_v24, 0.0  ;;  %v152_v37 = vsel %vm142_vm0, %v81_v25, 0.0 }
   0x8   :  { %v103_v38 = vunpack.c.l.bf16 %v39_v30  ;;  %v102_v39 = vunpack.c.l.bf16 %v38_v31  ;;  %v1027_v40 = vld [vmem:[%s1518_s0 + $0xe] sm:$0x1]  ;;  %v1032_v41 = vld [vmem:[%s1518_s0 + $0x6] sm:$0x1]  ;;  %v179_v42 = vsel %vm142_vm0, %v90_v28, 0.0  ;;  %v155_v43 = vsel %vm142_vm0, %v82_v29, 0.0 }
   0x9   :  { %171 = vadd.xlane.f32.xlu1 %v170_v12  ;;  %147 = vadd.xlane.f32.xlu0 %v146_v13  ;;  %v182_v44 = vsel %vm142_vm0, %v91_v32, 0.0  ;;  %v158_v45 = vsel %vm142_vm0, %v83_v33, 0.0  ;;  %v1041_v46 = vld [vmem:[%s1518_s0 + $0x1a] sm:$0x1]  ;;  %v1046_v47 = vld [vmem:[%s1518_s0 + $0x12] sm:$0x1]  ;;  %v92_v50 = vunpack.c.l.bf16 %v1027_v40  ;;  %v84_v51 = vunpack.c.l.bf16 %v1032_v41 }
   0xa   :  { %v1049_v48 = vsel %vm142_vm0, %v95_v34, 0.0  ;;  %v1052_v49 = vsel %vm142_vm0, %v94_v35, 0.0  ;;  %v44_v52 = vld [vmem:[%s1518_s0 + $0x1e] sm:$0x1]  ;;  %v36_v53 = vld [vmem:[%s1518_s0 + $0x16] sm:$0x1]  ;;  %v104_v60 = vunpack.c.l.bf16 %v1041_v46  ;;  %v96_v61 = vunpack.c.l.bf16 %v1046_v47 }
   0xb   :  { %v1063_v54 = vsel %vm142_vm0, %v103_v38, 0.0  ;;  %v1066_v55 = vsel %vm142_vm0, %v102_v39, 0.0  ;;  %v108_v56 = vunpack.c.l.bf16 %v44_v52  ;;  %v100_v57 = vunpack.c.l.bf16 %v36_v53  ;;  %v56_v58 = vld [vmem:[%s1518_s0 + $0x2a] sm:$0x1]  ;;  %v48_v59 = vld [vmem:[%s1518_s0 + $0x22] sm:$0x1] }
   0xc   :  { %v120_v62 = vunpack.c.l.bf16 %v56_v58  ;;  %v112_v63 = vunpack.c.l.bf16 %v48_v59  ;;  %v45_v0 = vld [vmem:[%s1518_s0 + $0x1f] sm:$0x1]  ;;  %v37_v1 = vld [vmem:[%s1518_s0 + $0x17] sm:$0x1]  ;;  %v57_v6 = vld [vmem:[%s1518_s0 + $0x2b] sm:$0x1] }
   0xd   :  { %174 = vadd.xlane.f32.xlu1 %v173_v22  ;;  %150 = vadd.xlane.f32.xlu0 %v149_v23  ;;  %v1083_v2 = vsel %vm142_vm0, %v108_v56, 0.0  ;;  %v1086_v3 = vsel %vm142_vm0, %v100_v57, 0.0  ;;  %v109_v4 = vunpack.c.l.bf16 %v45_v0  ;;  %v101_v5 = vunpack.c.l.bf16 %v37_v1  ;;  %v49_v7 = vld [vmem:[%s1518_s0 + $0x23] sm:$0x1]  ;;  %v58_v12 = vld [vmem:[%s1518_s0 + $0x2c] sm:$0x1] }
   0xe   :  { %v1095_v8 = vsel %vm142_vm0, %v120_v62, 0.0  ;;  %v1098_v9 = vsel %vm142_vm0, %v112_v63, 0.0  ;;  %v121_v10 = vunpack.c.l.bf16 %v57_v6  ;;  %v113_v11 = vunpack.c.l.bf16 %v49_v7  ;;  %v50_v13 = vld [vmem:[%s1518_s0 + $0x24] sm:$0x1]  ;;  %v59_v18 = vld [vmem:[%s1518_s0 + $0x2d] sm:$0x1] }
   0xf   :  { %v1107_v14 = vsel %vm142_vm0, %v109_v4, 0.0  ;;  %v1110_v15 = vsel %vm142_vm0, %v101_v5, 0.0  ;;  %v122_v16 = vunpack.c.l.bf16 %v58_v12  ;;  %v114_v17 = vunpack.c.l.bf16 %v50_v13  ;;  %v51_v19 = vld [vmem:[%s1518_s0 + $0x25] sm:$0x1]  ;;  %v63_v24 = vld [vmem:[%s1518_s0 + $0x31] sm:$0x1] }
  0x10   :  { %v1119_v20 = vsel %vm142_vm0, %v121_v10, 0.0  ;;  %v1122_v21 = vsel %vm142_vm0, %v113_v11, 0.0  ;;  %v123_v22 = vunpack.c.l.bf16 %v59_v18  ;;  %v115_v23 = vunpack.c.l.bf16 %v51_v19  ;;  %v62_v25 = vld [vmem:[%s1518_s0 + $0x30] sm:$0x1]  ;;  %v71_v30 = vld [vmem:[%s1518_s0 + $0x39] sm:$0x1] }
  0x11   :  { %177 = vadd.xlane.f32.xlu1 %v176_v36  ;;  %153 = vadd.xlane.f32.xlu0 %v152_v37  ;;  %v1131_v26 = vsel %vm142_vm0, %v122_v16, 0.0  ;;  %v1134_v27 = vsel %vm142_vm0, %v114_v17, 0.0  ;;  %v127_v28 = vunpack.c.l.bf16 %v63_v24  ;;  %v126_v29 = vunpack.c.l.bf16 %v62_v25  ;;  %v70_v31 = vld [vmem:[%s1518_s0 + $0x38] sm:$0x1]  ;;  %v60_v36 = vld [vmem:[%s1518_s0 + $0x2e] sm:$0x1] }
  0x12   :  { %v1143_v32 = vsel %vm142_vm0, %v123_v22, 0.0  ;;  %v1146_v33 = vsel %vm142_vm0, %v115_v23, 0.0  ;;  %v135_v34 = vunpack.c.l.bf16 %v71_v30  ;;  %v134_v35 = vunpack.c.l.bf16 %v70_v31  ;;  %v52_v37 = vld [vmem:[%s1518_s0 + $0x26] sm:$0x1]  ;;  %v61_v58 = vld [vmem:[%s1518_s0 + $0x2f] sm:$0x1] }
  0x13   :  { %v1155_v38 = vsel %vm142_vm0, %v127_v28, 0.0  ;;  %v1158_v39 = vsel %vm142_vm0, %v126_v29, 0.0  ;;  %v53_v59 = vld [vmem:[%s1518_s0 + $0x27] sm:$0x1]  ;;  %v125_v0 = vunpack.c.l.bf16 %v61_v58  ;;  %v73_v4 = vld [vmem:[%s1518_s0 + $0x3b] sm:$0x1] }
  0x14   :  { %v1167_v52 = vsel %vm142_vm0, %v135_v34, 0.0  ;;  %v1170_v53 = vsel %vm142_vm0, %v134_v35, 0.0  ;;  %v117_v1 = vunpack.c.l.bf16 %v53_v59  ;;  %v65_v5 = vld [vmem:[%s1518_s0 + $0x33] sm:$0x1]  ;;  %v137_v10 = vunpack.c.l.bf16 %v73_v4  ;;  %v74_v12 = vld [vmem:[%s1518_s0 + $0x3c] sm:$0x1] }
  0x15   :  { %180 = vadd.xlane.f32.xlu1 %v179_v42  ;;  %156 = vadd.xlane.f32.xlu0 %v155_v43  ;;  %v124_v42 = vunpack.c.l.bf16 %v60_v36  ;;  %v116_v43 = vunpack.c.l.bf16 %v52_v37  ;;  %v129_v11 = vunpack.c.l.bf16 %v65_v5  ;;  %v66_v13 = vld [vmem:[%s1518_s0 + $0x34] sm:$0x1]  ;;  %v138_v16 = vunpack.c.l.bf16 %v74_v12  ;;  %v75_v18 = vld [vmem:[%s1518_s0 + $0x3d] sm:$0x1]  ;;  %v67_v19 = vld [vmem:[%s1518_s0 + $0x35] sm:$0x1] }
  0x16   :  { %v130_v17 = vunpack.c.l.bf16 %v66_v13  ;;  %v1217_v22 = vsel %vm142_vm0, %v137_v10, 0.0  ;;  %v139_v24 = vunpack.c.l.bf16 %v75_v18  ;;  %v131_v25 = vunpack.c.l.bf16 %v67_v19  ;;  %v76_v28 = vld [vmem:[%s1518_s0 + $0x3e] sm:$0x1]  ;;  %v68_v29 = vld [vmem:[%s1518_s0 + $0x36] sm:$0x1] }
  0x17   :  { %v1179_v62 = vsel %vm142_vm0, %v124_v42, 0.0  ;;  %v1182_v63 = vsel %vm142_vm0, %v116_v43, 0.0  ;;  %v1220_v23 = vsel %vm142_vm0, %v129_v11, 0.0  ;;  %v1229_v30 = vsel %vm142_vm0, %v138_v16, 0.0  ;;  %v77_v36 = vld [vmem:[%s1518_s0 + $0x3f] sm:$0x1] }
  0x18   :  { %v1232_v31 = vsel %vm142_vm0, %v130_v17, 0.0  ;;  %v140_v34 = vunpack.c.l.bf16 %v76_v28  ;;  %v132_v35 = vunpack.c.l.bf16 %v68_v29  ;;  %v69_v37 = vld [vmem:[%s1518_s0 + $0x37] sm:$0x1]  ;;  %v1243_v42 = vsel %vm142_vm0, %v139_v24, 0.0  ;;  %v29_v58 = vld [vmem:[%s1518_s0 + $0xf] sm:$0x1] }
  0x19   :  { %183 = vadd.xlane.f32.xlu1 %v182_v44  ;;  %159 = vadd.xlane.f32.xlu0 %v158_v45  ;;  %v72_v44 = vld [vmem:[%s1518_s0 + $0x3a] sm:$0x1]  ;;  %v64_v45 = vld [vmem:[%s1518_s0 + $0x32] sm:$0x1]  ;;  %v1246_v43 = vsel %vm142_vm0, %v131_v25, 0.0  ;;  %v197_v59 = vsel %vm142_vm0, %v96_v61, 0.0 }
  0x1a   :  { %v136_v56 = vunpack.c.l.bf16 %v72_v44  ;;  %v128_v57 = vunpack.c.l.bf16 %v64_v45  ;;  %v141_v44 = vunpack.c.l.bf16 %v77_v36  ;;  %v133_v45 = vunpack.c.l.bf16 %v69_v37  ;;  %v21_v40 = vld [vmem:[%s1518_s0 + $0x7] sm:$0x1]  ;;  %v41_v4 = vld [vmem:[%s1518_s0 + $0x1b] sm:$0x1]  ;;  %v33_v5 = vld [vmem:[%s1518_s0 + $0x13] sm:$0x1] }
  0x1b   :  { %v105_v10 = vunpack.c.l.bf16 %v41_v4  ;;  %v97_v47 = vunpack.c.l.bf16 %v33_v5  ;;  %v42_v61 = vld [vmem:[%s1518_s0 + $0x1c] sm:$0x1]  ;;  %v34_v11 = vld [vmem:[%s1518_s0 + $0x14] sm:$0x1]  ;;  %v43_v18 = vld [vmem:[%s1518_s0 + $0x1d] sm:$0x1] }
  0x1c   :  { %v1193_v6 = vsel %vm142_vm0, %v136_v56, 0.0  ;;  %v1196_v7 = vsel %vm142_vm0, %v128_v57, 0.0  ;;  %v185_v56 = vsel %vm142_vm0, %v92_v50, 0.0  ;;  %v161_v57 = vsel %vm142_vm0, %v84_v51, 0.0  ;;  %v35_v19 = vld [vmem:[%s1518_s0 + $0x15] sm:$0x1] }
  0x1d   :  { %195 = vadd.xlane.f32.xlu1 %v1049_v48  ;;  %192 = vadd.xlane.f32.xlu0 %v1052_v49  ;;  %v1205_v48 = vsel %vm142_vm0, %v125_v0, 0.0  ;;  %v1208_v49 = vsel %vm142_vm0, %v117_v1, 0.0  ;;  %v1267_v50 = vsel %vm142_vm0, %v141_v44, 0.0  ;;  %v1270_v41 = vsel %vm142_vm0, %v133_v45, 0.0 }
  0x1e   :  { %v221_v51 = vsel %vm142_vm0, %v104_v60, 0.0  ;;  %v93_v0 = vunpack.c.l.bf16 %v29_v58  ;;  %v85_v1 = vunpack.c.l.bf16 %v21_v40  ;;  %v224_v12 = vsel %vm142_vm0, %v105_v10, 0.0 }
  0x1f   :  { %v200_v13 = vsel %vm142_vm0, %v97_v47, 0.0  ;;  %v106_v16 = vunpack.c.l.bf16 %v42_v61  ;;  %v98_v17 = vunpack.c.l.bf16 %v34_v11  ;;  %v107_v28 = vunpack.c.l.bf16 %v43_v18 }
  0x20   :  { %v188_v46 = vsel %vm142_vm0, %v93_v0, 0.0  ;;  %v164_v60 = vsel %vm142_vm0, %v85_v1, 0.0  ;;  %v99_v29 = vunpack.c.l.bf16 %v35_v19  ;;  %vm740_vm4 = vcmask 1043459  }
  0x21   :  { %219 = vadd.xlane.f32.xlu1 %v1063_v54  ;;  %216 = vadd.xlane.f32.xlu0 %v1066_v55  ;;  %v1255_v54 = vsel %vm142_vm0, %v140_v34, 0.0  ;;  %v1258_v55 = vsel %vm142_vm0, %v132_v35, 0.0  ;;  %v227_v24 = vsel %vm142_vm0, %v106_v16, 0.0  ;;  %v203_v25 = vsel %vm142_vm0, %v98_v17, 0.0  ;;  %v47_v34 = vld [vmem:[%s1518_s0 + $0x21] sm:$0x1] }
  0x22   :  { %v46_v35 = vld [vmem:[%s1518_s0 + $0x20] sm:$0x1]  ;;  %v230_v36 = vsel %vm142_vm0, %v107_v28, 0.0  ;;  %v206_v37 = vsel %vm142_vm0, %v99_v29, 0.0  ;;  %v111_v44 = vunpack.c.l.bf16 %v47_v34  ;;  %vm742_vm5 = vcmask 1044484  }
  0x23   :  { %v110_v45 = vunpack.c.l.bf16 %v46_v35  ;;  %vm744_vm6 = vcmask 1045509   ;;  %vm746_vm7 = vcmask 1046534   ;;  %vm748_vm8 = vcmask 1047559  }
  0x24   :  { %v242_v58 = vsel %vm142_vm0, %v111_v44, 0.0  ;;  %vm891_vm9 = vcmask 9216   ;;  %vm889_vm10 = vcmask 15360  }
  0x25   :  { %186 = vadd.xlane.f32.xlu1 %v185_v56  ;;  %162 = vadd.xlane.f32.xlu0 %v161_v57  ;;  %v55_v56 = vld [vmem:[%s1518_s0 + $0x29] sm:$0x1]  ;;  %v54_v57 = vld [vmem:[%s1518_s0 + $0x28] sm:$0x1]  ;;  %v239_v40 = vsel %vm142_vm0, %v110_v45, 0.0 }
  0x29   :  { %222 = vadd.xlane.f32.xlu1 %v221_v51  ;;  %198 = vadd.xlane.f32.xlu0 %v197_v59  ;;  %v119_v51 = vunpack.c.l.bf16 %v55_v56  ;;  %v118_v59 = vunpack.c.l.bf16 %v54_v57 }
  0x2b   :  { %v266_v0 = vsel %vm142_vm0, %v119_v51, 0.0  ;;  %v263_v1 = vsel %vm142_vm0, %v118_v59, 0.0 }
  0x2d   :  { %189 = vadd.xlane.f32.xlu1 %v188_v46  ;;  %165 = vadd.xlane.f32.xlu0 %v164_v60 }
  0x31   :  { %225 = vadd.xlane.f32.xlu1 %v224_v12  ;;  %201 = vadd.xlane.f32.xlu0 %v200_v13 }
  0x35   :  { %228 = vadd.xlane.f32.xlu1 %v227_v24  ;;  %204 = vadd.xlane.f32.xlu0 %v203_v25 }
  0x39   :  { %231 = vadd.xlane.f32.xlu1 %v230_v36  ;;  %207 = vadd.xlane.f32.xlu0 %v206_v37 }
  0x3d   :  { %243 = vadd.xlane.f32.xlu1 %v242_v58  ;;  %240 = vadd.xlane.f32.xlu0 %v239_v40 }
  0x41   :  { %267 = vadd.xlane.f32.xlu1 %v266_v0  ;;  %264 = vadd.xlane.f32.xlu0 %v263_v1 }
  0x45   :  { %234 = vadd.xlane.f32.xlu1 %v1083_v2  ;;  %210 = vadd.xlane.f32.xlu0 %v1086_v3 }
  0x49   :  { %270 = vadd.xlane.f32.xlu1 %v1095_v8  ;;  %246 = vadd.xlane.f32.xlu0 %v1098_v9 }
  0x4d   :  { %237 = vadd.xlane.f32.xlu1 %v1107_v14  ;;  %213 = vadd.xlane.f32.xlu0 %v1110_v15  ;;  %v400_v14 = vld [vmem:[%s1519_s1] sm:$0xff] }
  0x4e   :  { %925 = vmatprep.mubr.msk.f32.mxu0 %vm807_vm1, %v400_v14 }
  0x51   :  { %273 = vadd.xlane.f32.xlu1 %v1119_v20  ;;  %249 = vadd.xlane.f32.xlu0 %v1122_v21  ;;  %v947_v21 = vmov 0  }
  0x52   :  { %946 = vset.pattern.permute.xlu1 %v947_v21  ;;  %945 = vset.pattern.permute.xlu0 %v947_v21 }
  0x55   :  { %276 = vadd.xlane.f32.xlu1 %v1131_v26  ;;  %252 = vadd.xlane.f32.xlu0 %v1134_v27  ;;  %v403_v26 = vld [vmem:[%s1520_s2 + $0x8] sm:$0x3]  ;;  %v402_v27 = vld [vmem:[%s1520_s2] sm:$0xff] }
  0x59   :  { %279 = vadd.xlane.f32.xlu1 %v1143_v32  ;;  %255 = vadd.xlane.f32.xlu0 %v1146_v33 }
  0x5d   :  { %291 = vadd.xlane.f32.xlu1 %v1155_v38  ;;  %288 = vadd.xlane.f32.xlu0 %v1158_v39 }
  0x61   :  { %315 = vadd.xlane.f32.xlu1 %v1167_v52  ;;  %312 = vadd.xlane.f32.xlu0 %v1170_v53 }
  0x65   :  { %282 = vadd.xlane.f32.xlu1 %v1179_v62  ;;  %258 = vadd.xlane.f32.xlu0 %v1182_v63  ;;  %v478_v62 = vlaneseq }
  0x69   :  { %318 = vadd.xlane.f32.xlu1 %v1193_v6  ;;  %294 = vadd.xlane.f32.xlu0 %v1196_v7  ;;  %v479_v7 = vand.u32 127, %v478_v62 }
  0x6d   :  { %285 = vadd.xlane.f32.xlu1 %v1205_v48  ;;  %261 = vadd.xlane.f32.xlu0 %v1208_v49  ;;  %v481_v48 = vshrl.u32 %v478_v62, 7 }
  0x71   :  { %321 = vadd.xlane.f32.xlu1 %v1217_v22  ;;  %297 = vadd.xlane.f32.xlu0 %v1220_v23  ;;  %v1370_v23 = vsub.s32 %v479_v7, %v481_v48 }
  0x75   :  { %324 = vadd.xlane.f32.xlu1 %v1229_v30  ;;  %300 = vadd.xlane.f32.xlu0 %v1232_v31 }
  0x79   :  { %327 = vadd.xlane.f32.xlu1 %v1243_v42  ;;  %303 = vadd.xlane.f32.xlu0 %v1246_v43 }
  0x7d   :  { %330 = vadd.xlane.f32.xlu1 %v1255_v54  ;;  %306 = vadd.xlane.f32.xlu0 %v1258_v55 }
  0x81   :  { %333 = vadd.xlane.f32.xlu1 %v1267_v50  ;;  %309 = vadd.xlane.f32.xlu0 %v1270_v41 }
  0x92   :  { %v169_v2 = vpop.xlane.xlu1 %168  ;;  %v145_v3 = vpop.xlane.xlu0 %144  ;;  %411 = vperm.xlu1 %946, %v403_v26  }
  0x93   :  { %v344_v50 = vmul.f32 0.0625, %v169_v2  ;;  %v336_v41 = vmul.f32 0.0625, %v145_v3 }
  0x95   :  { %v515_v24 = vrot.slane %v344_v50, %v1370_v23  ;;  %v483_v25 = vrot.slane %v336_v41, %v1370_v23 }
  0x96   :  { %v172_v8 = vpop.xlane.xlu1 %171  ;;  %v148_v9 = vpop.xlane.xlu0 %147 }
  0x97   :  { %406 = vperm.xlu0 %945, %v402_v27   ;;  %v345_v30 = vmul.f32 0.0625, %v172_v8  ;;  %v337_v31 = vmul.f32 0.0625, %v148_v9 }
  0x99   :  { %v519_v10 = vrot.slane %v345_v30, %v1370_v23  ;;  %v487_v47 = vrot.slane %v337_v31, %v1370_v23 }
  0x9a   :  { %v175_v15 = vpop.xlane.xlu1 %174  ;;  %v151_v20 = vpop.xlane.xlu0 %150 }
  0x9b   :  { %v346_v42 = vmul.f32 0.0625, %v175_v15  ;;  %v338_v43 = vmul.f32 0.0625, %v151_v20  ;;  %v750_v36 = vsel %vm736_vm2, %v519_v10, %v515_v24  ;;  %v737_v37 = vsel %vm736_vm2, %v487_v47, %v483_v25 }
  0x9d   :  { %v523_v12 = vrot.slane %v346_v42, %v1370_v23  ;;  %v491_v13 = vrot.slane %v338_v43, %v1370_v23 }
  0x9e   :  { %v178_v32 = vpop.xlane.xlu1 %177  ;;  %v154_v33 = vpop.xlane.xlu0 %153 }
  0x9f   :  { %v347_v4 = vmul.f32 0.0625, %v178_v32  ;;  %v339_v5 = vmul.f32 0.0625, %v154_v33  ;;  %v751_v56 = vsel %vm738_vm3, %v523_v12, %v750_v36  ;;  %v739_v57 = vsel %vm738_vm3, %v491_v13, %v737_v37 }
  0xa1   :  { %v527_v28 = vrot.slane %v347_v4, %v1370_v23  ;;  %v495_v29 = vrot.slane %v339_v5, %v1370_v23 }
  0xa2   :  { %v181_v38 = vpop.xlane.xlu1 %180  ;;  %v157_v39 = vpop.xlane.xlu0 %156 }
  0xa3   :  { %v348_v46 = vmul.f32 0.0625, %v181_v38  ;;  %v340_v60 = vmul.f32 0.0625, %v157_v39  ;;  %v752_v0 = vsel %vm740_vm4, %v527_v28, %v751_v56  ;;  %v741_v1 = vsel %vm740_vm4, %v495_v29, %v739_v57 }
  0xa5   :  { %v531_v34 = vrot.slane %v348_v46, %v1370_v23  ;;  %v499_v35 = vrot.slane %v340_v60, %v1370_v23 }
  0xa6   :  { %v184_v52 = vpop.xlane.xlu1 %183  ;;  %v160_v53 = vpop.xlane.xlu0 %159 }
  0xa7   :  { %v349_v61 = vmul.f32 0.0625, %v184_v52  ;;  %v341_v11 = vmul.f32 0.0625, %v160_v53  ;;  %v753_v8 = vsel %vm742_vm5, %v531_v34, %v752_v0  ;;  %v743_v9 = vsel %vm742_vm5, %v499_v35, %v741_v1 }
  0xa9   :  { %v535_v44 = vrot.slane %v349_v61, %v1370_v23  ;;  %v503_v45 = vrot.slane %v341_v11, %v1370_v23 }
  0xaa   :  { %v1362_v63 = vpop.xlane.xlu1 %195  ;;  %v1364_v6 = vpop.xlane.xlu0 %192 }
  0xab   :  { %v745_v20 = vsel %vm744_vm6, %v503_v45, %v743_v9  ;;  %v754_v21 = vsel %vm744_vm6, %v535_v44, %v753_v8 }
  0xae   :  { %v1366_v49 = vpop.xlane.xlu1 %219  ;;  %v1368_v22 = vpop.xlane.xlu0 %216 }
  0xaf   :  { %v361_v50 = vmul.f32 0.0625, %v1366_v49  ;;  %v360_v41 = vmul.f32 0.0625, %v1368_v22 }
  0xb2   :  { %v187_v54 = vpop.xlane.xlu1 %186  ;;  %v163_v55 = vpop.xlane.xlu0 %162 }
  0xb3   :  { %v350_v16 = vmul.f32 0.0625, %v187_v54  ;;  %v342_v17 = vmul.f32 0.0625, %v163_v55  ;;  %v353_v54 = vmul.f32 0.0625, %v1362_v63  ;;  %v352_v55 = vmul.f32 0.0625, %v1364_v6 }
  0xb4   :  { %v583_v63 = vrot.slane %v361_v50, %v1370_v23  ;;  %v579_v6 = vrot.slane %v360_v41, %v1370_v23 }
  0xb5   :  { %v539_v58 = vrot.slane %v350_v16, %v1370_v23  ;;  %v507_v40 = vrot.slane %v342_v17, %v1370_v23  ;;  %v551_v61 = vrot.slane %v353_v54, %v1370_v23  ;;  %v547_v11 = vrot.slane %v352_v55, %v1370_v23 }
  0xb6   :  { %v223_v18 = vpop.xlane.xlu1 %222  ;;  %v199_v19 = vpop.xlane.xlu0 %198  ;;  %v764_v37 = vsel %vm736_vm2, %v583_v63, %v579_v6 }
  0xb7   :  { %v747_v32 = vsel %vm746_vm7, %v507_v40, %v745_v20  ;;  %v755_v33 = vsel %vm746_vm7, %v539_v58, %v754_v21  ;;  %v362_v4 = vmul.f32 0.0625, %v223_v18  ;;  %v354_v5 = vmul.f32 0.0625, %v199_v19 }
  0xb8   :  { %v757_v36 = vsel %vm736_vm2, %v551_v61, %v547_v11 }
  0xb9   :  { %v587_v22 = vrot.slane %v362_v4, %v1370_v23  ;;  %v555_v17 = vrot.slane %v354_v5, %v1370_v23 }
  0xba   :  { %v190_v51 = vpop.xlane.xlu1 %189  ;;  %v166_v59 = vpop.xlane.xlu0 %165 }
  0xbb   :  { %v351_v2 = vmul.f32 0.0625, %v190_v51  ;;  %v343_v3 = vmul.f32 0.0625, %v166_v59  ;;  %v765_v56 = vsel %vm738_vm3, %v587_v22, %v764_v37  ;;  %v758_v57 = vsel %vm738_vm3, %v555_v17, %v757_v36 }
  0xbd   :  { %v543_v14 = vrot.slane %v351_v2, %v1370_v23  ;;  %v511_v15 = vrot.slane %v343_v3, %v1370_v23 }
  0xbe   :  { %v226_v26 = vpop.xlane.xlu1 %225  ;;  %v202_v27 = vpop.xlane.xlu0 %201 }
  0xbf   :  { %v749_v38 = vsel %vm748_vm8, %v511_v15, %v747_v32  ;;  %v756_v39 = vsel %vm748_vm8, %v543_v14, %v755_v33  ;;  %v363_v10 = vmul.f32 0.0625, %v226_v26  ;;  %v355_v47 = vmul.f32 0.0625, %v202_v27 }
  0xc0   :  { %v928_v52 = vpack.c.bf16 %v756_v39, %v749_v38 }
  0xc1   :  { %v591_v28 = vrot.slane %v363_v10, %v1370_v23  ;;  %v559_v29 = vrot.slane %v355_v47, %v1370_v23 }
  0xc2   :  { %v229_v53 = vpop.xlane.xlu1 %228  ;;  %929 = vmatprep.subr.bf16.mxu0 %v928_v52  ;;  %v205_v62 = vpop.xlane.xlu0 %204 }
  0xc3   :  { %931 = vmatpush3.bf16.msra.mxu0 %v928_v52  ;;  %v364_v12 = vmul.f32 0.0625, %v229_v53  ;;  %v356_v13 = vmul.f32 0.0625, %v205_v62  ;;  %v766_v0 = vsel %vm740_vm4, %v591_v28, %v765_v56  ;;  %v759_v1 = vsel %vm740_vm4, %v559_v29, %v758_v57 }
  0xc5   :  { %v595_v34 = vrot.slane %v364_v12, %v1370_v23  ;;  %v563_v35 = vrot.slane %v356_v13, %v1370_v23 }
  0xc6   :  { %v232_v7 = vpop.xlane.xlu1 %231  ;;  %v208_v48 = vpop.xlane.xlu0 %207 }
  0xc7   :  { %v365_v16 = vmul.f32 0.0625, %v232_v7  ;;  %v357_v49 = vmul.f32 0.0625, %v208_v48  ;;  %v767_v8 = vsel %vm742_vm5, %v595_v34, %v766_v0  ;;  %v760_v9 = vsel %vm742_vm5, %v563_v35, %v759_v1 }
  0xc9   :  { %v599_v44 = vrot.slane %v365_v16, %v1370_v23  ;;  %v567_v45 = vrot.slane %v357_v49, %v1370_v23 }
  0xca   :  { %v1402_v30 = vpop.xlane.xlu1 %243  ;;  %v1404_v31 = vpop.xlane.xlu0 %240 }
  0xcb   :  { %v768_v14 = vsel %vm744_vm6, %v599_v44, %v767_v8  ;;  %v761_v15 = vsel %vm744_vm6, %v567_v45, %v760_v9  ;;  %v369_v4 = vmul.f32 0.0625, %v1402_v30  ;;  %v368_v5 = vmul.f32 0.0625, %v1404_v31 }
  0xcd   :  { %v615_v63 = vrot.slane %v369_v4, %v1370_v23  ;;  %v611_v6 = vrot.slane %v368_v5, %v1370_v23 }
  0xce   :  { %v1406_v42 = vpop.xlane.xlu1 %267  ;;  %v1408_v43 = vpop.xlane.xlu0 %264 }
  0xcf   :  { %v771_v36 = vsel %vm736_vm2, %v615_v63, %v611_v6 }
  0xd2   :  { %v235_v46 = vpop.xlane.xlu1 %234  ;;  %v211_v60 = vpop.xlane.xlu0 %210 }
  0xd3   :  { %v366_v18 = vmul.f32 0.0625, %v235_v46  ;;  %v358_v19 = vmul.f32 0.0625, %v211_v60  ;;  %v377_v46 = vmul.f32 0.0625, %v1406_v42  ;;  %v376_v60 = vmul.f32 0.0625, %v1408_v43 }
  0xd5   :  { %v603_v58 = vrot.slane %v366_v18, %v1370_v23  ;;  %v571_v40 = vrot.slane %v358_v19, %v1370_v23  ;;  %v647_v30 = vrot.slane %v377_v46, %v1370_v23  ;;  %v643_v31 = vrot.slane %v376_v60, %v1370_v23 }
  0xd6   :  { %v271_v24 = vpop.xlane.xlu1 %270  ;;  %v247_v25 = vpop.xlane.xlu0 %246 }
  0xd7   :  { %v769_v26 = vsel %vm746_vm7, %v603_v58, %v768_v14  ;;  %v762_v27 = vsel %vm746_vm7, %v571_v40, %v761_v15  ;;  %v378_v10 = vmul.f32 0.0625, %v271_v24  ;;  %v370_v47 = vmul.f32 0.0625, %v247_v25 }
  0xd8   :  { %v778_v37 = vsel %vm736_vm2, %v647_v30, %v643_v31 }
  0xd9   :  { %v651_v43 = vrot.slane %v378_v10, %v1370_v23  ;;  %v619_v17 = vrot.slane %v370_v47, %v1370_v23 }
  0xda   :  { %v238_v51 = vpop.xlane.xlu1 %237  ;;  %v214_v59 = vpop.xlane.xlu0 %213 }
  0xdb   :  { %v367_v2 = vmul.f32 0.0625, %v238_v51  ;;  %v359_v3 = vmul.f32 0.0625, %v214_v59  ;;  %v779_v56 = vsel %vm738_vm3, %v651_v43, %v778_v37  ;;  %v772_v57 = vsel %vm738_vm3, %v619_v17, %v771_v36 }
  0xdd   :  { %v607_v20 = vrot.slane %v367_v2, %v1370_v23  ;;  %v575_v21 = vrot.slane %v359_v3, %v1370_v23 }
  0xde   :  { %v274_v32 = vpop.xlane.xlu1 %273  ;;  %v250_v33 = vpop.xlane.xlu0 %249 }
  0xdf   :  { %v763_v38 = vsel %vm748_vm8, %v575_v21, %v762_v27  ;;  %v770_v39 = vsel %vm748_vm8, %v607_v20, %v769_v26  ;;  %v379_v12 = vmul.f32 0.0625, %v274_v32  ;;  %v371_v13 = vmul.f32 0.0625, %v250_v33 }
  0xe0   :  { %v932_v52 = vpack.c.bf16 %v770_v39, %v763_v38 }
  0xe1   :  { %v655_v28 = vrot.slane %v379_v12, %v1370_v23  ;;  %v623_v29 = vrot.slane %v371_v13, %v1370_v23 }
  0xe2   :  { %v277_v53 = vpop.xlane.xlu1 %276  ;;  %933 = vmatprep.subr.bf16.mxu0 %v932_v52  ;;  %v253_v62 = vpop.xlane.xlu0 %252 }
  0xe3   :  { %935 = vmatpush3.bf16.msra.mxu0 %v932_v52  ;;  %v380_v16 = vmul.f32 0.0625, %v277_v53  ;;  %v372_v49 = vmul.f32 0.0625, %v253_v62  ;;  %v780_v0 = vsel %vm740_vm4, %v655_v28, %v779_v56  ;;  %v773_v1 = vsel %vm740_vm4, %v623_v29, %v772_v57 }
  0xe5   :  { %v659_v34 = vrot.slane %v380_v16, %v1370_v23  ;;  %v627_v35 = vrot.slane %v372_v49, %v1370_v23 }
  0xe6   :  { %v280_v7 = vpop.xlane.xlu1 %279  ;;  %v256_v48 = vpop.xlane.xlu0 %255 }
  0xe7   :  { %v381_v22 = vmul.f32 0.0625, %v280_v7  ;;  %v373_v42 = vmul.f32 0.0625, %v256_v48  ;;  %v781_v8 = vsel %vm742_vm5, %v659_v34, %v780_v0  ;;  %v774_v9 = vsel %vm742_vm5, %v627_v35, %v773_v1 }
  0xe9   :  { %v663_v44 = vrot.slane %v381_v22, %v1370_v23  ;;  %v631_v45 = vrot.slane %v373_v42, %v1370_v23 }
  0xea   :  { %v292_v54 = vpop.xlane.xlu1 %291  ;;  %v289_v55 = vpop.xlane.xlu0 %288 }
  0xeb   :  { %v782_v14 = vsel %vm744_vm6, %v663_v44, %v781_v8  ;;  %v775_v15 = vsel %vm744_vm6, %v631_v45, %v774_v9  ;;  %v385_v7 = vmul.f32 0.0625, %v292_v54  ;;  %v384_v48 = vmul.f32 0.0625, %v289_v55 }
  0xed   :  { %v679_v12 = vrot.slane %v385_v7, %v1370_v23  ;;  %v675_v13 = vrot.slane %v384_v48, %v1370_v23 }
  0xee   :  { %v316_v50 = vpop.xlane.xlu1 %315  ;;  %v313_v41 = vpop.xlane.xlu0 %312 }
  0xef   :  { %v393_v4 = vmul.f32 0.0625, %v316_v50  ;;  %v392_v5 = vmul.f32 0.0625, %v313_v41 }
  0xf1   :  { %v711_v16 = vrot.slane %v393_v4, %v1370_v23  ;;  %v707_v49 = vrot.slane %v392_v5, %v1370_v23 }
  0xf2   :  { %v283_v61 = vpop.xlane.xlu1 %282  ;;  %v259_v11 = vpop.xlane.xlu0 %258 }
  0xf3   :  { %v382_v18 = vmul.f32 0.0625, %v283_v61  ;;  %v374_v19 = vmul.f32 0.0625, %v259_v11 }
  0xf5   :  { %v667_v58 = vrot.slane %v382_v18, %v1370_v23  ;;  %v635_v40 = vrot.slane %v374_v19, %v1370_v23 }
  0xf6   :  { %v319_v24 = vpop.xlane.xlu1 %318  ;;  %v295_v25 = vpop.xlane.xlu0 %294 }
  0xf7   :  { %v783_v26 = vsel %vm746_vm7, %v667_v58, %v782_v14  ;;  %v776_v27 = vsel %vm746_vm7, %v635_v40, %v775_v15  ;;  %v394_v46 = vmul.f32 0.0625, %v319_v24  ;;  %v386_v60 = vmul.f32 0.0625, %v295_v25 }
  0xf8   :  { %v785_v24 = vsel %vm736_vm2, %v679_v12, %v675_v13  ;;  %v792_v25 = vsel %vm736_vm2, %v711_v16, %v707_v49 }
  0xf9   :  { %v715_v50 = vrot.slane %v394_v46, %v1370_v23  ;;  %v683_v41 = vrot.slane %v386_v60, %v1370_v23 }
  0xfa   :  { %v286_v51 = vpop.xlane.xlu1 %285  ;;  %v262_v59 = vpop.xlane.xlu0 %261 }
  0xfb   :  { %v383_v2 = vmul.f32 0.0625, %v286_v51  ;;  %v375_v3 = vmul.f32 0.0625, %v262_v59  ;;  %v793_v34 = vsel %vm738_vm3, %v715_v50, %v792_v25  ;;  %v786_v35 = vsel %vm738_vm3, %v683_v41, %v785_v24 }
  0xfd   :  { %v671_v20 = vrot.slane %v383_v2, %v1370_v23  ;;  %v639_v21 = vrot.slane %v375_v3, %v1370_v23 }
  0xfe   :  { %v322_v32 = vpop.xlane.xlu1 %321  ;;  %v298_v33 = vpop.xlane.xlu0 %297 }
  0xff   :  { %v777_v38 = vsel %vm748_vm8, %v639_v21, %v776_v27  ;;  %v784_v39 = vsel %vm748_vm8, %v671_v20, %v783_v26  ;;  %v395_v61 = vmul.f32 0.0625, %v322_v32  ;;  %v387_v11 = vmul.f32 0.0625, %v298_v33  ;;  %v401_v21 = vld [vmem:[%s1519_s1 + $0x8] sm:$0x3] }
 0x100   :  { %v936_v52 = vpack.c.bf16 %v784_v39, %v777_v38 }
 0x101   :  { %v719_v22 = vrot.slane %v395_v61, %v1370_v23  ;;  %v687_v42 = vrot.slane %v387_v11, %v1370_v23 }
 0x102   :  { %v325_v53 = vpop.xlane.xlu1 %324  ;;  %937 = vmatprep.subr.bf16.mxu0 %v936_v52  ;;  %v301_v62 = vpop.xlane.xlu0 %300 }
 0x103   :  { %939 = vmatpush3.bf16.msra.mxu0 %v936_v52  ;;  %v396_v63 = vmul.f32 0.0625, %v325_v53  ;;  %v388_v6 = vmul.f32 0.0625, %v301_v62  ;;  %v794_v56 = vsel %vm740_vm4, %v719_v22, %v793_v34  ;;  %v787_v57 = vsel %vm740_vm4, %v687_v42, %v786_v35 }
 0x105   :  { %v723_v18 = vrot.slane %v396_v63, %v1370_v23  ;;  %v691_v19 = vrot.slane %v388_v6, %v1370_v23 }
 0x106   :  { %v328_v10 = vpop.xlane.xlu1 %327  ;;  %v304_v47 = vpop.xlane.xlu0 %303 }
 0x107   :  { %v397_v54 = vmul.f32 0.0625, %v328_v10  ;;  %v389_v55 = vmul.f32 0.0625, %v304_v47  ;;  %v795_v51 = vsel %vm742_vm5, %v723_v18, %v794_v56  ;;  %v788_v59 = vsel %vm742_vm5, %v691_v19, %v787_v57 }
 0x109   :  { %v727_v28 = vrot.slane %v397_v54, %v1370_v23  ;;  %v695_v29 = vrot.slane %v389_v55, %v1370_v23 }
 0x10a   :  { %v331_v30 = vpop.xlane.xlu1 %330  ;;  %v307_v31 = vpop.xlane.xlu0 %306 }
 0x10b   :  { %v398_v43 = vmul.f32 0.0625, %v331_v30  ;;  %v390_v17 = vmul.f32 0.0625, %v307_v31  ;;  %v796_v0 = vsel %vm744_vm6, %v727_v28, %v795_v51  ;;  %v789_v1 = vsel %vm744_vm6, %v695_v29, %v788_v59 }
 0x10d   :  { %v731_v36 = vrot.slane %v398_v43, %v1370_v23  ;;  %v699_v37 = vrot.slane %v390_v17, %v1370_v23 }
 0x10e   :  { %v334_v44 = vpop.xlane.xlu1 %333  ;;  %v310_v45 = vpop.xlane.xlu0 %309 }
 0x10f   :  { %v399_v58 = vmul.f32 0.0625, %v334_v44  ;;  %v391_v40 = vmul.f32 0.0625, %v310_v45  ;;  %v797_v8 = vsel %vm746_vm7, %v731_v36, %v796_v0  ;;  %v790_v9 = vsel %vm746_vm7, %v699_v37, %v789_v1 }
 0x111   :  { %v735_v2 = vrot.slane %v399_v58, %v1370_v23  ;;  %v703_v3 = vrot.slane %v391_v40, %v1370_v23 }
 0x112   :  { %v412_v26 = vpop.permute.xlu1 %411 }
 0x113   :  { %v791_v14 = vsel %vm748_vm8, %v703_v3, %v790_v9  ;;  %v798_v15 = vsel %vm748_vm8, %v735_v2, %v797_v8 }
 0x114   :  { %v940_v20 = vpack.c.bf16 %v798_v15, %v791_v14 }
 0x116   :  { %941 = vmatprep.subr.bf16.mxu0 %v940_v20  ;;  %v407_v27 = vpop.permute.xlu0 %406 }
 0x117   :  { %943 = vmatpush3.bf16.msra.mxu0 %v940_v20 }
 0x11a   :  { %926 = vmatmul.mubr.msk.f32.vlgmr.msra.gmra.mrb[0].mxu0 %vm807_vm1, %v401_v21 }
 0x1ed   :  { %v927_v23 = vpop.f32.mrb[0].mxu0 }
 0x1ee   :  { %v886_v32 = vadd.f32 %v927_v23, %v412_v26  ;;  %v880_v33 = vpop.f32.mrb[1].mxu0 }
 0x1ef   :  { %v881_v38 = vadd.f32 %v880_v33, %v407_v27 }
 0x1f0   :  { %892 = vst.msk [vmem:[%s1521_s3 + $0x8] sm:$0x3] %vm891_vm9, %v886_v32 }
 0x1f1   :  { %890 = vst.msk [vmem:[%s1521_s3] sm:$0xff] %vm889_vm10, %v881_v38 }

// kernel: scaled_resnet_forward.12
= control target key start
LH: loop header
LB: loop body
LE: loop exit
PB: predicated region body
PF: predicated region fallthrough
CT: control target
= control target key end

     0   :  { %vm263_vm0 = vcmask 261120   ;;  %vm420_vm1 = vcmask 588800   ;;  %vm677_vm2 = vcmask 703488   ;;  %vm702_vm3 = vcmask 646200   ;;  %s3200_s22 = smov 122   ;;  %s3201_s23 = smov 121   ;;  %s4121_s0 = inlined_call_operand.vmem [shape: bf16[288,72], index: 0, kind: input, shape index: {}]   ;;  %s4122_s1 = inlined_call_operand.vmem [shape: bf16[64,288], index: 1, kind: input, shape index: {}]   ;;  %s4123_s11 = inlined_call_operand.vmem [shape: f32[1,72], index: 11, kind: input, shape index: {}]   ;;  %s4124_s2 = inlined_call_operand.vmem [shape: f32[64,1], index: 2, kind: input, shape index: {}]   ;;  %s4125_s3 = inlined_call_operand.vmem [shape: f32[64,1], index: 3, kind: input, shape index: {}]   ;;  %s4126_s8 = inlined_call_operand.vmem [shape: bf16[9,64,64], index: 8, kind: input, shape index: {}]   ;;  %s4127_s4 = inlined_call_operand.vmem [shape: bf16[32,72], index: 4, kind: input, shape index: {}]   ;;  %s4128_s5 = inlined_call_operand.vmem [shape: bf16[64,32], index: 5, kind: input, shape index: {}]   ;;  %s4129_s6 = inlined_call_operand.vmem [shape: f32[64,1], index: 6, kind: input, shape index: {}]   ;;  %s4130_s7 = inlined_call_operand.vmem [shape: f32[64,1], index: 7, kind: input, shape index: {}]   ;;  %s4131_s9 = inlined_call_operand.vmem [shape: f32[64,1], index: 9, kind: input, shape index: {}]   ;;  %s4132_s10 = inlined_call_operand.vmem [shape: f32[64,1], index: 10, kind: input, shape index: {}]   ;;  %s4133_s12 = inlined_call_operand.vmem [shape: bf16[64,72], index: 12, kind: output, shape index: {}]  }
   0x1   :  { %v3072_v0 = vld [vmem:[%s4121_s0 + $0x40] sm:$0xff]   ;;  %v3074_v2 = vld [vmem:[%s4121_s0 + $0x48] sm:$0xff]   ;;  %v3076_v4 = vld [vmem:[%s4121_s0 + $0x50] sm:$0xff]   ;;  %vm764_vm4 = vcmask 523264   ;;  %s3202_s24 = smov 120   ;;  %s3203_s25 = smov 116  }
   0x2   :  { %v3073_v1 = vld [vmem:[%s4121_s0] sm:$0xff]   ;;  %2704 = vmatprep.subr.bf16.mxu0 %v3072_v0  ;;  %v3075_v3 = vld [vmem:[%s4121_s0 + $0x8] sm:$0xff]   ;;  %v3077_v5 = vld [vmem:[%s4121_s0 + $0x10] sm:$0xff]   ;;  %s3205_s28 = smov 115   ;;  %s3206_s29 = smov 114   ;;  %vm2494_vm5 = vcmask 584704  }
   0x3   :  { %2705 = vmatpush3.bf16.msra.mxu0 %v3073_v1  ;;  %v3078_v6 = vld [vmem:[%s4121_s0 + $0x58] sm:$0xff]   ;;  %v3080_v8 = vld [vmem:[%s4121_s0 + $0x60] sm:$0xff]   ;;  %v3082_v10 = vld [vmem:[%s4121_s0 + $0x68] sm:$0xff]  }
   0x4   :  { %2706 = vmatprep.subr.bf16.mxu0 %v3074_v2  ;;  %v3079_v7 = vld [vmem:[%s4121_s0 + $0x18] sm:$0xff]   ;;  %v3081_v9 = vld [vmem:[%s4121_s0 + $0x20] sm:$0xff]   ;;  %v3083_v12 = vld [vmem:[%s4121_s0 + $0x28] sm:$0xff]  }
   0x5   :  { %v3090_v11 = vld [vmem:[%s4122_s1 + $0x4] ss:$12 sps:$4 sm:$0xff]   ;;  %v3086_v15 = vld [vmem:[%s4121_s0 + $0x78] sm:$0xff]   ;;  %v3088_v18 = vld [vmem:[%s4122_s1] ss:$12 sps:$4 sm:$0xff]  }
   0x6   :  { %308 = vmatprep.mubr.bf16.mxu0 %v3090_v11  ;;  %v3084_v13 = vld [vmem:[%s4121_s0 + $0x70] sm:$0xff]   ;;  %v3087_v16 = vld [vmem:[%s4121_s0 + $0x38] sm:$0xff]   ;;  %v3091_v17 = vld [vmem:[%s4121_s0 + $0x80] sm:$0xff]  }
   0x7   :  { %2707 = vmatpush3.bf16.msra.mxu0 %v3075_v3  ;;  %v3085_v14 = vld [vmem:[%s4121_s0 + $0x30] sm:$0xff]   ;;  %v3092_v19 = vld [vmem:[%s4122_s1 + $0x1c] ss:$12 sps:$4 sm:$0xff]   ;;  %v3094_v21 = vld [vmem:[%s4122_s1 + $0x18] ss:$12 sps:$4 sm:$0xff]  }
   0x8   :  { %2708 = vmatprep.subr.bf16.mxu0 %v3076_v4  ;;  %v3098_v20 = vld [vmem:[%s4121_s0 + $0x88] sm:$0xff]   ;;  %v3095_v22 = vld [vmem:[%s4122_s1 + $0x34] ss:$12 sps:$4 sm:$0xff]   ;;  %v3097_v23 = vld [vmem:[%s4122_s1 + $0x30] ss:$12 sps:$4 sm:$0xff]  }
   0x9   :  { %v3099_v24 = vld [vmem:[%s4122_s1 + $0x4c] ss:$12 sps:$4 sm:$0xff]   ;;  %v3101_v25 = vld [vmem:[%s4122_s1 + $0x48] ss:$12 sps:$4 sm:$0xff]   ;;  %v3105_v29 = vld [vmem:[%s4122_s1 + $0x50] ss:$12 sps:$4 sm:$0xff]  }
   0xa   :  { %v3102_v26 = vld [vmem:[%s4122_s1 + $0x8] ss:$12 sps:$4 sm:$0xff]   ;;  %v3103_v27 = vld [vmem:[%s4122_s1 + $0x20] ss:$12 sps:$4 sm:$0xff]   ;;  %v3104_v28 = vld [vmem:[%s4122_s1 + $0x38] ss:$12 sps:$4 sm:$0xff]  }
   0xb   :  { %2709 = vmatpush3.bf16.msra.mxu0 %v3077_v5  ;;  %v3369_v55 = vld [vmem:[%s4123_s11] ss:$0 sm:$0xff]  ;;  %s3204_s1 = smov 127  }
   0xc   :  { %2710 = vmatprep.subr.bf16.mxu0 %v3078_v6 }
   0xf   :  { %2711 = vmatpush3.bf16.msra.mxu0 %v3079_v7 }
  0x10   :  { %2712 = vmatprep.subr.bf16.mxu0 %v3080_v8 }
  0x13   :  { %2713 = vmatpush3.bf16.msra.mxu0 %v3081_v9 }
  0x14   :  { %2714 = vmatprep.subr.bf16.mxu0 %v3082_v10 }
  0x17   :  { %2715 = vmatpush3.bf16.msra.mxu0 %v3083_v12 }
  0x18   :  { %2716 = vmatprep.subr.bf16.mxu0 %v3084_v13 }
  0x1b   :  { %2717 = vmatpush3.bf16.msra.mxu0 %v3085_v14 }
  0x1c   :  { %2718 = vmatprep.subr.bf16.mxu0 %v3086_v15 }
  0x1f   :  { %2719 = vmatpush3.bf16.msra.mxu0 %v3087_v16 }
  0x20   :  { %2828 = vmatprep.subr.bf16.mxu0 %v3091_v17 }
  0x22   :  { %309 = vmatmul.mubr.bf16.vlgmr.msra.gmra.mrb[0].mxu0 %v3088_v18 }
  0x23   :  { %2829 = vmatpush3.bf16.msra.mxu0 %v3091_v17  ;;  %316 = vmatprep.mubr.bf16.mxu0 %v3092_v19 }
  0x24   :  { %2830 = vmatprep.subr.bf16.mxu0 %v3098_v20 }
  0x27   :  { %2831 = vmatpush3.bf16.msra.mxu0 %v3098_v20 }
  0x2a   :  { %317 = vmatmul.mubr.bf16.gmra.mrb[4].mxu0 %v3094_v21 }
  0x2b   :  { %324 = vmatprep.mubr.bf16.mxu0 %v3095_v22 }
  0x32   :  { %325 = vmatmul.mubr.bf16.gmra.mrb[8].mxu0 %v3097_v23 }
  0x33   :  { %332 = vmatprep.mubr.bf16.mxu0 %v3099_v24 }
  0x3a   :  { %333 = vmatmul.mubr.bf16.gmra.mrb[12].mxu0 %v3101_v25 }
  0x3b   :  { %2832 = vmatprep.mubr.msk.bf16.mxu0 %vm263_vm0, %v3102_v26 }
  0x42   :  { %2833 = vmatmul.mubr.msk.bf16.vlgmr.msra.gmra.mrb[16].mxu0 %vm263_vm0, %v3103_v27 }
  0x43   :  { %2836 = vmatprep.mubr.msk.bf16.mxu0 %vm263_vm0, %v3104_v28 }
  0x4a   :  { %2837 = vmatmul.mubr.msk.bf16.gmra.mrb[20].mxu0 %vm263_vm0, %v3105_v29 }
  0xf5   :  { %v2720_v30 = vpop.f32.mrb[0].mxu0 }
  0xf6   :  { %v2721_v31 = vpop.f32.mrb[1].mxu0 }
  0xf7   :  { %v2722_v32 = vadd.f32 %v2721_v31, %v2720_v30  ;;  %v2723_v33 = vpop.f32.mrb[2].mxu0 }
  0xf8   :  { %v2724_v34 = vpop.f32.mrb[3].mxu0 }
  0xf9   :  { %v2725_v35 = vadd.f32 %v2724_v34, %v2723_v33 }
  0xfd   :  { %v2726_v36 = vpop.f32.mrb[4].mxu0 }
  0xfe   :  { %v2727_v37 = vpop.f32.mrb[5].mxu0 }
  0xff   :  { %v2728_v38 = vadd.f32 %v2727_v37, %v2726_v36  ;;  %v2729_v39 = vpop.f32.mrb[6].mxu0 }
 0x100   :  { %v2730_v40 = vpop.f32.mrb[7].mxu0 }
 0x101   :  { %v2731_v41 = vadd.f32 %v2730_v40, %v2729_v39 }
 0x105   :  { %v2732_v42 = vpop.f32.mrb[8].mxu0 }
 0x106   :  { %v2733_v43 = vpop.f32.mrb[9].mxu0 }
 0x107   :  { %v2734_v44 = vadd.f32 %v2733_v43, %v2732_v42  ;;  %v2735_v45 = vpop.f32.mrb[10].mxu0 }
 0x108   :  { %v2736_v46 = vpop.f32.mrb[11].mxu0 }
 0x109   :  { %v2737_v47 = vadd.f32 %v2736_v46, %v2735_v45 }
 0x10d   :  { %v2738_v48 = vpop.f32.mrb[12].mxu0 }
 0x10e   :  { %v2739_v49 = vpop.f32.mrb[13].mxu0 }
 0x10f   :  { %v2740_v50 = vadd.f32 %v2739_v49, %v2738_v48  ;;  %v2741_v51 = vpop.f32.mrb[14].mxu0 }
 0x110   :  { %v2742_v52 = vpop.f32.mrb[15].mxu0 }
 0x111   :  { %v2743_v53 = vadd.f32 %v2742_v52, %v2741_v51 }
 0x115   :  { %v2834_v54 = vpop.f32.mrb[16].mxu0 }
 0x116   :  { %v3371_v56 = vadd.f32 %v2834_v54, %v2728_v38  ;;  %v375_v57 = vpop.f32.mrb[17].mxu0 }
 0x117   :  { %v3373_v58 = vadd.f32 %v2722_v32, %v375_v57  ;;  %v2835_v59 = vpop.f32.mrb[18].mxu0 }
 0x118   :  { %v3375_v60 = vadd.f32 %v2835_v59, %v2731_v41  ;;  %v378_v61 = vpop.f32.mrb[19].mxu0  ;;  %v414_v62 = vmul.f32 %v3369_v55, %v3371_v56 }
 0x119   :  { %v3379_v63 = vadd.f32 %v2725_v35, %v378_v61  ;;  %v412_v0 = vmul.f32 %v3369_v55, %v3373_v58 }
 0x11a   :  { %v427_v1 = vsel %vm420_vm1, %v414_v62, 0.0  ;;  %v415_v2 = vmul.f32 %v3369_v55, %v3375_v60 }
 0x11b   :  { %428 = vadd.xlane.f32.xlu1 %v427_v1  ;;  %v421_v3 = vsel %vm420_vm1, %v412_v0, 0.0  ;;  %v413_v4 = vmul.f32 %v3369_v55, %v3379_v63 }
 0x11c   :  { %422 = vadd.xlane.f32.xlu0 %v421_v3  ;;  %v430_v8 = vsel %vm420_vm1, %v415_v2, 0.0 }
 0x11d   :  { %v2838_v5 = vpop.f32.mrb[20].mxu0  ;;  %v424_v11 = vsel %vm420_vm1, %v413_v4, 0.0 }
 0x11e   :  { %v3389_v6 = vadd.f32 %v2838_v5, %v2740_v50  ;;  %v391_v7 = vpop.f32.mrb[21].mxu0 }
 0x11f   :  { %v3392_v9 = vadd.f32 %v2734_v44, %v391_v7  ;;  %v2839_v10 = vpop.f32.mrb[22].mxu0  ;;  %431 = vadd.xlane.f32.xlu1 %v430_v8 }
 0x120   :  { %v3395_v12 = vadd.f32 %v2839_v10, %v2743_v53  ;;  %v394_v13 = vpop.f32.mrb[23].mxu0  ;;  %425 = vadd.xlane.f32.xlu0 %v424_v11  ;;  %v418_v18 = vmul.f32 %v3369_v55, %v3389_v6 }
 0x121   :  { %v3397_v14 = vadd.f32 %v2737_v47, %v394_v13  ;;  %v416_v15 = vmul.f32 %v3369_v55, %v3392_v9 }
 0x122   :  { %v419_v20 = vmul.f32 %v3369_v55, %v3395_v12  ;;  %v439_v21 = vsel %vm420_vm1, %v418_v18, 0.0 }
 0x123   :  { %v433_v16 = vsel %vm420_vm1, %v416_v15, 0.0  ;;  %v417_v17 = vmul.f32 %v3369_v55, %v3397_v14 }
 0x124   :  { %434 = vadd.xlane.f32.xlu0 %v433_v16  ;;  %v442_v22 = vsel %vm420_vm1, %v419_v20, 0.0  ;;  %v3197_v16 = vmov 0  }
 0x125   :  { %v436_v19 = vsel %vm420_vm1, %v417_v17, 0.0  ;;  %3071 = vset.pattern.permute.xlu0 %v3197_v16  ;;  %3070 = vset.pattern.permute.xlu1 %v3197_v16  ;;  %679 = vst.msk [vmem:[#allocation2 + $0x8] sm:$0xff] %vm677_vm2, %v3197_v16  ;;  %678 = vst.msk [vmem:[#allocation2] sm:$0xff] %vm677_vm2, %v3197_v16 }
 0x126   :  { %437 = vadd.xlane.f32.xlu1 %v436_v19  ;;  %680 = vst.msk [vmem:[#allocation2 + $0x10] sm:$0xff] %vm677_vm2, %v3197_v16  ;;  %681 = vst.msk [vmem:[#allocation2 + $0x18] sm:$0xff] %vm677_vm2, %v3197_v16 }
 0x128   :  { %440 = vadd.xlane.f32.xlu0 %v439_v21 }
 0x12a   :  { %443 = vadd.xlane.f32.xlu1 %v442_v22 }
 0x1a8   :  { %v429_v23 = vpop.xlane.xlu1 %428 }
 0x1a9   :  { %v3411_v24 = vmul.f32 0.03125, %v429_v23  ;;  %v423_v25 = vpop.xlane.xlu0 %422 }
 0x1aa   :  { %v3413_v26 = vmul.f32 0.03125, %v423_v25 }
 0x1ab   :  { %v455_v27 = vsub.f32 %v3371_v56, %v3411_v24 }
 0x1ac   :  { %v453_v28 = vsub.f32 %v3373_v58, %v3413_v26  ;;  %v432_v29 = vpop.xlane.xlu1 %431 }
 0x1ad   :  { %v3419_v30 = vmul.f32 0.03125, %v432_v29  ;;  %v426_v31 = vpop.xlane.xlu0 %425  ;;  %v463_v32 = vmul.f32 %v3369_v55, %v455_v27 }
 0x1ae   :  { %v3422_v33 = vmul.f32 0.03125, %v426_v31  ;;  %v461_v34 = vmul.f32 %v3369_v55, %v453_v28 }
 0x1af   :  { %v456_v35 = vsub.f32 %v3375_v60, %v3419_v30  ;;  %v471_v39 = vmul.f32 %v463_v32, %v463_v32 }
 0x1b0   :  { %v454_v36 = vsub.f32 %v3379_v63, %v3422_v33  ;;  %v469_v37 = vmul.f32 %v461_v34, %v461_v34 }
 0x1b1   :  { %v435_v38 = vpop.xlane.xlu0 %434  ;;  %v464_v40 = vmul.f32 %v3369_v55, %v456_v35  ;;  %v483_v49 = vsel %vm420_vm1, %v471_v39, 0.0  ;;  %v509_v35 = vld [vmem:[%s4124_s2] sm:$0xff] }
 0x1b2   :  { %v3430_v41 = vmul.f32 0.03125, %v435_v38  ;;  %v477_v42 = vsel %vm420_vm1, %v469_v37, 0.0  ;;  %v462_v43 = vmul.f32 %v3369_v55, %v454_v36 }
 0x1b3   :  { %v438_v44 = vpop.xlane.xlu1 %437  ;;  %478 = vadd.xlane.f32.xlu0 %v477_v42  ;;  %v472_v50 = vmul.f32 %v464_v40, %v464_v40  ;;  %v511_v42 = vld [vmem:[%s4124_s2 + $0x10] sm:$0xff] }
 0x1b4   :  { %v457_v45 = vsub.f32 %v3392_v9, %v3430_v41  ;;  %v3436_v46 = vmul.f32 0.03125, %v438_v44  ;;  %v470_v47 = vmul.f32 %v462_v43, %v462_v43 }
 0x1b5   :  { %v441_v48 = vpop.xlane.xlu0 %440  ;;  %v486_v1 = vsel %vm420_vm1, %v472_v50, 0.0 }
 0x1b6   :  { %v458_v51 = vsub.f32 %v3397_v14, %v3436_v46  ;;  %v3441_v52 = vmul.f32 0.03125, %v441_v48  ;;  %v480_v53 = vsel %vm420_vm1, %v470_v47, 0.0  ;;  %v465_v54 = vmul.f32 %v3369_v55, %v457_v45  ;;  %v512_v48 = vld [vmem:[%s4124_s2 + $0x18] sm:$0xff] }
 0x1b7   :  { %v444_v57 = vpop.xlane.xlu1 %443  ;;  %484 = vadd.xlane.f32.xlu0 %v483_v49  ;;  %481 = vadd.xlane.f32.xlu1 %v480_v53 }
 0x1b8   :  { %v459_v59 = vsub.f32 %v3389_v6, %v3441_v52  ;;  %v3447_v61 = vmul.f32 0.03125, %v444_v57  ;;  %v473_v62 = vmul.f32 %v465_v54, %v465_v54  ;;  %v466_v0 = vmul.f32 %v3369_v55, %v458_v51  ;;  %v510_v54 = vld [vmem:[%s4124_s2 + $0x8] sm:$0xff] }
 0x1ba   :  { %v460_v2 = vsub.f32 %v3395_v12, %v3447_v61  ;;  %v489_v3 = vsel %vm420_vm1, %v473_v62, 0.0  ;;  %v474_v4 = vmul.f32 %v466_v0, %v466_v0  ;;  %v467_v5 = vmul.f32 %v3369_v55, %v459_v59 }
 0x1bb   :  { %487 = vadd.xlane.f32.xlu1 %v486_v1  ;;  %490 = vadd.xlane.f32.xlu0 %v489_v3  ;;  %v516_v1 = vld [vmem:[%s4124_s2 + $0x38] sm:$0xff]  ;;  %v514_v3 = vld [vmem:[%s4124_s2 + $0x28] sm:$0xff] }
 0x1bc   :  { %v475_v7 = vmul.f32 %v467_v5, %v467_v5  ;;  %v468_v8 = vmul.f32 %v3369_v55, %v460_v2  ;;  %v492_v10 = vsel %vm420_vm1, %v474_v4, 0.0  ;;  %v543_v4 = vld [vmem:[%s4125_s3 + $0x10] sm:$0xff] }
 0x1be   :  { %v495_v11 = vsel %vm420_vm1, %v475_v7, 0.0  ;;  %v476_v13 = vmul.f32 %v468_v8, %v468_v8 }
 0x1bf   :  { %493 = vadd.xlane.f32.xlu1 %v492_v10  ;;  %496 = vadd.xlane.f32.xlu0 %v495_v11 }
 0x1c0   :  { %v498_v15 = vsel %vm420_vm1, %v476_v13, 0.0 }
 0x1c3   :  { %499 = vadd.xlane.f32.xlu1 %v498_v15 }
 0x240   :  { %v479_v17 = vpop.xlane.xlu0 %478 }
 0x241   :  { %v501_v18 = vmul.f32 0.03125, %v479_v17 }
 0x243   :  { %v517_v19 = vadd.f32 1e-05, %v501_v18 }
 0x244   :  { %v482_v20 = vpop.xlane.xlu1 %481  ;;  %v485_v21 = vpop.xlane.xlu0 %484 }
 0x245   :  { %3148 = vrsqrt.f32 %v517_v19  ;;  %v503_v22 = vmul.f32 0.03125, %v485_v21  ;;  %v502_v25 = vmul.f32 0.03125, %v482_v20  ;;  %v546_v19 = vld [vmem:[%s4125_s3 + $0x28] sm:$0xff] }
 0x247   :  { %v519_v23 = vadd.f32 1e-05, %v503_v22  ;;  %v518_v31 = vadd.f32 1e-05, %v502_v25 }
 0x248   :  { %v488_v27 = vpop.xlane.xlu1 %487  ;;  %v491_v43 = vpop.xlane.xlu0 %490 }
 0x249   :  { %v504_v28 = vmul.f32 0.03125, %v488_v27  ;;  %3150 = vrsqrt.f32 %v519_v23  ;;  %v505_v57 = vmul.f32 0.03125, %v491_v43 }
 0x24b   :  { %v520_v29 = vadd.f32 1e-05, %v504_v28  ;;  %v521_v7 = vadd.f32 1e-05, %v505_v57 }
 0x24c   :  { %v494_v32 = vpop.xlane.xlu1 %493  ;;  %v497_v51 = vpop.xlane.xlu0 %496 }
 0x24d   :  { %3152 = vrsqrt.f32 %v520_v29  ;;  %v506_v34 = vmul.f32 0.03125, %v494_v32  ;;  %v507_v59 = vmul.f32 0.03125, %v497_v51  ;;  %v513_v32 = vld [vmem:[%s4124_s2 + $0x20] sm:$0xff] }
 0x24e   :  { %3154 = vrsqrt.f32 %v518_v31 }
 0x24f   :  { %v3149_v36 = vpop.eup %3148  ;;  %v522_v37 = vadd.f32 1e-05, %v506_v34  ;;  %v523_v8 = vadd.f32 1e-05, %v507_v59 }
 0x250   :  { %v500_v38 = vpop.xlane.xlu1 %499  ;;  %v533_v39 = vmul.f32 %v3149_v36, %v509_v35  ;;  %v545_v36 = vld [vmem:[%s4125_s3 + $0x20] sm:$0xff] }
 0x251   :  { %v508_v40 = vmul.f32 0.03125, %v500_v38  ;;  %3156 = vrsqrt.f32 %v522_v37 }
 0x252   :  { %567 = vperm.xlu0 %3071, %v533_v39   ;;  %v549_v15 = vmul.f32 %v533_v39, %v3413_v26  ;;  %v544_v26 = vld [vmem:[%s4125_s3 + $0x18] sm:$0xff]  ;;  %v547_v39 = vld [vmem:[%s4125_s3 + $0x30] sm:$0xff] }
 0x253   :  { %v524_v44 = vadd.f32 1e-05, %v508_v40  ;;  %v3151_v45 = vpop.eup %3150 }
 0x254   :  { %v535_v47 = vmul.f32 %v3151_v45, %v511_v42 }
 0x255   :  { %3158 = vrsqrt.f32 %v524_v44 }
 0x256   :  { %577 = vperm.xlu1 %3070, %v535_v47   ;;  %v551_v2 = vmul.f32 %v535_v47, %v3411_v24  ;;  %v541_v24 = vld [vmem:[%s4125_s3] sm:$0xff]  ;;  %3160 = vrsqrt.f32 %v521_v7 }
 0x257   :  { %v3153_v49 = vpop.eup %3152  ;;  %3162 = vrsqrt.f32 %v523_v8  ;;  %v557_v18 = vsub.f32 %v541_v24, %v549_v15 }
 0x258   :  { %v536_v50 = vmul.f32 %v3153_v49, %v512_v48  ;;  %v3155_v53 = vpop.eup %3154  ;;  %v559_v13 = vsub.f32 %v543_v4, %v551_v2 }
 0x259   :  { %v534_v0 = vmul.f32 %v3155_v53, %v510_v54 }
 0x25a   :  { %582 = vperm.xlu1 %3070, %v536_v50   ;;  %v552_v20 = vmul.f32 %v536_v50, %v3419_v30  ;;  %v542_v30 = vld [vmem:[%s4125_s3 + $0x8] sm:$0xff] }
 0x25b   :  { %v3157_v62 = vpop.eup %3156  ;;  %v550_v25 = vmul.f32 %v534_v0, %v3422_v33 }
 0x25c   :  { %v538_v11 = vmul.f32 %v3157_v62, %v514_v3  ;;  %v560_v23 = vsub.f32 %v544_v26, %v552_v20 }
 0x25d   :  { %v558_v29 = vsub.f32 %v542_v30, %v550_v25 }
 0x25e   :  { %572 = vperm.xlu1 %3070, %v534_v0   ;;  %v554_v17 = vmul.f32 %v538_v11, %v3436_v46  ;;  %v548_v46 = vld [vmem:[%s4125_s3 + $0x38] sm:$0xff]  ;;  %s3199_s3 = smov 126  }
 0x25f   :  { %v3159_v5 = vpop.eup %3158 }
 0x260   :  { %v540_v10 = vmul.f32 %v3159_v5, %v516_v1  ;;  %v562_v21 = vsub.f32 %v546_v19, %v554_v17  ;;  %v3161_v28 = vpop.eup %3160 }
 0x261   :  { %v3163_v31 = vpop.eup %3162  ;;  %v537_v34 = vmul.f32 %v3161_v28, %v513_v32 }
 0x262   :  { %602 = vperm.xlu0 %3071, %v540_v10   ;;  %625 = vperm.xlu1 %3070, %v559_v13   ;;  %v556_v22 = vmul.f32 %v540_v10, %v3447_v61  ;;  %v515_v61 = vld [vmem:[%s4124_s2 + $0x30] sm:$0xff]  ;;  %s3198_s2 = smov 7  }
 0x263   :  { %v539_v33 = vmul.f32 %v3163_v31, %v515_v61  ;;  %v553_v35 = vmul.f32 %v537_v34, %v3430_v41 }
 0x264   :  { %v564_v27 = vsub.f32 %v548_v46, %v556_v22 }
 0x265   :  { %v561_v37 = vsub.f32 %v545_v36, %v553_v35  ;;  %v555_v38 = vmul.f32 %v539_v33, %v3441_v52 }
 0x266   :  { %592 = vperm.xlu0 %3071, %v538_v11   ;;  %615 = vperm.xlu1 %3070, %v557_v18  }
 0x267   :  { %v563_v40 = vsub.f32 %v547_v39, %v555_v38  ;;  %v3116_v38 = vld [vmem:[%s4126_s8 + $0x20] sm:$0xff]  }
 0x268   :  { %2848 = vmatprep.mubr.msk.bf16.mxu0 %vm764_vm4, %v3116_v38  ;;  %v3142_v38 = vld [vmem:[%s4126_s8 + $0xf0] sm:$0xff]  }
 0x26a   :  { %640 = vperm.xlu0 %3071, %v562_v21   ;;  %630 = vperm.xlu1 %3070, %v560_v23  }
 0x26e   :  { %650 = vperm.xlu0 %3071, %v564_v27   ;;  %620 = vperm.xlu1 %3070, %v558_v29  }
 0x272   :  { %597 = vperm.xlu1 %3070, %v539_v33  }
 0x276   :  { %587 = vperm.xlu1 %3070, %v537_v34   ;;  %v3106_v34 = vld [vmem:[%s4126_s8 + $0x40] sm:$0xff]  }
 0x277   :  { %2880 = vmatprep.mubr.msk.bf16.mxu1 %vm764_vm4, %v3106_v34 }
 0x27a   :  { %635 = vperm.xlu1 %3070, %v561_v37  }
 0x27e   :  { %645 = vperm.xlu1 %3070, %v563_v40  }
 0x2d1   :  { %v568_v52 = vpop.permute.xlu0 %567 }
 0x2d2   :  { %v605_v50 = vmul.f32 %v568_v52, %v3373_v58 }
 0x2d5   :  { %v578_v41 = vpop.permute.xlu1 %577 }
 0x2d6   :  { %v607_v45 = vmul.f32 %v578_v41, %v3371_v56 }
 0x2d9   :  { %v583_v42 = vpop.permute.xlu1 %582 }
 0x2da   :  { %v608_v51 = vmul.f32 %v583_v42, %v3375_v60 }
 0x2dd   :  { %v573_v43 = vpop.permute.xlu1 %572 }
 0x2de   :  { %v606_v16 = vmul.f32 %v573_v43, %v3379_v63  ;;  %v3107_v43 = vld [vmem:[%s4126_s8 + $0x48] sm:$0xff]  }
 0x2e1   :  { %v626_v44 = vpop.permute.xlu1 %625  ;;  %v603_v47 = vpop.permute.xlu0 %602 }
 0x2e2   :  { %v655_v49 = vadd.f32 %v626_v44, %v607_v45  ;;  %v612_v17 = vmul.f32 %v603_v47, %v3395_v12  ;;  %v3108_v44 = vld [vmem:[%s4126_s8 + $0x50] sm:$0xff]  }
 0x2e4   :  { %v663_v54 = vmax.f32 %v655_v49, 0.0 }
 0x2e5   :  { %v616_v48 = vpop.permute.xlu1 %615  ;;  %v593_v62 = vpop.permute.xlu0 %592 }
 0x2e6   :  { %v653_v57 = vadd.f32 %v616_v48, %v605_v50  ;;  %v671_v2 = vmul.f32 %v3369_v55, %v663_v54  ;;  %v610_v63 = vmul.f32 %v593_v62, %v3397_v14  ;;  %v3109_v48 = vld [vmem:[%s4126_s8 + $0x58] sm:$0xff]   ;;  %v3110_v50 = vld [vmem:[%s4126_s8 + $0x60] sm:$0xff]   ;;  %v3111_v54 = vld [vmem:[%s4126_s8 + $0x68] sm:$0xff]  }
 0x2e8   :  { %v661_v3 = vmax.f32 %v653_v57, 0.0 }
 0x2e9   :  { %v631_v53 = vpop.permute.xlu1 %630  ;;  %v641_v58 = vpop.permute.xlu0 %640 }
 0x2ea   :  { %v656_v59 = vadd.f32 %v631_v53, %v608_v51  ;;  %v669_v60 = vmul.f32 %v3369_v55, %v661_v3  ;;  %v658_v15 = vadd.f32 %v641_v58, %v610_v63  ;;  %v3119_v63 = vld [vmem:[%s4126_s8 + $0x98] sm:$0xff]  }
 0x2ec   :  { %v664_v0 = vmax.f32 %v656_v59, 0.0  ;;  %v666_v20 = vmax.f32 %v658_v15, 0.0  ;;  %v3112_v59 = vld [vmem:[%s4126_s8 + $0x70] sm:$0xff]   ;;  %v3121_v15 = vld [vmem:[%s4126_s8 + $0xa0] sm:$0xff]  }
 0x2ed   :  { %v621_v1 = vpop.permute.xlu1 %620  ;;  %v651_v24 = vpop.permute.xlu0 %650 }
 0x2ee   :  { %v672_v56 = vmul.f32 %v3369_v55, %v664_v0  ;;  %v654_v4 = vadd.f32 %v621_v1, %v606_v16  ;;  %v660_v26 = vadd.f32 %v651_v24, %v612_v17  ;;  %v674_v25 = vmul.f32 %v3369_v55, %v666_v20  ;;  %v3113_v1 = vld [vmem:[%s4126_s8 + $0x78] sm:$0xff]   ;;  %v3125_v20 = vld [vmem:[%s4126_s8 + $0xb0] sm:$0xff]  }
 0x2ef   :  { %v3122_v17 = vld [vmem:[%s4126_s8 + $0x38] sm:$0xff]  }
 0x2f0   :  { %v662_v5 = vmax.f32 %v654_v4, 0.0  ;;  %v683_v7 = vpack.c.bf16 %v672_v56, %v671_v2  ;;  %v668_v14 = vmax.f32 %v660_v26, 0.0  ;;  %v3114_v2 = vld [vmem:[%s4126_s8 + $0x80] sm:$0xff]  }
 0x2f1   :  { %v598_v8 = vpop.permute.xlu1 %597 }
 0x2f2   :  { %v670_v10 = vmul.f32 %v3369_v55, %v662_v5  ;;  %692 = vrot.lane.b32.xlu0 %v683_v7, %s3198_s2  ;;  %v611_v22 = vmul.f32 %v598_v8, %v3389_v6  ;;  %v676_v12 = vmul.f32 %v3369_v55, %v668_v14  ;;  %v3115_v5 = vld [vmem:[%s4126_s8 + $0x88] sm:$0xff]   ;;  %v3117_v7 = vld [vmem:[%s4126_s8 + $0x90] sm:$0xff]  }
 0x2f4   :  { %v682_v11 = vpack.c.bf16 %v670_v10, %v669_v60  ;;  %v3118_v10 = vld [vmem:[%s4126_s8 + $0x28] sm:$0xff]  }
 0x2f5   :  { %v588_v13 = vpop.permute.xlu1 %587 }
 0x2f6   :  { %690 = vrot.lane.b32.xlu1 %v682_v11, %s3198_s2  ;;  %v609_v18 = vmul.f32 %v588_v13, %v3392_v9  ;;  %v3120_v13 = vld [vmem:[%s4126_s8 + $0x30] sm:$0xff]  }
 0x2f9   :  { %v636_v19 = vpop.permute.xlu1 %635 }
 0x2fa   :  { %v657_v21 = vadd.f32 %v636_v19, %v609_v18  ;;  %v3123_v18 = vld [vmem:[%s4126_s8 + $0xa8] sm:$0xff]   ;;  %v3124_v19 = vld [vmem:[%s4126_s8] sm:$0xff]  }
 0x2fc   :  { %v665_v23 = vmax.f32 %v657_v21, 0.0  ;;  %v3132_v21 = vld [vmem:[%s4127_s4] sm:$0xff]  }
 0x2fd   :  { %v646_v46 = vpop.permute.xlu1 %645 }
 0x2fe   :  { %v673_v30 = vmul.f32 %v3369_v55, %v665_v23  ;;  %v659_v27 = vadd.f32 %v646_v46, %v611_v22  ;;  %v3126_v22 = vld [vmem:[%s4126_s8 + $0x8] sm:$0xff]   ;;  %v3127_v23 = vld [vmem:[%s4126_s8 + $0xb8] sm:$0xff]   ;;  %v3128_v46 = vld [vmem:[%s4126_s8 + $0x10] sm:$0xff]  }
 0x300   :  { %v667_v28 = vmax.f32 %v659_v27, 0.0  ;;  %v684_v29 = vpack.c.bf16 %v674_v25, %v673_v30  ;;  %v3129_v25 = vld [vmem:[%s4126_s8 + $0xc0] sm:$0xff]   ;;  %v3133_v30 = vld [vmem:[%s4127_s4 + $0x8] sm:$0xff]   ;;  %v3130_v27 = vld [vmem:[%s4126_s8 + $0x18] sm:$0xff]  }
 0x302   :  { %v675_v9 = vmul.f32 %v3369_v55, %v667_v28  ;;  %694 = vrot.lane.b32.xlu1 %v684_v29, %s3198_s2  ;;  %v3131_v28 = vld [vmem:[%s4126_s8 + $0xc8] sm:$0xff]  }
 0x304   :  { %v685_v31 = vpack.c.bf16 %v676_v12, %v675_v9  ;;  %v3134_v12 = vld [vmem:[%s4126_s8 + $0xd0] sm:$0xff]   ;;  %v3135_v9 = vld [vmem:[%s4128_s5] sm:$0xff]  }
 0x306   :  { %696 = vrot.lane.b32.xlu0 %v685_v31, %s3198_s2 }
 0x364   :  { %v693_v61 = vpop.permute.xlu0 %692 }
 0x365   :  { %704 = vst.msk [vmem:[#allocation2 + $0x8] sm:$0xff] %vm702_vm3, %v693_v61  ;;  %v3136_v61 = vld [vmem:[%s4126_s8 + $0xd8] sm:$0xff]  }
 0x368   :  { %v691_v6 = vpop.permute.xlu1 %690 }
 0x369   :  { %703 = vst.msk [vmem:[#allocation2] sm:$0xff] %vm702_vm3, %v691_v6  ;;  %v3137_v6 = vld [vmem:[%s4128_s5 + $0x8] sm:$0xff]  }
 0x36c   :  { %v3539_v32 = vld [vmem:[#allocation2 + $0x8] sm:$0xff] }
 0x36d   :  { %970 = vrot.lane.b32.xlu0 %v3539_v32, %s3199_s3 }
 0x370   :  { %v3542_v33 = vld [vmem:[#allocation2] sm:$0xff] }
 0x371   :  { %968 = vrot.lane.b32.xlu1 %v3542_v33, %s3199_s3 }
 0x374   :  { %v695_v55 = vpop.permute.xlu1 %694 }
 0x375   :  { %705 = vst.msk [vmem:[#allocation2 + $0x10] sm:$0xff] %vm702_vm3, %v695_v55  ;;  %v3139_v55 = vld [vmem:[%s4128_s5 + $0x10] sm:$0xff]  }
 0x378   :  { %v697_v35 = vpop.permute.xlu0 %696 }
 0x379   :  { %706 = vst.msk [vmem:[#allocation2 + $0x18] sm:$0xff] %vm702_vm3, %v697_v35  ;;  %v3140_v35 = vld [vmem:[%s4126_s8 + $0xe8] sm:$0xff]  }
 0x37c   :  { %v3551_v36 = vld [vmem:[#allocation2 + $0x10] sm:$0xff] }
 0x37d   :  { %972 = vrot.lane.b32.xlu1 %v3551_v36, %s3199_s3 }
 0x380   :  { %v3554_v37 = vld [vmem:[#allocation2 + $0x18] sm:$0xff] }
 0x381   :  { %1094 = vrot.lane.b32.xlu1 %v3542_v33, %s3200_s22  ;;  %974 = vrot.lane.b32.xlu0 %v3554_v37, %s3199_s3 }
 0x385   :  { %1098 = vrot.lane.b32.xlu1 %v3551_v36, %s3200_s22  ;;  %1096 = vrot.lane.b32.xlu0 %v3539_v32, %s3200_s22 }
 0x389   :  { %1220 = vrot.lane.b32.xlu1 %v3542_v33, %s3201_s23  ;;  %1100 = vrot.lane.b32.xlu0 %v3554_v37, %s3200_s22 }
 0x38d   :  { %1224 = vrot.lane.b32.xlu1 %v3551_v36, %s3201_s23  ;;  %1222 = vrot.lane.b32.xlu0 %v3539_v32, %s3201_s23 }
 0x391   :  { %1346 = vrot.lane.b32.xlu1 %v3542_v33, %s3202_s24  ;;  %1226 = vrot.lane.b32.xlu0 %v3554_v37, %s3201_s23 }
 0x395   :  { %1350 = vrot.lane.b32.xlu1 %v3551_v36, %s3202_s24  ;;  %1348 = vrot.lane.b32.xlu0 %v3539_v32, %s3202_s24 }
 0x399   :  { %1472 = vrot.lane.b32.xlu1 %v3542_v33, %s3203_s25  ;;  %1352 = vrot.lane.b32.xlu0 %v3554_v37, %s3202_s24 }
 0x39d   :  { %1474 = vrot.lane.b32.xlu1 %v3539_v32, %s3203_s25  ;;  %752 = vrot.lane.b32.xlu0 %v3542_v33, %s3204_s1 }
 0x3a1   :  { %1476 = vrot.lane.b32.xlu1 %v3551_v36, %s3203_s25  ;;  %754 = vrot.lane.b32.xlu0 %v3539_v32, %s3204_s1 }
 0x3a5   :  { %1478 = vrot.lane.b32.xlu1 %v3554_v37, %s3203_s25  ;;  %756 = vrot.lane.b32.xlu0 %v3551_v36, %s3204_s1 }
 0x3a9   :  { %1598 = vrot.lane.b32.xlu1 %v3542_v33, %s3205_s28  ;;  %758 = vrot.lane.b32.xlu0 %v3554_v37, %s3204_s1 }
 0x3ad   :  { %1602 = vrot.lane.b32.xlu1 %v3551_v36, %s3205_s28  ;;  %1600 = vrot.lane.b32.xlu0 %v3539_v32, %s3205_s28 }
 0x3b1   :  { %1724 = vrot.lane.b32.xlu1 %v3542_v33, %s3206_s29  ;;  %1604 = vrot.lane.b32.xlu0 %v3554_v37, %s3205_s28 }
 0x3b5   :  { %1728 = vrot.lane.b32.xlu1 %v3551_v36, %s3206_s29  ;;  %1726 = vrot.lane.b32.xlu0 %v3539_v32, %s3206_s29 }
 0x3b9   :  { %1730 = vrot.lane.b32.xlu0 %v3554_v37, %s3206_s29 }
 0x3df   :  { %v971_v40 = vpop.permute.xlu0 %970 }
 0x3e3   :  { %v969_v39 = vpop.permute.xlu1 %968 }
 0x3e4   :  { %2872 = vmatprep.subr.bf16.mxu1 %v969_v39 }
 0x3e5   :  { %2873 = vmatpush3.bf16.msra.mxu1 %v969_v39 }
 0x3e6   :  { %2874 = vmatprep.subr.bf16.mxu1 %v971_v40 }
 0x3e9   :  { %2875 = vmatpush3.bf16.msra.mxu1 %v971_v40  ;;  %v3143_v40 = vld [vmem:[%s4126_s8 + $0xf8] sm:$0xff]  }
 0x3ef   :  { %v973_v41 = vpop.permute.xlu1 %972 }
 0x3f0   :  { %2876 = vmatprep.subr.bf16.mxu1 %v973_v41 }
 0x3f1   :  { %2877 = vmatpush3.bf16.msra.mxu1 %v973_v41 }
 0x3f3   :  { %v975_v42 = vpop.permute.xlu0 %974  ;;  %v1095_v52 = vpop.permute.xlu1 %1094 }
 0x3f4   :  { %2878 = vmatprep.subr.bf16.mxu1 %v975_v42 }
 0x3f5   :  { %2879 = vmatpush3.bf16.msra.mxu1 %v975_v42  ;;  %v3144_v42 = vld [vmem:[%s4126_s8 + $0x100] sm:$0xff]  }
 0x3f6   :  { %2888 = vmatprep.subr.bf16.mxu1 %v1095_v52 }
 0x3f7   :  { %v1097_v45 = vpop.permute.xlu0 %1096  ;;  %v1099_v49 = vpop.permute.xlu1 %1098 }
 0x3f8   :  { %2881 = vmatmul.mubr.msk.bf16.vlgmr.msra.gmra.mrb[0].mxu1 %vm764_vm4, %v3107_v43 }
 0x3f9   :  { %2889 = vmatpush3.bf16.msra.mxu1 %v1095_v52  ;;  %2884 = vmatprep.mubr.msk.bf16.mxu1 %vm764_vm4, %v3108_v44  ;;  %v3145_v52 = vld [vmem:[%s4126_s8 + $0x108] sm:$0xff]   ;;  %v3146_v44 = vld [vmem:[%s4126_s8 + $0x110] sm:$0xff]  }
 0x3fa   :  { %2890 = vmatprep.subr.bf16.mxu1 %v1097_v45 }
 0x3fb   :  { %v1101_v47 = vpop.permute.xlu0 %1100  ;;  %v1221_v57 = vpop.permute.xlu1 %1220 }
 0x3fd   :  { %2891 = vmatpush3.bf16.msra.mxu1 %v1097_v45  ;;  %v3147_v45 = vld [vmem:[%s4126_s8 + $0x118] sm:$0xff]  }
 0x3fe   :  { %2892 = vmatprep.subr.bf16.mxu1 %v1099_v49 }
 0x3ff   :  { %v1223_v51 = vpop.permute.xlu0 %1222  ;;  %v1225_v16 = vpop.permute.xlu1 %1224 }
 0x400   :  { %2885 = vmatmul.mubr.msk.bf16.gmra.mrb[4].mxu1 %vm764_vm4, %v3109_v48 }
 0x401   :  { %2893 = vmatpush3.bf16.msra.mxu1 %v1099_v49  ;;  %2896 = vmatprep.mubr.msk.bf16.mxu1 %vm764_vm4, %v3110_v50 }
 0x402   :  { %2894 = vmatprep.subr.bf16.mxu1 %v1101_v47 }
 0x403   :  { %v1227_v53 = vpop.permute.xlu0 %1226  ;;  %v1347_v56 = vpop.permute.xlu1 %1346 }
 0x405   :  { %2895 = vmatpush3.bf16.msra.mxu1 %v1101_v47 }
 0x406   :  { %2904 = vmatprep.subr.bf16.mxu1 %v1221_v57 }
 0x407   :  { %v1349_v62 = vpop.permute.xlu0 %1348  ;;  %v1351_v58 = vpop.permute.xlu1 %1350 }
 0x408   :  { %2897 = vmatmul.mubr.msk.bf16.vlgmr.msra.gmra.mrb[0].mxu1 %vm764_vm4, %v3111_v54 }
 0x409   :  { %2905 = vmatpush3.bf16.msra.mxu1 %v1221_v57  ;;  %2900 = vmatprep.mubr.msk.bf16.mxu1 %vm764_vm4, %v3112_v59 }
 0x40a   :  { %2906 = vmatprep.subr.bf16.mxu1 %v1223_v51 }
 0x40b   :  { %v1353_v0 = vpop.permute.xlu0 %1352  ;;  %v1473_v11 = vpop.permute.xlu1 %1472 }
 0x40d   :  { %2907 = vmatpush3.bf16.msra.mxu1 %v1223_v51 }
 0x40e   :  { %2908 = vmatprep.subr.bf16.mxu1 %v1225_v16 }
 0x40f   :  { %v753_v3 = vpop.permute.xlu0 %752  ;;  %v1475_v24 = vpop.permute.xlu1 %1474 }
 0x410   :  { %2840 = vmatprep.subr.bf16.mxu0 %v753_v3  ;;  %2901 = vmatmul.mubr.msk.bf16.gmra.mrb[4].mxu1 %vm764_vm4, %v3113_v1 }
 0x411   :  { %2841 = vmatpush3.bf16.msra.mxu0 %v753_v3  ;;  %2909 = vmatpush3.bf16.msra.mxu1 %v1225_v16  ;;  %v3762_v16 = vld [vmem:[%s4123_s11] ss:$0 sm:$0xff] }
 0x412   :  { %2910 = vmatprep.subr.bf16.mxu1 %v1227_v53  ;;  %2912 = vmatprep.mubr.msk.bf16.mxu1 %vm764_vm4, %v3114_v2 }
 0x413   :  { %v755_v4 = vpop.permute.xlu0 %754  ;;  %v1477_v26 = vpop.permute.xlu1 %1476 }
 0x414   :  { %2842 = vmatprep.subr.bf16.mxu0 %v755_v4 }
 0x415   :  { %2843 = vmatpush3.bf16.msra.mxu0 %v755_v4  ;;  %2911 = vmatpush3.bf16.msra.mxu1 %v1227_v53 }
 0x416   :  { %2920 = vmatprep.subr.bf16.mxu1 %v1347_v56 }
 0x417   :  { %v757_v8 = vpop.permute.xlu0 %756  ;;  %v1479_v14 = vpop.permute.xlu1 %1478 }
 0x418   :  { %2844 = vmatprep.subr.bf16.mxu0 %v757_v8  ;;  %2913 = vmatmul.mubr.msk.bf16.vlgmr.msra.gmra.mrb[0].mxu1 %vm764_vm4, %v3115_v5 }
 0x419   :  { %2845 = vmatpush3.bf16.msra.mxu0 %v757_v8  ;;  %2921 = vmatpush3.bf16.msra.mxu1 %v1347_v56 }
 0x41a   :  { %2922 = vmatprep.subr.bf16.mxu1 %v1349_v62  ;;  %2916 = vmatprep.mubr.msk.bf16.mxu1 %vm764_vm4, %v3117_v7 }
 0x41b   :  { %v759_v60 = vpop.permute.xlu0 %758  ;;  %v1599_v29 = vpop.permute.xlu1 %1598 }
 0x41c   :  { %2846 = vmatprep.subr.bf16.mxu0 %v759_v60 }
 0x41d   :  { %2847 = vmatpush3.bf16.msra.mxu0 %v759_v60  ;;  %2923 = vmatpush3.bf16.msra.mxu1 %v1349_v62 }
 0x41e   :  { %2856 = vmatprep.subr.bf16.mxu0 %v3542_v33  ;;  %2924 = vmatprep.subr.bf16.mxu1 %v1351_v58 }
 0x41f   :  { %v1601_v31 = vpop.permute.xlu0 %1600 }
 0x420   :  { %2849 = vmatmul.mubr.msk.bf16.vlgmr.msra.gmra.mrb[24].mxu0 %vm764_vm4, %v3118_v10  ;;  %2917 = vmatmul.mubr.msk.bf16.gmra.mrb[4].mxu1 %vm764_vm4, %v3119_v63 }
 0x421   :  { %2857 = vmatpush3.bf16.msra.mxu0 %v3542_v33  ;;  %2925 = vmatpush3.bf16.msra.mxu1 %v1351_v58  ;;  %v3138_v33 = vld [vmem:[%s4126_s8 + $0xe0] sm:$0xff]  }
 0x422   :  { %2858 = vmatprep.subr.bf16.mxu0 %v3539_v32  ;;  %2926 = vmatprep.subr.bf16.mxu1 %v1353_v0 }
 0x423   :  { %2852 = vmatprep.mubr.msk.bf16.mxu0 %vm764_vm4, %v3120_v13  ;;  %2928 = vmatprep.mubr.msk.bf16.mxu1 %vm764_vm4, %v3121_v15  ;;  %v1605_v34 = vpop.permute.xlu0 %1604 }
 0x425   :  { %2859 = vmatpush3.bf16.msra.mxu0 %v3539_v32  ;;  %2927 = vmatpush3.bf16.msra.mxu1 %v1353_v0  ;;  %v1603_v32 = vpop.permute.xlu1 %1602 }
 0x426   :  { %2860 = vmatprep.subr.bf16.mxu0 %v3551_v36  ;;  %2936 = vmatprep.subr.bf16.mxu1 %v1473_v11 }
 0x427   :  { %v1727_v39 = vpop.permute.xlu0 %1726 }
 0x428   :  { %2853 = vmatmul.mubr.msk.bf16.gmra.mrb[28].mxu0 %vm764_vm4, %v3122_v17  ;;  %2929 = vmatmul.mubr.msk.bf16.vlgmr.msra.gmra.mrb[0].mxu1 %vm764_vm4, %v3123_v18 }
 0x429   :  { %2861 = vmatpush3.bf16.msra.mxu0 %v3551_v36  ;;  %2937 = vmatpush3.bf16.msra.mxu1 %v1473_v11  ;;  %v3141_v36 = vld [vmem:[%s4128_s5 + $0x18] sm:$0xff]  }
 0x42a   :  { %2862 = vmatprep.subr.bf16.mxu0 %v3554_v37  ;;  %2938 = vmatprep.subr.bf16.mxu1 %v1475_v24 }
 0x42b   :  { %2864 = vmatprep.mubr.msk.bf16.mxu0 %vm764_vm4, %v3124_v19  ;;  %2932 = vmatprep.mubr.msk.bf16.mxu1 %vm764_vm4, %v3125_v20  ;;  %v1731_v43 = vpop.permute.xlu0 %1730 }
 0x42d   :  { %2863 = vmatpush3.bf16.msra.mxu0 %v3554_v37  ;;  %2939 = vmatpush3.bf16.msra.mxu1 %v1475_v24  ;;  %v1725_v37 = vpop.permute.xlu1 %1724 }
 0x42e   :  { %2940 = vmatprep.subr.bf16.mxu1 %v1477_v26  ;;  %2984 = vmatprep.subr.bf16.mxu0 %v3132_v21 }
 0x430   :  { %2865 = vmatmul.mubr.msk.bf16.vlgmr.msra.gmra.mrb[24].mxu0 %vm764_vm4, %v3126_v22  ;;  %2933 = vmatmul.mubr.msk.bf16.gmra.mrb[4].mxu1 %vm764_vm4, %v3127_v23 }
 0x431   :  { %2941 = vmatpush3.bf16.msra.mxu1 %v1477_v26  ;;  %2868 = vmatprep.mubr.msk.bf16.mxu0 %vm764_vm4, %v3128_v46  ;;  %v1729_v41 = vpop.permute.xlu1 %1728 }
 0x432   :  { %2942 = vmatprep.subr.bf16.mxu1 %v1479_v14  ;;  %2944 = vmatprep.mubr.msk.bf16.mxu1 %vm764_vm4, %v3129_v25 }
 0x433   :  { %2985 = vmatpush3.bf16.msra.mxu0 %v3132_v21 }
 0x434   :  { %2986 = vmatprep.subr.bf16.mxu0 %v3133_v30 }
 0x435   :  { %2943 = vmatpush3.bf16.msra.mxu1 %v1479_v14 }
 0x436   :  { %2952 = vmatprep.subr.bf16.mxu1 %v1599_v29 }
 0x437   :  { %2987 = vmatpush3.bf16.msra.mxu0 %v3133_v30 }
 0x438   :  { %2869 = vmatmul.mubr.msk.bf16.gmra.mrb[28].mxu0 %vm764_vm4, %v3130_v27  ;;  %2945 = vmatmul.mubr.msk.bf16.vlgmr.msra.gmra.mrb[0].mxu1 %vm764_vm4, %v3131_v28 }
 0x439   :  { %2953 = vmatpush3.bf16.msra.mxu1 %v1599_v29  ;;  %2948 = vmatprep.mubr.msk.bf16.mxu1 %vm764_vm4, %v3134_v12 }
 0x43a   :  { %2954 = vmatprep.subr.bf16.mxu1 %v1601_v31  ;;  %2988 = vmatprep.mubr.msk.bf16.mxu0 %vm263_vm0, %v3135_v9 }
 0x43d   :  { %2955 = vmatpush3.bf16.msra.mxu1 %v1601_v31 }
 0x43e   :  { %2956 = vmatprep.subr.bf16.mxu1 %v1603_v32 }
 0x440   :  { %2949 = vmatmul.mubr.msk.bf16.gmra.mrb[4].mxu1 %vm764_vm4, %v3136_v61  ;;  %2989 = vmatmul.mubr.msk.bf16.vlgmr.msra.gmra.mrb[32].mxu0 %vm263_vm0, %v3137_v6 }
 0x441   :  { %2957 = vmatpush3.bf16.msra.mxu1 %v1603_v32  ;;  %2960 = vmatprep.mubr.msk.bf16.mxu1 %vm764_vm4, %v3138_v33 }
 0x442   :  { %2958 = vmatprep.subr.bf16.mxu1 %v1605_v34  ;;  %2992 = vmatprep.mubr.msk.bf16.mxu0 %vm263_vm0, %v3139_v55 }
 0x445   :  { %2959 = vmatpush3.bf16.msra.mxu1 %v1605_v34 }
 0x446   :  { %2968 = vmatprep.subr.bf16.mxu1 %v1725_v37 }
 0x448   :  { %2961 = vmatmul.mubr.msk.bf16.vlgmr.msra.gmra.mrb[0].mxu1 %vm764_vm4, %v3140_v35  ;;  %2993 = vmatmul.mubr.msk.bf16.gmra.mrb[36].mxu0 %vm263_vm0, %v3141_v36 }
 0x449   :  { %2969 = vmatpush3.bf16.msra.mxu1 %v1725_v37  ;;  %2964 = vmatprep.mubr.msk.bf16.mxu1 %vm764_vm4, %v3142_v38 }
 0x44a   :  { %2970 = vmatprep.subr.bf16.mxu1 %v1727_v39 }
 0x44d   :  { %2971 = vmatpush3.bf16.msra.mxu1 %v1727_v39 }
 0x44e   :  { %2972 = vmatprep.subr.bf16.mxu1 %v1729_v41 }
 0x450   :  { %2965 = vmatmul.mubr.msk.bf16.gmra.mrb[4].mxu1 %vm764_vm4, %v3143_v40 }
 0x451   :  { %2973 = vmatpush3.bf16.msra.mxu1 %v1729_v41  ;;  %2976 = vmatprep.mubr.msk.bf16.mxu1 %vm764_vm4, %v3144_v42 }
 0x452   :  { %2974 = vmatprep.subr.bf16.mxu1 %v1731_v43 }
 0x455   :  { %2975 = vmatpush3.bf16.msra.mxu1 %v1731_v43 }
 0x458   :  { %2977 = vmatmul.mubr.msk.bf16.vlgmr.msra.gmra.mrb[0].mxu1 %vm764_vm4, %v3145_v52 }
 0x459   :  { %2980 = vmatprep.mubr.msk.bf16.mxu1 %vm764_vm4, %v3146_v44 }
 0x460   :  { %2981 = vmatmul.mubr.msk.bf16.gmra.mrb[4].mxu1 %vm764_vm4, %v3147_v45 }
 0x503   :  { %v2866_v47 = vpop.f32.mrb[24].mxu0 }
 0x504   :  { %v908_v48 = vpop.f32.mrb[25].mxu0 }
 0x505   :  { %v2867_v49 = vpop.f32.mrb[26].mxu0 }
 0x506   :  { %v911_v50 = vpop.f32.mrb[27].mxu0 }
 0x50b   :  { %v2870_v51 = vpop.f32.mrb[28].mxu0 }
 0x50c   :  { %v924_v53 = vpop.f32.mrb[29].mxu0 }
 0x50d   :  { %v2871_v54 = vpop.f32.mrb[30].mxu0 }
 0x50e   :  { %v927_v57 = vpop.f32.mrb[31].mxu0 }
 0x513   :  { %v3755_v59 = vpop.f32.mrb[32].mxu0 }
 0x514   :  { %v3757_v62 = vpop.f32.mrb[33].mxu0  ;;  %v2192_v0 = vmul.f32 %v3762_v16, %v3755_v59 }
 0x515   :  { %v3766_v1 = vpop.f32.mrb[34].mxu0  ;;  %v2190_v2 = vmul.f32 %v3762_v16, %v3757_v62 }
 0x516   :  { %v2204_v3 = vsel %vm420_vm1, %v2192_v0, 0.0  ;;  %v2193_v56 = vmul.f32 %v3762_v16, %v3766_v1  ;;  %v3773_v4 = vpop.f32.mrb[35].mxu0 }
 0x517   :  { %2205 = vadd.xlane.f32.xlu0 %v2204_v3  ;;  %v2191_v5 = vmul.f32 %v3762_v16, %v3773_v4  ;;  %v2198_v58 = vsel %vm420_vm1, %v2190_v2, 0.0 }
 0x518   :  { %v2207_v7 = vsel %vm420_vm1, %v2193_v56, 0.0 }
 0x519   :  { %2208 = vadd.xlane.f32.xlu1 %v2207_v7  ;;  %v2201_v8 = vsel %vm420_vm1, %v2191_v5, 0.0 }
 0x51b   :  { %2199 = vadd.xlane.f32.xlu0 %v2198_v58  ;;  %v3780_v60 = vpop.f32.mrb[36].mxu0 }
 0x51c   :  { %v3782_v10 = vpop.f32.mrb[37].mxu0  ;;  %v2196_v43 = vmul.f32 %v3762_v16, %v3780_v60 }
 0x51d   :  { %2202 = vadd.xlane.f32.xlu1 %v2201_v8  ;;  %v3784_v63 = vpop.f32.mrb[38].mxu0  ;;  %v2194_v11 = vmul.f32 %v3762_v16, %v3782_v10 }
 0x51e   :  { %v3788_v13 = vpop.f32.mrb[39].mxu0  ;;  %v2197_v44 = vmul.f32 %v3762_v16, %v3784_v63  ;;  %v2216_v45 = vsel %vm420_vm1, %v2196_v43, 0.0 }
 0x51f   :  { %v2195_v15 = vmul.f32 %v3762_v16, %v3788_v13  ;;  %v2210_v24 = vsel %vm420_vm1, %v2194_v11, 0.0 }
 0x520   :  { %2211 = vadd.xlane.f32.xlu0 %v2210_v24 }
 0x521   :  { %v2213_v17 = vsel %vm420_vm1, %v2195_v15, 0.0 }
 0x522   :  { %2214 = vadd.xlane.f32.xlu1 %v2213_v17 }
 0x52b   :  { %v2978_v18 = vpop.f32.mrb[0].mxu1 }
 0x52c   :  { %v3794_v19 = vadd.f32 %v2978_v18, %v2866_v47  ;;  %v1782_v20 = vpop.f32.mrb[1].mxu1  ;;  %v2219_v47 = vsel %vm420_vm1, %v2197_v44, 0.0 }
 0x52d   :  { %v3796_v26 = vadd.f32 %v1782_v20, %v908_v48  ;;  %v2979_v21 = vpop.f32.mrb[2].mxu1 }
 0x52e   :  { %v3798_v22 = vadd.f32 %v2979_v21, %v2867_v49  ;;  %v1785_v23 = vpop.f32.mrb[3].mxu1  ;;  %v1823_v46 = vmul.f32 %v3762_v16, %v3794_v19 }
 0x52f   :  { %v3802_v25 = vadd.f32 %v1785_v23, %v911_v50  ;;  %v1821_v14 = vmul.f32 %v3762_v16, %v3796_v26 }
 0x530   :  { %v1835_v30 = vsel %vm420_vm1, %v1823_v46, 0.0  ;;  %v1824_v29 = vmul.f32 %v3762_v16, %v3798_v22 }
 0x531   :  { %1836 = vadd.xlane.f32.xlu0 %v1835_v30  ;;  %v1829_v27 = vsel %vm420_vm1, %v1821_v14, 0.0  ;;  %v1822_v28 = vmul.f32 %v3762_v16, %v3802_v25 }
 0x532   :  { %1830 = vadd.xlane.f32.xlu1 %v1829_v27  ;;  %v1838_v33 = vsel %vm420_vm1, %v1824_v29, 0.0 }
 0x533   :  { %v2982_v12 = vpop.f32.mrb[4].mxu1  ;;  %v1832_v9 = vsel %vm420_vm1, %v1822_v28, 0.0 }
 0x534   :  { %v3813_v31 = vadd.f32 %v2982_v12, %v2870_v51  ;;  %v1798_v61 = vpop.f32.mrb[5].mxu1 }
 0x535   :  { %v3815_v6 = vadd.f32 %v1798_v61, %v924_v53  ;;  %1833 = vadd.xlane.f32.xlu0 %v1832_v9  ;;  %v2983_v32 = vpop.f32.mrb[6].mxu1 }
 0x536   :  { %v3818_v55 = vadd.f32 %v2983_v32, %v2871_v54  ;;  %1839 = vadd.xlane.f32.xlu1 %v1838_v33  ;;  %v1801_v34 = vpop.f32.mrb[7].mxu1  ;;  %v1827_v35 = vmul.f32 %v3762_v16, %v3813_v31 }
 0x537   :  { %v3822_v36 = vadd.f32 %v1801_v34, %v927_v57  ;;  %v1825_v39 = vmul.f32 %v3762_v16, %v3815_v6 }
 0x538   :  { %v1847_v37 = vsel %vm420_vm1, %v1827_v35, 0.0  ;;  %v1828_v38 = vmul.f32 %v3762_v16, %v3818_v55 }
 0x539   :  { %1848 = vadd.xlane.f32.xlu0 %v1847_v37  ;;  %v1826_v41 = vmul.f32 %v3762_v16, %v3822_v36  ;;  %v1841_v42 = vsel %vm420_vm1, %v1825_v39, 0.0 }
 0x53a   :  { %v1850_v40 = vsel %vm420_vm1, %v1828_v38, 0.0 }
 0x53b   :  { %1851 = vadd.xlane.f32.xlu1 %v1850_v40  ;;  %v1844_v52 = vsel %vm420_vm1, %v1826_v41, 0.0 }
 0x53d   :  { %1842 = vadd.xlane.f32.xlu0 %v1841_v42 }
 0x53f   :  { %1845 = vadd.xlane.f32.xlu1 %v1844_v52 }
 0x541   :  { %2217 = vadd.xlane.f32.xlu0 %v2216_v45 }
 0x543   :  { %2220 = vadd.xlane.f32.xlu1 %v2219_v47 }
 0x5a4   :  { %v2206_v48 = vpop.xlane.xlu0 %2205 }
 0x5a5   :  { %v3840_v49 = vmul.f32 0.03125, %v2206_v48 }
 0x5a6   :  { %v2209_v50 = vpop.xlane.xlu1 %2208 }
 0x5a7   :  { %v2232_v51 = vsub.f32 %v3755_v59, %v3840_v49  ;;  %v3844_v53 = vmul.f32 0.03125, %v2209_v50 }
 0x5a8   :  { %v2200_v54 = vpop.xlane.xlu0 %2199 }
 0x5a9   :  { %v2233_v57 = vsub.f32 %v3766_v1, %v3844_v53  ;;  %v3848_v0 = vmul.f32 0.03125, %v2200_v54  ;;  %v2240_v2 = vmul.f32 %v3762_v16, %v2232_v51 }
 0x5aa   :  { %v2203_v3 = vpop.xlane.xlu1 %2202 }
 0x5ab   :  { %v2230_v56 = vsub.f32 %v3757_v62, %v3848_v0  ;;  %v3853_v5 = vmul.f32 0.03125, %v2203_v3  ;;  %v2248_v7 = vmul.f32 %v2240_v2, %v2240_v2  ;;  %v2241_v24 = vmul.f32 %v3762_v16, %v2233_v57 }
 0x5ad   :  { %v2231_v58 = vsub.f32 %v3773_v4, %v3853_v5  ;;  %v2212_v8 = vpop.xlane.xlu0 %2211  ;;  %v2260_v11 = vsel %vm420_vm1, %v2248_v7, 0.0  ;;  %v2238_v15 = vmul.f32 %v3762_v16, %v2230_v56  ;;  %v2249_v27 = vmul.f32 %v2241_v24, %v2241_v24 }
 0x5ae   :  { %v3860_v17 = vmul.f32 0.03125, %v2212_v8  ;;  %2261 = vadd.xlane.f32.xlu0 %v2260_v11 }
 0x5af   :  { %v2215_v18 = vpop.xlane.xlu1 %2214  ;;  %v2246_v20 = vmul.f32 %v2238_v15, %v2238_v15  ;;  %v2239_v21 = vmul.f32 %v3762_v16, %v2231_v58  ;;  %v2263_v32 = vsel %vm420_vm1, %v2249_v27, 0.0 }
 0x5b0   :  { %v2234_v23 = vsub.f32 %v3782_v10, %v3860_v17  ;;  %v3865_v46 = vmul.f32 0.03125, %v2215_v18 }
 0x5b1   :  { %v2254_v14 = vsel %vm420_vm1, %v2246_v20, 0.0  ;;  %v2247_v30 = vmul.f32 %v2239_v21, %v2239_v21 }
 0x5b2   :  { %v2235_v28 = vsub.f32 %v3788_v13, %v3865_v46  ;;  %2255 = vadd.xlane.f32.xlu1 %v2254_v14  ;;  %v2242_v29 = vmul.f32 %v3762_v16, %v2234_v23 }
 0x5b3   :  { %v2257_v12 = vsel %vm420_vm1, %v2247_v30, 0.0 }
 0x5b4   :  { %2258 = vadd.xlane.f32.xlu0 %v2257_v12  ;;  %v2250_v9 = vmul.f32 %v2242_v29, %v2242_v29  ;;  %v2243_v61 = vmul.f32 %v3762_v16, %v2235_v28 }
 0x5b6   :  { %2264 = vadd.xlane.f32.xlu1 %v2263_v32  ;;  %v2266_v33 = vsel %vm420_vm1, %v2250_v9, 0.0  ;;  %v2251_v34 = vmul.f32 %v2243_v61, %v2243_v61 }
 0x5b8   :  { %2267 = vadd.xlane.f32.xlu0 %v2266_v33  ;;  %v2269_v35 = vsel %vm420_vm1, %v2251_v34, 0.0 }
 0x5ba   :  { %2270 = vadd.xlane.f32.xlu1 %v2269_v35 }
 0x5be   :  { %v1837_v37 = vpop.xlane.xlu0 %1836 }
 0x5bf   :  { %v3876_v38 = vmul.f32 0.03125, %v1837_v37  ;;  %v1831_v39 = vpop.xlane.xlu1 %1830 }
 0x5c0   :  { %v3878_v40 = vmul.f32 0.03125, %v1831_v39 }
 0x5c1   :  { %v1863_v41 = vsub.f32 %v3794_v19, %v3876_v38 }
 0x5c2   :  { %v1861_v42 = vsub.f32 %v3796_v26, %v3878_v40  ;;  %v1834_v43 = vpop.xlane.xlu0 %1833 }
 0x5c3   :  { %v3884_v52 = vmul.f32 0.03125, %v1834_v43  ;;  %v1840_v44 = vpop.xlane.xlu1 %1839  ;;  %v1871_v45 = vmul.f32 %v3762_v16, %v1863_v41 }
 0x5c4   :  { %v3887_v47 = vmul.f32 0.03125, %v1840_v44  ;;  %v1869_v48 = vmul.f32 %v3762_v16, %v1861_v42 }
 0x5c5   :  { %v1862_v50 = vsub.f32 %v3802_v25, %v3884_v52  ;;  %v1879_v51 = vmul.f32 %v1871_v45, %v1871_v45 }
 0x5c6   :  { %v1864_v54 = vsub.f32 %v3798_v22, %v3887_v47  ;;  %v1849_v57 = vpop.xlane.xlu0 %1848  ;;  %v1877_v56 = vmul.f32 %v1869_v48, %v1869_v48 }
 0x5c7   :  { %v3894_v2 = vmul.f32 0.03125, %v1849_v57  ;;  %v1891_v3 = vsel %vm420_vm1, %v1879_v51, 0.0  ;;  %v1870_v8 = vmul.f32 %v3762_v16, %v1862_v50 }
 0x5c8   :  { %v1852_v7 = vpop.xlane.xlu1 %1851  ;;  %1892 = vadd.xlane.f32.xlu0 %v1891_v3  ;;  %v1872_v58 = vmul.f32 %v3762_v16, %v1864_v54  ;;  %v1885_v20 = vsel %vm420_vm1, %v1877_v56, 0.0 }
 0x5c9   :  { %v1867_v11 = vsub.f32 %v3813_v31, %v3894_v2  ;;  %v3905_v23 = vmul.f32 0.03125, %v1852_v7  ;;  %v1878_v27 = vmul.f32 %v1870_v8, %v1870_v8 }
 0x5ca   :  { %v1843_v15 = vpop.xlane.xlu0 %1842  ;;  %v1880_v24 = vmul.f32 %v1872_v58, %v1872_v58 }
 0x5cb   :  { %v3901_v18 = vmul.f32 0.03125, %v1843_v15  ;;  %v1875_v21 = vmul.f32 %v3762_v16, %v1867_v11  ;;  %v1868_v33 = vsub.f32 %v3818_v55, %v3905_v23  ;;  %v1888_v35 = vsel %vm420_vm1, %v1878_v27, 0.0 }
 0x5cc   :  { %v1846_v14 = vpop.xlane.xlu1 %1845  ;;  %1886 = vadd.xlane.f32.xlu0 %v1885_v20  ;;  %v1894_v30 = vsel %vm420_vm1, %v1880_v24, 0.0 }
 0x5cd   :  { %v1865_v28 = vsub.f32 %v3815_v6, %v3901_v18  ;;  %1895 = vadd.xlane.f32.xlu1 %v1894_v30  ;;  %v1883_v29 = vmul.f32 %v1875_v21, %v1875_v21  ;;  %v3917_v37 = vmul.f32 0.03125, %v1846_v14  ;;  %v1876_v54 = vmul.f32 %v3762_v16, %v1868_v33 }
 0x5ce   :  { %v2218_v12 = vpop.xlane.xlu0 %2217 }
 0x5cf   :  { %v3910_v9 = vmul.f32 0.03125, %v2218_v12  ;;  %v1903_v61 = vsel %vm420_vm1, %v1883_v29, 0.0  ;;  %v1873_v32 = vmul.f32 %v3762_v16, %v1865_v28  ;;  %v1866_v48 = vsub.f32 %v3822_v36, %v3917_v37 }
 0x5d0   :  { %v2221_v34 = vpop.xlane.xlu1 %2220  ;;  %1904 = vadd.xlane.f32.xlu0 %v1903_v61  ;;  %v1884_v7 = vmul.f32 %v1876_v54, %v1876_v54 }
 0x5d1   :  { %v2236_v39 = vsub.f32 %v3780_v60, %v3910_v9  ;;  %v3921_v41 = vmul.f32 0.03125, %v2221_v34  ;;  %1889 = vadd.xlane.f32.xlu1 %v1888_v35  ;;  %v1881_v42 = vmul.f32 %v1873_v32, %v1873_v32  ;;  %v1874_v58 = vmul.f32 %v3762_v16, %v1866_v48  ;;  %v2288_v34 = vld [vmem:[%s4129_s6 + $0x10] sm:$0xff]  ;;  %v2289_v48 = vld [vmem:[%s4129_s6 + $0x18] sm:$0xff] }
 0x5d2   :  { %v1906_v8 = vsel %vm420_vm1, %v1884_v7, 0.0 }
 0x5d3   :  { %v2237_v43 = vsub.f32 %v3784_v63, %v3921_v41  ;;  %v1897_v44 = vsel %vm420_vm1, %v1881_v42, 0.0  ;;  %v2244_v45 = vmul.f32 %v3762_v16, %v2236_v39  ;;  %v1882_v11 = vmul.f32 %v1874_v58, %v1874_v58  ;;  %v2286_v42 = vld [vmem:[%s4129_s6] sm:$0xff] }
 0x5d4   :  { %1898 = vadd.xlane.f32.xlu0 %v1897_v44 }
 0x5d5   :  { %v2252_v50 = vmul.f32 %v2244_v45, %v2244_v45  ;;  %v2245_v51 = vmul.f32 %v3762_v16, %v2237_v43  ;;  %v1900_v15 = vsel %vm420_vm1, %v1882_v11, 0.0 }
 0x5d7   :  { %v2272_v57 = vsel %vm420_vm1, %v2252_v50, 0.0  ;;  %v2253_v3 = vmul.f32 %v2245_v51, %v2245_v51  ;;  %v2287_v50 = vld [vmem:[%s4129_s6 + $0x8] sm:$0xff] }
 0x5d8   :  { %2273 = vadd.xlane.f32.xlu0 %v2272_v57 }
 0x5d9   :  { %v2275_v56 = vsel %vm420_vm1, %v2253_v3, 0.0 }
 0x5da   :  { %2276 = vadd.xlane.f32.xlu1 %v2275_v56  ;;  %v2321_v56 = vld [vmem:[%s4130_s7 + $0x18] sm:$0xff] }
 0x5de   :  { %1907 = vadd.xlane.f32.xlu1 %v1906_v8 }
 0x5e2   :  { %1901 = vadd.xlane.f32.xlu1 %v1900_v15 }
 0x63b   :  { %v2262_v24 = vpop.xlane.xlu0 %2261 }
 0x63c   :  { %v2280_v20 = vmul.f32 0.03125, %v2262_v24  ;;  %v2320_v24 = vld [vmem:[%s4130_s7 + $0x10] sm:$0xff] }
 0x63e   :  { %v2296_v21 = vadd.f32 1e-05, %v2280_v20  ;;  %v2319_v20 = vld [vmem:[%s4130_s7 + $0x8] sm:$0xff] }
 0x63f   :  { %v2256_v14 = vpop.xlane.xlu1 %2255 }
 0x640   :  { %3164 = vrsqrt.f32 %v2296_v21  ;;  %v2278_v30 = vmul.f32 0.03125, %v2256_v14 }
 0x641   :  { %v2259_v27 = vpop.xlane.xlu0 %2258 }
 0x642   :  { %v2294_v28 = vadd.f32 1e-05, %v2278_v30  ;;  %v2279_v29 = vmul.f32 0.03125, %v2259_v27 }
 0x643   :  { %v2265_v12 = vpop.xlane.xlu1 %2264 }
 0x644   :  { %3166 = vrsqrt.f32 %v2294_v28  ;;  %v2295_v61 = vadd.f32 1e-05, %v2279_v29  ;;  %v2281_v32 = vmul.f32 0.03125, %v2265_v12 }
 0x645   :  { %v2268_v51 = vpop.xlane.xlu0 %2267 }
 0x646   :  { %3168 = vrsqrt.f32 %v2295_v61  ;;  %v2297_v33 = vadd.f32 1e-05, %v2281_v32  ;;  %v2282_v61 = vmul.f32 0.03125, %v2268_v51 }
 0x647   :  { %v2271_v21 = vpop.xlane.xlu1 %2270 }
 0x648   :  { %3170 = vrsqrt.f32 %v2297_v33  ;;  %v2283_v12 = vmul.f32 0.03125, %v2271_v21  ;;  %v2290_v21 = vld [vmem:[%s4129_s6 + $0x20] sm:$0xff] }
 0x64a   :  { %v3165_v35 = vpop.eup %3164 }
 0x64b   :  { %v2312_v39 = vmul.f32 %v3165_v35, %v2288_v34  ;;  %v2299_v34 = vadd.f32 1e-05, %v2283_v12  ;;  %v2298_v35 = vadd.f32 1e-05, %v2282_v61  ;;  %v2323_v12 = vld [vmem:[%s4130_s7 + $0x28] sm:$0xff] }
 0x64d   :  { %2354 = vperm.xlu0 %3071, %v2312_v39   ;;  %v2328_v8 = vmul.f32 %v2312_v39, %v3840_v49  ;;  %v2318_v49 = vld [vmem:[%s4130_s7] sm:$0xff]  ;;  %3172 = vrsqrt.f32 %v2299_v34 }
 0x64e   :  { %v3167_v43 = vpop.eup %3166  ;;  %3174 = vrsqrt.f32 %v2298_v35  ;;  %v2322_v34 = vld [vmem:[%s4130_s7 + $0x20] sm:$0xff] }
 0x64f   :  { %v2310_v44 = vmul.f32 %v3167_v43, %v2286_v42 }
 0x650   :  { %v3169_v45 = vpop.eup %3168 }
 0x651   :  { %2344 = vperm.xlu0 %3071, %v2310_v44   ;;  %v2311_v3 = vmul.f32 %v3169_v45, %v2287_v50  ;;  %v2326_v30 = vmul.f32 %v2310_v44, %v3848_v0 }
 0x652   :  { %v3171_v54 = vpop.eup %3170 }
 0x653   :  { %v2313_v57 = vmul.f32 %v3171_v54, %v2289_v48  ;;  %v2327_v15 = vmul.f32 %v2311_v3, %v3853_v5  ;;  %v2334_v29 = vsub.f32 %v2318_v49, %v2326_v30 }
 0x655   :  { %2359 = vperm.xlu1 %3070, %v2313_v57   ;;  %v1893_v7 = vpop.xlane.xlu0 %1892  ;;  %v2329_v58 = vmul.f32 %v2313_v57, %v3844_v53  ;;  %v2336_v53 = vsub.f32 %v2320_v24, %v2328_v8  ;;  %v2335_v27 = vsub.f32 %v2319_v20, %v2327_v15  ;;  %v2291_v8 = vld [vmem:[%s4129_s6 + $0x28] sm:$0xff]  ;;  %v2293_v20 = vld [vmem:[%s4129_s6 + $0x38] sm:$0xff] }
 0x656   :  { %v1911_v48 = vmul.f32 0.03125, %v1893_v7 }
 0x657   :  { %v2337_v11 = vsub.f32 %v2321_v56, %v2329_v58  ;;  %v3173_v56 = vpop.eup %3172  ;;  %v2292_v58 = vld [vmem:[%s4129_s6 + $0x30] sm:$0xff] }
 0x658   :  { %v1927_v54 = vadd.f32 1e-05, %v1911_v48  ;;  %v2315_v30 = vmul.f32 %v3173_v56, %v2291_v8  ;;  %v1917_v56 = vld [vmem:[%s4131_s9] sm:$0xff] }
 0x659   :  { %2407 = vperm.xlu0 %3071, %v2337_v11   ;;  %2349 = vperm.xlu1 %3070, %v2311_v3   ;;  %v1887_v14 = vpop.xlane.xlu0 %1886  ;;  %v3175_v11 = vpop.eup %3174 }
 0x65a   :  { %v1896_v5 = vpop.xlane.xlu1 %1895  ;;  %v1909_v51 = vmul.f32 0.03125, %v1887_v14 }
 0x65b   :  { %v1912_v50 = vmul.f32 0.03125, %v1896_v5  ;;  %v2314_v5 = vmul.f32 %v3175_v11, %v2290_v21  ;;  %v1951_v21 = vld [vmem:[%s4132_s10 + $0x10] sm:$0xff] }
 0x65c   :  { %v1925_v15 = vadd.f32 1e-05, %v1909_v51 }
 0x65d   :  { %2402 = vperm.xlu1 %3070, %v2336_v53   ;;  %2397 = vperm.xlu0 %3071, %v2335_v27   ;;  %v1905_v28 = vpop.xlane.xlu0 %1904  ;;  %v1928_v57 = vadd.f32 1e-05, %v1912_v50  ;;  %v2330_v61 = vmul.f32 %v2314_v5, %v3860_v17 }
 0x65e   :  { %v1890_v33 = vpop.xlane.xlu1 %1889 }
 0x65f   :  { %v1910_v3 = vmul.f32 0.03125, %v1890_v33  ;;  %v2338_v17 = vsub.f32 %v2322_v34, %v2330_v61  ;;  %v1923_v34 = vld [vmem:[%s4131_s9 + $0x30] sm:$0xff] }
 0x661   :  { %2392 = vperm.xlu1 %3070, %v2334_v29   ;;  %v3964_v32 = vpop.xlane.xlu0 %1898  ;;  %v1926_v7 = vadd.f32 1e-05, %v1910_v3  ;;  %v2331_v29 = vmul.f32 %v2315_v30, %v3865_v46  ;;  %v1919_v46 = vld [vmem:[%s4131_s9 + $0x10] sm:$0xff] }
 0x665   :  { %v2274_v0 = vpop.xlane.xlu0 %2273 }
 0x666   :  { %v2284_v39 = vmul.f32 0.03125, %v2274_v0 }
 0x667   :  { %v2277_v42 = vpop.xlane.xlu1 %2276 }
 0x668   :  { %v2300_v43 = vadd.f32 1e-05, %v2284_v39  ;;  %v2285_v44 = vmul.f32 0.03125, %v2277_v42  ;;  %v2339_v39 = vsub.f32 %v2323_v12, %v2331_v29 }
 0x66a   :  { %3176 = vrsqrt.f32 %v2300_v43  ;;  %v2301_v45 = vadd.f32 1e-05, %v2285_v44  ;;  %v1915_v43 = vmul.f32 0.03125, %v1905_v28  ;;  %v1920_v44 = vld [vmem:[%s4131_s9 + $0x18] sm:$0xff]  ;;  %v1913_v28 = vmul.f32 0.03125, %v3964_v32 }
 0x66b   :  { %v1908_v27 = vpop.xlane.xlu1 %1907  ;;  %v1952_v32 = vld [vmem:[%s4132_s10 + $0x18] sm:$0xff] }
 0x66c   :  { %3178 = vrsqrt.f32 %v2301_v45  ;;  %v1916_v33 = vmul.f32 0.03125, %v1908_v27  ;;  %v1931_v3 = vadd.f32 1e-05, %v1915_v43  ;;  %v1921_v43 = vld [vmem:[%s4131_s9 + $0x20] sm:$0xff] }
 0x66d   :  { %3180 = vrsqrt.f32 %v1927_v54 }
 0x66e   :  { %3182 = vrsqrt.f32 %v1928_v57  ;;  %v1932_v45 = vadd.f32 1e-05, %v1916_v33 }
 0x66f   :  { %3184 = vrsqrt.f32 %v1925_v15  ;;  %v1902_v0 = vpop.xlane.xlu1 %1901 }
 0x670   :  { %3186 = vrsqrt.f32 %v1926_v7  ;;  %v1914_v48 = vmul.f32 0.03125, %v1902_v0  ;;  %v1929_v7 = vadd.f32 1e-05, %v1913_v28  ;;  %v1922_v0 = vld [vmem:[%s4131_s9 + $0x28] sm:$0xff] }
 0x671   :  { %3188 = vrsqrt.f32 %v1932_v45 }
 0x672   :  { %v1930_v8 = vadd.f32 1e-05, %v1914_v48  ;;  %3190 = vrsqrt.f32 %v1931_v3 }
 0x674   :  { %v3177_v24 = vpop.eup %3176  ;;  %3192 = vrsqrt.f32 %v1930_v8 }
 0x675   :  { %v3978_v14 = vmul.f32 %v3177_v24, %v2292_v58  ;;  %v1918_v58 = vld [vmem:[%s4131_s9 + $0x8] sm:$0xff]  ;;  %3194 = vrsqrt.f32 %v1929_v7 }
 0x676   :  { %v3179_v53 = vpop.eup %3178 }
 0x677   :  { %2374 = vperm.xlu0 %3071, %v3978_v14   ;;  %v3981_v49 = vmul.f32 %v3179_v53, %v2293_v20  ;;  %v3181_v35 = vpop.eup %3180  ;;  %v2332_v8 = vmul.f32 %v3978_v14, %v3910_v9 }
 0x678   :  { %v3183_v42 = vpop.eup %3182  ;;  %v1943_v54 = vmul.f32 %v3181_v35, %v1919_v46 }
 0x679   :  { %2379 = vperm.xlu1 %3070, %v3981_v49   ;;  %v3185_v50 = vpop.eup %3184  ;;  %v1944_v51 = vmul.f32 %v3183_v42, %v1920_v44 }
 0x67a   :  { %v3187_v57 = vpop.eup %3186  ;;  %v1941_v11 = vmul.f32 %v3185_v50, %v1917_v56  ;;  %v1959_v20 = vmul.f32 %v1943_v54, %v3876_v38  ;;  %v1949_v38 = vld [vmem:[%s4132_s10] sm:$0xff]  ;;  %v1955_v50 = vld [vmem:[%s4132_s10 + $0x30] sm:$0xff]  ;;  %v2333_v56 = vmul.f32 %v3981_v49, %v3921_v41 }
 0x67b   :  { %2364 = vperm.xlu0 %3071, %v2314_v5   ;;  %v1942_v15 = vmul.f32 %v3187_v57, %v1918_v58  ;;  %v1960_v24 = vmul.f32 %v1944_v51, %v3887_v47  ;;  %v1950_v47 = vld [vmem:[%s4132_s10 + $0x8] sm:$0xff]  ;;  %v3189_v12 = vpop.eup %3188 }
 0x67c   :  { %v1967_v27 = vsub.f32 %v1951_v21, %v1959_v20  ;;  %v1957_v5 = vmul.f32 %v1941_v11, %v3878_v40  ;;  %v3191_v33 = vpop.eup %3190 }
 0x67d   :  { %2369 = vperm.xlu1 %3070, %v2315_v30   ;;  %v1968_v30 = vsub.f32 %v1952_v32, %v1960_v24  ;;  %v1958_v53 = vmul.f32 %v1942_v15, %v3884_v52  ;;  %v1924_v52 = vld [vmem:[%s4131_s9 + $0x38] sm:$0xff] }
 0x67e   :  { %v1965_v61 = vsub.f32 %v1949_v38, %v1957_v5  ;;  %v1948_v40 = vmul.f32 %v3189_v12, %v1924_v52  ;;  %v3193_v35 = vpop.eup %3192 }
 0x67f   :  { %2417 = vperm.xlu0 %3071, %v2339_v39   ;;  %v1966_v29 = vsub.f32 %v1950_v47, %v1958_v53  ;;  %v1947_v39 = vmul.f32 %v3191_v33, %v1923_v34  ;;  %v3195_v42 = vpop.eup %3194  ;;  %v1946_v46 = vmul.f32 %v3193_v35, %v1922_v0 }
 0x680   :  { %v1964_v44 = vmul.f32 %v1948_v40, %v3905_v23  ;;  %v1945_v45 = vmul.f32 %v3195_v42, %v1921_v43  ;;  %v1954_v23 = vld [vmem:[%s4132_s10 + $0x28] sm:$0xff] }
 0x681   :  { %2412 = vperm.xlu1 %3070, %v2338_v17   ;;  %v1956_v17 = vld [vmem:[%s4132_s10 + $0x38] sm:$0xff]  ;;  %v1963_v48 = vmul.f32 %v1947_v39, %v3894_v2  ;;  %v1953_v2 = vld [vmem:[%s4132_s10 + $0x20] sm:$0xff] }
 0x682   :  { %v1961_v3 = vmul.f32 %v1945_v45, %v3901_v18  ;;  %v2324_v18 = vld [vmem:[%s4130_s7 + $0x30] sm:$0xff] }
 0x683   :  { %1985 = vperm.xlu0 %3071, %v1943_v54   ;;  %v1972_v54 = vsub.f32 %v1956_v17, %v1964_v44  ;;  %v1971_v57 = vsub.f32 %v1955_v50, %v1963_v48 }
 0x684   :  { %v1969_v58 = vsub.f32 %v1953_v2, %v1961_v3 }
 0x685   :  { %1990 = vperm.xlu1 %3070, %v1944_v51   ;;  %v1962_v51 = vmul.f32 %v1946_v46, %v3917_v37  ;;  %v2325_v37 = vld [vmem:[%s4130_s7 + $0x38] sm:$0xff] }
 0x687   :  { %1975 = vperm.xlu0 %3071, %v1941_v11   ;;  %v1970_v28 = vsub.f32 %v1954_v23, %v1962_v51  ;;  %v2341_v11 = vsub.f32 %v2325_v37, %v2333_v56 }
 0x689   :  { %1980 = vperm.xlu1 %3070, %v1942_v15   ;;  %v2340_v15 = vsub.f32 %v2324_v18, %v2332_v8 }
 0x68b   :  { %2038 = vperm.xlu0 %3071, %v1968_v30  }
 0x68d   :  { %2033 = vperm.xlu1 %3070, %v1967_v27  }
 0x68f   :  { %2028 = vperm.xlu0 %3071, %v1966_v29  }
 0x691   :  { %2023 = vperm.xlu1 %3070, %v1965_v61  }
 0x693   :  { %2010 = vperm.xlu0 %3071, %v1948_v40  }
 0x695   :  { %2005 = vperm.xlu1 %3070, %v1947_v39  }
 0x697   :  { %2000 = vperm.xlu0 %3071, %v1946_v46  }
 0x699   :  { %1995 = vperm.xlu1 %3070, %v1945_v45  }
 0x69b   :  { %2058 = vperm.xlu0 %3071, %v1972_v54  }
 0x69d   :  { %2053 = vperm.xlu1 %3070, %v1971_v57  }
 0x69f   :  { %2048 = vperm.xlu0 %3071, %v1970_v28  }
 0x6a1   :  { %2043 = vperm.xlu1 %3070, %v1969_v58  }
 0x6a3   :  { %2427 = vperm.xlu0 %3071, %v2341_v11  }
 0x6a5   :  { %2422 = vperm.xlu1 %3070, %v2340_v15  }
 0x6cc   :  { %v2355_v24 = vpop.permute.xlu0 %2354 }
 0x6cd   :  { %v2384_v40 = vmul.f32 %v3755_v59, %v2355_v24 }
 0x6d0   :  { %v2345_v49 = vpop.permute.xlu0 %2344 }
 0x6d1   :  { %v2382_v48 = vmul.f32 %v2345_v49, %v3757_v62 }
 0x6d4   :  { %v2360_v41 = vpop.permute.xlu1 %2359 }
 0x6d5   :  { %v2385_v61 = vmul.f32 %v3766_v1, %v2360_v41 }
 0x6d8   :  { %v2350_v7 = vpop.permute.xlu1 %2349  ;;  %v2408_v32 = vpop.permute.xlu0 %2407 }
 0x6d9   :  { %v2433_v35 = vadd.f32 %v2408_v32, %v2385_v61  ;;  %v2383_v42 = vmul.f32 %v2350_v7, %v3773_v4 }
 0x6dc   :  { %v2403_v20 = vpop.permute.xlu1 %2402  ;;  %v2398_v21 = vpop.permute.xlu0 %2397 }
 0x6dd   :  { %v2432_v46 = vadd.f32 %v2403_v20, %v2384_v40  ;;  %v2431_v1 = vadd.f32 %v2398_v21, %v2383_v42 }
 0x6e0   :  { %v2393_v30 = vpop.permute.xlu1 %2392 }
 0x6e1   :  { %v2430_v23 = vadd.f32 %v2393_v30, %v2382_v48 }
 0x6f6   :  { %v4059_v53 = vpop.permute.xlu0 %2374 }
 0x6f8   :  { %v4061_v9 = vpop.permute.xlu1 %2379 }
 0x6f9   :  { %v2389_v61 = vmul.f32 %v3784_v63, %v4061_v9 }
 0x6fa   :  { %v2365_v14 = vpop.permute.xlu0 %2364 }
 0x6fc   :  { %v2370_v47 = vpop.permute.xlu1 %2369 }
 0x6fd   :  { %v2387_v32 = vmul.f32 %v2370_v47, %v3788_v13 }
 0x6fe   :  { %v2418_v27 = vpop.permute.xlu0 %2417 }
 0x700   :  { %v2413_v5 = vpop.permute.xlu1 %2412 }
 0x702   :  { %v1986_v38 = vpop.permute.xlu0 %1985 }
 0x703   :  { %v2015_v0 = vmul.f32 %v3794_v19, %v1986_v38  ;;  %v2386_v38 = vmul.f32 %v2365_v14, %v3782_v10 }
 0x704   :  { %v1991_v29 = vpop.permute.xlu1 %1990 }
 0x705   :  { %v2016_v33 = vmul.f32 %v3798_v22, %v1991_v29  ;;  %v2435_v29 = vadd.f32 %v2418_v27, %v2387_v32  ;;  %v2434_v13 = vadd.f32 %v2413_v5, %v2386_v38 }
 0x706   :  { %v1976_v12 = vpop.permute.xlu0 %1975 }
 0x707   :  { %v2013_v22 = vmul.f32 %v3796_v26, %v1976_v12 }
 0x708   :  { %v1981_v52 = vpop.permute.xlu1 %1980 }
 0x709   :  { %v2014_v44 = vmul.f32 %v3802_v25, %v1981_v52 }
 0x70a   :  { %v2039_v34 = vpop.permute.xlu0 %2038 }
 0x70b   :  { %v2064_v39 = vadd.f32 %v2039_v34, %v2016_v33 }
 0x70c   :  { %v2034_v43 = vpop.permute.xlu1 %2033 }
 0x70d   :  { %v2441_v17 = vadd.f32 %v2433_v35, %v2064_v39  ;;  %v2063_v45 = vadd.f32 %v2034_v43, %v2015_v0  ;;  %v2388_v35 = vmul.f32 %v3780_v60, %v4059_v53 }
 0x70e   :  { %v2029_v50 = vpop.permute.xlu0 %2028 }
 0x70f   :  { %v2449_v54 = vmax.f32 %v2441_v17, 0.0  ;;  %v2440_v59 = vadd.f32 %v2432_v46, %v2063_v45  ;;  %v2062_v51 = vadd.f32 %v2029_v50, %v2014_v44 }
 0x710   :  { %v2024_v19 = vpop.permute.xlu1 %2023 }
 0x711   :  { %v2457_v57 = vmul.f32 %v3762_v16, %v2449_v54  ;;  %v2448_v4 = vmax.f32 %v2440_v59, 0.0  ;;  %v2439_v3 = vadd.f32 %v2431_v1, %v2062_v51  ;;  %v2061_v2 = vadd.f32 %v2024_v19, %v2013_v22 }
 0x712   :  { %v2011_v25 = vpop.permute.xlu0 %2010 }
 0x713   :  { %v2699_v28 = vpack.c.bf16 %v2457_v57, %v2457_v57  ;;  %v2456_v56 = vmul.f32 %v3762_v16, %v2448_v4  ;;  %v2447_v62 = vmax.f32 %v2439_v3, 0.0  ;;  %v2438_v37 = vadd.f32 %v2430_v23, %v2061_v2 }
 0x714   :  { %v2006_v58 = vpop.permute.xlu1 %2005  ;;  %v2020_v47 = vmul.f32 %v3818_v55, %v2011_v25 }
 0x715   :  { %2498 = vst.msk [vmem:[%s4133_s12 + $0xc] sm:$0xf] %vm2494_vm5, %v2699_v28  ;;  %v2698_v26 = vpack.c.bf16 %v2456_v56, %v2456_v56  ;;  %v2455_v8 = vmul.f32 %v3762_v16, %v2447_v62  ;;  %v2446_v18 = vmax.f32 %v2438_v37, 0.0 }
 0x716   :  { %v2001_v11 = vpop.permute.xlu0 %2000 }
 0x717   :  { %2497 = vst.msk [vmem:[%s4133_s12 + $0x8] sm:$0xf] %vm2494_vm5, %v2698_v26  ;;  %v2697_v15 = vpack.c.bf16 %v2455_v8, %v2455_v8  ;;  %v2454_v24 = vmul.f32 %v3762_v16, %v2446_v18  ;;  %v2018_v21 = vmul.f32 %v3822_v36, %v2001_v11  ;;  %v2019_v36 = vmul.f32 %v3813_v31, %v2006_v58 }
 0x718   :  { %v1996_v41 = vpop.permute.xlu1 %1995 }
 0x719   :  { %2496 = vst.msk [vmem:[%s4133_s12 + $0x4] sm:$0xf] %vm2494_vm5, %v2697_v15  ;;  %v2696_v49 = vpack.c.bf16 %v2454_v24, %v2454_v24  ;;  %v2017_v12 = vmul.f32 %v3815_v6, %v1996_v41 }
 0x71a   :  { %v2059_v7 = vpop.permute.xlu0 %2058 }
 0x71b   :  { %2495 = vst.msk [vmem:[%s4133_s12] sm:$0xf] %vm2494_vm5, %v2696_v49  ;;  %v2068_v10 = vadd.f32 %v2059_v7, %v2020_v47 }
 0x71c   :  { %v2054_v20 = vpop.permute.xlu1 %2053 }
 0x71d   :  { %v2067_v39 = vadd.f32 %v2054_v20, %v2019_v36 }
 0x71e   :  { %v2049_v30 = vpop.permute.xlu0 %2048 }
 0x71f   :  { %v2066_v52 = vadd.f32 %v2049_v30, %v2018_v21 }
 0x720   :  { %v2044_v33 = vpop.permute.xlu1 %2043 }
 0x721   :  { %v2443_v34 = vadd.f32 %v2435_v29, %v2066_v52  ;;  %v2065_v40 = vadd.f32 %v2044_v33, %v2017_v12 }
 0x722   :  { %v2428_v0 = vpop.permute.xlu0 %2427 }
 0x723   :  { %v2451_v14 = vmax.f32 %v2443_v34, 0.0  ;;  %v2442_v27 = vadd.f32 %v2434_v13, %v2065_v40  ;;  %v2437_v6 = vadd.f32 %v2428_v0, %v2389_v61 }
 0x724   :  { %v2423_v42 = vpop.permute.xlu1 %2422 }
 0x725   :  { %v2459_v63 = vmul.f32 %v3762_v16, %v2451_v14  ;;  %v2450_v9 = vmax.f32 %v2442_v27, 0.0  ;;  %v2445_v5 = vadd.f32 %v2437_v6, %v2068_v10  ;;  %v2436_v43 = vadd.f32 %v2423_v42, %v2388_v35 }
 0x727   :  { %v2701_v55 = vpack.c.bf16 %v2459_v63, %v2459_v63  ;;  %v2458_v46 = vmul.f32 %v3762_v16, %v2450_v9  ;;  %v2453_v44 = vmax.f32 %v2445_v5, 0.0  ;;  %v2444_v17 = vadd.f32 %v2436_v43, %v2067_v39 }
 0x729   :  { %2500 = vst.msk [vmem:[%s4133_s12 + $0x14] sm:$0xf] %vm2494_vm5, %v2701_v55  ;;  %v2700_v60 = vpack.c.bf16 %v2458_v46, %v2458_v46  ;;  %v2461_v31 = vmul.f32 %v3762_v16, %v2453_v44  ;;  %v2452_v53 = vmax.f32 %v2444_v17, 0.0 }
 0x72b   :  { %2499 = vst.msk [vmem:[%s4133_s12 + $0x10] sm:$0xf] %vm2494_vm5, %v2700_v60  ;;  %v2703_v45 = vpack.c.bf16 %v2461_v31, %v2461_v31  ;;  %v2460_v48 = vmul.f32 %v3762_v16, %v2452_v53 }
 0x72d   :  { %2502 = vst.msk [vmem:[%s4133_s12 + $0x1c] sm:$0xf] %vm2494_vm5, %v2703_v45  ;;  %v2702_v1 = vpack.c.bf16 %v2460_v48, %v2460_v48 }
 0x72f   :  { %2501 = vst.msk [vmem:[%s4133_s12 + $0x18] sm:$0xf] %vm2494_vm5, %v2702_v1 }

</bundles_post_ra>
